<compile_context>
chip_gen: v7x
topology: tpu7x:2x2x1
jax: 0.10.0
libtpu: 0.0.40
codegen_flags: <defaults>
</compile_context>

<pallas_src>
import jax
import jax.numpy as jnp
from jax.experimental import pallas as pl
from jax.experimental.pallas import tpu as pltpu

# Make the XLA reference and the Pallas dots use exact f32 matmuls.
jax.config.update("jax_default_matmul_precision", "highest")

# ----- hyperparameters (consistent with forward's x.view(B, 10, -1)) -----
B = 2
C_IN = 4
C_OUT = 10                 # == SEQ so view(B, 10, -1) maps one channel per timestep
K = 3                      # conv kernel size
H_IMG = 16
W_IMG = 16
OH = H_IMG - K + 1         # 14 (VALID conv)
OW = W_IMG - K + 1         # 14
PH = OH // 2               # 7  (MaxPool2d(2))
PW = OW // 2               # 7
INPUT_SIZE = PH * PW       # 49 = LSTM input_size
SEQ = C_OUT                # 10 timesteps
HIDDEN = 32
GATES = 4 * HIDDEN         # 128 -> exactly one lane-dense vreg width
NUM_LAYERS = 2
NUM_CLASSES = 10
PATCH = C_IN * K * K       # 36

_F32 = jnp.float32
_HI = jax.lax.Precision.HIGHEST


def _sigmoid(z):
    # exact sigmoid via tanh: transcendental lands on the EUP slot, no f32 divide
    return 0.5 * (jnp.tanh(0.5 * z) + 1.0)


def _concat_rows(pieces):
    # pairwise tree of plain 2-operand concats along the sublane axis
    while len(pieces) > 1:
        nxt = [jnp.concatenate(pieces[i:i + 2], axis=0)
               for i in range(0, len(pieces) - 1, 2)]
        if len(pieces) % 2:
            nxt.append(pieces[-1])
        pieces = nxt
    return pieces[0]


# --------------------------------------------------------------------------
# Fused kernel: conv+pool (4 small matmuls + max) + 2-layer BiLSTM + fc.
# Single invocation, whole batch in the block; everything stays in VMEM/vregs.
# --------------------------------------------------------------------------
def fused_kernel(patches_ref, cwbd_ref, cb_ref,
                 wih0f_ref, b0f_ref, wih0b_ref, b0b_ref, whh0_ref,
                 wih1f_ref, b1f_ref, wih1b_ref, b1b_ref, whh1_ref,
                 fcw_ref, fcb_ref,
                 out_ref):
    # ---- Conv2d(VALID) + 2x2 max pool, pooling folded into im2col offsets ----
    # cwbd is the conv weight laid out block-diagonally per batch element, so
    # the matmul directly emits rows ordered (t*B + b) with no in-kernel reshape.
    cwbd = cwbd_ref[...]                                           # (SEQ*B, B*PATCH)
    pooled = None
    for d in range(4):                                             # 4 pool offsets
        p = jnp.dot(cwbd, patches_ref[d],
                    precision=_HI, preferred_element_type=_F32)    # (SEQ*B, 49)
        pooled = p if pooled is None else jnp.maximum(pooled, p)
    pooled = pooled + cb_ref[...]                                  # row t*B+b = x_t[b]

    # row mask: rows [0,B) carry the forward direction, rows [B,2B) the backward
    fwd_rows = jax.lax.broadcasted_iota(jnp.int32, (2 * B, GATES), 0) < B

    def bidir_layer(xg_f, xg_b, whh):
        # xg_*: (SEQ*B, GATES) precomputed x_t @ W_ih^T + (b_ih+b_hh), rows t*B+b.
        # whh : (HIDDEN, 2*GATES) = [W_hh_f^T | W_hh_b^T].
        # One fused dot + one shared gate-math block per step handles BOTH
        # directions (forward at time t, backward at time SEQ-1-t).
        h = jnp.zeros((2 * B, HIDDEN), _F32)
        c = jnp.zeros((2 * B, HIDDEN), _F32)
        hf = [None] * SEQ
        hb = [None] * SEQ
        for t in range(SEQ):                                       # fully unrolled
            tb = SEQ - 1 - t
            xg_t = jnp.concatenate(
                [xg_f[t * B:(t + 1) * B], xg_b[tb * B:(tb + 1) * B]], axis=0)  # (2B,128)
            g2 = jnp.dot(h, whh, precision=_HI,
                         preferred_element_type=_F32)              # (2B, 256)
            g = xg_t + jnp.where(fwd_rows, g2[:, :GATES], g2[:, GATES:])
            i_g = _sigmoid(g[:, 0 * HIDDEN:1 * HIDDEN])
            f_g = _sigmoid(g[:, 1 * HIDDEN:2 * HIDDEN])
            g_g = jnp.tanh(g[:, 2 * HIDDEN:3 * HIDDEN])
            o_g = _sigmoid(g[:, 3 * HIDDEN:4 * HIDDEN])
            c = f_g * c + i_g * g_g
            h = o_g * jnp.tanh(c)
            hf[t] = h[:B]                                          # fwd h at time t
            hb[tb] = h[B:]                                         # bwd h at time tb
        return hf, hb

    # ---- layer 0 (bidirectional), input = pooled (SEQ*B, 49) ----
    xg0f = jnp.dot(pooled, wih0f_ref[...],
                   precision=_HI, preferred_element_type=_F32) + b0f_ref[...]
    xg0b = jnp.dot(pooled, wih0b_ref[...],
                   precision=_HI, preferred_element_type=_F32) + b0b_ref[...]
    hf0, hb0 = bidir_layer(xg0f, xg0b, whh0_ref[...])
    # (SEQ*B, 2*HIDDEN), row t*B+b = [h_fwd(t,b) | h_bwd(t,b)]
    seq1 = _concat_rows([jnp.concatenate([hf0[t], hb0[t]], axis=1)
                         for t in range(SEQ)])

    # ---- layer 1 (bidirectional top layer) ----
    xg1f = jnp.dot(seq1, wih1f_ref[...],
                   precision=_HI, preferred_element_type=_F32) + b1f_ref[...]
    xg1b = jnp.dot(seq1, wih1b_ref[...],
                   precision=_HI, preferred_element_type=_F32) + b1b_ref[...]
    hf1, hb1 = bidir_layer(xg1f, xg1b, whh1_ref[...])

    # fc consumes only out[:, -1, :] = [fwd h at t=SEQ-1 | bwd h at t=SEQ-1].
    # The backward value at t=SEQ-1 is its FIRST reverse step from zero state
    # (hb1[SEQ-1]); the remaining backward steps ride for free on the dots that
    # the forward direction needs anyway.
    last = jnp.concatenate([hf1[SEQ - 1], hb1[SEQ - 1]], axis=1)   # (B, 64)
    out_ref[...] = (jnp.dot(last, fcw_ref[...],
                            precision=_HI, preferred_element_type=_F32)
                    + fcb_ref[...])


# --------------------------------------------------------------------------
# Host-side layout plumbing (pure indexing, done once / per input)
# --------------------------------------------------------------------------
def _im2col_pooled(x):
    """(B, C_IN, H, W) -> (4, B*PATCH, PH*PW) pool-offset im2col patches.

    patches[2*dy+dx, b*PATCH + (ic*K+kh)*K+kw, py*PW+px]
        = x[b, ic, 2*py+dy+kh, 2*px+dx+kw]
    (column/row orders match conv_w.reshape(C_OUT, -1) and the view(B,10,-1)).
    """
    per_d = []
    for dy in (0, 1):
        for dx in (0, 1):
            cols = []
            for ic in range(C_IN):
                for kh in range(K):
                    for kw in range(K):
                        patch = x[:, ic, dy + kh:dy + kh + 2 * PH:2,
                                         dx + kw:dx + kw + 2 * PW:2]   # (B, PH, PW)
                        cols.append(patch.reshape(B, PH * PW))
            per_d.append(jnp.stack(cols, axis=1).reshape(B * PATCH, PH * PW))
    return jnp.stack(per_d, axis=0)                                    # (4, B*36, 49)


def prepare_params(params):
    """One-time conversion of PyTorch-layout params into kernel layouts."""
    kp = {}
    cw = params['conv_w'].reshape(C_OUT, PATCH)                        # (10, 36)
    # block-diagonal conv weights: row t*B+b holds cw[t] in column block b, so
    # cwbd @ patches_d directly yields (t*B+b)-ordered rows (no in-kernel reshape)
    bd = jnp.zeros((SEQ * B, B * PATCH), _F32)
    for b in range(B):
        bd = bd.at[b::B, b * PATCH:(b + 1) * PATCH].set(cw)
    kp['conv_w_bd'] = bd                                               # (20, 72)
    kp['conv_b_rows'] = jnp.repeat(params['conv_b'], B).reshape(SEQ * B, 1)

    for l in range(NUM_LAYERS):
        for suf in ('f', 'b'):
            kp[f'wih_{l}_{suf}'] = params[f'w_ih_{l}_{suf}'].T         # (in, 128)
            kp[f'b_{l}_{suf}'] = (params[f'b_ih_{l}_{suf}']
                                  + params[f'b_hh_{l}_{suf}']).reshape(1, GATES)
        # fused recurrent weights for both directions: (32, 256)
        kp[f'whh_{l}'] = jnp.concatenate(
            [params[f'w_hh_{l}_f'].T, params[f'w_hh_{l}_b'].T], axis=1)
    kp['fc_w_t'] = params['fc_w'].T                                    # (64, 10)
    kp['fc_b_row'] = params['fc_b'].reshape(1, NUM_CLASSES)            # (1, 10)
    return kp


@jax.jit
def cnn_bilstm_forward(x, kp):
    patches = _im2col_pooled(x)                                        # (4, 72, 49)
    args = [patches, kp['conv_w_bd'], kp['conv_b_rows'],
            kp['wih_0_f'], kp['b_0_f'], kp['wih_0_b'], kp['b_0_b'], kp['whh_0'],
            kp['wih_1_f'], kp['b_1_f'], kp['wih_1_b'], kp['b_1_b'], kp['whh_1'],
            kp['fc_w_t'], kp['fc_b_row']]
    # No grid: whole problem (<0.2 MiB resident) in a single invocation, every
    # operand mapped entirely into VMEM.
    out = pl.pallas_call(
        fused_kernel,
        out_shape=jax.ShapeDtypeStruct((B, NUM_CLASSES), _F32),
        in_specs=[pl.BlockSpec(memory_space=pltpu.MemorySpace.VMEM) for _ in args],
        out_specs=pl.BlockSpec(memory_space=pltpu.MemorySpace.VMEM),
    )(*args)
    return out


# --------------------------------------------------------------------------
# Pure-JAX reference (exact bidirectional nn.LSTM semantics) for correctness
# --------------------------------------------------------------------------
def reference_forward(x, params):
    conv = jax.lax.conv_general_dilated(
        x, params['conv_w'], window_strides=(1, 1), padding='VALID',
        dimension_numbers=('NCHW', 'OIHW', 'NCHW'), precision=_HI)
    conv = conv + params['conv_b'][None, :, None, None]
    pooled = conv.reshape(B, C_OUT, PH, 2, PW, 2).max(axis=(3, 5))
    seq = pooled.reshape(B, SEQ, INPUT_SIZE)

    def run_dir(xseq, w_ih, w_hh, b_ih, b_hh, reverse):
        T = xseq.shape[1]
        h = jnp.zeros((B, HIDDEN), _F32)
        c = jnp.zeros((B, HIDDEN), _F32)
        outs = [None] * T
        order = range(T - 1, -1, -1) if reverse else range(T)
        for t in order:
            gates = xseq[:, t] @ w_ih.T + b_ih + h @ w_hh.T + b_hh
            i, f, g, o = jnp.split(gates, 4, axis=-1)
            i = jax.nn.sigmoid(i)
            f = jax.nn.sigmoid(f)
            g = jnp.tanh(g)
            o = jax.nn.sigmoid(o)
            c = f * c + i * g
            h = o * jnp.tanh(c)
            outs[t] = h
        return jnp.stack(outs, axis=1)

    layer_in = seq
    for l in range(NUM_LAYERS):
        of = run_dir(layer_in, params[f'w_ih_{l}_f'], params[f'w_hh_{l}_f'],
                     params[f'b_ih_{l}_f'], params[f'b_hh_{l}_f'], False)
        ob = run_dir(layer_in, params[f'w_ih_{l}_b'], params[f'w_hh_{l}_b'],
                     params[f'b_ih_{l}_b'], params[f'b_hh_{l}_b'], True)
        layer_in = jnp.concatenate([of, ob], axis=-1)
    return layer_in[:, -1, :] @ params['fc_w'].T + params['fc_b']


# --------------------------------------------------------------------------
# Deterministic parameter init (PyTorch-default-like uniform bounds)
# --------------------------------------------------------------------------
def init_params(key):
    keys = jax.random.split(key, 32)

    def u(k, shape, bound):
        return jax.random.uniform(k, shape, _F32, -bound, bound)

    params = {}
    cb = 1.0 / (C_IN * K * K) ** 0.5
    params['conv_w'] = u(keys[0], (C_OUT, C_IN, K, K), cb)
    params['conv_b'] = u(keys[1], (C_OUT,), cb)
    hb = 1.0 / HIDDEN ** 0.5
    idx = 2
    for l in range(NUM_LAYERS):
        in_sz = INPUT_SIZE if l == 0 else 2 * HIDDEN
        for suf in ('f', 'b'):
            params[f'w_ih_{l}_{suf}'] = u(keys[idx], (GATES, in_sz), hb); idx += 1
            params[f'w_hh_{l}_{suf}'] = u(keys[idx], (GATES, HIDDEN), hb); idx += 1
            params[f'b_ih_{l}_{suf}'] = u(keys[idx], (GATES,), hb); idx += 1
            params[f'b_hh_{l}_{suf}'] = u(keys[idx], (GATES,), hb); idx += 1
    params['fc_w'] = u(keys[idx], (NUM_CLASSES, 2 * HIDDEN), hb); idx += 1
    params['fc_b'] = u(keys[idx], (NUM_CLASSES,), hb)
    return params


if __name__ == "__main__":
    key = jax.random.PRNGKey(0)
    kx, kparam = jax.random.split(key)
    x = jax.random.normal(kx, (B, C_IN, H_IMG, W_IMG), _F32)
    params = init_params(kparam)
    kp = prepare_params(params)      # one-time host-side weight layout prep

    out = jax.block_until_ready(cnn_bilstm_forward(x, kp))
    assert out.shape == (B, NUM_CLASSES)

    ref = jax.block_until_ready(jax.jit(reference_forward)(x, params))
    max_err = float(jnp.max(jnp.abs(out - ref)))
    if not (max_err < 1e-4):
        raise SystemExit(f"mismatch vs reference, max abs err = {max_err}")
    print("KERNEL_OK")
</pallas_src>

<mosaic_0001>
module attributes {stable_mosaic.version = 11 : i64} {
  func.func @fused_kernel(%arg0: memref<4x72x49xf32, #tpu.memory_space<vmem>>, %arg1: memref<20x72xf32, #tpu.memory_space<vmem>>, %arg2: memref<20x1xf32, #tpu.memory_space<vmem>>, %arg3: memref<49x128xf32, #tpu.memory_space<vmem>>, %arg4: memref<1x128xf32, #tpu.memory_space<vmem>>, %arg5: memref<49x128xf32, #tpu.memory_space<vmem>>, %arg6: memref<1x128xf32, #tpu.memory_space<vmem>>, %arg7: memref<32x256xf32, #tpu.memory_space<vmem>>, %arg8: memref<64x128xf32, #tpu.memory_space<vmem>>, %arg9: memref<1x128xf32, #tpu.memory_space<vmem>>, %arg10: memref<64x128xf32, #tpu.memory_space<vmem>>, %arg11: memref<1x128xf32, #tpu.memory_space<vmem>>, %arg12: memref<32x256xf32, #tpu.memory_space<vmem>>, %arg13: memref<64x10xf32, #tpu.memory_space<vmem>>, %arg14: memref<1x10xf32, #tpu.memory_space<vmem>>, %arg15: memref<2x10xf32, #tpu.memory_space<vmem>>) attributes {dimension_semantics = [], scalar_prefetch = 0 : i64, scratch_operands = 0 : i64, tpu.core_type = #tpu.core_type<tc>} {
    %c0 = arith.constant 0 : index
    %c0_0 = arith.constant 0 : index
    %0 = vector.load %arg1[%c0, %c0_0] : memref<20x72xf32, #tpu.memory_space<vmem>>, vector<20x72xf32>
    %c0_1 = arith.constant 0 : index
    %c0_2 = arith.constant 0 : index
    %c0_3 = arith.constant 0 : index
    %1 = vector.load %arg0[%c0_1, %c0_2, %c0_3] : memref<4x72x49xf32, #tpu.memory_space<vmem>>, vector<1x72x49xf32>
    %2 = vector.shape_cast %1 : vector<1x72x49xf32> to vector<72x49xf32>
    %cst = arith.constant dense<0.000000e+00> : vector<20x49xf32>
    %3 = tpu.matmul %0, %2, %cst {dimension_numbers = #tpu.dot_dimension_numbers<[1], [0], [0], [1], [0, 0, 1, 1], [], []>, precision = #tpu.contract_precision<fp32>} : vector<20x72xf32>, vector<72x49xf32>, vector<20x49xf32> -> vector<20x49xf32>
    %c1 = arith.constant 1 : index
    %c0_4 = arith.constant 0 : index
    %c0_5 = arith.constant 0 : index
    %4 = vector.load %arg0[%c1, %c0_4, %c0_5] : memref<4x72x49xf32, #tpu.memory_space<vmem>>, vector<1x72x49xf32>
    %5 = vector.shape_cast %4 : vector<1x72x49xf32> to vector<72x49xf32>
    %cst_6 = arith.constant dense<0.000000e+00> : vector<20x49xf32>
    %6 = tpu.matmul %0, %5, %cst_6 {dimension_numbers = #tpu.dot_dimension_numbers<[1], [0], [0], [1], [0, 0, 1, 1], [], []>, precision = #tpu.contract_precision<fp32>} : vector<20x72xf32>, vector<72x49xf32>, vector<20x49xf32> -> vector<20x49xf32>
    %7 = arith.maximumf %3, %6 : vector<20x49xf32>
    %c2 = arith.constant 2 : index
    %c0_7 = arith.constant 0 : index
    %c0_8 = arith.constant 0 : index
    %8 = vector.load %arg0[%c2, %c0_7, %c0_8] : memref<4x72x49xf32, #tpu.memory_space<vmem>>, vector<1x72x49xf32>
    %9 = vector.shape_cast %8 : vector<1x72x49xf32> to vector<72x49xf32>
    %cst_9 = arith.constant dense<0.000000e+00> : vector<20x49xf32>
    %10 = tpu.matmul %0, %9, %cst_9 {dimension_numbers = #tpu.dot_dimension_numbers<[1], [0], [0], [1], [0, 0, 1, 1], [], []>, precision = #tpu.contract_precision<fp32>} : vector<20x72xf32>, vector<72x49xf32>, vector<20x49xf32> -> vector<20x49xf32>
    %11 = arith.maximumf %7, %10 : vector<20x49xf32>
    %c3 = arith.constant 3 : index
    %c0_10 = arith.constant 0 : index
    %c0_11 = arith.constant 0 : index
    %12 = vector.load %arg0[%c3, %c0_10, %c0_11] : memref<4x72x49xf32, #tpu.memory_space<vmem>>, vector<1x72x49xf32>
    %13 = vector.shape_cast %12 : vector<1x72x49xf32> to vector<72x49xf32>
    %cst_12 = arith.constant dense<0.000000e+00> : vector<20x49xf32>
    %14 = tpu.matmul %0, %13, %cst_12 {dimension_numbers = #tpu.dot_dimension_numbers<[1], [0], [0], [1], [0, 0, 1, 1], [], []>, precision = #tpu.contract_precision<fp32>} : vector<20x72xf32>, vector<72x49xf32>, vector<20x49xf32> -> vector<20x49xf32>
    %15 = arith.maximumf %11, %14 : vector<20x49xf32>
    %c0_13 = arith.constant 0 : index
    %c0_14 = arith.constant 0 : index
    %16 = vector.load %arg2[%c0_13, %c0_14] : memref<20x1xf32, #tpu.memory_space<vmem>>, vector<20x1xf32>
    %17 = vector.broadcast %16 : vector<20x1xf32> to vector<20x49xf32>
    %18 = arith.addf %15, %17 : vector<20x49xf32>
    %19 = tpu.iota {dimensions = array<i32: 0>} : vector<4x128xi32>
    %c2_i32 = arith.constant 2 : i32
    %20 = vector.broadcast %c2_i32 : i32 to vector<4x128xi32>
    %21 = arith.cmpi slt, %19, %20 : vector<4x128xi32>
    %c0_15 = arith.constant 0 : index
    %c0_16 = arith.constant 0 : index
    %22 = vector.load %arg3[%c0_15, %c0_16] : memref<49x128xf32, #tpu.memory_space<vmem>>, vector<49x128xf32>
    %cst_17 = arith.constant dense<0.000000e+00> : vector<20x128xf32>
    %23 = tpu.matmul %18, %22, %cst_17 {dimension_numbers = #tpu.dot_dimension_numbers<[1], [0], [0], [1], [0, 0, 1, 1], [], []>, precision = #tpu.contract_precision<fp32>} : vector<20x49xf32>, vector<49x128xf32>, vector<20x128xf32> -> vector<20x128xf32>
    %c0_18 = arith.constant 0 : index
    %c0_19 = arith.constant 0 : index
    %24 = vector.load %arg4[%c0_18, %c0_19] : memref<1x128xf32, #tpu.memory_space<vmem>>, vector<1x128xf32>
    %25 = vector.broadcast %24 : vector<1x128xf32> to vector<20x128xf32>
    %26 = arith.addf %23, %25 : vector<20x128xf32>
    %c0_20 = arith.constant 0 : index
    %c0_21 = arith.constant 0 : index
    %27 = vector.load %arg5[%c0_20, %c0_21] : memref<49x128xf32, #tpu.memory_space<vmem>>, vector<49x128xf32>
    %cst_22 = arith.constant dense<0.000000e+00> : vector<20x128xf32>
    %28 = tpu.matmul %18, %27, %cst_22 {dimension_numbers = #tpu.dot_dimension_numbers<[1], [0], [0], [1], [0, 0, 1, 1], [], []>, precision = #tpu.contract_precision<fp32>} : vector<20x49xf32>, vector<49x128xf32>, vector<20x128xf32> -> vector<20x128xf32>
    %c0_23 = arith.constant 0 : index
    %c0_24 = arith.constant 0 : index
    %29 = vector.load %arg6[%c0_23, %c0_24] : memref<1x128xf32, #tpu.memory_space<vmem>>, vector<1x128xf32>
    %30 = vector.broadcast %29 : vector<1x128xf32> to vector<20x128xf32>
    %31 = arith.addf %28, %30 : vector<20x128xf32>
    %c0_25 = arith.constant 0 : index
    %c0_26 = arith.constant 0 : index
    %32 = vector.load %arg7[%c0_25, %c0_26] : memref<32x256xf32, #tpu.memory_space<vmem>>, vector<32x256xf32>
    %cst_27 = arith.constant 0.000000e+00 : f32
    %33 = vector.broadcast %cst_27 : f32 to vector<4x32xf32>
    %cst_28 = arith.constant 0.000000e+00 : f32
    %34 = vector.broadcast %cst_28 : f32 to vector<4x32xf32>
    %35 = vector.extract_strided_slice %26 {offsets = [0, 0], sizes = [2, 128], strides = [1, 1]} : vector<20x128xf32> to vector<2x128xf32>
    %36 = vector.extract_strided_slice %31 {offsets = [18, 0], sizes = [2, 128], strides = [1, 1]} : vector<20x128xf32> to vector<2x128xf32>
    %37 = tpu.concatenate %35, %36 in 0 : vector<2x128xf32>, vector<2x128xf32> -> vector<4x128xf32>
    %cst_29 = arith.constant dense<0.000000e+00> : vector<4x256xf32>
    %38 = tpu.matmul %33, %32, %cst_29 {dimension_numbers = #tpu.dot_dimension_numbers<[1], [0], [0], [1], [0, 0, 1, 1], [], []>, precision = #tpu.contract_precision<fp32>} : vector<4x32xf32>, vector<32x256xf32>, vector<4x256xf32> -> vector<4x256xf32>
    %39 = vector.extract_strided_slice %38 {offsets = [0, 0], sizes = [4, 128], strides = [1, 1]} : vector<4x256xf32> to vector<4x128xf32>
    %40 = vector.extract_strided_slice %38 {offsets = [0, 128], sizes = [4, 128], strides = [1, 1]} : vector<4x256xf32> to vector<4x128xf32>
    %41 = arith.select %21, %39, %40 : vector<4x128xi1>, vector<4x128xf32>
    %42 = arith.addf %37, %41 : vector<4x128xf32>
    %43 = vector.extract_strided_slice %42 {offsets = [0, 0], sizes = [4, 32], strides = [1, 1]} : vector<4x128xf32> to vector<4x32xf32>
    %cst_30 = arith.constant 5.000000e-01 : f32
    %44 = vector.broadcast %cst_30 : f32 to vector<4x32xf32>
    %45 = arith.mulf %44, %43 : vector<4x32xf32>
    %46 = math.tanh %45 : vector<4x32xf32>
    %cst_31 = arith.constant 1.000000e+00 : f32
    %47 = vector.broadcast %cst_31 : f32 to vector<4x32xf32>
    %48 = arith.addf %46, %47 : vector<4x32xf32>
    %cst_32 = arith.constant 5.000000e-01 : f32
    %49 = vector.broadcast %cst_32 : f32 to vector<4x32xf32>
    %50 = arith.mulf %49, %48 : vector<4x32xf32>
    %51 = vector.extract_strided_slice %42 {offsets = [0, 32], sizes = [4, 32], strides = [1, 1]} : vector<4x128xf32> to vector<4x32xf32>
    %cst_33 = arith.constant 5.000000e-01 : f32
    %52 = vector.broadcast %cst_33 : f32 to vector<4x32xf32>
    %53 = arith.mulf %52, %51 : vector<4x32xf32>
    %54 = math.tanh %53 : vector<4x32xf32>
    %cst_34 = arith.constant 1.000000e+00 : f32
    %55 = vector.broadcast %cst_34 : f32 to vector<4x32xf32>
    %56 = arith.addf %54, %55 : vector<4x32xf32>
    %cst_35 = arith.constant 5.000000e-01 : f32
    %57 = vector.broadcast %cst_35 : f32 to vector<4x32xf32>
    %58 = arith.mulf %57, %56 : vector<4x32xf32>
    %59 = vector.extract_strided_slice %42 {offsets = [0, 64], sizes = [4, 32], strides = [1, 1]} : vector<4x128xf32> to vector<4x32xf32>
    %60 = math.tanh %59 : vector<4x32xf32>
    %61 = vector.extract_strided_slice %42 {offsets = [0, 96], sizes = [4, 32], strides = [1, 1]} : vector<4x128xf32> to vector<4x32xf32>
    %cst_36 = arith.constant 5.000000e-01 : f32
    %62 = vector.broadcast %cst_36 : f32 to vector<4x32xf32>
    %63 = arith.mulf %62, %61 : vector<4x32xf32>
    %64 = math.tanh %63 : vector<4x32xf32>
    %cst_37 = arith.constant 1.000000e+00 : f32
    %65 = vector.broadcast %cst_37 : f32 to vector<4x32xf32>
    %66 = arith.addf %64, %65 : vector<4x32xf32>
    %cst_38 = arith.constant 5.000000e-01 : f32
    %67 = vector.broadcast %cst_38 : f32 to vector<4x32xf32>
    %68 = arith.mulf %67, %66 : vector<4x32xf32>
    %69 = arith.mulf %58, %34 : vector<4x32xf32>
    %70 = arith.mulf %50, %60 : vector<4x32xf32>
    %71 = arith.addf %69, %70 : vector<4x32xf32>
    %72 = math.tanh %71 : vector<4x32xf32>
    %73 = arith.mulf %68, %72 : vector<4x32xf32>
    %74 = vector.extract_strided_slice %73 {offsets = [0, 0], sizes = [2, 32], strides = [1, 1]} : vector<4x32xf32> to vector<2x32xf32>
    %75 = vector.extract_strided_slice %73 {offsets = [2, 0], sizes = [2, 32], strides = [1, 1]} : vector<4x32xf32> to vector<2x32xf32>
    %76 = vector.extract_strided_slice %26 {offsets = [2, 0], sizes = [2, 128], strides = [1, 1]} : vector<20x128xf32> to vector<2x128xf32>
    %77 = vector.extract_strided_slice %31 {offsets = [16, 0], sizes = [2, 128], strides = [1, 1]} : vector<20x128xf32> to vector<2x128xf32>
    %78 = tpu.concatenate %76, %77 in 0 : vector<2x128xf32>, vector<2x128xf32> -> vector<4x128xf32>
    %cst_39 = arith.constant dense<0.000000e+00> : vector<4x256xf32>
    %79 = tpu.matmul %73, %32, %cst_39 {dimension_numbers = #tpu.dot_dimension_numbers<[1], [0], [0], [1], [0, 0, 1, 1], [], []>, precision = #tpu.contract_precision<fp32>} : vector<4x32xf32>, vector<32x256xf32>, vector<4x256xf32> -> vector<4x256xf32>
    %80 = vector.extract_strided_slice %79 {offsets = [0, 0], sizes = [4, 128], strides = [1, 1]} : vector<4x256xf32> to vector<4x128xf32>
    %81 = vector.extract_strided_slice %79 {offsets = [0, 128], sizes = [4, 128], strides = [1, 1]} : vector<4x256xf32> to vector<4x128xf32>
    %82 = arith.select %21, %80, %81 : vector<4x128xi1>, vector<4x128xf32>
    %83 = arith.addf %78, %82 : vector<4x128xf32>
    %84 = vector.extract_strided_slice %83 {offsets = [0, 0], sizes = [4, 32], strides = [1, 1]} : vector<4x128xf32> to vector<4x32xf32>
    %cst_40 = arith.constant 5.000000e-01 : f32
    %85 = vector.broadcast %cst_40 : f32 to vector<4x32xf32>
    %86 = arith.mulf %85, %84 : vector<4x32xf32>
    %87 = math.tanh %86 : vector<4x32xf32>
    %cst_41 = arith.constant 1.000000e+00 : f32
    %88 = vector.broadcast %cst_41 : f32 to vector<4x32xf32>
    %89 = arith.addf %87, %88 : vector<4x32xf32>
    %cst_42 = arith.constant 5.000000e-01 : f32
    %90 = vector.broadcast %cst_42 : f32 to vector<4x32xf32>
    %91 = arith.mulf %90, %89 : vector<4x32xf32>
    %92 = vector.extract_strided_slice %83 {offsets = [0, 32], sizes = [4, 32], strides = [1, 1]} : vector<4x128xf32> to vector<4x32xf32>
    %cst_43 = arith.constant 5.000000e-01 : f32
    %93 = vector.broadcast %cst_43 : f32 to vector<4x32xf32>
    %94 = arith.mulf %93, %92 : vector<4x32xf32>
    %95 = math.tanh %94 : vector<4x32xf32>
    %cst_44 = arith.constant 1.000000e+00 : f32
    %96 = vector.broadcast %cst_44 : f32 to vector<4x32xf32>
    %97 = arith.addf %95, %96 : vector<4x32xf32>
    %cst_45 = arith.constant 5.000000e-01 : f32
    %98 = vector.broadcast %cst_45 : f32 to vector<4x32xf32>
    %99 = arith.mulf %98, %97 : vector<4x32xf32>
    %100 = vector.extract_strided_slice %83 {offsets = [0, 64], sizes = [4, 32], strides = [1, 1]} : vector<4x128xf32> to vector<4x32xf32>
    %101 = math.tanh %100 : vector<4x32xf32>
    %102 = vector.extract_strided_slice %83 {offsets = [0, 96], sizes = [4, 32], strides = [1, 1]} : vector<4x128xf32> to vector<4x32xf32>
    %cst_46 = arith.constant 5.000000e-01 : f32
    %103 = vector.broadcast %cst_46 : f32 to vector<4x32xf32>
    %104 = arith.mulf %103, %102 : vector<4x32xf32>
    %105 = math.tanh %104 : vector<4x32xf32>
    %cst_47 = arith.constant 1.000000e+00 : f32
    %106 = vector.broadcast %cst_47 : f32 to vector<4x32xf32>
    %107 = arith.addf %105, %106 : vector<4x32xf32>
    %cst_48 = arith.constant 5.000000e-01 : f32
    %108 = vector.broadcast %cst_48 : f32 to vector<4x32xf32>
    %109 = arith.mulf %108, %107 : vector<4x32xf32>
    %110 = arith.mulf %99, %71 : vector<4x32xf32>
    %111 = arith.mulf %91, %101 : vector<4x32xf32>
    %112 = arith.addf %110, %111 : vector<4x32xf32>
    %113 = math.tanh %112 : vector<4x32xf32>
    %114 = arith.mulf %109, %113 : vector<4x32xf32>
    %115 = vector.extract_strided_slice %114 {offsets = [0, 0], sizes = [2, 32], strides = [1, 1]} : vector<4x32xf32> to vector<2x32xf32>
    %116 = vector.extract_strided_slice %114 {offsets = [2, 0], sizes = [2, 32], strides = [1, 1]} : vector<4x32xf32> to vector<2x32xf32>
    %117 = vector.extract_strided_slice %26 {offsets = [4, 0], sizes = [2, 128], strides = [1, 1]} : vector<20x128xf32> to vector<2x128xf32>
    %118 = vector.extract_strided_slice %31 {offsets = [14, 0], sizes = [2, 128], strides = [1, 1]} : vector<20x128xf32> to vector<2x128xf32>
    %119 = tpu.concatenate %117, %118 in 0 : vector<2x128xf32>, vector<2x128xf32> -> vector<4x128xf32>
    %cst_49 = arith.constant dense<0.000000e+00> : vector<4x256xf32>
    %120 = tpu.matmul %114, %32, %cst_49 {dimension_numbers = #tpu.dot_dimension_numbers<[1], [0], [0], [1], [0, 0, 1, 1], [], []>, precision = #tpu.contract_precision<fp32>} : vector<4x32xf32>, vector<32x256xf32>, vector<4x256xf32> -> vector<4x256xf32>
    %121 = vector.extract_strided_slice %120 {offsets = [0, 0], sizes = [4, 128], strides = [1, 1]} : vector<4x256xf32> to vector<4x128xf32>
    %122 = vector.extract_strided_slice %120 {offsets = [0, 128], sizes = [4, 128], strides = [1, 1]} : vector<4x256xf32> to vector<4x128xf32>
    %123 = arith.select %21, %121, %122 : vector<4x128xi1>, vector<4x128xf32>
    %124 = arith.addf %119, %123 : vector<4x128xf32>
    %125 = vector.extract_strided_slice %124 {offsets = [0, 0], sizes = [4, 32], strides = [1, 1]} : vector<4x128xf32> to vector<4x32xf32>
    %cst_50 = arith.constant 5.000000e-01 : f32
    %126 = vector.broadcast %cst_50 : f32 to vector<4x32xf32>
    %127 = arith.mulf %126, %125 : vector<4x32xf32>
    %128 = math.tanh %127 : vector<4x32xf32>
    %cst_51 = arith.constant 1.000000e+00 : f32
    %129 = vector.broadcast %cst_51 : f32 to vector<4x32xf32>
    %130 = arith.addf %128, %129 : vector<4x32xf32>
    %cst_52 = arith.constant 5.000000e-01 : f32
    %131 = vector.broadcast %cst_52 : f32 to vector<4x32xf32>
    %132 = arith.mulf %131, %130 : vector<4x32xf32>
    %133 = vector.extract_strided_slice %124 {offsets = [0, 32], sizes = [4, 32], strides = [1, 1]} : vector<4x128xf32> to vector<4x32xf32>
    %cst_53 = arith.constant 5.000000e-01 : f32
    %134 = vector.broadcast %cst_53 : f32 to vector<4x32xf32>
    %135 = arith.mulf %134, %133 : vector<4x32xf32>
    %136 = math.tanh %135 : vector<4x32xf32>
    %cst_54 = arith.constant 1.000000e+00 : f32
    %137 = vector.broadcast %cst_54 : f32 to vector<4x32xf32>
    %138 = arith.addf %136, %137 : vector<4x32xf32>
    %cst_55 = arith.constant 5.000000e-01 : f32
    %139 = vector.broadcast %cst_55 : f32 to vector<4x32xf32>
    %140 = arith.mulf %139, %138 : vector<4x32xf32>
    %141 = vector.extract_strided_slice %124 {offsets = [0, 64], sizes = [4, 32], strides = [1, 1]} : vector<4x128xf32> to vector<4x32xf32>
    %142 = math.tanh %141 : vector<4x32xf32>
    %143 = vector.extract_strided_slice %124 {offsets = [0, 96], sizes = [4, 32], strides = [1, 1]} : vector<4x128xf32> to vector<4x32xf32>
    %cst_56 = arith.constant 5.000000e-01 : f32
    %144 = vector.broadcast %cst_56 : f32 to vector<4x32xf32>
    %145 = arith.mulf %144, %143 : vector<4x32xf32>
    %146 = math.tanh %145 : vector<4x32xf32>
    %cst_57 = arith.constant 1.000000e+00 : f32
    %147 = vector.broadcast %cst_57 : f32 to vector<4x32xf32>
    %148 = arith.addf %146, %147 : vector<4x32xf32>
    %cst_58 = arith.constant 5.000000e-01 : f32
    %149 = vector.broadcast %cst_58 : f32 to vector<4x32xf32>
    %150 = arith.mulf %149, %148 : vector<4x32xf32>
    %151 = arith.mulf %140, %112 : vector<4x32xf32>
    %152 = arith.mulf %132, %142 : vector<4x32xf32>
    %153 = arith.addf %151, %152 : vector<4x32xf32>
    %154 = math.tanh %153 : vector<4x32xf32>
    %155 = arith.mulf %150, %154 : vector<4x32xf32>
    %156 = vector.extract_strided_slice %155 {offsets = [0, 0], sizes = [2, 32], strides = [1, 1]} : vector<4x32xf32> to vector<2x32xf32>
    %157 = vector.extract_strided_slice %155 {offsets = [2, 0], sizes = [2, 32], strides = [1, 1]} : vector<4x32xf32> to vector<2x32xf32>
    %158 = vector.extract_strided_slice %26 {offsets = [6, 0], sizes = [2, 128], strides = [1, 1]} : vector<20x128xf32> to vector<2x128xf32>
    %159 = vector.extract_strided_slice %31 {offsets = [12, 0], sizes = [2, 128], strides = [1, 1]} : vector<20x128xf32> to vector<2x128xf32>
    %160 = tpu.concatenate %158, %159 in 0 : vector<2x128xf32>, vector<2x128xf32> -> vector<4x128xf32>
    %cst_59 = arith.constant dense<0.000000e+00> : vector<4x256xf32>
    %161 = tpu.matmul %155, %32, %cst_59 {dimension_numbers = #tpu.dot_dimension_numbers<[1], [0], [0], [1], [0, 0, 1, 1], [], []>, precision = #tpu.contract_precision<fp32>} : vector<4x32xf32>, vector<32x256xf32>, vector<4x256xf32> -> vector<4x256xf32>
    %162 = vector.extract_strided_slice %161 {offsets = [0, 0], sizes = [4, 128], strides = [1, 1]} : vector<4x256xf32> to vector<4x128xf32>
    %163 = vector.extract_strided_slice %161 {offsets = [0, 128], sizes = [4, 128], strides = [1, 1]} : vector<4x256xf32> to vector<4x128xf32>
    %164 = arith.select %21, %162, %163 : vector<4x128xi1>, vector<4x128xf32>
    %165 = arith.addf %160, %164 : vector<4x128xf32>
    %166 = vector.extract_strided_slice %165 {offsets = [0, 0], sizes = [4, 32], strides = [1, 1]} : vector<4x128xf32> to vector<4x32xf32>
    %cst_60 = arith.constant 5.000000e-01 : f32
    %167 = vector.broadcast %cst_60 : f32 to vector<4x32xf32>
    %168 = arith.mulf %167, %166 : vector<4x32xf32>
    %169 = math.tanh %168 : vector<4x32xf32>
    %cst_61 = arith.constant 1.000000e+00 : f32
    %170 = vector.broadcast %cst_61 : f32 to vector<4x32xf32>
    %171 = arith.addf %169, %170 : vector<4x32xf32>
    %cst_62 = arith.constant 5.000000e-01 : f32
    %172 = vector.broadcast %cst_62 : f32 to vector<4x32xf32>
    %173 = arith.mulf %172, %171 : vector<4x32xf32>
    %174 = vector.extract_strided_slice %165 {offsets = [0, 32], sizes = [4, 32], strides = [1, 1]} : vector<4x128xf32> to vector<4x32xf32>
    %cst_63 = arith.constant 5.000000e-01 : f32
    %175 = vector.broadcast %cst_63 : f32 to vector<4x32xf32>
    %176 = arith.mulf %175, %174 : vector<4x32xf32>
    %177 = math.tanh %176 : vector<4x32xf32>
    %cst_64 = arith.constant 1.000000e+00 : f32
    %178 = vector.broadcast %cst_64 : f32 to vector<4x32xf32>
    %179 = arith.addf %177, %178 : vector<4x32xf32>
    %cst_65 = arith.constant 5.000000e-01 : f32
    %180 = vector.broadcast %cst_65 : f32 to vector<4x32xf32>
    %181 = arith.mulf %180, %179 : vector<4x32xf32>
    %182 = vector.extract_strided_slice %165 {offsets = [0, 64], sizes = [4, 32], strides = [1, 1]} : vector<4x128xf32> to vector<4x32xf32>
    %183 = math.tanh %182 : vector<4x32xf32>
    %184 = vector.extract_strided_slice %165 {offsets = [0, 96], sizes = [4, 32], strides = [1, 1]} : vector<4x128xf32> to vector<4x32xf32>
    %cst_66 = arith.constant 5.000000e-01 : f32
    %185 = vector.broadcast %cst_66 : f32 to vector<4x32xf32>
    %186 = arith.mulf %185, %184 : vector<4x32xf32>
    %187 = math.tanh %186 : vector<4x32xf32>
    %cst_67 = arith.constant 1.000000e+00 : f32
    %188 = vector.broadcast %cst_67 : f32 to vector<4x32xf32>
    %189 = arith.addf %187, %188 : vector<4x32xf32>
    %cst_68 = arith.constant 5.000000e-01 : f32
    %190 = vector.broadcast %cst_68 : f32 to vector<4x32xf32>
    %191 = arith.mulf %190, %189 : vector<4x32xf32>
    %192 = arith.mulf %181, %153 : vector<4x32xf32>
    %193 = arith.mulf %173, %183 : vector<4x32xf32>
    %194 = arith.addf %192, %193 : vector<4x32xf32>
    %195 = math.tanh %194 : vector<4x32xf32>
    %196 = arith.mulf %191, %195 : vector<4x32xf32>
    %197 = vector.extract_strided_slice %196 {offsets = [0, 0], sizes = [2, 32], strides = [1, 1]} : vector<4x32xf32> to vector<2x32xf32>
    %198 = vector.extract_strided_slice %196 {offsets = [2, 0], sizes = [2, 32], strides = [1, 1]} : vector<4x32xf32> to vector<2x32xf32>
    %199 = vector.extract_strided_slice %26 {offsets = [8, 0], sizes = [2, 128], strides = [1, 1]} : vector<20x128xf32> to vector<2x128xf32>
    %200 = vector.extract_strided_slice %31 {offsets = [10, 0], sizes = [2, 128], strides = [1, 1]} : vector<20x128xf32> to vector<2x128xf32>
    %201 = tpu.concatenate %199, %200 in 0 : vector<2x128xf32>, vector<2x128xf32> -> vector<4x128xf32>
    %cst_69 = arith.constant dense<0.000000e+00> : vector<4x256xf32>
    %202 = tpu.matmul %196, %32, %cst_69 {dimension_numbers = #tpu.dot_dimension_numbers<[1], [0], [0], [1], [0, 0, 1, 1], [], []>, precision = #tpu.contract_precision<fp32>} : vector<4x32xf32>, vector<32x256xf32>, vector<4x256xf32> -> vector<4x256xf32>
    %203 = vector.extract_strided_slice %202 {offsets = [0, 0], sizes = [4, 128], strides = [1, 1]} : vector<4x256xf32> to vector<4x128xf32>
    %204 = vector.extract_strided_slice %202 {offsets = [0, 128], sizes = [4, 128], strides = [1, 1]} : vector<4x256xf32> to vector<4x128xf32>
    %205 = arith.select %21, %203, %204 : vector<4x128xi1>, vector<4x128xf32>
    %206 = arith.addf %201, %205 : vector<4x128xf32>
    %207 = vector.extract_strided_slice %206 {offsets = [0, 0], sizes = [4, 32], strides = [1, 1]} : vector<4x128xf32> to vector<4x32xf32>
    %cst_70 = arith.constant 5.000000e-01 : f32
    %208 = vector.broadcast %cst_70 : f32 to vector<4x32xf32>
    %209 = arith.mulf %208, %207 : vector<4x32xf32>
    %210 = math.tanh %209 : vector<4x32xf32>
    %cst_71 = arith.constant 1.000000e+00 : f32
    %211 = vector.broadcast %cst_71 : f32 to vector<4x32xf32>
    %212 = arith.addf %210, %211 : vector<4x32xf32>
    %cst_72 = arith.constant 5.000000e-01 : f32
    %213 = vector.broadcast %cst_72 : f32 to vector<4x32xf32>
    %214 = arith.mulf %213, %212 : vector<4x32xf32>
    %215 = vector.extract_strided_slice %206 {offsets = [0, 32], sizes = [4, 32], strides = [1, 1]} : vector<4x128xf32> to vector<4x32xf32>
    %cst_73 = arith.constant 5.000000e-01 : f32
    %216 = vector.broadcast %cst_73 : f32 to vector<4x32xf32>
    %217 = arith.mulf %216, %215 : vector<4x32xf32>
    %218 = math.tanh %217 : vector<4x32xf32>
    %cst_74 = arith.constant 1.000000e+00 : f32
    %219 = vector.broadcast %cst_74 : f32 to vector<4x32xf32>
    %220 = arith.addf %218, %219 : vector<4x32xf32>
    %cst_75 = arith.constant 5.000000e-01 : f32
    %221 = vector.broadcast %cst_75 : f32 to vector<4x32xf32>
    %222 = arith.mulf %221, %220 : vector<4x32xf32>
    %223 = vector.extract_strided_slice %206 {offsets = [0, 64], sizes = [4, 32], strides = [1, 1]} : vector<4x128xf32> to vector<4x32xf32>
    %224 = math.tanh %223 : vector<4x32xf32>
    %225 = vector.extract_strided_slice %206 {offsets = [0, 96], sizes = [4, 32], strides = [1, 1]} : vector<4x128xf32> to vector<4x32xf32>
    %cst_76 = arith.constant 5.000000e-01 : f32
    %226 = vector.broadcast %cst_76 : f32 to vector<4x32xf32>
    %227 = arith.mulf %226, %225 : vector<4x32xf32>
    %228 = math.tanh %227 : vector<4x32xf32>
    %cst_77 = arith.constant 1.000000e+00 : f32
    %229 = vector.broadcast %cst_77 : f32 to vector<4x32xf32>
    %230 = arith.addf %228, %229 : vector<4x32xf32>
    %cst_78 = arith.constant 5.000000e-01 : f32
    %231 = vector.broadcast %cst_78 : f32 to vector<4x32xf32>
    %232 = arith.mulf %231, %230 : vector<4x32xf32>
    %233 = arith.mulf %222, %194 : vector<4x32xf32>
    %234 = arith.mulf %214, %224 : vector<4x32xf32>
    %235 = arith.addf %233, %234 : vector<4x32xf32>
    %236 = math.tanh %235 : vector<4x32xf32>
    %237 = arith.mulf %232, %236 : vector<4x32xf32>
    %238 = vector.extract_strided_slice %237 {offsets = [0, 0], sizes = [2, 32], strides = [1, 1]} : vector<4x32xf32> to vector<2x32xf32>
    %239 = vector.extract_strided_slice %237 {offsets = [2, 0], sizes = [2, 32], strides = [1, 1]} : vector<4x32xf32> to vector<2x32xf32>
    %240 = vector.extract_strided_slice %26 {offsets = [10, 0], sizes = [2, 128], strides = [1, 1]} : vector<20x128xf32> to vector<2x128xf32>
    %241 = vector.extract_strided_slice %31 {offsets = [8, 0], sizes = [2, 128], strides = [1, 1]} : vector<20x128xf32> to vector<2x128xf32>
    %242 = tpu.concatenate %240, %241 in 0 : vector<2x128xf32>, vector<2x128xf32> -> vector<4x128xf32>
    %cst_79 = arith.constant dense<0.000000e+00> : vector<4x256xf32>
    %243 = tpu.matmul %237, %32, %cst_79 {dimension_numbers = #tpu.dot_dimension_numbers<[1], [0], [0], [1], [0, 0, 1, 1], [], []>, precision = #tpu.contract_precision<fp32>} : vector<4x32xf32>, vector<32x256xf32>, vector<4x256xf32> -> vector<4x256xf32>
    %244 = vector.extract_strided_slice %243 {offsets = [0, 0], sizes = [4, 128], strides = [1, 1]} : vector<4x256xf32> to vector<4x128xf32>
    %245 = vector.extract_strided_slice %243 {offsets = [0, 128], sizes = [4, 128], strides = [1, 1]} : vector<4x256xf32> to vector<4x128xf32>
    %246 = arith.select %21, %244, %245 : vector<4x128xi1>, vector<4x128xf32>
    %247 = arith.addf %242, %246 : vector<4x128xf32>
    %248 = vector.extract_strided_slice %247 {offsets = [0, 0], sizes = [4, 32], strides = [1, 1]} : vector<4x128xf32> to vector<4x32xf32>
    %cst_80 = arith.constant 5.000000e-01 : f32
    %249 = vector.broadcast %cst_80 : f32 to vector<4x32xf32>
    %250 = arith.mulf %249, %248 : vector<4x32xf32>
    %251 = math.tanh %250 : vector<4x32xf32>
    %cst_81 = arith.constant 1.000000e+00 : f32
    %252 = vector.broadcast %cst_81 : f32 to vector<4x32xf32>
    %253 = arith.addf %251, %252 : vector<4x32xf32>
    %cst_82 = arith.constant 5.000000e-01 : f32
    %254 = vector.broadcast %cst_82 : f32 to vector<4x32xf32>
    %255 = arith.mulf %254, %253 : vector<4x32xf32>
    %256 = vector.extract_strided_slice %247 {offsets = [0, 32], sizes = [4, 32], strides = [1, 1]} : vector<4x128xf32> to vector<4x32xf32>
    %cst_83 = arith.constant 5.000000e-01 : f32
    %257 = vector.broadcast %cst_83 : f32 to vector<4x32xf32>
    %258 = arith.mulf %257, %256 : vector<4x32xf32>
    %259 = math.tanh %258 : vector<4x32xf32>
    %cst_84 = arith.constant 1.000000e+00 : f32
    %260 = vector.broadcast %cst_84 : f32 to vector<4x32xf32>
    %261 = arith.addf %259, %260 : vector<4x32xf32>
    %cst_85 = arith.constant 5.000000e-01 : f32
    %262 = vector.broadcast %cst_85 : f32 to vector<4x32xf32>
    %263 = arith.mulf %262, %261 : vector<4x32xf32>
    %264 = vector.extract_strided_slice %247 {offsets = [0, 64], sizes = [4, 32], strides = [1, 1]} : vector<4x128xf32> to vector<4x32xf32>
    %265 = math.tanh %264 : vector<4x32xf32>
    %266 = vector.extract_strided_slice %247 {offsets = [0, 96], sizes = [4, 32], strides = [1, 1]} : vector<4x128xf32> to vector<4x32xf32>
    %cst_86 = arith.constant 5.000000e-01 : f32
    %267 = vector.broadcast %cst_86 : f32 to vector<4x32xf32>
    %268 = arith.mulf %267, %266 : vector<4x32xf32>
    %269 = math.tanh %268 : vector<4x32xf32>
    %cst_87 = arith.constant 1.000000e+00 : f32
    %270 = vector.broadcast %cst_87 : f32 to vector<4x32xf32>
    %271 = arith.addf %269, %270 : vector<4x32xf32>
    %cst_88 = arith.constant 5.000000e-01 : f32
    %272 = vector.broadcast %cst_88 : f32 to vector<4x32xf32>
    %273 = arith.mulf %272, %271 : vector<4x32xf32>
    %274 = arith.mulf %263, %235 : vector<4x32xf32>
    %275 = arith.mulf %255, %265 : vector<4x32xf32>
    %276 = arith.addf %274, %275 : vector<4x32xf32>
    %277 = math.tanh %276 : vector<4x32xf32>
    %278 = arith.mulf %273, %277 : vector<4x32xf32>
    %279 = vector.extract_strided_slice %278 {offsets = [0, 0], sizes = [2, 32], strides = [1, 1]} : vector<4x32xf32> to vector<2x32xf32>
    %280 = vector.extract_strided_slice %278 {offsets = [2, 0], sizes = [2, 32], strides = [1, 1]} : vector<4x32xf32> to vector<2x32xf32>
    %281 = vector.extract_strided_slice %26 {offsets = [12, 0], sizes = [2, 128], strides = [1, 1]} : vector<20x128xf32> to vector<2x128xf32>
    %282 = vector.extract_strided_slice %31 {offsets = [6, 0], sizes = [2, 128], strides = [1, 1]} : vector<20x128xf32> to vector<2x128xf32>
    %283 = tpu.concatenate %281, %282 in 0 : vector<2x128xf32>, vector<2x128xf32> -> vector<4x128xf32>
    %cst_89 = arith.constant dense<0.000000e+00> : vector<4x256xf32>
    %284 = tpu.matmul %278, %32, %cst_89 {dimension_numbers = #tpu.dot_dimension_numbers<[1], [0], [0], [1], [0, 0, 1, 1], [], []>, precision = #tpu.contract_precision<fp32>} : vector<4x32xf32>, vector<32x256xf32>, vector<4x256xf32> -> vector<4x256xf32>
    %285 = vector.extract_strided_slice %284 {offsets = [0, 0], sizes = [4, 128], strides = [1, 1]} : vector<4x256xf32> to vector<4x128xf32>
    %286 = vector.extract_strided_slice %284 {offsets = [0, 128], sizes = [4, 128], strides = [1, 1]} : vector<4x256xf32> to vector<4x128xf32>
    %287 = arith.select %21, %285, %286 : vector<4x128xi1>, vector<4x128xf32>
    %288 = arith.addf %283, %287 : vector<4x128xf32>
    %289 = vector.extract_strided_slice %288 {offsets = [0, 0], sizes = [4, 32], strides = [1, 1]} : vector<4x128xf32> to vector<4x32xf32>
    %cst_90 = arith.constant 5.000000e-01 : f32
    %290 = vector.broadcast %cst_90 : f32 to vector<4x32xf32>
    %291 = arith.mulf %290, %289 : vector<4x32xf32>
    %292 = math.tanh %291 : vector<4x32xf32>
    %cst_91 = arith.constant 1.000000e+00 : f32
    %293 = vector.broadcast %cst_91 : f32 to vector<4x32xf32>
    %294 = arith.addf %292, %293 : vector<4x32xf32>
    %cst_92 = arith.constant 5.000000e-01 : f32
    %295 = vector.broadcast %cst_92 : f32 to vector<4x32xf32>
    %296 = arith.mulf %295, %294 : vector<4x32xf32>
    %297 = vector.extract_strided_slice %288 {offsets = [0, 32], sizes = [4, 32], strides = [1, 1]} : vector<4x128xf32> to vector<4x32xf32>
    %cst_93 = arith.constant 5.000000e-01 : f32
    %298 = vector.broadcast %cst_93 : f32 to vector<4x32xf32>
    %299 = arith.mulf %298, %297 : vector<4x32xf32>
    %300 = math.tanh %299 : vector<4x32xf32>
    %cst_94 = arith.constant 1.000000e+00 : f32
    %301 = vector.broadcast %cst_94 : f32 to vector<4x32xf32>
    %302 = arith.addf %300, %301 : vector<4x32xf32>
    %cst_95 = arith.constant 5.000000e-01 : f32
    %303 = vector.broadcast %cst_95 : f32 to vector<4x32xf32>
    %304 = arith.mulf %303, %302 : vector<4x32xf32>
    %305 = vector.extract_strided_slice %288 {offsets = [0, 64], sizes = [4, 32], strides = [1, 1]} : vector<4x128xf32> to vector<4x32xf32>
    %306 = math.tanh %305 : vector<4x32xf32>
    %307 = vector.extract_strided_slice %288 {offsets = [0, 96], sizes = [4, 32], strides = [1, 1]} : vector<4x128xf32> to vector<4x32xf32>
    %cst_96 = arith.constant 5.000000e-01 : f32
    %308 = vector.broadcast %cst_96 : f32 to vector<4x32xf32>
    %309 = arith.mulf %308, %307 : vector<4x32xf32>
    %310 = math.tanh %309 : vector<4x32xf32>
    %cst_97 = arith.constant 1.000000e+00 : f32
    %311 = vector.broadcast %cst_97 : f32 to vector<4x32xf32>
    %312 = arith.addf %310, %311 : vector<4x32xf32>
    %cst_98 = arith.constant 5.000000e-01 : f32
    %313 = vector.broadcast %cst_98 : f32 to vector<4x32xf32>
    %314 = arith.mulf %313, %312 : vector<4x32xf32>
    %315 = arith.mulf %304, %276 : vector<4x32xf32>
    %316 = arith.mulf %296, %306 : vector<4x32xf32>
    %317 = arith.addf %315, %316 : vector<4x32xf32>
    %318 = math.tanh %317 : vector<4x32xf32>
    %319 = arith.mulf %314, %318 : vector<4x32xf32>
    %320 = vector.extract_strided_slice %319 {offsets = [0, 0], sizes = [2, 32], strides = [1, 1]} : vector<4x32xf32> to vector<2x32xf32>
    %321 = vector.extract_strided_slice %319 {offsets = [2, 0], sizes = [2, 32], strides = [1, 1]} : vector<4x32xf32> to vector<2x32xf32>
    %322 = vector.extract_strided_slice %26 {offsets = [14, 0], sizes = [2, 128], strides = [1, 1]} : vector<20x128xf32> to vector<2x128xf32>
    %323 = vector.extract_strided_slice %31 {offsets = [4, 0], sizes = [2, 128], strides = [1, 1]} : vector<20x128xf32> to vector<2x128xf32>
    %324 = tpu.concatenate %322, %323 in 0 : vector<2x128xf32>, vector<2x128xf32> -> vector<4x128xf32>
    %cst_99 = arith.constant dense<0.000000e+00> : vector<4x256xf32>
    %325 = tpu.matmul %319, %32, %cst_99 {dimension_numbers = #tpu.dot_dimension_numbers<[1], [0], [0], [1], [0, 0, 1, 1], [], []>, precision = #tpu.contract_precision<fp32>} : vector<4x32xf32>, vector<32x256xf32>, vector<4x256xf32> -> vector<4x256xf32>
    %326 = vector.extract_strided_slice %325 {offsets = [0, 0], sizes = [4, 128], strides = [1, 1]} : vector<4x256xf32> to vector<4x128xf32>
    %327 = vector.extract_strided_slice %325 {offsets = [0, 128], sizes = [4, 128], strides = [1, 1]} : vector<4x256xf32> to vector<4x128xf32>
    %328 = arith.select %21, %326, %327 : vector<4x128xi1>, vector<4x128xf32>
    %329 = arith.addf %324, %328 : vector<4x128xf32>
    %330 = vector.extract_strided_slice %329 {offsets = [0, 0], sizes = [4, 32], strides = [1, 1]} : vector<4x128xf32> to vector<4x32xf32>
    %cst_100 = arith.constant 5.000000e-01 : f32
    %331 = vector.broadcast %cst_100 : f32 to vector<4x32xf32>
    %332 = arith.mulf %331, %330 : vector<4x32xf32>
    %333 = math.tanh %332 : vector<4x32xf32>
    %cst_101 = arith.constant 1.000000e+00 : f32
    %334 = vector.broadcast %cst_101 : f32 to vector<4x32xf32>
    %335 = arith.addf %333, %334 : vector<4x32xf32>
    %cst_102 = arith.constant 5.000000e-01 : f32
    %336 = vector.broadcast %cst_102 : f32 to vector<4x32xf32>
    %337 = arith.mulf %336, %335 : vector<4x32xf32>
    %338 = vector.extract_strided_slice %329 {offsets = [0, 32], sizes = [4, 32], strides = [1, 1]} : vector<4x128xf32> to vector<4x32xf32>
    %cst_103 = arith.constant 5.000000e-01 : f32
    %339 = vector.broadcast %cst_103 : f32 to vector<4x32xf32>
    %340 = arith.mulf %339, %338 : vector<4x32xf32>
    %341 = math.tanh %340 : vector<4x32xf32>
    %cst_104 = arith.constant 1.000000e+00 : f32
    %342 = vector.broadcast %cst_104 : f32 to vector<4x32xf32>
    %343 = arith.addf %341, %342 : vector<4x32xf32>
    %cst_105 = arith.constant 5.000000e-01 : f32
    %344 = vector.broadcast %cst_105 : f32 to vector<4x32xf32>
    %345 = arith.mulf %344, %343 : vector<4x32xf32>
    %346 = vector.extract_strided_slice %329 {offsets = [0, 64], sizes = [4, 32], strides = [1, 1]} : vector<4x128xf32> to vector<4x32xf32>
    %347 = math.tanh %346 : vector<4x32xf32>
    %348 = vector.extract_strided_slice %329 {offsets = [0, 96], sizes = [4, 32], strides = [1, 1]} : vector<4x128xf32> to vector<4x32xf32>
    %cst_106 = arith.constant 5.000000e-01 : f32
    %349 = vector.broadcast %cst_106 : f32 to vector<4x32xf32>
    %350 = arith.mulf %349, %348 : vector<4x32xf32>
    %351 = math.tanh %350 : vector<4x32xf32>
    %cst_107 = arith.constant 1.000000e+00 : f32
    %352 = vector.broadcast %cst_107 : f32 to vector<4x32xf32>
    %353 = arith.addf %351, %352 : vector<4x32xf32>
    %cst_108 = arith.constant 5.000000e-01 : f32
    %354 = vector.broadcast %cst_108 : f32 to vector<4x32xf32>
    %355 = arith.mulf %354, %353 : vector<4x32xf32>
    %356 = arith.mulf %345, %317 : vector<4x32xf32>
    %357 = arith.mulf %337, %347 : vector<4x32xf32>
    %358 = arith.addf %356, %357 : vector<4x32xf32>
    %359 = math.tanh %358 : vector<4x32xf32>
    %360 = arith.mulf %355, %359 : vector<4x32xf32>
    %361 = vector.extract_strided_slice %360 {offsets = [0, 0], sizes = [2, 32], strides = [1, 1]} : vector<4x32xf32> to vector<2x32xf32>
    %362 = vector.extract_strided_slice %360 {offsets = [2, 0], sizes = [2, 32], strides = [1, 1]} : vector<4x32xf32> to vector<2x32xf32>
    %363 = vector.extract_strided_slice %26 {offsets = [16, 0], sizes = [2, 128], strides = [1, 1]} : vector<20x128xf32> to vector<2x128xf32>
    %364 = vector.extract_strided_slice %31 {offsets = [2, 0], sizes = [2, 128], strides = [1, 1]} : vector<20x128xf32> to vector<2x128xf32>
    %365 = tpu.concatenate %363, %364 in 0 : vector<2x128xf32>, vector<2x128xf32> -> vector<4x128xf32>
    %cst_109 = arith.constant dense<0.000000e+00> : vector<4x256xf32>
    %366 = tpu.matmul %360, %32, %cst_109 {dimension_numbers = #tpu.dot_dimension_numbers<[1], [0], [0], [1], [0, 0, 1, 1], [], []>, precision = #tpu.contract_precision<fp32>} : vector<4x32xf32>, vector<32x256xf32>, vector<4x256xf32> -> vector<4x256xf32>
    %367 = vector.extract_strided_slice %366 {offsets = [0, 0], sizes = [4, 128], strides = [1, 1]} : vector<4x256xf32> to vector<4x128xf32>
    %368 = vector.extract_strided_slice %366 {offsets = [0, 128], sizes = [4, 128], strides = [1, 1]} : vector<4x256xf32> to vector<4x128xf32>
    %369 = arith.select %21, %367, %368 : vector<4x128xi1>, vector<4x128xf32>
    %370 = arith.addf %365, %369 : vector<4x128xf32>
    %371 = vector.extract_strided_slice %370 {offsets = [0, 0], sizes = [4, 32], strides = [1, 1]} : vector<4x128xf32> to vector<4x32xf32>
    %cst_110 = arith.constant 5.000000e-01 : f32
    %372 = vector.broadcast %cst_110 : f32 to vector<4x32xf32>
    %373 = arith.mulf %372, %371 : vector<4x32xf32>
    %374 = math.tanh %373 : vector<4x32xf32>
    %cst_111 = arith.constant 1.000000e+00 : f32
    %375 = vector.broadcast %cst_111 : f32 to vector<4x32xf32>
    %376 = arith.addf %374, %375 : vector<4x32xf32>
    %cst_112 = arith.constant 5.000000e-01 : f32
    %377 = vector.broadcast %cst_112 : f32 to vector<4x32xf32>
    %378 = arith.mulf %377, %376 : vector<4x32xf32>
    %379 = vector.extract_strided_slice %370 {offsets = [0, 32], sizes = [4, 32], strides = [1, 1]} : vector<4x128xf32> to vector<4x32xf32>
    %cst_113 = arith.constant 5.000000e-01 : f32
    %380 = vector.broadcast %cst_113 : f32 to vector<4x32xf32>
    %381 = arith.mulf %380, %379 : vector<4x32xf32>
    %382 = math.tanh %381 : vector<4x32xf32>
    %cst_114 = arith.constant 1.000000e+00 : f32
    %383 = vector.broadcast %cst_114 : f32 to vector<4x32xf32>
    %384 = arith.addf %382, %383 : vector<4x32xf32>
    %cst_115 = arith.constant 5.000000e-01 : f32
    %385 = vector.broadcast %cst_115 : f32 to vector<4x32xf32>
    %386 = arith.mulf %385, %384 : vector<4x32xf32>
    %387 = vector.extract_strided_slice %370 {offsets = [0, 64], sizes = [4, 32], strides = [1, 1]} : vector<4x128xf32> to vector<4x32xf32>
    %388 = math.tanh %387 : vector<4x32xf32>
    %389 = vector.extract_strided_slice %370 {offsets = [0, 96], sizes = [4, 32], strides = [1, 1]} : vector<4x128xf32> to vector<4x32xf32>
    %cst_116 = arith.constant 5.000000e-01 : f32
    %390 = vector.broadcast %cst_116 : f32 to vector<4x32xf32>
    %391 = arith.mulf %390, %389 : vector<4x32xf32>
    %392 = math.tanh %391 : vector<4x32xf32>
    %cst_117 = arith.constant 1.000000e+00 : f32
    %393 = vector.broadcast %cst_117 : f32 to vector<4x32xf32>
    %394 = arith.addf %392, %393 : vector<4x32xf32>
    %cst_118 = arith.constant 5.000000e-01 : f32
    %395 = vector.broadcast %cst_118 : f32 to vector<4x32xf32>
    %396 = arith.mulf %395, %394 : vector<4x32xf32>
    %397 = arith.mulf %386, %358 : vector<4x32xf32>
    %398 = arith.mulf %378, %388 : vector<4x32xf32>
    %399 = arith.addf %397, %398 : vector<4x32xf32>
    %400 = math.tanh %399 : vector<4x32xf32>
    %401 = arith.mulf %396, %400 : vector<4x32xf32>
    %402 = vector.extract_strided_slice %401 {offsets = [0, 0], sizes = [2, 32], strides = [1, 1]} : vector<4x32xf32> to vector<2x32xf32>
    %403 = vector.extract_strided_slice %401 {offsets = [2, 0], sizes = [2, 32], strides = [1, 1]} : vector<4x32xf32> to vector<2x32xf32>
    %404 = vector.extract_strided_slice %26 {offsets = [18, 0], sizes = [2, 128], strides = [1, 1]} : vector<20x128xf32> to vector<2x128xf32>
    %405 = vector.extract_strided_slice %31 {offsets = [0, 0], sizes = [2, 128], strides = [1, 1]} : vector<20x128xf32> to vector<2x128xf32>
    %406 = tpu.concatenate %404, %405 in 0 : vector<2x128xf32>, vector<2x128xf32> -> vector<4x128xf32>
    %cst_119 = arith.constant dense<0.000000e+00> : vector<4x256xf32>
    %407 = tpu.matmul %401, %32, %cst_119 {dimension_numbers = #tpu.dot_dimension_numbers<[1], [0], [0], [1], [0, 0, 1, 1], [], []>, precision = #tpu.contract_precision<fp32>} : vector<4x32xf32>, vector<32x256xf32>, vector<4x256xf32> -> vector<4x256xf32>
    %408 = vector.extract_strided_slice %407 {offsets = [0, 0], sizes = [4, 128], strides = [1, 1]} : vector<4x256xf32> to vector<4x128xf32>
    %409 = vector.extract_strided_slice %407 {offsets = [0, 128], sizes = [4, 128], strides = [1, 1]} : vector<4x256xf32> to vector<4x128xf32>
    %410 = arith.select %21, %408, %409 : vector<4x128xi1>, vector<4x128xf32>
    %411 = arith.addf %406, %410 : vector<4x128xf32>
    %412 = vector.extract_strided_slice %411 {offsets = [0, 0], sizes = [4, 32], strides = [1, 1]} : vector<4x128xf32> to vector<4x32xf32>
    %cst_120 = arith.constant 5.000000e-01 : f32
    %413 = vector.broadcast %cst_120 : f32 to vector<4x32xf32>
    %414 = arith.mulf %413, %412 : vector<4x32xf32>
    %415 = math.tanh %414 : vector<4x32xf32>
    %cst_121 = arith.constant 1.000000e+00 : f32
    %416 = vector.broadcast %cst_121 : f32 to vector<4x32xf32>
    %417 = arith.addf %415, %416 : vector<4x32xf32>
    %cst_122 = arith.constant 5.000000e-01 : f32
    %418 = vector.broadcast %cst_122 : f32 to vector<4x32xf32>
    %419 = arith.mulf %418, %417 : vector<4x32xf32>
    %420 = vector.extract_strided_slice %411 {offsets = [0, 32], sizes = [4, 32], strides = [1, 1]} : vector<4x128xf32> to vector<4x32xf32>
    %cst_123 = arith.constant 5.000000e-01 : f32
    %421 = vector.broadcast %cst_123 : f32 to vector<4x32xf32>
    %422 = arith.mulf %421, %420 : vector<4x32xf32>
    %423 = math.tanh %422 : vector<4x32xf32>
    %cst_124 = arith.constant 1.000000e+00 : f32
    %424 = vector.broadcast %cst_124 : f32 to vector<4x32xf32>
    %425 = arith.addf %423, %424 : vector<4x32xf32>
    %cst_125 = arith.constant 5.000000e-01 : f32
    %426 = vector.broadcast %cst_125 : f32 to vector<4x32xf32>
    %427 = arith.mulf %426, %425 : vector<4x32xf32>
    %428 = vector.extract_strided_slice %411 {offsets = [0, 64], sizes = [4, 32], strides = [1, 1]} : vector<4x128xf32> to vector<4x32xf32>
    %429 = math.tanh %428 : vector<4x32xf32>
    %430 = vector.extract_strided_slice %411 {offsets = [0, 96], sizes = [4, 32], strides = [1, 1]} : vector<4x128xf32> to vector<4x32xf32>
    %cst_126 = arith.constant 5.000000e-01 : f32
    %431 = vector.broadcast %cst_126 : f32 to vector<4x32xf32>
    %432 = arith.mulf %431, %430 : vector<4x32xf32>
    %433 = math.tanh %432 : vector<4x32xf32>
    %cst_127 = arith.constant 1.000000e+00 : f32
    %434 = vector.broadcast %cst_127 : f32 to vector<4x32xf32>
    %435 = arith.addf %433, %434 : vector<4x32xf32>
    %cst_128 = arith.constant 5.000000e-01 : f32
    %436 = vector.broadcast %cst_128 : f32 to vector<4x32xf32>
    %437 = arith.mulf %436, %435 : vector<4x32xf32>
    %438 = arith.mulf %427, %399 : vector<4x32xf32>
    %439 = arith.mulf %419, %429 : vector<4x32xf32>
    %440 = arith.addf %438, %439 : vector<4x32xf32>
    %441 = math.tanh %440 : vector<4x32xf32>
    %442 = arith.mulf %437, %441 : vector<4x32xf32>
    %443 = vector.extract_strided_slice %442 {offsets = [0, 0], sizes = [2, 32], strides = [1, 1]} : vector<4x32xf32> to vector<2x32xf32>
    %444 = vector.extract_strided_slice %442 {offsets = [2, 0], sizes = [2, 32], strides = [1, 1]} : vector<4x32xf32> to vector<2x32xf32>
    %445 = tpu.concatenate %74, %444 in 1 : vector<2x32xf32>, vector<2x32xf32> -> vector<2x64xf32>
    %446 = tpu.concatenate %115, %403 in 1 : vector<2x32xf32>, vector<2x32xf32> -> vector<2x64xf32>
    %447 = tpu.concatenate %156, %362 in 1 : vector<2x32xf32>, vector<2x32xf32> -> vector<2x64xf32>
    %448 = tpu.concatenate %197, %321 in 1 : vector<2x32xf32>, vector<2x32xf32> -> vector<2x64xf32>
    %449 = tpu.concatenate %238, %280 in 1 : vector<2x32xf32>, vector<2x32xf32> -> vector<2x64xf32>
    %450 = tpu.concatenate %279, %239 in 1 : vector<2x32xf32>, vector<2x32xf32> -> vector<2x64xf32>
    %451 = tpu.concatenate %320, %198 in 1 : vector<2x32xf32>, vector<2x32xf32> -> vector<2x64xf32>
    %452 = tpu.concatenate %361, %157 in 1 : vector<2x32xf32>, vector<2x32xf32> -> vector<2x64xf32>
    %453 = tpu.concatenate %402, %116 in 1 : vector<2x32xf32>, vector<2x32xf32> -> vector<2x64xf32>
    %454 = tpu.concatenate %443, %75 in 1 : vector<2x32xf32>, vector<2x32xf32> -> vector<2x64xf32>
    %455 = tpu.concatenate %445, %446 in 0 : vector<2x64xf32>, vector<2x64xf32> -> vector<4x64xf32>
    %456 = tpu.concatenate %447, %448 in 0 : vector<2x64xf32>, vector<2x64xf32> -> vector<4x64xf32>
    %457 = tpu.concatenate %449, %450 in 0 : vector<2x64xf32>, vector<2x64xf32> -> vector<4x64xf32>
    %458 = tpu.concatenate %451, %452 in 0 : vector<2x64xf32>, vector<2x64xf32> -> vector<4x64xf32>
    %459 = tpu.concatenate %453, %454 in 0 : vector<2x64xf32>, vector<2x64xf32> -> vector<4x64xf32>
    %460 = tpu.concatenate %455, %456 in 0 : vector<4x64xf32>, vector<4x64xf32> -> vector<8x64xf32>
    %461 = tpu.concatenate %457, %458 in 0 : vector<4x64xf32>, vector<4x64xf32> -> vector<8x64xf32>
    %462 = tpu.concatenate %460, %461 in 0 : vector<8x64xf32>, vector<8x64xf32> -> vector<16x64xf32>
    %463 = tpu.concatenate %462, %459 in 0 : vector<16x64xf32>, vector<4x64xf32> -> vector<20x64xf32>
    %c0_129 = arith.constant 0 : index
    %c0_130 = arith.constant 0 : index
    %464 = vector.load %arg8[%c0_129, %c0_130] : memref<64x128xf32, #tpu.memory_space<vmem>>, vector<64x128xf32>
    %cst_131 = arith.constant dense<0.000000e+00> : vector<20x128xf32>
    %465 = tpu.matmul %463, %464, %cst_131 {dimension_numbers = #tpu.dot_dimension_numbers<[1], [0], [0], [1], [0, 0, 1, 1], [], []>, precision = #tpu.contract_precision<fp32>} : vector<20x64xf32>, vector<64x128xf32>, vector<20x128xf32> -> vector<20x128xf32>
    %c0_132 = arith.constant 0 : index
    %c0_133 = arith.constant 0 : index
    %466 = vector.load %arg9[%c0_132, %c0_133] : memref<1x128xf32, #tpu.memory_space<vmem>>, vector<1x128xf32>
    %467 = vector.broadcast %466 : vector<1x128xf32> to vector<20x128xf32>
    %468 = arith.addf %465, %467 : vector<20x128xf32>
    %c0_134 = arith.constant 0 : index
    %c0_135 = arith.constant 0 : index
    %469 = vector.load %arg10[%c0_134, %c0_135] : memref<64x128xf32, #tpu.memory_space<vmem>>, vector<64x128xf32>
    %cst_136 = arith.constant dense<0.000000e+00> : vector<20x128xf32>
    %470 = tpu.matmul %463, %469, %cst_136 {dimension_numbers = #tpu.dot_dimension_numbers<[1], [0], [0], [1], [0, 0, 1, 1], [], []>, precision = #tpu.contract_precision<fp32>} : vector<20x64xf32>, vector<64x128xf32>, vector<20x128xf32> -> vector<20x128xf32>
    %c0_137 = arith.constant 0 : index
    %c0_138 = arith.constant 0 : index
    %471 = vector.load %arg11[%c0_137, %c0_138] : memref<1x128xf32, #tpu.memory_space<vmem>>, vector<1x128xf32>
    %472 = vector.broadcast %471 : vector<1x128xf32> to vector<20x128xf32>
    %473 = arith.addf %470, %472 : vector<20x128xf32>
    %c0_139 = arith.constant 0 : index
    %c0_140 = arith.constant 0 : index
    %474 = vector.load %arg12[%c0_139, %c0_140] : memref<32x256xf32, #tpu.memory_space<vmem>>, vector<32x256xf32>
    %cst_141 = arith.constant 0.000000e+00 : f32
    %475 = vector.broadcast %cst_141 : f32 to vector<4x32xf32>
    %cst_142 = arith.constant 0.000000e+00 : f32
    %476 = vector.broadcast %cst_142 : f32 to vector<4x32xf32>
    %477 = vector.extract_strided_slice %468 {offsets = [0, 0], sizes = [2, 128], strides = [1, 1]} : vector<20x128xf32> to vector<2x128xf32>
    %478 = vector.extract_strided_slice %473 {offsets = [18, 0], sizes = [2, 128], strides = [1, 1]} : vector<20x128xf32> to vector<2x128xf32>
    %479 = tpu.concatenate %477, %478 in 0 : vector<2x128xf32>, vector<2x128xf32> -> vector<4x128xf32>
    %cst_143 = arith.constant dense<0.000000e+00> : vector<4x256xf32>
    %480 = tpu.matmul %475, %474, %cst_143 {dimension_numbers = #tpu.dot_dimension_numbers<[1], [0], [0], [1], [0, 0, 1, 1], [], []>, precision = #tpu.contract_precision<fp32>} : vector<4x32xf32>, vector<32x256xf32>, vector<4x256xf32> -> vector<4x256xf32>
    %481 = vector.extract_strided_slice %480 {offsets = [0, 0], sizes = [4, 128], strides = [1, 1]} : vector<4x256xf32> to vector<4x128xf32>
    %482 = vector.extract_strided_slice %480 {offsets = [0, 128], sizes = [4, 128], strides = [1, 1]} : vector<4x256xf32> to vector<4x128xf32>
    %483 = arith.select %21, %481, %482 : vector<4x128xi1>, vector<4x128xf32>
    %484 = arith.addf %479, %483 : vector<4x128xf32>
    %485 = vector.extract_strided_slice %484 {offsets = [0, 0], sizes = [4, 32], strides = [1, 1]} : vector<4x128xf32> to vector<4x32xf32>
    %cst_144 = arith.constant 5.000000e-01 : f32
    %486 = vector.broadcast %cst_144 : f32 to vector<4x32xf32>
    %487 = arith.mulf %486, %485 : vector<4x32xf32>
    %488 = math.tanh %487 : vector<4x32xf32>
    %cst_145 = arith.constant 1.000000e+00 : f32
    %489 = vector.broadcast %cst_145 : f32 to vector<4x32xf32>
    %490 = arith.addf %488, %489 : vector<4x32xf32>
    %cst_146 = arith.constant 5.000000e-01 : f32
    %491 = vector.broadcast %cst_146 : f32 to vector<4x32xf32>
    %492 = arith.mulf %491, %490 : vector<4x32xf32>
    %493 = vector.extract_strided_slice %484 {offsets = [0, 32], sizes = [4, 32], strides = [1, 1]} : vector<4x128xf32> to vector<4x32xf32>
    %cst_147 = arith.constant 5.000000e-01 : f32
    %494 = vector.broadcast %cst_147 : f32 to vector<4x32xf32>
    %495 = arith.mulf %494, %493 : vector<4x32xf32>
    %496 = math.tanh %495 : vector<4x32xf32>
    %cst_148 = arith.constant 1.000000e+00 : f32
    %497 = vector.broadcast %cst_148 : f32 to vector<4x32xf32>
    %498 = arith.addf %496, %497 : vector<4x32xf32>
    %cst_149 = arith.constant 5.000000e-01 : f32
    %499 = vector.broadcast %cst_149 : f32 to vector<4x32xf32>
    %500 = arith.mulf %499, %498 : vector<4x32xf32>
    %501 = vector.extract_strided_slice %484 {offsets = [0, 64], sizes = [4, 32], strides = [1, 1]} : vector<4x128xf32> to vector<4x32xf32>
    %502 = math.tanh %501 : vector<4x32xf32>
    %503 = vector.extract_strided_slice %484 {offsets = [0, 96], sizes = [4, 32], strides = [1, 1]} : vector<4x128xf32> to vector<4x32xf32>
    %cst_150 = arith.constant 5.000000e-01 : f32
    %504 = vector.broadcast %cst_150 : f32 to vector<4x32xf32>
    %505 = arith.mulf %504, %503 : vector<4x32xf32>
    %506 = math.tanh %505 : vector<4x32xf32>
    %cst_151 = arith.constant 1.000000e+00 : f32
    %507 = vector.broadcast %cst_151 : f32 to vector<4x32xf32>
    %508 = arith.addf %506, %507 : vector<4x32xf32>
    %cst_152 = arith.constant 5.000000e-01 : f32
    %509 = vector.broadcast %cst_152 : f32 to vector<4x32xf32>
    %510 = arith.mulf %509, %508 : vector<4x32xf32>
    %511 = arith.mulf %500, %476 : vector<4x32xf32>
    %512 = arith.mulf %492, %502 : vector<4x32xf32>
    %513 = arith.addf %511, %512 : vector<4x32xf32>
    %514 = math.tanh %513 : vector<4x32xf32>
    %515 = arith.mulf %510, %514 : vector<4x32xf32>
    %516 = vector.extract_strided_slice %515 {offsets = [2, 0], sizes = [2, 32], strides = [1, 1]} : vector<4x32xf32> to vector<2x32xf32>
    %517 = vector.extract_strided_slice %468 {offsets = [2, 0], sizes = [2, 128], strides = [1, 1]} : vector<20x128xf32> to vector<2x128xf32>
    %518 = vector.extract_strided_slice %473 {offsets = [16, 0], sizes = [2, 128], strides = [1, 1]} : vector<20x128xf32> to vector<2x128xf32>
    %519 = tpu.concatenate %517, %518 in 0 : vector<2x128xf32>, vector<2x128xf32> -> vector<4x128xf32>
    %cst_153 = arith.constant dense<0.000000e+00> : vector<4x256xf32>
    %520 = tpu.matmul %515, %474, %cst_153 {dimension_numbers = #tpu.dot_dimension_numbers<[1], [0], [0], [1], [0, 0, 1, 1], [], []>, precision = #tpu.contract_precision<fp32>} : vector<4x32xf32>, vector<32x256xf32>, vector<4x256xf32> -> vector<4x256xf32>
    %521 = vector.extract_strided_slice %520 {offsets = [0, 0], sizes = [4, 128], strides = [1, 1]} : vector<4x256xf32> to vector<4x128xf32>
    %522 = vector.extract_strided_slice %520 {offsets = [0, 128], sizes = [4, 128], strides = [1, 1]} : vector<4x256xf32> to vector<4x128xf32>
    %523 = arith.select %21, %521, %522 : vector<4x128xi1>, vector<4x128xf32>
    %524 = arith.addf %519, %523 : vector<4x128xf32>
    %525 = vector.extract_strided_slice %524 {offsets = [0, 0], sizes = [4, 32], strides = [1, 1]} : vector<4x128xf32> to vector<4x32xf32>
    %cst_154 = arith.constant 5.000000e-01 : f32
    %526 = vector.broadcast %cst_154 : f32 to vector<4x32xf32>
    %527 = arith.mulf %526, %525 : vector<4x32xf32>
    %528 = math.tanh %527 : vector<4x32xf32>
    %cst_155 = arith.constant 1.000000e+00 : f32
    %529 = vector.broadcast %cst_155 : f32 to vector<4x32xf32>
    %530 = arith.addf %528, %529 : vector<4x32xf32>
    %cst_156 = arith.constant 5.000000e-01 : f32
    %531 = vector.broadcast %cst_156 : f32 to vector<4x32xf32>
    %532 = arith.mulf %531, %530 : vector<4x32xf32>
    %533 = vector.extract_strided_slice %524 {offsets = [0, 32], sizes = [4, 32], strides = [1, 1]} : vector<4x128xf32> to vector<4x32xf32>
    %cst_157 = arith.constant 5.000000e-01 : f32
    %534 = vector.broadcast %cst_157 : f32 to vector<4x32xf32>
    %535 = arith.mulf %534, %533 : vector<4x32xf32>
    %536 = math.tanh %535 : vector<4x32xf32>
    %cst_158 = arith.constant 1.000000e+00 : f32
    %537 = vector.broadcast %cst_158 : f32 to vector<4x32xf32>
    %538 = arith.addf %536, %537 : vector<4x32xf32>
    %cst_159 = arith.constant 5.000000e-01 : f32
    %539 = vector.broadcast %cst_159 : f32 to vector<4x32xf32>
    %540 = arith.mulf %539, %538 : vector<4x32xf32>
    %541 = vector.extract_strided_slice %524 {offsets = [0, 64], sizes = [4, 32], strides = [1, 1]} : vector<4x128xf32> to vector<4x32xf32>
    %542 = math.tanh %541 : vector<4x32xf32>
    %543 = vector.extract_strided_slice %524 {offsets = [0, 96], sizes = [4, 32], strides = [1, 1]} : vector<4x128xf32> to vector<4x32xf32>
    %cst_160 = arith.constant 5.000000e-01 : f32
    %544 = vector.broadcast %cst_160 : f32 to vector<4x32xf32>
    %545 = arith.mulf %544, %543 : vector<4x32xf32>
    %546 = math.tanh %545 : vector<4x32xf32>
    %cst_161 = arith.constant 1.000000e+00 : f32
    %547 = vector.broadcast %cst_161 : f32 to vector<4x32xf32>
    %548 = arith.addf %546, %547 : vector<4x32xf32>
    %cst_162 = arith.constant 5.000000e-01 : f32
    %549 = vector.broadcast %cst_162 : f32 to vector<4x32xf32>
    %550 = arith.mulf %549, %548 : vector<4x32xf32>
    %551 = arith.mulf %540, %513 : vector<4x32xf32>
    %552 = arith.mulf %532, %542 : vector<4x32xf32>
    %553 = arith.addf %551, %552 : vector<4x32xf32>
    %554 = math.tanh %553 : vector<4x32xf32>
    %555 = arith.mulf %550, %554 : vector<4x32xf32>
    %556 = vector.extract_strided_slice %468 {offsets = [4, 0], sizes = [2, 128], strides = [1, 1]} : vector<20x128xf32> to vector<2x128xf32>
    %557 = vector.extract_strided_slice %473 {offsets = [14, 0], sizes = [2, 128], strides = [1, 1]} : vector<20x128xf32> to vector<2x128xf32>
    %558 = tpu.concatenate %556, %557 in 0 : vector<2x128xf32>, vector<2x128xf32> -> vector<4x128xf32>
    %cst_163 = arith.constant dense<0.000000e+00> : vector<4x256xf32>
    %559 = tpu.matmul %555, %474, %cst_163 {dimension_numbers = #tpu.dot_dimension_numbers<[1], [0], [0], [1], [0, 0, 1, 1], [], []>, precision = #tpu.contract_precision<fp32>} : vector<4x32xf32>, vector<32x256xf32>, vector<4x256xf32> -> vector<4x256xf32>
    %560 = vector.extract_strided_slice %559 {offsets = [0, 0], sizes = [4, 128], strides = [1, 1]} : vector<4x256xf32> to vector<4x128xf32>
    %561 = vector.extract_strided_slice %559 {offsets = [0, 128], sizes = [4, 128], strides = [1, 1]} : vector<4x256xf32> to vector<4x128xf32>
    %562 = arith.select %21, %560, %561 : vector<4x128xi1>, vector<4x128xf32>
    %563 = arith.addf %558, %562 : vector<4x128xf32>
    %564 = vector.extract_strided_slice %563 {offsets = [0, 0], sizes = [4, 32], strides = [1, 1]} : vector<4x128xf32> to vector<4x32xf32>
    %cst_164 = arith.constant 5.000000e-01 : f32
    %565 = vector.broadcast %cst_164 : f32 to vector<4x32xf32>
    %566 = arith.mulf %565, %564 : vector<4x32xf32>
    %567 = math.tanh %566 : vector<4x32xf32>
    %cst_165 = arith.constant 1.000000e+00 : f32
    %568 = vector.broadcast %cst_165 : f32 to vector<4x32xf32>
    %569 = arith.addf %567, %568 : vector<4x32xf32>
    %cst_166 = arith.constant 5.000000e-01 : f32
    %570 = vector.broadcast %cst_166 : f32 to vector<4x32xf32>
    %571 = arith.mulf %570, %569 : vector<4x32xf32>
    %572 = vector.extract_strided_slice %563 {offsets = [0, 32], sizes = [4, 32], strides = [1, 1]} : vector<4x128xf32> to vector<4x32xf32>
    %cst_167 = arith.constant 5.000000e-01 : f32
    %573 = vector.broadcast %cst_167 : f32 to vector<4x32xf32>
    %574 = arith.mulf %573, %572 : vector<4x32xf32>
    %575 = math.tanh %574 : vector<4x32xf32>
    %cst_168 = arith.constant 1.000000e+00 : f32
    %576 = vector.broadcast %cst_168 : f32 to vector<4x32xf32>
    %577 = arith.addf %575, %576 : vector<4x32xf32>
    %cst_169 = arith.constant 5.000000e-01 : f32
    %578 = vector.broadcast %cst_169 : f32 to vector<4x32xf32>
    %579 = arith.mulf %578, %577 : vector<4x32xf32>
    %580 = vector.extract_strided_slice %563 {offsets = [0, 64], sizes = [4, 32], strides = [1, 1]} : vector<4x128xf32> to vector<4x32xf32>
    %581 = math.tanh %580 : vector<4x32xf32>
    %582 = vector.extract_strided_slice %563 {offsets = [0, 96], sizes = [4, 32], strides = [1, 1]} : vector<4x128xf32> to vector<4x32xf32>
    %cst_170 = arith.constant 5.000000e-01 : f32
    %583 = vector.broadcast %cst_170 : f32 to vector<4x32xf32>
    %584 = arith.mulf %583, %582 : vector<4x32xf32>
    %585 = math.tanh %584 : vector<4x32xf32>
    %cst_171 = arith.constant 1.000000e+00 : f32
    %586 = vector.broadcast %cst_171 : f32 to vector<4x32xf32>
    %587 = arith.addf %585, %586 : vector<4x32xf32>
    %cst_172 = arith.constant 5.000000e-01 : f32
    %588 = vector.broadcast %cst_172 : f32 to vector<4x32xf32>
    %589 = arith.mulf %588, %587 : vector<4x32xf32>
    %590 = arith.mulf %579, %553 : vector<4x32xf32>
    %591 = arith.mulf %571, %581 : vector<4x32xf32>
    %592 = arith.addf %590, %591 : vector<4x32xf32>
    %593 = math.tanh %592 : vector<4x32xf32>
    %594 = arith.mulf %589, %593 : vector<4x32xf32>
    %595 = vector.extract_strided_slice %468 {offsets = [6, 0], sizes = [2, 128], strides = [1, 1]} : vector<20x128xf32> to vector<2x128xf32>
    %596 = vector.extract_strided_slice %473 {offsets = [12, 0], sizes = [2, 128], strides = [1, 1]} : vector<20x128xf32> to vector<2x128xf32>
    %597 = tpu.concatenate %595, %596 in 0 : vector<2x128xf32>, vector<2x128xf32> -> vector<4x128xf32>
    %cst_173 = arith.constant dense<0.000000e+00> : vector<4x256xf32>
    %598 = tpu.matmul %594, %474, %cst_173 {dimension_numbers = #tpu.dot_dimension_numbers<[1], [0], [0], [1], [0, 0, 1, 1], [], []>, precision = #tpu.contract_precision<fp32>} : vector<4x32xf32>, vector<32x256xf32>, vector<4x256xf32> -> vector<4x256xf32>
    %599 = vector.extract_strided_slice %598 {offsets = [0, 0], sizes = [4, 128], strides = [1, 1]} : vector<4x256xf32> to vector<4x128xf32>
    %600 = vector.extract_strided_slice %598 {offsets = [0, 128], sizes = [4, 128], strides = [1, 1]} : vector<4x256xf32> to vector<4x128xf32>
    %601 = arith.select %21, %599, %600 : vector<4x128xi1>, vector<4x128xf32>
    %602 = arith.addf %597, %601 : vector<4x128xf32>
    %603 = vector.extract_strided_slice %602 {offsets = [0, 0], sizes = [4, 32], strides = [1, 1]} : vector<4x128xf32> to vector<4x32xf32>
    %cst_174 = arith.constant 5.000000e-01 : f32
    %604 = vector.broadcast %cst_174 : f32 to vector<4x32xf32>
    %605 = arith.mulf %604, %603 : vector<4x32xf32>
    %606 = math.tanh %605 : vector<4x32xf32>
    %cst_175 = arith.constant 1.000000e+00 : f32
    %607 = vector.broadcast %cst_175 : f32 to vector<4x32xf32>
    %608 = arith.addf %606, %607 : vector<4x32xf32>
    %cst_176 = arith.constant 5.000000e-01 : f32
    %609 = vector.broadcast %cst_176 : f32 to vector<4x32xf32>
    %610 = arith.mulf %609, %608 : vector<4x32xf32>
    %611 = vector.extract_strided_slice %602 {offsets = [0, 32], sizes = [4, 32], strides = [1, 1]} : vector<4x128xf32> to vector<4x32xf32>
    %cst_177 = arith.constant 5.000000e-01 : f32
    %612 = vector.broadcast %cst_177 : f32 to vector<4x32xf32>
    %613 = arith.mulf %612, %611 : vector<4x32xf32>
    %614 = math.tanh %613 : vector<4x32xf32>
    %cst_178 = arith.constant 1.000000e+00 : f32
    %615 = vector.broadcast %cst_178 : f32 to vector<4x32xf32>
    %616 = arith.addf %614, %615 : vector<4x32xf32>
    %cst_179 = arith.constant 5.000000e-01 : f32
    %617 = vector.broadcast %cst_179 : f32 to vector<4x32xf32>
    %618 = arith.mulf %617, %616 : vector<4x32xf32>
    %619 = vector.extract_strided_slice %602 {offsets = [0, 64], sizes = [4, 32], strides = [1, 1]} : vector<4x128xf32> to vector<4x32xf32>
    %620 = math.tanh %619 : vector<4x32xf32>
    %621 = vector.extract_strided_slice %602 {offsets = [0, 96], sizes = [4, 32], strides = [1, 1]} : vector<4x128xf32> to vector<4x32xf32>
    %cst_180 = arith.constant 5.000000e-01 : f32
    %622 = vector.broadcast %cst_180 : f32 to vector<4x32xf32>
    %623 = arith.mulf %622, %621 : vector<4x32xf32>
    %624 = math.tanh %623 : vector<4x32xf32>
    %cst_181 = arith.constant 1.000000e+00 : f32
    %625 = vector.broadcast %cst_181 : f32 to vector<4x32xf32>
    %626 = arith.addf %624, %625 : vector<4x32xf32>
    %cst_182 = arith.constant 5.000000e-01 : f32
    %627 = vector.broadcast %cst_182 : f32 to vector<4x32xf32>
    %628 = arith.mulf %627, %626 : vector<4x32xf32>
    %629 = arith.mulf %618, %592 : vector<4x32xf32>
    %630 = arith.mulf %610, %620 : vector<4x32xf32>
    %631 = arith.addf %629, %630 : vector<4x32xf32>
    %632 = math.tanh %631 : vector<4x32xf32>
    %633 = arith.mulf %628, %632 : vector<4x32xf32>
    %634 = vector.extract_strided_slice %468 {offsets = [8, 0], sizes = [2, 128], strides = [1, 1]} : vector<20x128xf32> to vector<2x128xf32>
    %635 = vector.extract_strided_slice %473 {offsets = [10, 0], sizes = [2, 128], strides = [1, 1]} : vector<20x128xf32> to vector<2x128xf32>
    %636 = tpu.concatenate %634, %635 in 0 : vector<2x128xf32>, vector<2x128xf32> -> vector<4x128xf32>
    %cst_183 = arith.constant dense<0.000000e+00> : vector<4x256xf32>
    %637 = tpu.matmul %633, %474, %cst_183 {dimension_numbers = #tpu.dot_dimension_numbers<[1], [0], [0], [1], [0, 0, 1, 1], [], []>, precision = #tpu.contract_precision<fp32>} : vector<4x32xf32>, vector<32x256xf32>, vector<4x256xf32> -> vector<4x256xf32>
    %638 = vector.extract_strided_slice %637 {offsets = [0, 0], sizes = [4, 128], strides = [1, 1]} : vector<4x256xf32> to vector<4x128xf32>
    %639 = vector.extract_strided_slice %637 {offsets = [0, 128], sizes = [4, 128], strides = [1, 1]} : vector<4x256xf32> to vector<4x128xf32>
    %640 = arith.select %21, %638, %639 : vector<4x128xi1>, vector<4x128xf32>
    %641 = arith.addf %636, %640 : vector<4x128xf32>
    %642 = vector.extract_strided_slice %641 {offsets = [0, 0], sizes = [4, 32], strides = [1, 1]} : vector<4x128xf32> to vector<4x32xf32>
    %cst_184 = arith.constant 5.000000e-01 : f32
    %643 = vector.broadcast %cst_184 : f32 to vector<4x32xf32>
    %644 = arith.mulf %643, %642 : vector<4x32xf32>
    %645 = math.tanh %644 : vector<4x32xf32>
    %cst_185 = arith.constant 1.000000e+00 : f32
    %646 = vector.broadcast %cst_185 : f32 to vector<4x32xf32>
    %647 = arith.addf %645, %646 : vector<4x32xf32>
    %cst_186 = arith.constant 5.000000e-01 : f32
    %648 = vector.broadcast %cst_186 : f32 to vector<4x32xf32>
    %649 = arith.mulf %648, %647 : vector<4x32xf32>
    %650 = vector.extract_strided_slice %641 {offsets = [0, 32], sizes = [4, 32], strides = [1, 1]} : vector<4x128xf32> to vector<4x32xf32>
    %cst_187 = arith.constant 5.000000e-01 : f32
    %651 = vector.broadcast %cst_187 : f32 to vector<4x32xf32>
    %652 = arith.mulf %651, %650 : vector<4x32xf32>
    %653 = math.tanh %652 : vector<4x32xf32>
    %cst_188 = arith.constant 1.000000e+00 : f32
    %654 = vector.broadcast %cst_188 : f32 to vector<4x32xf32>
    %655 = arith.addf %653, %654 : vector<4x32xf32>
    %cst_189 = arith.constant 5.000000e-01 : f32
    %656 = vector.broadcast %cst_189 : f32 to vector<4x32xf32>
    %657 = arith.mulf %656, %655 : vector<4x32xf32>
    %658 = vector.extract_strided_slice %641 {offsets = [0, 64], sizes = [4, 32], strides = [1, 1]} : vector<4x128xf32> to vector<4x32xf32>
    %659 = math.tanh %658 : vector<4x32xf32>
    %660 = vector.extract_strided_slice %641 {offsets = [0, 96], sizes = [4, 32], strides = [1, 1]} : vector<4x128xf32> to vector<4x32xf32>
    %cst_190 = arith.constant 5.000000e-01 : f32
    %661 = vector.broadcast %cst_190 : f32 to vector<4x32xf32>
    %662 = arith.mulf %661, %660 : vector<4x32xf32>
    %663 = math.tanh %662 : vector<4x32xf32>
    %cst_191 = arith.constant 1.000000e+00 : f32
    %664 = vector.broadcast %cst_191 : f32 to vector<4x32xf32>
    %665 = arith.addf %663, %664 : vector<4x32xf32>
    %cst_192 = arith.constant 5.000000e-01 : f32
    %666 = vector.broadcast %cst_192 : f32 to vector<4x32xf32>
    %667 = arith.mulf %666, %665 : vector<4x32xf32>
    %668 = arith.mulf %657, %631 : vector<4x32xf32>
    %669 = arith.mulf %649, %659 : vector<4x32xf32>
    %670 = arith.addf %668, %669 : vector<4x32xf32>
    %671 = math.tanh %670 : vector<4x32xf32>
    %672 = arith.mulf %667, %671 : vector<4x32xf32>
    %673 = vector.extract_strided_slice %468 {offsets = [10, 0], sizes = [2, 128], strides = [1, 1]} : vector<20x128xf32> to vector<2x128xf32>
    %674 = vector.extract_strided_slice %473 {offsets = [8, 0], sizes = [2, 128], strides = [1, 1]} : vector<20x128xf32> to vector<2x128xf32>
    %675 = tpu.concatenate %673, %674 in 0 : vector<2x128xf32>, vector<2x128xf32> -> vector<4x128xf32>
    %cst_193 = arith.constant dense<0.000000e+00> : vector<4x256xf32>
    %676 = tpu.matmul %672, %474, %cst_193 {dimension_numbers = #tpu.dot_dimension_numbers<[1], [0], [0], [1], [0, 0, 1, 1], [], []>, precision = #tpu.contract_precision<fp32>} : vector<4x32xf32>, vector<32x256xf32>, vector<4x256xf32> -> vector<4x256xf32>
    %677 = vector.extract_strided_slice %676 {offsets = [0, 0], sizes = [4, 128], strides = [1, 1]} : vector<4x256xf32> to vector<4x128xf32>
    %678 = vector.extract_strided_slice %676 {offsets = [0, 128], sizes = [4, 128], strides = [1, 1]} : vector<4x256xf32> to vector<4x128xf32>
    %679 = arith.select %21, %677, %678 : vector<4x128xi1>, vector<4x128xf32>
    %680 = arith.addf %675, %679 : vector<4x128xf32>
    %681 = vector.extract_strided_slice %680 {offsets = [0, 0], sizes = [4, 32], strides = [1, 1]} : vector<4x128xf32> to vector<4x32xf32>
    %cst_194 = arith.constant 5.000000e-01 : f32
    %682 = vector.broadcast %cst_194 : f32 to vector<4x32xf32>
    %683 = arith.mulf %682, %681 : vector<4x32xf32>
    %684 = math.tanh %683 : vector<4x32xf32>
    %cst_195 = arith.constant 1.000000e+00 : f32
    %685 = vector.broadcast %cst_195 : f32 to vector<4x32xf32>
    %686 = arith.addf %684, %685 : vector<4x32xf32>
    %cst_196 = arith.constant 5.000000e-01 : f32
    %687 = vector.broadcast %cst_196 : f32 to vector<4x32xf32>
    %688 = arith.mulf %687, %686 : vector<4x32xf32>
    %689 = vector.extract_strided_slice %680 {offsets = [0, 32], sizes = [4, 32], strides = [1, 1]} : vector<4x128xf32> to vector<4x32xf32>
    %cst_197 = arith.constant 5.000000e-01 : f32
    %690 = vector.broadcast %cst_197 : f32 to vector<4x32xf32>
    %691 = arith.mulf %690, %689 : vector<4x32xf32>
    %692 = math.tanh %691 : vector<4x32xf32>
    %cst_198 = arith.constant 1.000000e+00 : f32
    %693 = vector.broadcast %cst_198 : f32 to vector<4x32xf32>
    %694 = arith.addf %692, %693 : vector<4x32xf32>
    %cst_199 = arith.constant 5.000000e-01 : f32
    %695 = vector.broadcast %cst_199 : f32 to vector<4x32xf32>
    %696 = arith.mulf %695, %694 : vector<4x32xf32>
    %697 = vector.extract_strided_slice %680 {offsets = [0, 64], sizes = [4, 32], strides = [1, 1]} : vector<4x128xf32> to vector<4x32xf32>
    %698 = math.tanh %697 : vector<4x32xf32>
    %699 = vector.extract_strided_slice %680 {offsets = [0, 96], sizes = [4, 32], strides = [1, 1]} : vector<4x128xf32> to vector<4x32xf32>
    %cst_200 = arith.constant 5.000000e-01 : f32
    %700 = vector.broadcast %cst_200 : f32 to vector<4x32xf32>
    %701 = arith.mulf %700, %699 : vector<4x32xf32>
    %702 = math.tanh %701 : vector<4x32xf32>
    %cst_201 = arith.constant 1.000000e+00 : f32
    %703 = vector.broadcast %cst_201 : f32 to vector<4x32xf32>
    %704 = arith.addf %702, %703 : vector<4x32xf32>
    %cst_202 = arith.constant 5.000000e-01 : f32
    %705 = vector.broadcast %cst_202 : f32 to vector<4x32xf32>
    %706 = arith.mulf %705, %704 : vector<4x32xf32>
    %707 = arith.mulf %696, %670 : vector<4x32xf32>
    %708 = arith.mulf %688, %698 : vector<4x32xf32>
    %709 = arith.addf %707, %708 : vector<4x32xf32>
    %710 = math.tanh %709 : vector<4x32xf32>
    %711 = arith.mulf %706, %710 : vector<4x32xf32>
    %712 = vector.extract_strided_slice %468 {offsets = [12, 0], sizes = [2, 128], strides = [1, 1]} : vector<20x128xf32> to vector<2x128xf32>
    %713 = vector.extract_strided_slice %473 {offsets = [6, 0], sizes = [2, 128], strides = [1, 1]} : vector<20x128xf32> to vector<2x128xf32>
    %714 = tpu.concatenate %712, %713 in 0 : vector<2x128xf32>, vector<2x128xf32> -> vector<4x128xf32>
    %cst_203 = arith.constant dense<0.000000e+00> : vector<4x256xf32>
    %715 = tpu.matmul %711, %474, %cst_203 {dimension_numbers = #tpu.dot_dimension_numbers<[1], [0], [0], [1], [0, 0, 1, 1], [], []>, precision = #tpu.contract_precision<fp32>} : vector<4x32xf32>, vector<32x256xf32>, vector<4x256xf32> -> vector<4x256xf32>
    %716 = vector.extract_strided_slice %715 {offsets = [0, 0], sizes = [4, 128], strides = [1, 1]} : vector<4x256xf32> to vector<4x128xf32>
    %717 = vector.extract_strided_slice %715 {offsets = [0, 128], sizes = [4, 128], strides = [1, 1]} : vector<4x256xf32> to vector<4x128xf32>
    %718 = arith.select %21, %716, %717 : vector<4x128xi1>, vector<4x128xf32>
    %719 = arith.addf %714, %718 : vector<4x128xf32>
    %720 = vector.extract_strided_slice %719 {offsets = [0, 0], sizes = [4, 32], strides = [1, 1]} : vector<4x128xf32> to vector<4x32xf32>
    %cst_204 = arith.constant 5.000000e-01 : f32
    %721 = vector.broadcast %cst_204 : f32 to vector<4x32xf32>
    %722 = arith.mulf %721, %720 : vector<4x32xf32>
    %723 = math.tanh %722 : vector<4x32xf32>
    %cst_205 = arith.constant 1.000000e+00 : f32
    %724 = vector.broadcast %cst_205 : f32 to vector<4x32xf32>
    %725 = arith.addf %723, %724 : vector<4x32xf32>
    %cst_206 = arith.constant 5.000000e-01 : f32
    %726 = vector.broadcast %cst_206 : f32 to vector<4x32xf32>
    %727 = arith.mulf %726, %725 : vector<4x32xf32>
    %728 = vector.extract_strided_slice %719 {offsets = [0, 32], sizes = [4, 32], strides = [1, 1]} : vector<4x128xf32> to vector<4x32xf32>
    %cst_207 = arith.constant 5.000000e-01 : f32
    %729 = vector.broadcast %cst_207 : f32 to vector<4x32xf32>
    %730 = arith.mulf %729, %728 : vector<4x32xf32>
    %731 = math.tanh %730 : vector<4x32xf32>
    %cst_208 = arith.constant 1.000000e+00 : f32
    %732 = vector.broadcast %cst_208 : f32 to vector<4x32xf32>
    %733 = arith.addf %731, %732 : vector<4x32xf32>
    %cst_209 = arith.constant 5.000000e-01 : f32
    %734 = vector.broadcast %cst_209 : f32 to vector<4x32xf32>
    %735 = arith.mulf %734, %733 : vector<4x32xf32>
    %736 = vector.extract_strided_slice %719 {offsets = [0, 64], sizes = [4, 32], strides = [1, 1]} : vector<4x128xf32> to vector<4x32xf32>
    %737 = math.tanh %736 : vector<4x32xf32>
    %738 = vector.extract_strided_slice %719 {offsets = [0, 96], sizes = [4, 32], strides = [1, 1]} : vector<4x128xf32> to vector<4x32xf32>
    %cst_210 = arith.constant 5.000000e-01 : f32
    %739 = vector.broadcast %cst_210 : f32 to vector<4x32xf32>
    %740 = arith.mulf %739, %738 : vector<4x32xf32>
    %741 = math.tanh %740 : vector<4x32xf32>
    %cst_211 = arith.constant 1.000000e+00 : f32
    %742 = vector.broadcast %cst_211 : f32 to vector<4x32xf32>
    %743 = arith.addf %741, %742 : vector<4x32xf32>
    %cst_212 = arith.constant 5.000000e-01 : f32
    %744 = vector.broadcast %cst_212 : f32 to vector<4x32xf32>
    %745 = arith.mulf %744, %743 : vector<4x32xf32>
    %746 = arith.mulf %735, %709 : vector<4x32xf32>
    %747 = arith.mulf %727, %737 : vector<4x32xf32>
    %748 = arith.addf %746, %747 : vector<4x32xf32>
    %749 = math.tanh %748 : vector<4x32xf32>
    %750 = arith.mulf %745, %749 : vector<4x32xf32>
    %751 = vector.extract_strided_slice %468 {offsets = [14, 0], sizes = [2, 128], strides = [1, 1]} : vector<20x128xf32> to vector<2x128xf32>
    %752 = vector.extract_strided_slice %473 {offsets = [4, 0], sizes = [2, 128], strides = [1, 1]} : vector<20x128xf32> to vector<2x128xf32>
    %753 = tpu.concatenate %751, %752 in 0 : vector<2x128xf32>, vector<2x128xf32> -> vector<4x128xf32>
    %cst_213 = arith.constant dense<0.000000e+00> : vector<4x256xf32>
    %754 = tpu.matmul %750, %474, %cst_213 {dimension_numbers = #tpu.dot_dimension_numbers<[1], [0], [0], [1], [0, 0, 1, 1], [], []>, precision = #tpu.contract_precision<fp32>} : vector<4x32xf32>, vector<32x256xf32>, vector<4x256xf32> -> vector<4x256xf32>
    %755 = vector.extract_strided_slice %754 {offsets = [0, 0], sizes = [4, 128], strides = [1, 1]} : vector<4x256xf32> to vector<4x128xf32>
    %756 = vector.extract_strided_slice %754 {offsets = [0, 128], sizes = [4, 128], strides = [1, 1]} : vector<4x256xf32> to vector<4x128xf32>
    %757 = arith.select %21, %755, %756 : vector<4x128xi1>, vector<4x128xf32>
    %758 = arith.addf %753, %757 : vector<4x128xf32>
    %759 = vector.extract_strided_slice %758 {offsets = [0, 0], sizes = [4, 32], strides = [1, 1]} : vector<4x128xf32> to vector<4x32xf32>
    %cst_214 = arith.constant 5.000000e-01 : f32
    %760 = vector.broadcast %cst_214 : f32 to vector<4x32xf32>
    %761 = arith.mulf %760, %759 : vector<4x32xf32>
    %762 = math.tanh %761 : vector<4x32xf32>
    %cst_215 = arith.constant 1.000000e+00 : f32
    %763 = vector.broadcast %cst_215 : f32 to vector<4x32xf32>
    %764 = arith.addf %762, %763 : vector<4x32xf32>
    %cst_216 = arith.constant 5.000000e-01 : f32
    %765 = vector.broadcast %cst_216 : f32 to vector<4x32xf32>
    %766 = arith.mulf %765, %764 : vector<4x32xf32>
    %767 = vector.extract_strided_slice %758 {offsets = [0, 32], sizes = [4, 32], strides = [1, 1]} : vector<4x128xf32> to vector<4x32xf32>
    %cst_217 = arith.constant 5.000000e-01 : f32
    %768 = vector.broadcast %cst_217 : f32 to vector<4x32xf32>
    %769 = arith.mulf %768, %767 : vector<4x32xf32>
    %770 = math.tanh %769 : vector<4x32xf32>
    %cst_218 = arith.constant 1.000000e+00 : f32
    %771 = vector.broadcast %cst_218 : f32 to vector<4x32xf32>
    %772 = arith.addf %770, %771 : vector<4x32xf32>
    %cst_219 = arith.constant 5.000000e-01 : f32
    %773 = vector.broadcast %cst_219 : f32 to vector<4x32xf32>
    %774 = arith.mulf %773, %772 : vector<4x32xf32>
    %775 = vector.extract_strided_slice %758 {offsets = [0, 64], sizes = [4, 32], strides = [1, 1]} : vector<4x128xf32> to vector<4x32xf32>
    %776 = math.tanh %775 : vector<4x32xf32>
    %777 = vector.extract_strided_slice %758 {offsets = [0, 96], sizes = [4, 32], strides = [1, 1]} : vector<4x128xf32> to vector<4x32xf32>
    %cst_220 = arith.constant 5.000000e-01 : f32
    %778 = vector.broadcast %cst_220 : f32 to vector<4x32xf32>
    %779 = arith.mulf %778, %777 : vector<4x32xf32>
    %780 = math.tanh %779 : vector<4x32xf32>
    %cst_221 = arith.constant 1.000000e+00 : f32
    %781 = vector.broadcast %cst_221 : f32 to vector<4x32xf32>
    %782 = arith.addf %780, %781 : vector<4x32xf32>
    %cst_222 = arith.constant 5.000000e-01 : f32
    %783 = vector.broadcast %cst_222 : f32 to vector<4x32xf32>
    %784 = arith.mulf %783, %782 : vector<4x32xf32>
    %785 = arith.mulf %774, %748 : vector<4x32xf32>
    %786 = arith.mulf %766, %776 : vector<4x32xf32>
    %787 = arith.addf %785, %786 : vector<4x32xf32>
    %788 = math.tanh %787 : vector<4x32xf32>
    %789 = arith.mulf %784, %788 : vector<4x32xf32>
    %790 = vector.extract_strided_slice %468 {offsets = [16, 0], sizes = [2, 128], strides = [1, 1]} : vector<20x128xf32> to vector<2x128xf32>
    %791 = vector.extract_strided_slice %473 {offsets = [2, 0], sizes = [2, 128], strides = [1, 1]} : vector<20x128xf32> to vector<2x128xf32>
    %792 = tpu.concatenate %790, %791 in 0 : vector<2x128xf32>, vector<2x128xf32> -> vector<4x128xf32>
    %cst_223 = arith.constant dense<0.000000e+00> : vector<4x256xf32>
    %793 = tpu.matmul %789, %474, %cst_223 {dimension_numbers = #tpu.dot_dimension_numbers<[1], [0], [0], [1], [0, 0, 1, 1], [], []>, precision = #tpu.contract_precision<fp32>} : vector<4x32xf32>, vector<32x256xf32>, vector<4x256xf32> -> vector<4x256xf32>
    %794 = vector.extract_strided_slice %793 {offsets = [0, 0], sizes = [4, 128], strides = [1, 1]} : vector<4x256xf32> to vector<4x128xf32>
    %795 = vector.extract_strided_slice %793 {offsets = [0, 128], sizes = [4, 128], strides = [1, 1]} : vector<4x256xf32> to vector<4x128xf32>
    %796 = arith.select %21, %794, %795 : vector<4x128xi1>, vector<4x128xf32>
    %797 = arith.addf %792, %796 : vector<4x128xf32>
    %798 = vector.extract_strided_slice %797 {offsets = [0, 0], sizes = [4, 32], strides = [1, 1]} : vector<4x128xf32> to vector<4x32xf32>
    %cst_224 = arith.constant 5.000000e-01 : f32
    %799 = vector.broadcast %cst_224 : f32 to vector<4x32xf32>
    %800 = arith.mulf %799, %798 : vector<4x32xf32>
    %801 = math.tanh %800 : vector<4x32xf32>
    %cst_225 = arith.constant 1.000000e+00 : f32
    %802 = vector.broadcast %cst_225 : f32 to vector<4x32xf32>
    %803 = arith.addf %801, %802 : vector<4x32xf32>
    %cst_226 = arith.constant 5.000000e-01 : f32
    %804 = vector.broadcast %cst_226 : f32 to vector<4x32xf32>
    %805 = arith.mulf %804, %803 : vector<4x32xf32>
    %806 = vector.extract_strided_slice %797 {offsets = [0, 32], sizes = [4, 32], strides = [1, 1]} : vector<4x128xf32> to vector<4x32xf32>
    %cst_227 = arith.constant 5.000000e-01 : f32
    %807 = vector.broadcast %cst_227 : f32 to vector<4x32xf32>
    %808 = arith.mulf %807, %806 : vector<4x32xf32>
    %809 = math.tanh %808 : vector<4x32xf32>
    %cst_228 = arith.constant 1.000000e+00 : f32
    %810 = vector.broadcast %cst_228 : f32 to vector<4x32xf32>
    %811 = arith.addf %809, %810 : vector<4x32xf32>
    %cst_229 = arith.constant 5.000000e-01 : f32
    %812 = vector.broadcast %cst_229 : f32 to vector<4x32xf32>
    %813 = arith.mulf %812, %811 : vector<4x32xf32>
    %814 = vector.extract_strided_slice %797 {offsets = [0, 64], sizes = [4, 32], strides = [1, 1]} : vector<4x128xf32> to vector<4x32xf32>
    %815 = math.tanh %814 : vector<4x32xf32>
    %816 = vector.extract_strided_slice %797 {offsets = [0, 96], sizes = [4, 32], strides = [1, 1]} : vector<4x128xf32> to vector<4x32xf32>
    %cst_230 = arith.constant 5.000000e-01 : f32
    %817 = vector.broadcast %cst_230 : f32 to vector<4x32xf32>
    %818 = arith.mulf %817, %816 : vector<4x32xf32>
    %819 = math.tanh %818 : vector<4x32xf32>
    %cst_231 = arith.constant 1.000000e+00 : f32
    %820 = vector.broadcast %cst_231 : f32 to vector<4x32xf32>
    %821 = arith.addf %819, %820 : vector<4x32xf32>
    %cst_232 = arith.constant 5.000000e-01 : f32
    %822 = vector.broadcast %cst_232 : f32 to vector<4x32xf32>
    %823 = arith.mulf %822, %821 : vector<4x32xf32>
    %824 = arith.mulf %813, %787 : vector<4x32xf32>
    %825 = arith.mulf %805, %815 : vector<4x32xf32>
    %826 = arith.addf %824, %825 : vector<4x32xf32>
    %827 = math.tanh %826 : vector<4x32xf32>
    %828 = arith.mulf %823, %827 : vector<4x32xf32>
    %829 = vector.extract_strided_slice %468 {offsets = [18, 0], sizes = [2, 128], strides = [1, 1]} : vector<20x128xf32> to vector<2x128xf32>
    %830 = vector.extract_strided_slice %473 {offsets = [0, 0], sizes = [2, 128], strides = [1, 1]} : vector<20x128xf32> to vector<2x128xf32>
    %831 = tpu.concatenate %829, %830 in 0 : vector<2x128xf32>, vector<2x128xf32> -> vector<4x128xf32>
    %cst_233 = arith.constant dense<0.000000e+00> : vector<4x256xf32>
    %832 = tpu.matmul %828, %474, %cst_233 {dimension_numbers = #tpu.dot_dimension_numbers<[1], [0], [0], [1], [0, 0, 1, 1], [], []>, precision = #tpu.contract_precision<fp32>} : vector<4x32xf32>, vector<32x256xf32>, vector<4x256xf32> -> vector<4x256xf32>
    %833 = vector.extract_strided_slice %832 {offsets = [0, 0], sizes = [4, 128], strides = [1, 1]} : vector<4x256xf32> to vector<4x128xf32>
    %834 = vector.extract_strided_slice %832 {offsets = [0, 128], sizes = [4, 128], strides = [1, 1]} : vector<4x256xf32> to vector<4x128xf32>
    %835 = arith.select %21, %833, %834 : vector<4x128xi1>, vector<4x128xf32>
    %836 = arith.addf %831, %835 : vector<4x128xf32>
    %837 = vector.extract_strided_slice %836 {offsets = [0, 0], sizes = [4, 32], strides = [1, 1]} : vector<4x128xf32> to vector<4x32xf32>
    %cst_234 = arith.constant 5.000000e-01 : f32
    %838 = vector.broadcast %cst_234 : f32 to vector<4x32xf32>
    %839 = arith.mulf %838, %837 : vector<4x32xf32>
    %840 = math.tanh %839 : vector<4x32xf32>
    %cst_235 = arith.constant 1.000000e+00 : f32
    %841 = vector.broadcast %cst_235 : f32 to vector<4x32xf32>
    %842 = arith.addf %840, %841 : vector<4x32xf32>
    %cst_236 = arith.constant 5.000000e-01 : f32
    %843 = vector.broadcast %cst_236 : f32 to vector<4x32xf32>
    %844 = arith.mulf %843, %842 : vector<4x32xf32>
    %845 = vector.extract_strided_slice %836 {offsets = [0, 32], sizes = [4, 32], strides = [1, 1]} : vector<4x128xf32> to vector<4x32xf32>
    %cst_237 = arith.constant 5.000000e-01 : f32
    %846 = vector.broadcast %cst_237 : f32 to vector<4x32xf32>
    %847 = arith.mulf %846, %845 : vector<4x32xf32>
    %848 = math.tanh %847 : vector<4x32xf32>
    %cst_238 = arith.constant 1.000000e+00 : f32
    %849 = vector.broadcast %cst_238 : f32 to vector<4x32xf32>
    %850 = arith.addf %848, %849 : vector<4x32xf32>
    %cst_239 = arith.constant 5.000000e-01 : f32
    %851 = vector.broadcast %cst_239 : f32 to vector<4x32xf32>
    %852 = arith.mulf %851, %850 : vector<4x32xf32>
    %853 = vector.extract_strided_slice %836 {offsets = [0, 64], sizes = [4, 32], strides = [1, 1]} : vector<4x128xf32> to vector<4x32xf32>
    %854 = math.tanh %853 : vector<4x32xf32>
    %855 = vector.extract_strided_slice %836 {offsets = [0, 96], sizes = [4, 32], strides = [1, 1]} : vector<4x128xf32> to vector<4x32xf32>
    %cst_240 = arith.constant 5.000000e-01 : f32
    %856 = vector.broadcast %cst_240 : f32 to vector<4x32xf32>
    %857 = arith.mulf %856, %855 : vector<4x32xf32>
    %858 = math.tanh %857 : vector<4x32xf32>
    %cst_241 = arith.constant 1.000000e+00 : f32
    %859 = vector.broadcast %cst_241 : f32 to vector<4x32xf32>
    %860 = arith.addf %858, %859 : vector<4x32xf32>
    %cst_242 = arith.constant 5.000000e-01 : f32
    %861 = vector.broadcast %cst_242 : f32 to vector<4x32xf32>
    %862 = arith.mulf %861, %860 : vector<4x32xf32>
    %863 = arith.mulf %852, %826 : vector<4x32xf32>
    %864 = arith.mulf %844, %854 : vector<4x32xf32>
    %865 = arith.addf %863, %864 : vector<4x32xf32>
    %866 = math.tanh %865 : vector<4x32xf32>
    %867 = arith.mulf %862, %866 : vector<4x32xf32>
    %868 = vector.extract_strided_slice %867 {offsets = [0, 0], sizes = [2, 32], strides = [1, 1]} : vector<4x32xf32> to vector<2x32xf32>
    %869 = tpu.concatenate %868, %516 in 1 : vector<2x32xf32>, vector<2x32xf32> -> vector<2x64xf32>
    %c0_243 = arith.constant 0 : index
    %c0_244 = arith.constant 0 : index
    %870 = vector.load %arg13[%c0_243, %c0_244] : memref<64x10xf32, #tpu.memory_space<vmem>>, vector<64x10xf32>
    %cst_245 = arith.constant dense<0.000000e+00> : vector<2x10xf32>
    %871 = tpu.matmul %869, %870, %cst_245 {dimension_numbers = #tpu.dot_dimension_numbers<[1], [0], [0], [1], [0, 0, 1, 1], [], []>, precision = #tpu.contract_precision<fp32>} : vector<2x64xf32>, vector<64x10xf32>, vector<2x10xf32> -> vector<2x10xf32>
    %c0_246 = arith.constant 0 : index
    %c0_247 = arith.constant 0 : index
    %872 = vector.load %arg14[%c0_246, %c0_247] : memref<1x10xf32, #tpu.memory_space<vmem>>, vector<1x10xf32>
    %873 = vector.broadcast %872 : vector<1x10xf32> to vector<2x10xf32>
    %874 = arith.addf %871, %873 : vector<2x10xf32>
    %c0_248 = arith.constant 0 : index
    %c0_249 = arith.constant 0 : index
    %875 = vector.load %arg15[%c0_248, %c0_249] : memref<2x10xf32, #tpu.memory_space<vmem>>, vector<2x10xf32>
    tpu.vector_store %arg15[%c0_248, %c0_249], %874 {strides = array<i32>} : memref<2x10xf32, #tpu.memory_space<vmem>>, vector<2x10xf32>,
    return
  }
}

</mosaic_0001>

<bundles_post_ra>
// kernel: squeeze.144
= control target key start
LH: loop header
LB: loop body
LE: loop exit
PB: predicated region body
PF: predicated region fallthrough
CT: control target
= control target key end

     0   :  { %s7_s6 = smov 3  ;;  %s21_s9 = smov 3  ;;  %vm4_vm0 = vcmask 56320   ;;  %vm11_vm1 = vcmask 400720   ;;  %vm18_vm2 = vcmask 343320   ;;  %vm25_vm3 = vcmask 285920   ;;  %s106_s0 = inlined_call_operand.vmem [shape: f32[2,1,7,7], index: 0, kind: input, shape index: {}]   ;;  %s107_s1 = inlined_call_operand.vmem [shape: f32[2,1,49], index: 1, kind: output, shape index: {}]  }
   0x1   :  { %v54_v0 = vld [vmem:[%s106_s0 + $0x6] ss:$8 sm:%s7_s6]   ;;  %s66_s10 = smov 42   ;;  %v56_v1 = vld [vmem:[%s106_s0 + $0x4] ss:$8 sm:%s21_s9]   ;;  %s14_s13 = smov 3 }
   0x2   :  { %9 = vrot.lane.b32.xlu0 %v54_v0, %s66_s10  ;;  %s67_s14 = smov 28   ;;  %v55_v2 = vld [vmem:[%s106_s0 + $0x5] ss:$8 sm:%s14_s13]   ;;  %s28_s17 = smov 3  ;;  %vm32_vm4 = vcmask 228520   ;;  %vm39_vm5 = vcmask 171120  }
   0x3   :  { %23 = vrot.lane.b32.xlu1 %v56_v1, %s67_s14  ;;  %v57_v3 = vld [vmem:[%s106_s0 + $0x3] ss:$8 sm:%s28_s17]   ;;  %s35_s20 = smov 3  ;;  %s42_s21 = smov 3  ;;  %vm46_vm6 = vcmask 113720  }
   0x4   :  { %s68_s22 = smov 35   ;;  %v58_v4 = vld [vmem:[%s106_s0 + $0x2] ss:$8 sm:%s35_s20]   ;;  %s2_s25 = smov 3  ;;  %v59_v6 = vld [vmem:[%s106_s0 + $0x1] ss:$8 sm:%s42_s21]  }
   0x5   :  { %s69_s26 = smov 21   ;;  %v3_v5 = vld [vmem:[%s106_s0] ss:$8 sm:%s2_s25]   ;;  %s70_s0 = smov 14  }
   0x6   :  { %16 = vrot.lane.b32.xlu0 %v55_v2, %s68_s22  ;;  %5 = vst.msk [vmem:[#allocation0] sm:$0x3] %vm4_vm0, %v3_v5   ;;  %s71_s2 = smov 7  }
   0x7   :  { %30 = vrot.lane.b32.xlu1 %v57_v3, %s69_s26 }
   0xa   :  { %37 = vrot.lane.b32.xlu0 %v58_v4, %s70_s0 }
   0xb   :  { %44 = vrot.lane.b32.xlu1 %v59_v6, %s71_s2 }
  0x74   :  { %v10_v7 = vpop.permute.xlu0 %9  }
  0x75   :  { %12 = vst.msk [vmem:[#allocation0] sm:$0x3] %vm11_vm1, %v10_v7   ;;  %v24_v8 = vpop.permute.xlu1 %23  }
  0x78   :  { %v17_v9 = vpop.permute.xlu0 %16  }
  0x79   :  { %19 = vst.msk [vmem:[#allocation0] sm:$0x3] %vm18_vm2, %v17_v9   ;;  %v31_v10 = vpop.permute.xlu1 %30  }
  0x7a   :  { %26 = vst.msk [vmem:[#allocation0] sm:$0x3] %vm25_vm3, %v24_v8  }
  0x7b   :  { %33 = vst.msk [vmem:[#allocation0] sm:$0x3] %vm32_vm4, %v31_v10  }
  0x7c   :  { %v38_v11 = vpop.permute.xlu0 %37  }
  0x7d   :  { %40 = vst.msk [vmem:[#allocation0] sm:$0x3] %vm39_vm5, %v38_v11   ;;  %v45_v12 = vpop.permute.xlu1 %44  }
  0x7e   :  { %47 = vst.msk [vmem:[#allocation0] sm:$0x3] %vm46_vm6, %v45_v12  }
  0x85   :  { %v51_v13 = vld [vmem:[#allocation0] sm:$0x3] }
  0x86   :  { %53 = vst [vmem:[%s107_s1] sm:$0x3] %v51_v13 }

// kernel: cnn_bilstm_forward.1
= control target key start
LH: loop header
LB: loop body
LE: loop exit
PB: predicated region body
PF: predicated region fallthrough
CT: control target
= control target key end

     0   :  { %v24878_v3 = vmov 0.0|0.0   ;;  %vm21589_vm0 = vmmov 0   ;;  %v24876_v13 = vmov 0.0   ;;  %vm63_vm1 = vcmask 588800   ;;  %s24854_s0 = inlined_call_operand.vmem [shape: f32[4,72,49], index: 0, kind: input, shape index: {}]   ;;  %s24855_s1 = inlined_call_operand.vmem [shape: f32[20,72], index: 1, kind: input, shape index: {}]   ;;  %s24856_s2 = inlined_call_operand.vmem [shape: f32[20,1], index: 2, kind: input, shape index: {}]   ;;  %s24857_s3 = inlined_call_operand.vmem [shape: f32[49,128], index: 3, kind: input, shape index: {}]   ;;  %s24858_s4 = inlined_call_operand.vmem [shape: f32[1,128], index: 4, kind: input, shape index: {}]   ;;  %s24859_s5 = inlined_call_operand.vmem [shape: f32[49,128], index: 5, kind: input, shape index: {}]   ;;  %s24860_s6 = inlined_call_operand.vmem [shape: f32[1,128], index: 6, kind: input, shape index: {}]   ;;  %s24861_s7 = inlined_call_operand.vmem [shape: f32[32,256], index: 7, kind: input, shape index: {}]   ;;  %s24862_s8 = inlined_call_operand.vmem [shape: f32[64,128], index: 8, kind: input, shape index: {}]   ;;  %s24863_s9 = inlined_call_operand.vmem [shape: f32[1,128], index: 9, kind: input, shape index: {}]   ;;  %s24864_s10 = inlined_call_operand.vmem [shape: f32[64,128], index: 10, kind: input, shape index: {}]   ;;  %s24865_s11 = inlined_call_operand.vmem [shape: f32[1,128], index: 11, kind: input, shape index: {}]   ;;  %s24866_s12 = inlined_call_operand.vmem [shape: f32[32,256], index: 12, kind: input, shape index: {}]   ;;  %s24867_s13 = inlined_call_operand.vmem [shape: f32[64,10], index: 13, kind: input, shape index: {}]   ;;  %s24868_s14 = inlined_call_operand.vmem [shape: f32[1,10], index: 14, kind: input, shape index: {}]   ;;  %s24869_s15 = inlined_call_operand.hbm [shape: f32[2,10], index: 15, kind: output, shape index: {}]  }
   0x1   :  { %v54_v0 = vld [vmem:[%s24854_s0] sm:$0xff]  ;;  %v55_v1 = vld [vmem:[%s24854_s0 + $0x8] sm:$0xff]  ;;  %v56_v2 = vld [vmem:[%s24854_s0 + $0x10] sm:$0xff]  ;;  %19406 = vmatprep.subr.bf16.mxu1 %v24878_v3  ;;  %19430 = vmatprep.subr.bf16.mxu0 %v24878_v3 }
   0x2   :  { %v74_v4 = vand.u32 4294901760, %v54_v0  ;;  %v77_v5 = vand.u32 4294901760, %v55_v1  ;;  %v57_v6 = vld [vmem:[%s24854_s0 + $0x18] sm:$0xff]  ;;  %v80_v7 = vand.u32 4294901760, %v56_v2  ;;  %v58_v8 = vld [vmem:[%s24854_s0 + $0x20] sm:$0xff]  ;;  %v59_v9 = vld [vmem:[%s24854_s0 + $0x28] sm:$0xff]  ;;  %18086 = vmatprep.mubr.msk.f32.mxu1 %vm21589_vm0, %v24876_v13  ;;  %18140 = vmatprep.mubr.msk.f32.mxu0 %vm21589_vm0, %v24876_v13 }
   0x3   :  { %v83_v10 = vand.u32 4294901760, %v57_v6  ;;  %v86_v11 = vand.u32 4294901760, %v58_v8  ;;  %v89_v12 = vand.u32 4294901760, %v59_v9  ;;  %v60_v18 = vld [vmem:[%s24854_s0 + $0x30] sm:$0xff]  ;;  %v61_v19 = vld [vmem:[%s24854_s0 + $0x38] sm:$0xff]  ;;  %v51_v25 = vld [vmem:[%s24855_s1] sm:$0xff] }
   0x4   :  { %v21699_v14 = vpack.c.bf16 %v77_v5, %v74_v4  ;;  %v21701_v15 = vsub.f32 %v54_v0, %v74_v4  ;;  %v21703_v16 = vsub.f32 %v55_v1, %v77_v5  ;;  %v21705_v17 = vsub.f32 %v56_v2, %v80_v7  ;;  %v62_v33 = vld [vmem:[%s24854_s0 + $0x40] sm:$0xff]  ;;  %v52_v37 = vld [vmem:[%s24855_s1 + $0x8] sm:$0xff] }
   0x5   :  { %v21713_v20 = vsub.f32 %v57_v6, %v83_v10  ;;  %v21720_v24 = vpack.c.bf16 %v83_v10, %v80_v7  ;;  %v92_v26 = vand.u32 4294901760, %v60_v18  ;;  %v95_v27 = vand.u32 4294901760, %v61_v19 }
   0x6   :  { %19408 = vmatpush3.bf16.msra.mxu1 %v21699_v14  ;;  %v180_v21 = vand.u32 4294901760, %v21701_v15  ;;  %v187_v22 = vand.u32 4294901760, %v21703_v16  ;;  %v19431_v23 = vpack.c.bf16 %v21703_v16, %v21701_v15  ;;  %v21728_v29 = vsub.f32 %v58_v8, %v86_v11 }
   0x7   :  { %19409 = vmatprep.subr.bf16.mxu1 %v24878_v3  ;;  %v19434_v28 = vpack.c.bf16 %v21713_v20, %v21705_v17  ;;  %v21730_v30 = vsub.f32 %v59_v9, %v89_v12  ;;  %v65_v31 = vsel %vm63_vm1, %v51_v25, 0  ;;  %v21735_v32 = vpack.c.bf16 %v89_v12, %v86_v11 }
   0x8   :  { %19432 = vmatpush3.bf16.msra.mxu0 %v19431_v23  ;;  %v21740_v34 = vand.u32 4294901760, %v65_v31  ;;  %v181_v35 = vsub.f32 %v21701_v15, %v180_v21  ;;  %v188_v36 = vsub.f32 %v21703_v16, %v187_v22  ;;  %v21752_v38 = vsub.f32 %v60_v18, %v92_v26 }
   0x9   :  { %19433 = vmatprep.subr.bf16.mxu0 %v24878_v3  ;;  %v21754_v39 = vsub.f32 %v61_v19, %v95_v27 }
   0xa   :  { %19411 = vmatpush3.bf16.msra.mxu1 %v21720_v24 }
   0xb   :  { %19412 = vmatprep.subr.bf16.mxu1 %v24878_v3 }
   0xc   :  { %20 = vsyncpa [#allocation3], 0  ;;  %19435 = vmatpush3.bf16.msra.mxu0 %v19434_v28  ;;  %v19437_v40 = vpack.c.bf16 %v21730_v30, %v21728_v29  ;;  %v21759_v41 = vsub.f32 %v65_v31, %v21740_v34  ;;  %v194_v42 = vand.u32 4294901760, %v21705_v17  ;;  %v201_v43 = vand.u32 4294901760, %v21713_v20  ;;  %v53_v51 = vld [vmem:[%s24855_s1 + $0x10] sm:$0xf] }
   0xd   :  { %19436 = vmatprep.subr.bf16.mxu0 %v24878_v3  ;;  %v21764_v44 = vpack.c.bf16 %v95_v27, %v92_v26  ;;  %v21766_v45 = vand.u32 4294901760, %v62_v33  ;;  %v68_v46 = vsel %vm63_vm1, %v52_v37, 0  ;;  %v182_v48 = vand.u32 4294901760, %v181_v35  ;;  %v17443_v37 = vld [vmem:[%s24854_s0 + $0x50] sm:$0xff]  ;;  %v17448_v15 = vld [vmem:[%s24854_s0 + $0x78] sm:$0xff]  ;;  %v17449_v16 = vld [vmem:[%s24854_s0 + $0x80] sm:$0xff] }
   0xe   :  { %19414 = vmatpush3.bf16.msra.mxu1 %v21735_v32  ;;  %v21771_v47 = vand.u32 4294901760, %v21759_v41  ;;  %v189_v49 = vand.u32 4294901760, %v188_v36  ;;  %v21773_v50 = vand.u32 4294901760, %v68_v46  ;;  %v19440_v52 = vpack.c.bf16 %v21754_v39, %v21752_v38  ;;  %v17442_v36 = vld [vmem:[%s24854_s0 + $0x48] sm:$0xff]  ;;  %s21594_s26 = smov [#allocation2]  }
   0xf   :  { %19415 = vmatprep.subr.bf16.mxu1 %v24878_v3  ;;  %v208_v53 = vand.u32 4294901760, %v21728_v29  ;;  %v215_v54 = vand.u32 4294901760, %v21730_v30  ;;  %v195_v56 = vsub.f32 %v21705_v17, %v194_v42  ;;  %v202_v57 = vsub.f32 %v21713_v20, %v201_v43  ;;  %s17434_s1 = sshll.u32 %s21594_s26, 4  ;;  %s17435_s1 = int_to_ptr.vmem [resolvable:$true] %s17434_s1 }
  0x10   :  { %19438 = vmatpush3.bf16.msra.mxu0 %v19437_v40  ;;  %v150_v55 = vsub.f32 %v21759_v41, %v21771_v47  ;;  %v21792_v58 = vsub.f32 %v68_v46, %v21773_v50  ;;  %v71_v59 = vsel %vm63_vm1, %v53_v51, 0  ;;  %v19419_v60 = vpack.c.bf16 %v189_v49, %v182_v48  ;;  %v17444_v51 = vld [vmem:[%s24854_s0 + $0x58] sm:$0xff]  ;;  %s21564_s27 = scalar_lea.vmem %s17435_s1, 32  ;;  %p21569_p1 = scmp.lt.s32.totalorder %s17435_s1, %s17435_s1 }
  0x11   :  { %19439 = vmatprep.subr.bf16.mxu0 %v24878_v3  ;;  %v21798_v61 = vsub.f32 %v62_v33, %v21766_v45  ;;  %v209_v0 = vsub.f32 %v21728_v29, %v208_v53  ;;  %v216_v1 = vsub.f32 %v21730_v30, %v215_v54  ;;  %v21812_v2 = vand.u32 4294901760, %v71_v59  ;;  %v17450_v29 = vld [vmem:[%s24854_s0 + $0x88] sm:$0xff]  ;;  %p21565_p0 = scmp.ne.s32.totalorder %s17435_s1, %s21564_s27  ;;  %p21570_p2 = scmp.lt.s32.totalorder %s21564_s27, %s21564_s27 }
  0x12   :  { %19417 = vmatpush3.bf16.msra.mxu1 %v21764_v44  ;;  %v21801_v62 = vand.u32 4294901760, %v21792_v58  ;;  %v21804_v63 = vand.u32 4294901760, %v150_v55  ;;  %v196_v4 = vand.u32 4294901760, %v195_v56  ;;  %v203_v5 = vand.u32 4294901760, %v202_v57 }
  0x13   :  { %18084 = vmatprep.subr.mxu1 %v24876_v13  ;;  %v222_v6 = vand.u32 4294901760, %v21752_v38  ;;  %v229_v7 = vand.u32 4294901760, %v21754_v39  ;;  %v21820_v9 = vsub.f32 %v71_v59, %v21812_v2  ;;  %v210_v10 = vand.u32 4294901760, %v209_v0  ;;  %v17447_v0 = vld [vmem:[%s24854_s0 + $0x70] sm:$0xff]  ;;  %p21571_p3 = por %p21570_p2, %p21569_p1 }
  0x14   :  { %19441 = vmatpush3.bf16.msra.mxu0 %v19440_v52  ;;  %v160_v8 = vsub.f32 %v21792_v58, %v21801_v62  ;;  %v19422_v12 = vpack.c.bf16 %v203_v5, %v196_v4  ;;  %v217_v18 = vand.u32 4294901760, %v216_v1  ;;  %v236_v27 = vand.u32 4294901760, %v21798_v61  ;;  %v17445_v52 = vld [vmem:[%s24854_s0 + $0x60] sm:$0xff] }
  0x15   :  { %18138 = vmatprep.subr.mxu0 %v24876_v13  ;;  %v21826_v11 = vand.u32 4294901760, %v21820_v9  ;;  %v223_v19 = vsub.f32 %v21752_v38, %v222_v6  ;;  %v230_v23 = vsub.f32 %v21754_v39, %v229_v7  ;;  %v720_v48 = vand.u32 4294901760, %v17442_v36  ;;  %p21572_p4 = pnand %p21571_p3, %p21565_p0 }
  0x16   :  { %18085 = vmatpush3.msra.mxu1 %v21766_v45  ;;  %v21837_v25 = vand.u32 4294901760, %v160_v8  ;;  %v19425_v28 = vpack.c.bf16 %v217_v18, %v210_v10  ;;  %v237_v46 = vsub.f32 %v21798_v61, %v236_v27  ;;  %v723_v49 = vand.u32 4294901760, %v17443_v37 }
  0x17   :  { %19418 = vmatprep.subr.bf16.mxu1 %v24878_v3  ;;  %18087 = vmatmul.mubr.f32.vlgmr.msra.gmra.mrb[0].mxu1 %v21804_v63  ;;  %v170_v26 = vsub.f32 %v21820_v9, %v21826_v11  ;;  %v224_v31 = vand.u32 4294901760, %v223_v19  ;;  %v231_v33 = vand.u32 4294901760, %v230_v23  ;;  %v726_v57 = vand.u32 4294901760, %v17444_v51 }
  0x18   :  { %19420 = vmatpush3.bf16.msra.mxu1 %v19419_v60  ;;  %18139 = vmatpush3.msra.mxu0 %v21798_v61  ;;  %v238_v55 = vand.u32 4294901760, %v237_v46  ;;  %v21886_v56 = vpack.c.bf16 %v723_v49, %v720_v48  ;;  %v729_v59 = vand.u32 4294901760, %v17445_v52  ;;  %v17446_v60 = vld [vmem:[%s24854_s0 + $0x68] sm:$0xff]  ;;  %v21895_v1 = vsub.f32 %v17442_v36, %v720_v48 }
  0x19   :  { %19442 = vmatprep.subr.bf16.mxu0 %v24878_v3  ;;  %18141 = vmatmul.mubr.f32.vlgmr.msra.gmra.mrb[0].mxu0 %v21759_v41  ;;  %v21851_v35 = vand.u32 4294901760, %v170_v26  ;;  %v19428_v40 = vpack.c.bf16 %v231_v33, %v224_v31  ;;  %v21897_v4 = vsub.f32 %v17443_v37, %v723_v49  ;;  %v19455_v5 = vpack.c.bf16 %v187_v22, %v180_v21 }
  0x1a   :  { %19444 = vmatpush3.bf16.msra.mxu0 %v21699_v14  ;;  %19421 = vmatprep.subr.bf16.mxu1 %v24878_v3  ;;  %v21907_v8 = vpack.c.bf16 %v729_v59, %v726_v57  ;;  %v732_v10 = vand.u32 4294901760, %v17446_v60  ;;  %v21920_v21 = vsub.f32 %v17444_v51, %v726_v57  ;;  %v21922_v22 = vsub.f32 %v17445_v52, %v729_v59 }
  0x1b   :  { %19445 = vmatprep.subr.bf16.mxu0 %v24878_v3  ;;  %18089 = vmatprep.mubr.msk.f32.mxu1 %vm21589_vm0, %v24876_v13  ;;  %v826_v18 = vand.u32 4294901760, %v21895_v1  ;;  %v833_v19 = vand.u32 4294901760, %v21897_v4  ;;  %v19458_v23 = vpack.c.bf16 %v201_v43, %v194_v42  ;;  %v741_v31 = vand.u32 4294901760, %v17449_v16 }
  0x1c   :  { %19423 = vmatpush3.bf16.msra.mxu1 %v19422_v12  ;;  %18143 = vmatprep.mubr.msk.f32.mxu0 %vm21589_vm0, %v24876_v13  ;;  %v735_v12 = vand.u32 4294901760, %v17447_v0  ;;  %v21938_v33 = vsub.f32 %v17446_v60, %v732_v10  ;;  %v840_v42 = vand.u32 4294901760, %v21920_v21  ;;  %v847_v43 = vand.u32 4294901760, %v21922_v22 }
  0x1d   :  { %19424 = vmatprep.subr.bf16.mxu1 %v24878_v3  ;;  %18090 = vmatmul.mubr.f32.gmra.mrb[2].mxu1 %v21837_v25  ;;  %v827_v17 = vsub.f32 %v21895_v1, %v826_v18  ;;  %v834_v20 = vsub.f32 %v21897_v4, %v833_v19  ;;  %v19461_v37 = vpack.c.bf16 %v215_v54, %v208_v53  ;;  %v21988_v57 = vand.u32 4294901760, %v17450_v29 }
  0x1e   :  { %19447 = vmatpush3.bf16.msra.mxu0 %v21720_v24  ;;  %18092 = vmatprep.mubr.msk.f32.mxu1 %vm21589_vm0, %v24876_v13  ;;  %v21933_v26 = vpack.c.bf16 %v735_v12, %v732_v10  ;;  %v21940_v36 = vsub.f32 %v17447_v0, %v735_v12  ;;  %v21965_v48 = vsub.f32 %v17449_v16, %v741_v31  ;;  %v854_v30 = vand.u32 4294901760, %v21938_v33 }
  0x1f   :  { %19448 = vmatprep.subr.bf16.mxu0 %v24878_v3  ;;  %18144 = vmatmul.mubr.f32.gmra.mrb[2].mxu0 %v21792_v58  ;;  %v828_v54 = vand.u32 4294901760, %v827_v17  ;;  %v835_v49 = vand.u32 4294901760, %v834_v20  ;;  %v841_v51 = vsub.f32 %v21920_v21, %v840_v42  ;;  %v848_v52 = vsub.f32 %v21922_v22, %v847_v43  ;;  %v17452_v20 = vld [vmem:[%s24854_s0 + $0x98] sm:$0xff] }
  0x20   :  { %19426 = vmatpush3.bf16.msra.mxu1 %v19425_v28  ;;  %18146 = vmatprep.mubr.msk.f32.mxu0 %vm21589_vm0, %v24876_v13  ;;  %v738_v28 = vand.u32 4294901760, %v17448_v15  ;;  %v861_v53 = vand.u32 4294901760, %v21940_v36  ;;  %v855_v59 = vsub.f32 %v21938_v33, %v854_v30  ;;  %v875_v38 = vand.u32 4294901760, %v21965_v48 }
  0x21   :  { %19427 = vmatprep.subr.bf16.mxu1 %v24878_v3  ;;  %18093 = vmatmul.mubr.f32.gmra.mrb[4].mxu1 %v21851_v35  ;;  %v19491_v39 = vpack.c.bf16 %v835_v49, %v828_v54  ;;  %v1372_v54 = vand.u32 4294901760, %v17452_v20  ;;  %v19503_v49 = vpack.c.bf16 %v21897_v4, %v21895_v1  ;;  %v19530_v1 = vpack.c.bf16 %v847_v43, %v840_v42  ;;  %v17463_v42 = vld [vmem:[%s24854_s0 + $0xf0] sm:$0xff] }
  0x22   :  { %19450 = vmatpush3.bf16.msra.mxu0 %v21735_v32  ;;  %18113 = vmatprep.mubr.msk.f32.mxu1 %vm21589_vm0, %v24876_v13  ;;  %v21963_v46 = vsub.f32 %v17448_v15, %v738_v28  ;;  %v862_v0 = vsub.f32 %v21940_v36, %v861_v53  ;;  %v856_v15 = vand.u32 4294901760, %v855_v59  ;;  %vm2704_vm2 = vcmask 1040384  }
  0x23   :  { %19451 = vmatprep.subr.bf16.mxu0 %v24878_v3  ;;  %18147 = vmatmul.mubr.f32.gmra.mrb[4].mxu0 %v21820_v9  ;;  %vm2694_vm3 = vcmask 400384   ;;  %vm3953_vm4 = vcmask 1041408   ;;  %vm3955_vm6 = vcmask 261120   ;;  %vm9803_vm7 = vcmask 1043456  }
  0x24   :  { %19429 = vmatpush3.bf16.msra.mxu1 %v19428_v40  ;;  %18167 = vmatprep.mubr.msk.f32.mxu0 %vm21589_vm0, %v24876_v13  ;;  %v21959_v40 = vpack.c.bf16 %v741_v31, %v738_v28  ;;  %v868_v60 = vand.u32 4294901760, %v21963_v46  ;;  %v863_v16 = vand.u32 4294901760, %v862_v0  ;;  %v22082_v0 = vsub.f32 %v17452_v20, %v1372_v54 }
  0x25   :  { %18111 = vmatprep.subr.mxu1 %v24876_v13  ;;  %vm9824_vm8 = vcmask 523264   ;;  %vm17426_vm9 = vcmask 74752  }
  0x26   :  { %19453 = vmatpush3.bf16.msra.mxu0 %v21764_v44  ;;  %v869_v10 = vsub.f32 %v21963_v46, %v868_v60  ;;  %v19497_v28 = vpack.c.bf16 %v863_v16, %v856_v15  ;;  %v19509_v16 = vpack.c.bf16 %v21940_v36, %v21938_v33 }
  0x27   :  { %18165 = vmatprep.subr.mxu0 %v24876_v13 }
  0x28   :  { %18112 = vmatpush3.msra.mxu1 %v238_v55  ;;  %v19464_v55 = vpack.c.bf16 %v229_v7, %v222_v6  ;;  %v842_v6 = vand.u32 4294901760, %v841_v51  ;;  %v849_v7 = vand.u32 4294901760, %v848_v52  ;;  %v870_v31 = vand.u32 4294901760, %v869_v10  ;;  %v17453_v51 = vld [vmem:[%s24854_s0 + $0xa0] sm:$0xff] }
  0x29   :  { %18114 = vmatmul.mubr.f32.vlgmr.msra.gmra.mrb[0].mxu1 %v21740_v34  ;;  %19478 = vmatprep.subr.bf16.mxu1 %v24878_v3 }
  0x2a   :  { %18166 = vmatpush3.msra.mxu0 %v21766_v45  ;;  %19480 = vmatpush3.bf16.msra.mxu1 %v21886_v56  ;;  %v19494_v12 = vpack.c.bf16 %v849_v7, %v842_v6  ;;  %v17456_v6 = vld [vmem:[%s24854_s0 + $0xb8] sm:$0xff] }
  0x2b   :  { %19454 = vmatprep.subr.bf16.mxu0 %v24878_v3  ;;  %18116 = vmatprep.mubr.msk.f32.mxu1 %vm21589_vm0, %v24876_v13  ;;  %v1384_v15 = vand.u32 4294901760, %v17456_v6 }
  0x2c   :  { %18168 = vmatmul.mubr.f32.vlgmr.msra.gmra.mrb[0].mxu0 %v21771_v47  ;;  %19481 = vmatprep.subr.bf16.mxu1 %v24878_v3 }
  0x2d   :  { %19456 = vmatpush3.bf16.msra.mxu0 %v19455_v5  ;;  %18117 = vmatmul.mubr.f32.gmra.mrb[2].mxu1 %v21773_v50  ;;  %v22005_v5 = vsub.f32 %v17450_v29, %v21988_v57 }
  0x2e   :  { %19483 = vmatpush3.bf16.msra.mxu1 %v21907_v8  ;;  %19457 = vmatprep.subr.bf16.mxu0 %v24878_v3 }
  0x2f   :  { %18119 = vmatprep.mubr.msk.f32.mxu1 %vm21589_vm0, %v24876_v13  ;;  %19484 = vmatprep.subr.bf16.mxu1 %v24878_v3  ;;  %v882_v61 = vand.u32 4294901760, %v22005_v5 }
  0x30   :  { %18170 = vmatprep.mubr.msk.f32.mxu0 %vm21589_vm0, %v24876_v13 }
  0x31   :  { %19459 = vmatpush3.bf16.msra.mxu0 %v19458_v23  ;;  %18120 = vmatmul.mubr.f32.gmra.mrb[4].mxu1 %v21812_v2  ;;  %v876_v23 = vsub.f32 %v21965_v48, %v875_v38 }
  0x32   :  { %19486 = vmatpush3.bf16.msra.mxu1 %v21933_v26  ;;  %19460 = vmatprep.subr.bf16.mxu0 %v24878_v3 }
  0x33   :  { %19487 = vmatprep.subr.bf16.mxu1 %v24878_v3  ;;  %18171 = vmatmul.mubr.f32.gmra.mrb[2].mxu0 %v21801_v62  ;;  %v877_v17 = vand.u32 4294901760, %v876_v23  ;;  %v17457_v23 = vld [vmem:[%s24854_s0 + $0xc0] sm:$0xff] }
  0x34   :  { %18173 = vmatprep.mubr.msk.f32.mxu0 %vm21589_vm0, %v24876_v13  ;;  %18248 = vmatprep.mubr.msk.f32.mxu1 %vm21589_vm0, %v24876_v13 }
  0x35   :  { %19462 = vmatpush3.bf16.msra.mxu0 %v19461_v37 }
  0x36   :  { %19489 = vmatpush3.bf16.msra.mxu1 %v21959_v40  ;;  %19463 = vmatprep.subr.bf16.mxu0 %v24878_v3 }
  0x37   :  { %18246 = vmatprep.subr.mxu1 %v24876_v13  ;;  %18174 = vmatmul.mubr.f32.gmra.mrb[4].mxu0 %v21826_v11 }
  0x38   :  { %18194 = vmatprep.mubr.msk.f32.mxu0 %vm21589_vm0, %v24876_v13 }
  0x39   :  { %19465 = vmatpush3.bf16.msra.mxu0 %v19464_v55  ;;  %v1375_v55 = vand.u32 4294901760, %v17453_v51 }
  0x3a   :  { %18247 = vmatpush3.msra.mxu1 %v21988_v57  ;;  %18192 = vmatprep.subr.mxu0 %v24876_v13 }
  0x3b   :  { %19490 = vmatprep.subr.bf16.mxu1 %v24878_v3  ;;  %18249 = vmatmul.mubr.f32.vlgmr.msra.gmra.mrb[6].mxu1 %v21804_v63 }
  0x3c   :  { %19492 = vmatpush3.bf16.msra.mxu1 %v19491_v39  ;;  %18251 = vmatprep.mubr.msk.f32.mxu1 %vm21589_vm0, %v24876_v13  ;;  %v19506_v39 = vpack.c.bf16 %v21922_v22, %v21920_v21  ;;  %v19533_v21 = vpack.c.bf16 %v861_v53, %v854_v30  ;;  %v17464_v30 = vld [vmem:[%s24854_s0 + $0xf8] sm:$0xff]  ;;  %v17465_v53 = vld [vmem:[%s24854_s0 + $0x100] sm:$0xff] }
  0x3d   :  { %18193 = vmatpush3.msra.mxu0 %v236_v27  ;;  %19493 = vmatprep.subr.bf16.mxu1 %v24878_v3  ;;  %v883_v27 = vsub.f32 %v22005_v5, %v882_v61 }
  0x3e   :  { %19466 = vmatprep.subr.bf16.mxu0 %v24878_v3  ;;  %18195 = vmatmul.mubr.f32.vlgmr.msra.gmra.mrb[0].mxu0 %v21740_v34 }
  0x3f   :  { %19468 = vmatpush3.bf16.msra.mxu0 %v21699_v14  ;;  %18197 = vmatprep.mubr.msk.f32.mxu0 %vm21589_vm0, %v24876_v13  ;;  %v19500_v14 = vpack.c.bf16 %v877_v17, %v870_v31  ;;  %v884_v37 = vand.u32 4294901760, %v883_v27 }
  0x40   :  { %19495 = vmatpush3.bf16.msra.mxu1 %v19494_v12  ;;  %19469 = vmatprep.subr.bf16.mxu0 %v24878_v3 }
  0x41   :  { %19496 = vmatprep.subr.bf16.mxu1 %v24878_v3  ;;  %18252 = vmatmul.mubr.f32.gmra.mrb[8].mxu1 %v21837_v25 }
  0x42   :  { %18198 = vmatmul.mubr.f32.gmra.mrb[2].mxu0 %v21773_v50  ;;  %18254 = vmatprep.mubr.msk.f32.mxu1 %vm21589_vm0, %v24876_v13 }
  0x43   :  { %19471 = vmatpush3.bf16.msra.mxu0 %v21720_v24  ;;  %18200 = vmatprep.mubr.msk.f32.mxu0 %vm21589_vm0, %v24876_v13  ;;  %v17451_v24 = vld [vmem:[%s24854_s0 + $0x90] sm:$0xff] }
  0x44   :  { %19498 = vmatpush3.bf16.msra.mxu1 %v19497_v28  ;;  %19472 = vmatprep.subr.bf16.mxu0 %v24878_v3  ;;  %v1369_v29 = vand.u32 4294901760, %v17451_v24  ;;  %v17458_v28 = vld [vmem:[%s24854_s0 + $0xc8] sm:$0xff] }
  0x45   :  { %19499 = vmatprep.subr.bf16.mxu1 %v24878_v3  ;;  %18255 = vmatmul.mubr.f32.gmra.mrb[10].mxu1 %v21851_v35  ;;  %v1390_v20 = vand.u32 4294901760, %v17458_v28 }
  0x46   :  { %18201 = vmatmul.mubr.f32.gmra.mrb[4].mxu0 %v21812_v2  ;;  %18275 = vmatprep.mubr.msk.f32.mxu1 %vm21589_vm0, %v24876_v13  ;;  %v22067_v52 = vpack.c.bf16 %v1372_v54, %v1369_v29  ;;  %v22080_v7 = vsub.f32 %v17451_v24, %v1369_v29  ;;  %v1387_v24 = vand.u32 4294901760, %v17457_v23  ;;  %v19512_v29 = vpack.c.bf16 %v21965_v48, %v21963_v46 }
  0x47   :  { %19474 = vmatpush3.bf16.msra.mxu0 %v21735_v32  ;;  %18221 = vmatprep.mubr.msk.f32.mxu0 %vm21589_vm0, %v24876_v13  ;;  %v17454_v32 = vld [vmem:[%s24854_s0 + $0xa8] sm:$0xff]  ;;  %v2027_v48 = vand.u32 4294901760, %v17463_v42 }
  0x48   :  { %19501 = vmatpush3.bf16.msra.mxu1 %v19500_v14  ;;  %19475 = vmatprep.subr.bf16.mxu0 %v24878_v3  ;;  %v1378_v59 = vand.u32 4294901760, %v17454_v32  ;;  %v24873_v17 = vand.u32 4294901760, %v22080_v7  ;;  %v24872_v14 = vand.u32 4294901760, %v22082_v0 }
  0x49   :  { %18273 = vmatprep.subr.mxu1 %v24876_v13 }
  0x4a   :  { %v22090_v10 = vpack.c.bf16 %v1378_v59, %v1375_v55  ;;  %v22103_v31 = vsub.f32 %v17454_v32, %v1378_v59  ;;  %v1483_v32 = vsub.f32 %v22082_v0, %v24872_v14  ;;  %v22138_v59 = vpack.c.bf16 %v1390_v20, %v1387_v24 }
  0x4b   :  { %19477 = vmatpush3.bf16.msra.mxu0 %v21764_v44  ;;  %v17455_v44 = vld [vmem:[%s24854_s0 + $0xb0] sm:$0xff] }
  0x4c   :  { %18274 = vmatpush3.msra.mxu1 %v884_v37  ;;  %18219 = vmatprep.subr.mxu0 %v24876_v13  ;;  %v1381_v12 = vand.u32 4294901760, %v17455_v44 }
  0x4d   :  { %19502 = vmatprep.subr.bf16.mxu1 %v24878_v3  ;;  %18276 = vmatmul.mubr.f32.vlgmr.msra.gmra.mrb[6].mxu1 %v21740_v34 }
  0x4e   :  { %19504 = vmatpush3.bf16.msra.mxu1 %v19503_v49  ;;  %18278 = vmatprep.mubr.msk.f32.mxu1 %vm21589_vm0, %v24876_v13  ;;  %v22115_v27 = vpack.c.bf16 %v1384_v15, %v1381_v12  ;;  %v22118_v37 = vsub.f32 %v17455_v44, %v1381_v12  ;;  %v22123_v49 = vsub.f32 %v17456_v6, %v1384_v15  ;;  %v17459_v6 = vld [vmem:[%s24854_s0 + $0xd0] sm:$0xff] }
  0x4f   :  { %18220 = vmatpush3.msra.mxu0 %v21766_v45  ;;  %19505 = vmatprep.subr.bf16.mxu1 %v24878_v3  ;;  %v22093_v45 = vsub.f32 %v17453_v51, %v1375_v55  ;;  %v1476_v51 = vsub.f32 %v22080_v7, %v24873_v17  ;;  %v24870_v55 = vand.u32 4294901760, %v22103_v31  ;;  %v22145_v44 = vsub.f32 %v17458_v28, %v1390_v20 }
  0x50   :  { %18222 = vmatmul.mubr.f32.vlgmr.msra.gmra.mrb[0].mxu0 %v21740_v34  ;;  %19550 = vmatprep.subr.bf16.mxu0 %v24878_v3  ;;  %v24874_v15 = vand.u32 4294901760, %v22118_v37  ;;  %v24875_v28 = vand.u32 4294901760, %v22123_v49  ;;  %v19581_v22 = vpack.c.bf16 %v22123_v49, %v22118_v37 }
  0x51   :  { %19552 = vmatpush3.bf16.msra.mxu0 %v22067_v52  ;;  %18224 = vmatprep.mubr.msk.f32.mxu0 %vm21589_vm0, %v24876_v13  ;;  %v24871_v54 = vand.u32 4294901760, %v22093_v45  ;;  %v19578_v4 = vpack.c.bf16 %v22103_v31, %v22093_v45 }
  0x52   :  { %19507 = vmatpush3.bf16.msra.mxu1 %v19506_v39  ;;  %19553 = vmatprep.subr.bf16.mxu0 %v24878_v3  ;;  %v22143_v39 = vsub.f32 %v17457_v23, %v1387_v24  ;;  %v1497_v23 = vsub.f32 %v22103_v31, %v24870_v55  ;;  %v22160_v24 = vand.u32 4294901760, %v17459_v6  ;;  %v1504_v20 = vsub.f32 %v22118_v37, %v24874_v15 }
  0x53   :  { %19508 = vmatprep.subr.bf16.mxu1 %v24878_v3  ;;  %18279 = vmatmul.mubr.f32.gmra.mrb[8].mxu1 %v21773_v50  ;;  %v1490_v12 = vsub.f32 %v22093_v45, %v24871_v54  ;;  %v1511_v17 = vsub.f32 %v22123_v49, %v24875_v28 }
  0x54   :  { %18225 = vmatmul.mubr.f32.gmra.mrb[2].mxu0 %v21773_v50  ;;  %18281 = vmatprep.mubr.msk.f32.mxu1 %vm21589_vm0, %v24876_v13  ;;  %v1498_v14 = vand.u32 4294901760, %v1497_v23  ;;  %v22180_v15 = vsub.f32 %v17459_v6, %v22160_v24 }
  0x55   :  { %19555 = vmatpush3.bf16.msra.mxu0 %v22090_v10  ;;  %18227 = vmatprep.mubr.msk.f32.mxu0 %vm21589_vm0, %v24876_v13  ;;  %v1491_v54 = vand.u32 4294901760, %v1490_v12  ;;  %v1512_v23 = vand.u32 4294901760, %v1511_v17 }
  0x56   :  { %19510 = vmatpush3.bf16.msra.mxu1 %v19509_v16  ;;  %19556 = vmatprep.subr.bf16.mxu0 %v24878_v3  ;;  %v1477_v16 = vand.u32 4294901760, %v1476_v51  ;;  %v1517_v51 = vand.u32 4294901760, %v22143_v39 }
  0x57   :  { %19511 = vmatprep.subr.bf16.mxu1 %v24878_v3  ;;  %18282 = vmatmul.mubr.f32.gmra.mrb[10].mxu1 %v21812_v2 }
  0x58   :  { %18228 = vmatmul.mubr.f32.gmra.mrb[4].mxu0 %v21812_v2  ;;  %18302 = vmatprep.mubr.msk.f32.mxu1 %vm21589_vm0, %v24876_v13  ;;  %v1518_v12 = vsub.f32 %v22143_v39, %v1517_v51 }
  0x59   :  { %19558 = vmatpush3.bf16.msra.mxu0 %v22115_v27  ;;  %18410 = vmatprep.mubr.msk.f32.mxu0 %vm21589_vm0, %v24876_v13 }
  0x5a   :  { %19513 = vmatpush3.bf16.msra.mxu1 %v19512_v29  ;;  %19559 = vmatprep.subr.bf16.mxu0 %v24878_v3  ;;  %v1484_v29 = vand.u32 4294901760, %v1483_v32  ;;  %v1524_v32 = vand.u32 4294901760, %v22145_v44 }
  0x5b   :  { %18300 = vmatprep.subr.mxu1 %v24876_v13 }
  0x5c   :  { %v19563_v55 = vpack.c.bf16 %v1484_v29, %v1477_v16  ;;  %v19566_v16 = vpack.c.bf16 %v1498_v14, %v1491_v54  ;;  %v1505_v29 = vand.u32 4294901760, %v1504_v20  ;;  %v1525_v28 = vsub.f32 %v22145_v44, %v1524_v32 }
  0x5d   :  { %19561 = vmatpush3.bf16.msra.mxu0 %v22138_v59  ;;  %v1519_v14 = vand.u32 4294901760, %v1518_v12  ;;  %v19527_v20 = vpack.c.bf16 %v833_v19, %v826_v18  ;;  %v19536_v18 = vpack.c.bf16 %v875_v38, %v868_v60  ;;  %v19584_v19 = vpack.c.bf16 %v22145_v44, %v22143_v39 }
  0x5e   :  { %18301 = vmatpush3.msra.mxu1 %v22005_v5  ;;  %18408 = vmatprep.subr.mxu0 %v24876_v13  ;;  %v19569_v17 = vpack.c.bf16 %v1512_v23, %v1505_v29  ;;  %v1526_v54 = vand.u32 4294901760, %v1525_v28  ;;  %v24889_v38 = vand.u32 4294901760, %v22080_v7  ;;  %v24890_v5 = vand.u32 4294901760, %v22082_v0 }
  0x5f   :  { %19514 = vmatprep.subr.bf16.mxu1 %v24878_v3  ;;  %18303 = vmatmul.mubr.f32.vlgmr.msra.gmra.mrb[6].mxu1 %v21759_v41  ;;  %v2030_v29 = vand.u32 4294901760, %v17464_v30  ;;  %v2033_v23 = vand.u32 4294901760, %v17465_v53 }
  0x60   :  { %19516 = vmatpush3.bf16.msra.mxu1 %v21886_v56  ;;  %18305 = vmatprep.mubr.msk.f32.mxu1 %vm21589_vm0, %v24876_v13  ;;  %v19572_v6 = vpack.c.bf16 %v1526_v54, %v1519_v14  ;;  %v22358_v14 = vsub.f32 %v17463_v42, %v2027_v48 }
  0x61   :  { %18409 = vmatpush3.msra.mxu0 %v22160_v24  ;;  %19517 = vmatprep.subr.bf16.mxu1 %v24878_v3 }
  0x62   :  { %19562 = vmatprep.subr.bf16.mxu0 %v24878_v3  ;;  %18411 = vmatmul.mubr.f32.vlgmr.msra.gmra.mrb[6].mxu0 %v21804_v63 }
  0x63   :  { %19564 = vmatpush3.bf16.msra.mxu0 %v19563_v55  ;;  %18306 = vmatmul.mubr.f32.gmra.mrb[8].mxu1 %v21792_v58  ;;  %v1531_v55 = vand.u32 4294901760, %v22180_v15 }
  0x64   :  { %19519 = vmatpush3.bf16.msra.mxu1 %v21907_v8  ;;  %19565 = vmatprep.subr.bf16.mxu0 %v24878_v3 }
  0x65   :  { %19520 = vmatprep.subr.bf16.mxu1 %v24878_v3  ;;  %18413 = vmatprep.mubr.msk.f32.mxu0 %vm21589_vm0, %v24876_v13  ;;  %v1532_v28 = vsub.f32 %v22180_v15, %v1531_v55 }
  0x66   :  { %18414 = vmatmul.mubr.f32.gmra.mrb[8].mxu0 %v21837_v25  ;;  %18308 = vmatprep.mubr.msk.f32.mxu1 %vm21589_vm0, %v24876_v13 }
  0x67   :  { %19567 = vmatpush3.bf16.msra.mxu0 %v19566_v16  ;;  %18309 = vmatmul.mubr.f32.gmra.mrb[10].mxu1 %v21820_v9  ;;  %v1533_v12 = vand.u32 4294901760, %v1532_v28  ;;  %v19575_v16 = vpack.c.bf16 %v22082_v0, %v22080_v7  ;;  %v17466_v7 = vld [vmem:[%s24854_s0 + $0x108] sm:$0xff]  ;;  %v17467_v0 = vld [vmem:[%s24854_s0 + $0x110] sm:$0xff]  ;;  %v24891_v28 = vand.u32 4294901760, %v22093_v45 }
  0x68   :  { %19522 = vmatpush3.bf16.msra.mxu1 %v21933_v26  ;;  %19568 = vmatprep.subr.bf16.mxu0 %v24878_v3 }
  0x69   :  { %19523 = vmatprep.subr.bf16.mxu1 %v24878_v3  ;;  %18416 = vmatprep.mubr.msk.f32.mxu0 %vm21589_vm0, %v24876_v13 }
  0x6a   :  { %18417 = vmatmul.mubr.f32.gmra.mrb[10].mxu0 %v21851_v35  ;;  %18329 = vmatprep.mubr.msk.f32.mxu1 %vm21589_vm0, %v24876_v13 }
  0x6b   :  { %19570 = vmatpush3.bf16.msra.mxu0 %v19569_v17  ;;  %18437 = vmatprep.mubr.msk.f32.mxu0 %vm21589_vm0, %v24876_v13 }
  0x6c   :  { %19525 = vmatpush3.bf16.msra.mxu1 %v21959_v40  ;;  %19571 = vmatprep.subr.bf16.mxu0 %v24878_v3 }
  0x6d   :  { %18327 = vmatprep.subr.mxu1 %v24876_v13 }
  0x6f   :  { %19573 = vmatpush3.bf16.msra.mxu0 %v19572_v6 }
  0x70   :  { %18328 = vmatpush3.msra.mxu1 %v21988_v57  ;;  %18435 = vmatprep.subr.mxu0 %v24876_v13 }
  0x71   :  { %19526 = vmatprep.subr.bf16.mxu1 %v24878_v3  ;;  %18330 = vmatmul.mubr.f32.vlgmr.msra.gmra.mrb[6].mxu1 %v21771_v47 }
  0x72   :  { %19528 = vmatpush3.bf16.msra.mxu1 %v19527_v20  ;;  %18332 = vmatprep.mubr.msk.f32.mxu1 %vm21589_vm0, %v24876_v13  ;;  %v24892_v20 = vand.u32 4294901760, %v22103_v31 }
  0x73   :  { %18436 = vmatpush3.msra.mxu0 %v1533_v12  ;;  %19529 = vmatprep.subr.bf16.mxu1 %v24878_v3 }
  0x74   :  { %19574 = vmatprep.subr.bf16.mxu0 %v24878_v3  ;;  %18438 = vmatmul.mubr.f32.vlgmr.msra.gmra.mrb[6].mxu0 %v21740_v34  ;;  %v19602_v12 = vpack.c.bf16 %v24892_v20, %v24891_v28 }
  0x75   :  { %19576 = vmatpush3.bf16.msra.mxu0 %v19575_v16  ;;  %18333 = vmatmul.mubr.f32.gmra.mrb[8].mxu1 %v21801_v62  ;;  %v22369_v16 = vpack.c.bf16 %v2033_v23, %v2030_v29 }
  0x76   :  { %19531 = vmatpush3.bf16.msra.mxu1 %v19530_v1  ;;  %19577 = vmatprep.subr.bf16.mxu0 %v24878_v3  ;;  %v2036_v1 = vand.u32 4294901760, %v17466_v7 }
  0x77   :  { %19532 = vmatprep.subr.bf16.mxu1 %v24878_v3  ;;  %18440 = vmatprep.mubr.msk.f32.mxu0 %vm21589_vm0, %v24876_v13 }
  0x78   :  { %18441 = vmatmul.mubr.f32.gmra.mrb[8].mxu0 %v21773_v50  ;;  %18335 = vmatprep.mubr.msk.f32.mxu1 %vm21589_vm0, %v24876_v13 }
  0x79   :  { %19579 = vmatpush3.bf16.msra.mxu0 %v19578_v4  ;;  %18336 = vmatmul.mubr.f32.gmra.mrb[10].mxu1 %v21826_v11  ;;  %v2039_v4 = vand.u32 4294901760, %v17467_v0 }
  0x7a   :  { %19534 = vmatpush3.bf16.msra.mxu1 %v19533_v21  ;;  %19580 = vmatprep.subr.bf16.mxu0 %v24878_v3  ;;  %v22374_v21 = vsub.f32 %v17464_v30, %v2030_v29 }
  0x7b   :  { %19535 = vmatprep.subr.bf16.mxu1 %v24878_v3  ;;  %18443 = vmatprep.mubr.msk.f32.mxu0 %vm21589_vm0, %v24876_v13  ;;  %v22401_v42 = vsub.f32 %v17467_v0, %v2039_v4 }
  0x7c   :  { %18444 = vmatmul.mubr.f32.gmra.mrb[10].mxu0 %v21812_v2  ;;  %18356 = vmatprep.mubr.msk.f32.mxu1 %vm21589_vm0, %v24876_v13 }
  0x7d   :  { %19582 = vmatpush3.bf16.msra.mxu0 %v19581_v22  ;;  %18464 = vmatprep.mubr.msk.f32.mxu0 %vm21589_vm0, %v24876_v13  ;;  %v22377_v22 = vsub.f32 %v17465_v53, %v2033_v23  ;;  %v2173_v39 = vand.u32 4294901760, %v22401_v42 }
  0x7e   :  { %19537 = vmatpush3.bf16.msra.mxu1 %v19536_v18  ;;  %19583 = vmatprep.subr.bf16.mxu0 %v24878_v3 }
  0x7f   :  { %18354 = vmatprep.subr.mxu1 %v24876_v13 }
  0x81   :  { %19585 = vmatpush3.bf16.msra.mxu0 %v19584_v19  ;;  %v2145_v19 = vand.u32 4294901760, %v22358_v14 }
  0x82   :  { %18355 = vmatpush3.msra.mxu1 %v882_v61  ;;  %18462 = vmatprep.subr.mxu0 %v24876_v13  ;;  %v19599_v61 = vpack.c.bf16 %v24890_v5, %v24889_v38  ;;  %v2159_v38 = vand.u32 4294901760, %v22377_v22  ;;  %v19608_v5 = vpack.c.bf16 %v1524_v32, %v1517_v51 }
  0x83   :  { %19538 = vmatprep.subr.bf16.mxu1 %v24878_v3  ;;  %18357 = vmatmul.mubr.f32.vlgmr.msra.gmra.mrb[6].mxu1 %v21740_v34  ;;  %v2146_v53 = vsub.f32 %v22358_v14, %v2145_v19 }
  0x84   :  { %19540 = vmatpush3.bf16.msra.mxu1 %v21886_v56  ;;  %18359 = vmatprep.mubr.msk.f32.mxu1 %vm21589_vm0, %v24876_v13  ;;  %v17460_v56 = vld [vmem:[%s24854_s0 + $0xd8] sm:$0xff] }
  0x85   :  { %18463 = vmatpush3.msra.mxu0 %v22180_v15  ;;  %19541 = vmatprep.subr.bf16.mxu1 %v24878_v3  ;;  %v2018_v33 = vand.u32 4294901760, %v17460_v56  ;;  %v2147_v32 = vand.u32 4294901760, %v2146_v53 }
  0x86   :  { %19586 = vmatprep.subr.bf16.mxu0 %v24878_v3  ;;  %18465 = vmatmul.mubr.f32.vlgmr.msra.gmra.mrb[6].mxu0 %v21759_v41 }
  0x87   :  { %19588 = vmatpush3.bf16.msra.mxu0 %v22067_v52  ;;  %18360 = vmatmul.mubr.f32.gmra.mrb[8].mxu1 %v21773_v50 }
  0x88   :  { %19543 = vmatpush3.bf16.msra.mxu1 %v21907_v8  ;;  %19589 = vmatprep.subr.bf16.mxu0 %v24878_v3  ;;  %v17461_v8 = vld [vmem:[%s24854_s0 + $0xe0] sm:$0xff] }
  0x89   :  { %19544 = vmatprep.subr.bf16.mxu1 %v24878_v3  ;;  %18467 = vmatprep.mubr.msk.f32.mxu0 %vm21589_vm0, %v24876_v13  ;;  %v2021_v36 = vand.u32 4294901760, %v17461_v8 }
  0x8a   :  { %18362 = vmatprep.mubr.msk.f32.mxu1 %vm21589_vm0, %v24876_v13  ;;  %18468 = vmatmul.mubr.f32.gmra.mrb[8].mxu0 %v21792_v58 }
  0x8b   :  { %19591 = vmatpush3.bf16.msra.mxu0 %v22090_v10  ;;  %18363 = vmatmul.mubr.f32.gmra.mrb[10].mxu1 %v21812_v2  ;;  %v22320_v43 = vpack.c.bf16 %v2021_v36, %v2018_v33  ;;  %v22333_v60 = vsub.f32 %v17461_v8, %v2021_v36  ;;  %v24894_v8 = vand.u32 4294901760, %v22123_v49  ;;  %v22395_v36 = vpack.c.bf16 %v2039_v4, %v2036_v1 }
  0x8c   :  { %19546 = vmatpush3.bf16.msra.mxu1 %v21933_v26  ;;  %19592 = vmatprep.subr.bf16.mxu0 %v24878_v3  ;;  %v17462_v26 = vld [vmem:[%s24854_s0 + $0xe8] sm:$0xff]  ;;  %v2174_v4 = vsub.f32 %v22401_v42, %v2173_v39 }
  0x8d   :  { %19547 = vmatprep.subr.bf16.mxu1 %v24878_v3  ;;  %18470 = vmatprep.mubr.msk.f32.mxu0 %vm21589_vm0, %v24876_v13  ;;  %v2024_v46 = vand.u32 4294901760, %v17462_v26  ;;  %v2131_v6 = vand.u32 4294901760, %v22333_v60 }
  0x8e   :  { %18383 = vmatprep.mubr.msk.f32.mxu1 %vm21589_vm0, %v24876_v13  ;;  %18471 = vmatmul.mubr.f32.gmra.mrb[10].mxu0 %v21820_v9 }
  0x8f   :  { %19594 = vmatpush3.bf16.msra.mxu0 %v22115_v27  ;;  %18491 = vmatprep.mubr.msk.f32.mxu0 %vm21589_vm0, %v24876_v13  ;;  %v22348_v17 = vsub.f32 %v17462_v26, %v2024_v46  ;;  %v2132_v18 = vsub.f32 %v22333_v60, %v2131_v6  ;;  %v22399_v26 = vsub.f32 %v17466_v7, %v2036_v1 }
  0x90   :  { %19549 = vmatpush3.bf16.msra.mxu1 %v21959_v40  ;;  %19595 = vmatprep.subr.bf16.mxu0 %v24878_v3  ;;  %v22331_v40 = vsub.f32 %v17460_v56, %v2018_v33  ;;  %v24893_v56 = vand.u32 4294901760, %v22118_v37  ;;  %v17468_v37 = vld [vmem:[%s24854_s0 + $0x118] sm:$0xff]  ;;  %v2160_v7 = vsub.f32 %v22377_v22, %v2159_v38 }
  0x91   :  { %18381 = vmatprep.subr.mxu1 %v24876_v13  ;;  %v2138_v45 = vand.u32 4294901760, %v22348_v17  ;;  %v2133_v30 = vand.u32 4294901760, %v2132_v18  ;;  %v2166_v23 = vand.u32 4294901760, %v22399_v26  ;;  %v2175_v18 = vand.u32 4294901760, %v2174_v4  ;;  %v2685_v4 = vld [vmem:[%s24857_s3 + $0x28] sm:$0xff] }
  0x92   :  { %v2124_v54 = vand.u32 4294901760, %v22331_v40  ;;  %v19605_v33 = vpack.c.bf16 %v24894_v8, %v24893_v56  ;;  %v2161_v1 = vand.u32 4294901760, %v2160_v7  ;;  %v21591_v56 = vmov 0   ;;  %v2657_v8 = vld [vmem:[%s24856_s2 + $0x8] sm:$0xff] }
  0x93   :  { %19597 = vmatpush3.bf16.msra.mxu0 %v22138_v59  ;;  %v2139_v49 = vsub.f32 %v22348_v17, %v2138_v45  ;;  %v2167_v28 = vsub.f32 %v22399_v26, %v2166_v23  ;;  %21442 = vset.pattern.permute.xlu0 %v21591_v56 }
  0x94   :  { %18382 = vmatpush3.msra.mxu1 %v21988_v57  ;;  %18489 = vmatprep.subr.mxu0 %v24876_v13  ;;  %v22344_v57 = vpack.c.bf16 %v2027_v48, %v2024_v46  ;;  %v2125_v31 = vsub.f32 %v22331_v40, %v2124_v54  ;;  %v2152_v46 = vand.u32 4294901760, %v22374_v21 }
  0x95   :  { %18384 = vmatmul.mubr.f32.vlgmr.msra.gmra.mrb[6].mxu1 %v21740_v34  ;;  %19622 = vmatprep.subr.bf16.mxu1 %v24878_v3  ;;  %v2140_v51 = vand.u32 4294901760, %v2139_v49 }
  0x96   :  { %19624 = vmatpush3.bf16.msra.mxu1 %v22320_v43  ;;  %18386 = vmatprep.mubr.msk.f32.mxu1 %vm21589_vm0, %v24876_v13  ;;  %v2126_v48 = vand.u32 4294901760, %v2125_v31  ;;  %v2153_v29 = vsub.f32 %v22374_v21, %v2152_v46  ;;  %v2168_v31 = vand.u32 4294901760, %v2167_v28 }
  0x97   :  { %18490 = vmatpush3.msra.mxu0 %v22160_v24  ;;  %19625 = vmatprep.subr.bf16.mxu1 %v24878_v3  ;;  %v19638_v20 = vpack.c.bf16 %v2147_v32, %v2140_v51 }
  0x98   :  { %19598 = vmatprep.subr.bf16.mxu0 %v24878_v3  ;;  %18492 = vmatmul.mubr.f32.vlgmr.msra.gmra.mrb[6].mxu0 %v21771_v47  ;;  %v19635_v44 = vpack.c.bf16 %v2133_v30, %v2126_v48 }
  0x99   :  { %19600 = vmatpush3.bf16.msra.mxu0 %v19599_v61  ;;  %18387 = vmatmul.mubr.f32.gmra.mrb[8].mxu1 %v21773_v50  ;;  %v22424_v61 = vand.u32 4294901760, %v17468_v37 }
  0x9a   :  { %19627 = vmatpush3.bf16.msra.mxu1 %v22344_v57  ;;  %19601 = vmatprep.subr.bf16.mxu0 %v24878_v3 }
  0x9b   :  { %18389 = vmatprep.mubr.msk.f32.mxu1 %vm21589_vm0, %v24876_v13  ;;  %19628 = vmatprep.subr.bf16.mxu1 %v24878_v3  ;;  %v22441_v0 = vsub.f32 %v17468_v37, %v22424_v61 }
  0x9c   :  { %18494 = vmatprep.mubr.msk.f32.mxu0 %vm21589_vm0, %v24876_v13  ;;  %21443 = vset.pattern.permute.xlu1 %v21591_v56 }
  0x9d   :  { %19603 = vmatpush3.bf16.msra.mxu0 %v19602_v12  ;;  %18390 = vmatmul.mubr.f32.gmra.mrb[10].mxu1 %v21812_v2  ;;  %v2154_v12 = vand.u32 4294901760, %v2153_v29  ;;  %v2180_v15 = vand.u32 4294901760, %v22441_v0 }
  0x9e   :  { %19630 = vmatpush3.bf16.msra.mxu1 %v22369_v16  ;;  %19604 = vmatprep.subr.bf16.mxu0 %v24878_v3 }
  0x9f   :  { %19631 = vmatprep.subr.bf16.mxu1 %v24878_v3  ;;  %18495 = vmatmul.mubr.f32.gmra.mrb[8].mxu0 %v21801_v62 }
  0xa0   :  { %18497 = vmatprep.mubr.msk.f32.mxu0 %vm21589_vm0, %v24876_v13  ;;  %18572 = vmatprep.mubr.msk.f32.mxu1 %vm21589_vm0, %v24876_v13 }
  0xa1   :  { %19606 = vmatpush3.bf16.msra.mxu0 %v19605_v33  ;;  %v19650_v33 = vpack.c.bf16 %v22358_v14, %v22348_v17  ;;  %v2681_v17 = vld [vmem:[%s24857_s3 + $0x8] sm:$0xff] }
  0xa2   :  { %19633 = vmatpush3.bf16.msra.mxu1 %v22395_v36  ;;  %19607 = vmatprep.subr.bf16.mxu0 %v24878_v3 }
  0xa3   :  { %18570 = vmatprep.subr.mxu1 %v24876_v13  ;;  %18498 = vmatmul.mubr.f32.gmra.mrb[10].mxu0 %v21826_v11 }
  0xa4   :  { %18518 = vmatprep.mubr.msk.f32.mxu0 %vm21589_vm0, %v24876_v13 }
  0xa5   :  { %19609 = vmatpush3.bf16.msra.mxu0 %v19608_v5 }
  0xa6   :  { %18571 = vmatpush3.msra.mxu1 %v22424_v61  ;;  %18516 = vmatprep.subr.mxu0 %v24876_v13 }
  0xa7   :  { %19634 = vmatprep.subr.bf16.mxu1 %v24878_v3  ;;  %18573 = vmatmul.mubr.f32.vlgmr.msra.gmra.mrb[12].mxu1 %v21804_v63  ;;  %v19641_v63 = vpack.c.bf16 %v2161_v1, %v2154_v12  ;;  %v2684_v1 = vld [vmem:[%s24857_s3 + $0x20] sm:$0xff] }
  0xa8   :  { %19636 = vmatpush3.bf16.msra.mxu1 %v19635_v44  ;;  %18575 = vmatprep.mubr.msk.f32.mxu1 %vm21589_vm0, %v24876_v13 }
  0xa9   :  { %18517 = vmatpush3.msra.mxu0 %v1531_v55  ;;  %19637 = vmatprep.subr.bf16.mxu1 %v24878_v3  ;;  %v2181_v55 = vsub.f32 %v22441_v0, %v2180_v15 }
  0xaa   :  { %19610 = vmatprep.subr.bf16.mxu0 %v24878_v3  ;;  %18519 = vmatmul.mubr.f32.vlgmr.msra.gmra.mrb[6].mxu0 %v21740_v34 }
  0xab   :  { %19612 = vmatpush3.bf16.msra.mxu0 %v22067_v52  ;;  %18521 = vmatprep.mubr.msk.f32.mxu0 %vm21589_vm0, %v24876_v13  ;;  %v19644_v52 = vpack.c.bf16 %v2175_v18, %v2168_v31  ;;  %v2724_v31 = vand.u32 4294901760, %v2685_v4 }
  0xac   :  { %19639 = vmatpush3.bf16.msra.mxu1 %v19638_v20  ;;  %19613 = vmatprep.subr.bf16.mxu0 %v24878_v3 }
  0xad   :  { %19640 = vmatprep.subr.bf16.mxu1 %v24878_v3  ;;  %18576 = vmatmul.mubr.f32.gmra.mrb[14].mxu1 %v21837_v25  ;;  %v2656_v25 = vld [vmem:[%s24856_s2] sm:$0xff] }
  0xae   :  { %18522 = vmatmul.mubr.f32.gmra.mrb[8].mxu0 %v21773_v50  ;;  %18578 = vmatprep.mubr.msk.f32.mxu1 %vm21589_vm0, %v24876_v13 }
  0xaf   :  { %19615 = vmatpush3.bf16.msra.mxu0 %v22090_v10  ;;  %18524 = vmatprep.mubr.msk.f32.mxu0 %vm21589_vm0, %v24876_v13  ;;  %v2182_v10 = vand.u32 4294901760, %v2181_v55 }
  0xb0   :  { %19642 = vmatpush3.bf16.msra.mxu1 %v19641_v63  ;;  %19616 = vmatprep.subr.bf16.mxu0 %v24878_v3  ;;  %v2721_v63 = vand.u32 4294901760, %v2684_v1 }
  0xb1   :  { %19643 = vmatprep.subr.bf16.mxu1 %v24878_v3  ;;  %18579 = vmatmul.mubr.f32.gmra.mrb[16].mxu1 %v21851_v35  ;;  %v2658_v35 = vld [vmem:[%s24856_s2 + $0x10] sm:$0xf] }
  0xb2   :  { %18525 = vmatmul.mubr.f32.gmra.mrb[10].mxu0 %v21812_v2  ;;  %18599 = vmatprep.mubr.msk.f32.mxu1 %vm21589_vm0, %v24876_v13  ;;  %v22660_v18 = vsub.f32 %v2684_v1, %v2721_v63 }
  0xb3   :  { %19618 = vmatpush3.bf16.msra.mxu0 %v22115_v27  ;;  %18545 = vmatprep.mubr.msk.f32.mxu0 %vm21589_vm0, %v24876_v13  ;;  %v19647_v27 = vpack.c.bf16 %v22333_v60, %v22331_v40 }
  0xb4   :  { %19645 = vmatpush3.bf16.msra.mxu1 %v19644_v52  ;;  %19619 = vmatprep.subr.bf16.mxu0 %v24878_v3  ;;  %v2841_v52 = vand.u32 4294901760, %v22660_v18 }
  0xb5   :  { %18597 = vmatprep.subr.mxu1 %v24876_v13  ;;  %2661 = vperm.xlu0 %21442, %v2656_v25   ;;  %v2686_v25 = vld [vmem:[%s24857_s3 + $0x30] sm:$0x1] }
  0xb6   :  { %2671 = vperm.xlu1 %21443, %v2658_v35   ;;  %v2842_v35 = vsub.f32 %v22660_v18, %v2841_v52 }
  0xb7   :  { %19621 = vmatpush3.bf16.msra.mxu0 %v22138_v59  ;;  %v19653_v59 = vpack.c.bf16 %v22377_v22, %v22374_v21 }
  0xb8   :  { %18598 = vmatpush3.msra.mxu1 %v2182_v10  ;;  %18543 = vmatprep.subr.mxu0 %v24876_v13  ;;  %v2706_v10 = vsel %vm2704_vm2, %v2686_v25, 0 }
  0xb9   :  { %19646 = vmatprep.subr.bf16.mxu1 %v24878_v3  ;;  %18600 = vmatmul.mubr.f32.vlgmr.msra.gmra.mrb[12].mxu1 %v21740_v34 }
  0xba   :  { %19648 = vmatpush3.bf16.msra.mxu1 %v19647_v27  ;;  %18602 = vmatprep.mubr.msk.f32.mxu1 %vm21589_vm0, %v24876_v13  ;;  %v22672_v27 = vand.u32 4294901760, %v2706_v10 }
  0xbb   :  { %18544 = vmatpush3.msra.mxu0 %v22160_v24  ;;  %19649 = vmatprep.subr.bf16.mxu1 %v24878_v3  ;;  %v19656_v24 = vpack.c.bf16 %v22401_v42, %v22399_v26 }
  0xbc   :  { %18546 = vmatmul.mubr.f32.vlgmr.msra.gmra.mrb[6].mxu0 %v21740_v34  ;;  %2666 = vperm.xlu0 %21442, %v2657_v8   ;;  %v2843_v8 = vand.u32 4294901760, %v2842_v35 }
  0xbd   :  { %18548 = vmatprep.mubr.msk.f32.mxu0 %vm21589_vm0, %v24876_v13  ;;  %18603 = vmatmul.mubr.f32.gmra.mrb[14].mxu1 %v21773_v50 }
  0xbe   :  { %19651 = vmatpush3.bf16.msra.mxu1 %v19650_v33  ;;  %18605 = vmatprep.mubr.msk.f32.mxu1 %vm21589_vm0, %v24876_v13 }
  0xbf   :  { %19652 = vmatprep.subr.bf16.mxu1 %v24878_v3  ;;  %19703 = vmatprep.subr.bf16.mxu0 %v24878_v3 }
  0xc0   :  { %18549 = vmatmul.mubr.f32.gmra.mrb[8].mxu0 %v21773_v50 }
  0xc1   :  { %18551 = vmatprep.mubr.msk.f32.mxu0 %vm21589_vm0, %v24876_v13  ;;  %18606 = vmatmul.mubr.f32.gmra.mrb[16].mxu1 %v21812_v2 }
  0xc2   :  { %19654 = vmatpush3.bf16.msra.mxu1 %v19653_v59  ;;  %18626 = vmatprep.mubr.msk.f32.mxu1 %vm21589_vm0, %v24876_v13  ;;  %v22675_v59 = vsub.f32 %v2706_v10, %v22672_v27 }
  0xc3   :  { %19655 = vmatprep.subr.bf16.mxu1 %v24878_v3 }
  0xc4   :  { %18552 = vmatmul.mubr.f32.gmra.mrb[10].mxu0 %v21812_v2 }
  0xc5   :  { %18753 = vmatprep.mubr.msk.f32.mxu0 %vm21589_vm0, %v24876_v13 }
  0xc6   :  { %19657 = vmatpush3.bf16.msra.mxu1 %v19656_v24 }
  0xc7   :  { %18624 = vmatprep.subr.mxu1 %v24876_v13 }
  0xca   :  { %18625 = vmatpush3.msra.mxu1 %v22441_v0 }
  0xcb   :  { %19658 = vmatprep.subr.bf16.mxu1 %v24878_v3  ;;  %18627 = vmatmul.mubr.f32.vlgmr.msra.gmra.mrb[12].mxu1 %v21759_v41  ;;  %v19671_v41 = vpack.c.bf16 %v2131_v6, %v2124_v54  ;;  %v2712_v54 = vand.u32 4294901760, %v2681_v17 }
  0xcc   :  { %19660 = vmatpush3.bf16.msra.mxu1 %v22320_v43  ;;  %18629 = vmatprep.mubr.msk.f32.mxu1 %vm21589_vm0, %v24876_v13 }
  0xcd   :  { %19661 = vmatprep.subr.bf16.mxu1 %v24878_v3 }
  0xcf   :  { %18630 = vmatmul.mubr.f32.gmra.mrb[14].mxu1 %v21792_v58  ;;  %v19674_v58 = vpack.c.bf16 %v2145_v19, %v2138_v45  ;;  %v22627_v45 = vsub.f32 %v2681_v17, %v2712_v54 }
  0xd0   :  { %19663 = vmatpush3.bf16.msra.mxu1 %v22344_v57  ;;  %18632 = vmatprep.mubr.msk.f32.mxu1 %vm21589_vm0, %v24876_v13 }
  0xd1   :  { %19664 = vmatprep.subr.bf16.mxu1 %v24878_v3  ;;  %v2820_v26 = vand.u32 4294901760, %v22627_v45 }
  0xd3   :  { %18633 = vmatmul.mubr.f32.gmra.mrb[16].mxu1 %v21820_v9  ;;  %v19677_v9 = vpack.c.bf16 %v2159_v38, %v2152_v46  ;;  %v2821_v46 = vsub.f32 %v22627_v45, %v2820_v26 }
  0xd4   :  { %19666 = vmatpush3.bf16.msra.mxu1 %v22369_v16  ;;  %18653 = vmatprep.mubr.msk.f32.mxu1 %vm21589_vm0, %v24876_v13 }
  0xd5   :  { %19667 = vmatprep.subr.bf16.mxu1 %v24878_v3  ;;  %v2822_v38 = vand.u32 4294901760, %v2821_v46 }
  0xd8   :  { %19669 = vmatpush3.bf16.msra.mxu1 %v22395_v36 }
  0xd9   :  { %18651 = vmatprep.subr.mxu1 %v24876_v13 }
  0xdc   :  { %18652 = vmatpush3.msra.mxu1 %v22424_v61 }
  0xdd   :  { %19670 = vmatprep.subr.bf16.mxu1 %v24878_v3  ;;  %18654 = vmatmul.mubr.f32.vlgmr.msra.gmra.mrb[12].mxu1 %v21771_v47  ;;  %v19680_v47 = vpack.c.bf16 %v2173_v39, %v2166_v23 }
  0xde   :  { %19672 = vmatpush3.bf16.msra.mxu1 %v19671_v41  ;;  %18656 = vmatprep.mubr.msk.f32.mxu1 %vm21589_vm0, %v24876_v13 }
  0xdf   :  { %19673 = vmatprep.subr.bf16.mxu1 %v24878_v3 }
  0xe1   :  { %18657 = vmatmul.mubr.f32.gmra.mrb[14].mxu1 %v21801_v62 }
  0xe2   :  { %19675 = vmatpush3.bf16.msra.mxu1 %v19674_v58  ;;  %18659 = vmatprep.mubr.msk.f32.mxu1 %vm21589_vm0, %v24876_v13  ;;  %v2855_v58 = vand.u32 4294901760, %v22675_v59 }
  0xe3   :  { %19676 = vmatprep.subr.bf16.mxu1 %v24878_v3 }
  0xe5   :  { %18660 = vmatmul.mubr.f32.gmra.mrb[16].mxu1 %v21826_v11 }
  0xe6   :  { %19678 = vmatpush3.bf16.msra.mxu1 %v19677_v9  ;;  %18680 = vmatprep.mubr.msk.f32.mxu1 %vm21589_vm0, %v24876_v13  ;;  %v2856_v9 = vsub.f32 %v22675_v59, %v2855_v58 }
  0xe7   :  { %19679 = vmatprep.subr.bf16.mxu1 %v24878_v3 }
  0xea   :  { %19681 = vmatpush3.bf16.msra.mxu1 %v19680_v47 }
  0xeb   :  { %18678 = vmatprep.subr.mxu1 %v24876_v13 }
  0xee   :  { %18679 = vmatpush3.msra.mxu1 %v2180_v15  ;;  %v22662_v15 = vsub.f32 %v2685_v4, %v2724_v31  ;;  %v3318_v4 = vld [vmem:[%s24859_s5] sm:$0xff] }
  0xef   :  { %19682 = vmatprep.subr.bf16.mxu1 %v24878_v3  ;;  %18681 = vmatmul.mubr.f32.vlgmr.msra.gmra.mrb[12].mxu1 %v21740_v34 }
  0xf0   :  { %19684 = vmatpush3.bf16.msra.mxu1 %v22320_v43  ;;  %18683 = vmatprep.mubr.msk.f32.mxu1 %vm21589_vm0, %v24876_v13  ;;  %v2848_v55 = vand.u32 4294901760, %v22662_v15 }
  0xf1   :  { %19685 = vmatprep.subr.bf16.mxu1 %v24878_v3 }
  0xf2   :  { %v2849_v56 = vsub.f32 %v22662_v15, %v2848_v55 }
  0xf3   :  { %18684 = vmatmul.mubr.f32.gmra.mrb[14].mxu1 %v21773_v50 }
  0xf4   :  { %19687 = vmatpush3.bf16.msra.mxu1 %v22344_v57  ;;  %18686 = vmatprep.mubr.msk.f32.mxu1 %vm21589_vm0, %v24876_v13  ;;  %v2850_v33 = vand.u32 4294901760, %v2849_v56 }
  0xf5   :  { %19688 = vmatprep.subr.bf16.mxu1 %v24878_v3 }
  0xf6   :  { %v19710_v41 = vpack.c.bf16 %v2850_v33, %v2843_v8  ;;  %v3336_v33 = vand.u32 4294901760, %v3318_v4 }
  0xf7   :  { %18687 = vmatmul.mubr.f32.gmra.mrb[16].mxu1 %v21812_v2 }
  0xf8   :  { %19690 = vmatpush3.bf16.msra.mxu1 %v22369_v16  ;;  %18707 = vmatprep.mubr.msk.f32.mxu1 %vm21589_vm0, %v24876_v13 }
  0xf9   :  { %19691 = vmatprep.subr.bf16.mxu1 %v24878_v3 }
  0xfc   :  { %v289_v62 = vpop.f32.mrb[0].mxu1  ;;  %19693 = vmatpush3.bf16.msra.mxu1 %v22395_v36 }
  0xfd   :  { %v18115_v11 = vpop.f32.mrb[1].mxu1  ;;  %18705 = vmatprep.subr.mxu1 %v24876_v13 }
 0x100   :  { %v295_v43 = vpop.f32.mrb[2].mxu1  ;;  %18706 = vmatpush3.msra.mxu1 %v22424_v61 }
 0x101   :  { %v18118_v40 = vpop.f32.mrb[3].mxu1  ;;  %18708 = vmatmul.mubr.f32.vlgmr.msra.gmra.mrb[12].mxu1 %v21740_v34  ;;  %19694 = vmatprep.subr.bf16.mxu1 %v24878_v3  ;;  %v2680_v34 = vld [vmem:[%s24857_s3] sm:$0xff] }
 0x102   :  { %18710 = vmatprep.mubr.msk.f32.mxu1 %vm21589_vm0, %v24876_v13  ;;  %v2709_v14 = vand.u32 4294901760, %v2680_v34  ;;  %v19719_v40 = vpack.c.bf16 %v22662_v15, %v22660_v18  ;;  %v3324_v15 = vld [vmem:[%s24859_s5 + $0x30] sm:$0x1] }
 0x104   :  { %v301_v60 = vpop.f32.mrb[4].mxu1  ;;  %v22625_v21 = vsub.f32 %v2680_v34, %v2709_v14  ;;  %v22677_v24 = vpack.c.bf16 %v2712_v54, %v2709_v14 }
 0x105   :  { %v18121_v57 = vpop.f32.mrb[5].mxu1  ;;  %18711 = vmatmul.mubr.f32.gmra.mrb[14].mxu1 %v21773_v50  ;;  %v22619_v50 = vld [vmem:[%s24857_s3 + $0x10] sm:$0xff] }
 0x106   :  { %18713 = vmatprep.mubr.msk.f32.mxu1 %vm21589_vm0, %v24876_v13  ;;  %v2715_v6 = vand.u32 4294901760, %v22619_v50  ;;  %v2813_v36 = vand.u32 4294901760, %v22625_v21  ;;  %19696 = vmatpush3.bf16.msra.mxu1 %v22677_v24  ;;  %v19713_v11 = vpack.c.bf16 %v22627_v45, %v22625_v21 }
 0x107   :  { %19697 = vmatprep.subr.bf16.mxu1 %v24878_v3 }
 0x108   :  { %v22630_v22 = vsub.f32 %v22619_v50, %v2715_v6  ;;  %v2814_v49 = vsub.f32 %v22625_v21, %v2813_v36 }
 0x109   :  { %18714 = vmatmul.mubr.f32.gmra.mrb[16].mxu1 %v21812_v2  ;;  %v2683_v2 = vld [vmem:[%s24857_s3 + $0x18] sm:$0xff] }
 0x10a   :  { %18730 = vmatprep.mubr.msk.f32.mxu1 %vm21589_vm0, %v24876_v13  ;;  %v2718_v16 = vand.u32 4294901760, %v2683_v2  ;;  %v2827_v42 = vand.u32 4294901760, %v22630_v22  ;;  %v2815_v53 = vand.u32 4294901760, %v2814_v49 }
 0x10c   :  { %v22632_v19 = vsub.f32 %v2683_v2, %v2718_v16  ;;  %v2828_v48 = vsub.f32 %v22630_v22, %v2827_v42  ;;  %v19704_v23 = vpack.c.bf16 %v2822_v38, %v2815_v53  ;;  %v22686_v47 = vpack.c.bf16 %v2718_v16, %v2715_v6 }
 0x10d   :  { %v22702_v16 = vpack.c.bf16 %v2848_v55, %v2841_v52 }
 0x10e   :  { %v2834_v37 = vand.u32 4294901760, %v22632_v19  ;;  %v2829_v5 = vand.u32 4294901760, %v2828_v48  ;;  %19705 = vmatpush3.bf16.msra.mxu0 %v19704_v23  ;;  %19699 = vmatpush3.bf16.msra.mxu1 %v22686_v47  ;;  %v19716_v10 = vpack.c.bf16 %v22632_v19, %v22630_v22 }
 0x10f   :  { %19706 = vmatprep.subr.bf16.mxu0 %v24878_v3  ;;  %19700 = vmatprep.subr.bf16.mxu1 %v24878_v3 }
 0x110   :  { %v2835_v30 = vsub.f32 %v22632_v19, %v2834_v37  ;;  %v19734_v21 = vpack.c.bf16 %v2834_v37, %v2827_v42  ;;  %v3948_v42 = vld [vmem:[%s24861_s7 + $0x18] sm:$0xff]  ;;  %v3945_v37 = vld [vmem:[%s24861_s7] sm:$0xff] }
 0x112   :  { %v2836_v61 = vand.u32 4294901760, %v2835_v30 }
 0x114   :  { %v19707_v51 = vpack.c.bf16 %v2836_v61, %v2829_v5 }
 0x116   :  { %19708 = vmatpush3.bf16.msra.mxu0 %v19707_v51 }
 0x117   :  { %19709 = vmatprep.subr.bf16.mxu0 %v24878_v3 }
 0x11a   :  { %19711 = vmatpush3.bf16.msra.mxu0 %v19710_v41 }
 0x11b   :  { %18751 = vmatprep.subr.mxu0 %v24876_v13 }
 0x123   :  { %v693_v29 = vpop.f32.mrb[0].mxu0 }
 0x124   :  { %v22650_v39 = vadd.f32 %v693_v29, %v289_v62  ;;  %v18223_v44 = vpop.f32.mrb[1].mxu0  ;;  %v2857_v62 = vand.u32 4294901760, %v2856_v9 }
 0x126   :  { %18752 = vmatpush3.msra.mxu0 %v2857_v62 }
 0x127   :  { %v699_v32 = vpop.f32.mrb[2].mxu0  ;;  %19712 = vmatprep.subr.bf16.mxu0 %v24878_v3 }
 0x128   :  { %v20979_v7 = vadd.f32 %v699_v32, %v295_v43  ;;  %v18226_v0 = vpop.f32.mrb[3].mxu0  ;;  %v22693_v43 = vpack.c.bf16 %v2724_v31, %v2721_v63  ;;  %v3319_v63 = vld [vmem:[%s24859_s5 + $0x8] sm:$0xff] }
 0x129   :  { %v3339_v41 = vand.u32 4294901760, %v3319_v63 }
 0x12a   :  { %19702 = vmatpush3.bf16.msra.mxu1 %v22693_v43 }
 0x12b   :  { %v705_v28 = vpop.f32.mrb[4].mxu0  ;;  %18728 = vmatprep.subr.mxu1 %v24876_v13 }
 0x12c   :  { %v20980_v20 = vadd.f32 %v705_v28, %v301_v60  ;;  %v18229_v12 = vpop.f32.mrb[5].mxu0 }
 0x12e   :  { %18729 = vmatpush3.msra.mxu1 %v22672_v27 }
 0x12f   :  { %19748 = vmatprep.subr.bf16.mxu1 %v24878_v3 }
 0x134   :  { %v2662_v23 = vpop.permute.xlu0 %2661 }
 0x135   :  { %v2672_v25 = vpop.permute.xlu1 %2671 }
 0x13b   :  { %v2667_v1 = vpop.permute.xlu0 %2666 }
 0x168   :  { %v1339_v60 = vpop.f32.mrb[6].mxu1 }
 0x169   :  { %v1355_v57 = vmax.f32 %v22650_v39, %v1339_v60  ;;  %v18385_v34 = vpop.f32.mrb[7].mxu1  ;;  %v3320_v60 = vld [vmem:[%s24859_s5 + $0x10] sm:$0xff] }
 0x16a   :  { %v22734_v34 = vsub.f32 %v3318_v4, %v3336_v33 }
 0x16c   :  { %v1345_v17 = vpop.f32.mrb[8].mxu1 }
 0x16d   :  { %v1356_v50 = vmax.f32 %v20979_v7, %v1345_v17  ;;  %v18388_v14 = vpop.f32.mrb[9].mxu1  ;;  %v22736_v17 = vsub.f32 %v3319_v63, %v3339_v41 }
 0x16f   :  { %v19767_v22 = vpack.c.bf16 %v22736_v17, %v22734_v34 }
 0x170   :  { %v1351_v54 = vpop.f32.mrb[10].mxu1 }
 0x171   :  { %v1357_v2 = vmax.f32 %v20980_v20, %v1351_v54  ;;  %v18391_v6 = vpop.f32.mrb[11].mxu1 }
 0x172   :  { %v3342_v6 = vand.u32 4294901760, %v3320_v60 }
 0x18f   :  { %v1988_v49 = vpop.f32.mrb[6].mxu0 }
 0x190   :  { %v2004_v46 = vmax.f32 %v1355_v57, %v1988_v49  ;;  %v18547_v48 = vpop.f32.mrb[7].mxu0 }
 0x193   :  { %v1994_v30 = vpop.f32.mrb[8].mxu0 }
 0x194   :  { %v2005_v53 = vmax.f32 %v1356_v50, %v1994_v30  ;;  %v18550_v38 = vpop.f32.mrb[9].mxu0 }
 0x195   :  { %v3323_v38 = vld [vmem:[%s24859_s5 + $0x28] sm:$0xff] }
 0x197   :  { %v2000_v5 = vpop.f32.mrb[10].mxu0 }
 0x198   :  { %v2006_v61 = vmax.f32 %v1357_v2, %v2000_v5  ;;  %v18553_v29 = vpop.f32.mrb[11].mxu0  ;;  %v22747_v2 = vpack.c.bf16 %v3339_v41, %v3336_v33  ;;  %v22763_v5 = vsub.f32 %v3320_v60, %v3342_v6 }
 0x199   :  { %v3447_v29 = vand.u32 4294901760, %v22736_v17 }
 0x19a   :  { %v3454_v63 = vand.u32 4294901760, %v22763_v5 }
 0x1d4   :  { %v2637_v39 = vpop.f32.mrb[12].mxu1 }
 0x1d5   :  { %v2653_v44 = vmax.f32 %v2004_v46, %v2637_v39  ;;  %v18709_v51 = vpop.f32.mrb[13].mxu1 }
 0x1d7   :  { %v2674_v32 = vadd.f32 %v2662_v23, %v2653_v44 }
 0x1d8   :  { %v2643_v7 = vpop.f32.mrb[14].mxu1 }
 0x1d9   :  { %v2696_v0 = vsel %vm2694_vm3, %v2674_v32, 0  ;;  %v2654_v28 = vmax.f32 %v2005_v53, %v2643_v7  ;;  %v18712_v20 = vpop.f32.mrb[15].mxu1  ;;  %v3322_v53 = vld [vmem:[%s24859_s5 + $0x20] sm:$0xff]  ;;  %v3351_v7 = vand.u32 4294901760, %v3323_v38 }
 0x1da   :  { %v22705_v12 = vand.u32 4294901760, %v2696_v0  ;;  %v3348_v32 = vand.u32 4294901760, %v3322_v53  ;;  %v3448_v20 = vsub.f32 %v22736_v17, %v3447_v29 }
 0x1db   :  { %v2675_v31 = vadd.f32 %v2667_v1, %v2654_v28  ;;  %v22804_v4 = vsub.f32 %v3323_v38, %v3351_v7 }
 0x1dc   :  { %v22714_v52 = vsub.f32 %v2696_v0, %v22705_v12  ;;  %v2649_v55 = vpop.f32.mrb[16].mxu1  ;;  %18754 = vmatmul.mubr.f32.vlgmr.msra.gmra.mrb[12].mxu0 %v22705_v12  ;;  %v22791_v18 = vsub.f32 %v3322_v53, %v3348_v32 }
 0x1dd   :  { %v2699_v35 = vsel %vm2694_vm3, %v2675_v31, 0  ;;  %v2655_v56 = vmax.f32 %v2006_v61, %v2649_v55  ;;  %19714 = vmatpush3.bf16.msra.mxu0 %v19713_v11  ;;  %v18715_v8 = vpop.f32.mrb[17].mxu1  ;;  %18756 = vmatprep.mubr.msk.f32.mxu0 %vm21589_vm0, %v24876_v13  ;;  %v3321_v11 = vld [vmem:[%s24859_s5 + $0x18] sm:$0xff]  ;;  %v3440_v61 = vand.u32 4294901760, %v22734_v34  ;;  %v22810_v55 = vpack.c.bf16 %v3351_v7, %v3348_v32 }
 0x1de   :  { %v22723_v9 = vand.u32 4294901760, %v22714_v52  ;;  %v22725_v62 = vand.u32 4294901760, %v2699_v35  ;;  %19715 = vmatprep.subr.bf16.mxu0 %v24878_v3  ;;  %v3345_v49 = vand.u32 4294901760, %v3321_v11  ;;  %v3455_v8 = vsub.f32 %v22763_v5, %v3454_v63 }
 0x1df   :  { %v2676_v57 = vadd.f32 %v2672_v25, %v2655_v56  ;;  %v3449_v56 = vand.u32 4294901760, %v3448_v20  ;;  %v3468_v41 = vand.u32 4294901760, %v22791_v18  ;;  %v3475_v60 = vand.u32 4294901760, %v22804_v4  ;;  %v3952_v20 = vld [vmem:[%s24861_s7 + $0x38] sm:$0xff] }
 0x1e0   :  { %v22739_v50 = vsub.f32 %v2699_v35, %v22725_v62  ;;  %18757 = vmatmul.mubr.f32.gmra.mrb[14].mxu0 %v22725_v62  ;;  %v2783_v14 = vsub.f32 %v22714_v52, %v22723_v9  ;;  %v22774_v44 = vsub.f32 %v3321_v11, %v3345_v49  ;;  %v22780_v51 = vpack.c.bf16 %v3345_v49, %v3342_v6 }
 0x1e1   :  { %v2702_v54 = vsel %vm2694_vm3, %v2676_v57, 0  ;;  %19717 = vmatpush3.bf16.msra.mxu0 %v19716_v10  ;;  %18759 = vmatprep.mubr.msk.f32.mxu0 %vm21589_vm0, %v24876_v13  ;;  %v3333_v10 = vsel %vm2704_vm2, %v3324_v15, 0  ;;  %v3469_v49 = vsub.f32 %v22791_v18, %v3468_v41  ;;  %v3476_v53 = vsub.f32 %v22804_v4, %v3475_v60 }
 0x1e2   :  { %v22749_v46 = vand.u32 4294901760, %v2702_v54  ;;  %19718 = vmatprep.subr.bf16.mxu0 %v24878_v3  ;;  %v22752_v48 = vand.u32 4294901760, %v2783_v14  ;;  %v22755_v30 = vand.u32 4294901760, %v22739_v50  ;;  %v3461_v31 = vand.u32 4294901760, %v22774_v44 }
 0x1e3   :  { %v22830_v11 = vand.u32 4294901760, %v3333_v10  ;;  %v3477_v32 = vand.u32 4294901760, %v3476_v53  ;;  %v19770_v19 = vpack.c.bf16 %v22774_v44, %v22763_v5  ;;  %v19791_v5 = vpack.c.bf16 %v3475_v60, %v3468_v41 }
 0x1e4   :  { %v22768_v23 = vsub.f32 %v2702_v54, %v22749_v46  ;;  %18731 = vmatmul.mubr.f32.vlgmr.msra.gmra.mrb[18].mxu1 %v22752_v48  ;;  %18760 = vmatmul.mubr.f32.gmra.mrb[16].mxu0 %v22749_v46  ;;  %v2793_v39 = vsub.f32 %v22739_v50, %v22755_v30  ;;  %v3462_v33 = vsub.f32 %v22774_v44, %v3461_v31  ;;  %v3456_v54 = vand.u32 4294901760, %v3455_v8 }
 0x1e5   :  { %19720 = vmatpush3.bf16.msra.mxu0 %v19719_v40  ;;  %19750 = vmatpush3.bf16.msra.mxu1 %v22747_v2  ;;  %v3441_v40 = vsub.f32 %v22734_v34, %v3440_v61  ;;  %v22837_v57 = vsub.f32 %v3333_v10, %v22830_v11  ;;  %v3951_v10 = vld [vmem:[%s24861_s7 + $0x30] sm:$0xff]  ;;  %v19788_v17 = vpack.c.bf16 %v3461_v31, %v3454_v63 }
 0x1e6   :  { %18733 = vmatprep.mubr.msk.f32.mxu1 %vm21589_vm0, %v24876_v13  ;;  %18774 = vmatprep.subr.mxu0 %v24876_v13  ;;  %v2794_v0 = vand.u32 4294901760, %v2793_v39  ;;  %v22786_v28 = vand.u32 4294901760, %v22768_v23  ;;  %v3463_v6 = vand.u32 4294901760, %v3462_v33  ;;  %v3470_v39 = vand.u32 4294901760, %v3469_v49 }
 0x1e7   :  { %19751 = vmatprep.subr.bf16.mxu1 %v24878_v3  ;;  %18776 = vmatprep.mubr.msk.f32.mxu0 %vm21589_vm0, %v24876_v13  ;;  %v3442_v35 = vand.u32 4294901760, %v3441_v40  ;;  %v3482_v7 = vand.u32 4294901760, %v22837_v57  ;;  %v3950_v40 = vld [vmem:[%s24861_s7 + $0x28] sm:$0xff] }
 0x1e8   :  { %18734 = vmatmul.mubr.f32.gmra.mrb[20].mxu1 %v2794_v0  ;;  %v2803_v1 = vsub.f32 %v22768_v23, %v22786_v28  ;;  %v19761_v38 = vpack.c.bf16 %v3463_v6, %v3456_v54  ;;  %v19764_v15 = vpack.c.bf16 %v3477_v32, %v3470_v39 }
 0x1e9   :  { %18775 = vmatpush3.msra.mxu0 %v22675_v59  ;;  %19753 = vmatpush3.bf16.msra.mxu1 %v22780_v51  ;;  %v19758_v14 = vpack.c.bf16 %v3449_v56, %v3442_v35  ;;  %v3947_v59 = vld [vmem:[%s24861_s7 + $0x10] sm:$0xff]  ;;  %v3967_v35 = vand.u32 4294901760, %v3950_v40  ;;  %v3971_v56 = vand.u32 4294901760, %v3952_v20 }
 0x1ea   :  { %18777 = vmatmul.mubr.f32.vlgmr.msra.gmra.mrb[12].mxu0 %v22714_v52  ;;  %19721 = vmatprep.subr.bf16.mxu0 %v24878_v3  ;;  %v2804_v25 = vand.u32 4294901760, %v2803_v1  ;;  %v3965_v1 = vand.u32 4294901760, %v3947_v59 }
 0x1eb   :  { %19723 = vmatpush3.bf16.msra.mxu0 %v22677_v24  ;;  %18736 = vmatprep.mubr.msk.f32.mxu1 %vm21589_vm0, %v24876_v13  ;;  %v22963_v49 = vsub.f32 %v3950_v40, %v3967_v35  ;;  %v22965_v53 = vsub.f32 %v3952_v20, %v3971_v56 }
 0x1ec   :  { %19754 = vmatprep.subr.bf16.mxu1 %v24878_v3  ;;  %18737 = vmatmul.mubr.f32.gmra.mrb[22].mxu1 %v2804_v25  ;;  %v22957_v6 = vsub.f32 %v3947_v59, %v3965_v1 }
 0x1ed   :  { %18779 = vmatprep.mubr.msk.f32.mxu0 %vm21589_vm0, %v24876_v13  ;;  %19756 = vmatpush3.bf16.msra.mxu1 %v22810_v55  ;;  %v23089_v44 = vpack.c.bf16 %v22965_v53, %v22963_v49 }
 0x1ee   :  { %18780 = vmatmul.mubr.f32.gmra.mrb[14].mxu0 %v22739_v50  ;;  %19724 = vmatprep.subr.bf16.mxu0 %v24878_v3 }
 0x1ef   :  { %19726 = vmatpush3.bf16.msra.mxu0 %v22686_v47  ;;  %18866 = vmatprep.subr.mxu1 %v24876_v13 }
 0x1f0   :  { %18782 = vmatprep.mubr.msk.f32.mxu0 %vm21589_vm0, %v24876_v13  ;;  %18868 = vmatprep.mubr.msk.f32.mxu1 %vm21589_vm0, %v24876_v13 }
 0x1f1   :  { %18867 = vmatpush3.msra.mxu1 %v22830_v11  ;;  %19727 = vmatprep.subr.bf16.mxu0 %v24878_v3 }
 0x1f2   :  { %18783 = vmatmul.mubr.f32.gmra.mrb[16].mxu0 %v22768_v23  ;;  %18869 = vmatmul.mubr.f32.vlgmr.msra.gmra.mrb[24].mxu1 %v22752_v48  ;;  %v19731_v48 = vpack.c.bf16 %v2820_v26, %v2813_v36  ;;  %v19773_v36 = vpack.c.bf16 %v22804_v4, %v22791_v18  ;;  %v3946_v26 = vld [vmem:[%s24861_s7 + $0x8] sm:$0xff] }
 0x1f3   :  { %19757 = vmatprep.subr.bf16.mxu1 %v24878_v3  ;;  %19729 = vmatpush3.bf16.msra.mxu0 %v22693_v43 }
 0x1f4   :  { %19759 = vmatpush3.bf16.msra.mxu1 %v19758_v14  ;;  %18871 = vmatprep.mubr.msk.f32.mxu1 %vm21589_vm0, %v24876_v13 }
 0x1f5   :  { %18797 = vmatprep.subr.mxu0 %v24876_v13  ;;  %19760 = vmatprep.subr.bf16.mxu1 %v24878_v3 }
 0x1f6   :  { %18872 = vmatmul.mubr.f32.gmra.mrb[26].mxu1 %v2794_v0  ;;  %18799 = vmatprep.mubr.msk.f32.mxu0 %vm21589_vm0, %v24876_v13  ;;  %v3483_v0 = vsub.f32 %v22837_v57, %v3482_v7 }
 0x1f7   :  { %18798 = vmatpush3.msra.mxu0 %v22672_v27  ;;  %18874 = vmatprep.mubr.msk.f32.mxu1 %vm21589_vm0, %v24876_v13 }
 0x1f8   :  { %19762 = vmatpush3.bf16.msra.mxu1 %v19761_v38  ;;  %18800 = vmatmul.mubr.f32.vlgmr.msra.gmra.mrb[12].mxu0 %v22723_v9  ;;  %v3484_v45 = vand.u32 4294901760, %v3483_v0 }
 0x1f9   :  { %19730 = vmatprep.subr.bf16.mxu0 %v24878_v3  ;;  %19763 = vmatprep.subr.bf16.mxu1 %v24878_v3 }
 0x1fa   :  { %19732 = vmatpush3.bf16.msra.mxu0 %v19731_v48  ;;  %18875 = vmatmul.mubr.f32.gmra.mrb[28].mxu1 %v2804_v25  ;;  %v3949_v25 = vld [vmem:[%s24861_s7 + $0x20] sm:$0xff] }
 0x1fb   :  { %18802 = vmatprep.mubr.msk.f32.mxu0 %vm21589_vm0, %v24876_v13  ;;  %19733 = vmatprep.subr.bf16.mxu0 %v24878_v3  ;;  %v3969_v14 = vand.u32 4294901760, %v3949_v25 }
 0x1fc   :  { %19765 = vmatpush3.bf16.msra.mxu1 %v19764_v15  ;;  %18803 = vmatmul.mubr.f32.gmra.mrb[14].mxu0 %v22755_v30 }
 0x1fd   :  { %18889 = vmatprep.subr.mxu1 %v24876_v13  ;;  %18805 = vmatprep.mubr.msk.f32.mxu0 %vm21589_vm0, %v24876_v13  ;;  %v22978_v48 = vsub.f32 %v3949_v25, %v3969_v14  ;;  %v19785_v25 = vpack.c.bf16 %v3447_v29, %v3440_v61 }
 0x1fe   :  { %19735 = vmatpush3.bf16.msra.mxu0 %v19734_v21  ;;  %18891 = vmatprep.mubr.msk.f32.mxu1 %vm21589_vm0, %v24876_v13  ;;  %v4069_v21 = vand.u32 4294901760, %v22963_v49 }
 0x1ff   :  { %19736 = vmatprep.subr.bf16.mxu0 %v24878_v3 }
 0x200   :  { %18890 = vmatpush3.msra.mxu1 %v3484_v45  ;;  %18806 = vmatmul.mubr.f32.gmra.mrb[16].mxu0 %v22786_v28  ;;  %v4081_v45 = vand.u32 4294901760, %v22965_v53  ;;  %v4070_v59 = vsub.f32 %v22963_v49, %v4069_v21 }
 0x201   :  { %18892 = vmatmul.mubr.f32.vlgmr.msra.gmra.mrb[24].mxu1 %v22705_v12  ;;  %19766 = vmatprep.subr.bf16.mxu1 %v24878_v3 }
 0x202   :  { %19738 = vmatpush3.bf16.msra.mxu0 %v22702_v16  ;;  %19768 = vmatpush3.bf16.msra.mxu1 %v19767_v22  ;;  %v3963_v16 = vand.u32 4294901760, %v3948_v42  ;;  %v23144_v18 = vpack.c.bf16 %v4081_v45, %v4069_v21 }
 0x203   :  { %18894 = vmatprep.mubr.msk.f32.mxu1 %vm21589_vm0, %v24876_v13  ;;  %18820 = vmatprep.subr.mxu0 %v24876_v13 }
 0x204   :  { %19769 = vmatprep.subr.bf16.mxu1 %v24878_v3  ;;  %18822 = vmatprep.mubr.msk.f32.mxu0 %vm21589_vm0, %v24876_v13  ;;  %v22951_v33 = vsub.f32 %v3948_v42, %v3963_v16  ;;  %v23012_v42 = vpack.c.bf16 %v3971_v56, %v3967_v35 }
 0x205   :  { %18895 = vmatmul.mubr.f32.gmra.mrb[26].mxu1 %v22725_v62 }
 0x206   :  { %18821 = vmatpush3.msra.mxu0 %v2855_v58  ;;  %19771 = vmatpush3.bf16.msra.mxu1 %v19770_v19  ;;  %v3959_v58 = vand.u32 4294901760, %v3946_v26  ;;  %v4057_v32 = vand.u32 4294901760, %v22951_v33 }
 0x207   :  { %18823 = vmatmul.mubr.f32.vlgmr.msra.gmra.mrb[12].mxu0 %v22705_v12  ;;  %19739 = vmatprep.subr.bf16.mxu0 %v24878_v3 }
 0x208   :  { %19741 = vmatpush3.bf16.msra.mxu0 %v22677_v24  ;;  %18897 = vmatprep.mubr.msk.f32.mxu1 %vm21589_vm0, %v24876_v13  ;;  %v3961_v24 = vand.u32 4294901760, %v3945_v37  ;;  %v22949_v8 = vsub.f32 %v3946_v26, %v3959_v58  ;;  %v22970_v38 = vpack.c.bf16 %v3963_v16, %v3959_v58  ;;  %v4058_v22 = vsub.f32 %v22951_v33, %v4057_v32 }
 0x209   :  { %18898 = vmatmul.mubr.f32.gmra.mrb[28].mxu1 %v22749_v46  ;;  %19772 = vmatprep.subr.bf16.mxu1 %v24878_v3 }
 0x20a   :  { %18825 = vmatprep.mubr.msk.f32.mxu0 %vm21589_vm0, %v24876_v13  ;;  %19774 = vmatpush3.bf16.msra.mxu1 %v19773_v36  ;;  %v22955_v54 = vsub.f32 %v3945_v37, %v3961_v24  ;;  %v4045_v39 = vand.u32 4294901760, %v22949_v8  ;;  %v22985_v0 = vpack.c.bf16 %v3965_v1, %v3961_v24  ;;  %v4075_v36 = vand.u32 4294901760, %v22978_v48 }
 0x20b   :  { %18826 = vmatmul.mubr.f32.gmra.mrb[14].mxu0 %v22725_v62  ;;  %19742 = vmatprep.subr.bf16.mxu0 %v24878_v3  ;;  %v4059_v16 = vand.u32 4294901760, %v4058_v22  ;;  %v23075_v29 = vpack.c.bf16 %v22951_v33, %v22949_v8 }
 0x20c   :  { %19744 = vmatpush3.bf16.msra.mxu0 %v22686_v47  ;;  %18912 = vmatprep.subr.mxu1 %v24876_v13  ;;  %v3973_v47 = vand.u32 4294901760, %v3951_v10  ;;  %v4076_v24 = vsub.f32 %v22978_v48, %v4075_v36 }
 0x20d   :  { %18828 = vmatprep.mubr.msk.f32.mxu0 %vm21589_vm0, %v24876_v13  ;;  %18914 = vmatprep.mubr.msk.f32.mxu1 %vm21589_vm0, %v24876_v13 }
 0x20e   :  { %18913 = vmatpush3.msra.mxu1 %v22837_v57  ;;  %19745 = vmatprep.subr.bf16.mxu0 %v24878_v3  ;;  %v22980_v15 = vsub.f32 %v3951_v10, %v3973_v47  ;;  %v23018_v37 = vpack.c.bf16 %v3973_v47, %v3969_v14  ;;  %v4071_v10 = vand.u32 4294901760, %v4070_v59  ;;  %v4077_v34 = vand.u32 4294901760, %v4076_v24 }
 0x20f   :  { %18829 = vmatmul.mubr.f32.gmra.mrb[16].mxu0 %v22749_v46  ;;  %18915 = vmatmul.mubr.f32.vlgmr.msra.gmra.mrb[24].mxu1 %v22714_v52  ;;  %v4063_v52 = vand.u32 4294901760, %v22957_v6 }
 0x210   :  { %19775 = vmatprep.subr.bf16.mxu1 %v24878_v3  ;;  %19747 = vmatpush3.bf16.msra.mxu0 %v22693_v43  ;;  %v4051_v43 = vand.u32 4294901760, %v22955_v54  ;;  %v4087_v26 = vand.u32 4294901760, %v22980_v15 }
 0x211   :  { %19777 = vmatpush3.bf16.msra.mxu1 %v22747_v2  ;;  %18917 = vmatprep.mubr.msk.f32.mxu1 %vm21589_vm0, %v24876_v13  ;;  %v4064_v19 = vsub.f32 %v22957_v6, %v4063_v52 }
 0x212   :  { %18843 = vmatprep.subr.mxu0 %v24876_v13  ;;  %19778 = vmatprep.subr.bf16.mxu1 %v24878_v3  ;;  %v4088_v1 = vsub.f32 %v22980_v15, %v4087_v26  ;;  %v23154_v4 = vpack.c.bf16 %v4087_v26, %v4075_v36 }
 0x213   :  { %18918 = vmatmul.mubr.f32.gmra.mrb[26].mxu1 %v22739_v50  ;;  %18845 = vmatprep.mubr.msk.f32.mxu0 %vm21589_vm0, %v24876_v13  ;;  %v4046_v50 = vsub.f32 %v22949_v8, %v4045_v39  ;;  %v4065_v20 = vand.u32 4294901760, %v4064_v19 }
 0x214   :  { %18844 = vmatpush3.msra.mxu0 %v22672_v27  ;;  %18920 = vmatprep.mubr.msk.f32.mxu1 %vm21589_vm0, %v24876_v13  ;;  %v4052_v27 = vsub.f32 %v22955_v54, %v4051_v43  ;;  %v4089_v47 = vand.u32 4294901760, %v4088_v1 }
 0x215   :  { %19780 = vmatpush3.bf16.msra.mxu1 %v22780_v51  ;;  %18846 = vmatmul.mubr.f32.vlgmr.msra.gmra.mrb[12].mxu0 %v22705_v12  ;;  %v4047_v58 = vand.u32 4294901760, %v4046_v50 }
 0x216   :  { %19803 = vmatprep.subr.bf16.mxu0 %v22970_v38  ;;  %19781 = vmatprep.subr.bf16.mxu1 %v24878_v3  ;;  %v4053_v40 = vand.u32 4294901760, %v4052_v27  ;;  %v23065_v61 = vpack.c.bf16 %v4089_v47, %v4077_v34 }
 0x217   :  { %18921 = vmatmul.mubr.f32.gmra.mrb[28].mxu1 %v22768_v23  ;;  %19805 = vmatpush1.bf16.msra.mxu0 %v22985_v0  ;;  %v4082_v23 = vsub.f32 %v22965_v53, %v4081_v45  ;;  %v23045_v56 = vpack.c.bf16 %v4059_v16, %v4047_v58 }
 0x218   :  { %18848 = vmatprep.mubr.msk.f32.mxu0 %vm21589_vm0, %v24876_v13  ;;  %18937 = vmatprep.mubr.msk.f32.mxu1 %vm21589_vm0, %v24876_v13  ;;  %v23049_v14 = vpack.c.bf16 %v4065_v20, %v4053_v40  ;;  %v2677_v20 = vlaneseq }
 0x219   :  { %19783 = vmatpush3.bf16.msra.mxu1 %v22810_v55  ;;  %18849 = vmatmul.mubr.f32.gmra.mrb[14].mxu0 %v22725_v62  ;;  %v4083_v35 = vand.u32 4294901760, %v4082_v23 }
 0x21a   :  { %18935 = vmatprep.subr.mxu1 %v24876_v13  ;;  %18851 = vmatprep.mubr.msk.f32.mxu0 %vm21589_vm0, %v24876_v13 }
 0x21b   :  { %19807 = vmatprep.subr.bf16.mxu0 %v23012_v42 }
 0x21c   :  { %19809 = vmatpush1.bf16.msra.mxu0 %v23018_v37 }
 0x21d   :  { %18936 = vmatpush3.msra.mxu1 %v22830_v11  ;;  %18852 = vmatmul.mubr.f32.gmra.mrb[16].mxu0 %v22749_v46 }
 0x21e   :  { %18938 = vmatmul.mubr.f32.vlgmr.msra.gmra.mrb[24].mxu1 %v22723_v9  ;;  %19784 = vmatprep.subr.bf16.mxu1 %v24878_v3  ;;  %v23059_v9 = vpack.c.bf16 %v4083_v35, %v4071_v10 }
 0x21f   :  { %19786 = vmatpush3.bf16.msra.mxu1 %v19785_v25  ;;  %18940 = vmatprep.mubr.msk.f32.mxu1 %vm21589_vm0, %v24876_v13 }
 0x220   :  { %4031 = vmatprep.mubr.f32.mxu0 %v24876_v13  ;;  %19787 = vmatprep.subr.bf16.mxu1 %v24878_v3 }
 0x221   :  { %4037 = vmatmul.mubr.f32.vlgmr.msra.gmra.mrb[18].mxu0 %v24876_v13  ;;  %19811 = vmatprep.subr.bf16.mxu0 %v23045_v56 }
 0x222   :  { %18941 = vmatmul.mubr.f32.gmra.mrb[26].mxu1 %v22755_v30  ;;  %19813 = vmatpush1.bf16.msra.mxu0 %v23049_v14  ;;  %v23084_v30 = vpack.c.bf16 %v22957_v6, %v22955_v54 }
 0x223   :  { %19789 = vmatpush3.bf16.msra.mxu1 %v19788_v17  ;;  %18943 = vmatprep.mubr.msk.f32.mxu1 %vm21589_vm0, %v24876_v13 }
 0x224   :  { %19790 = vmatprep.subr.bf16.mxu1 %v24878_v3  ;;  %19815 = vmatprep.subr.bf16.mxu0 %v23059_v9 }
 0x225   :  { %4147 = vmatprep.mubr.f32.mxu0 %v24876_v13 }
 0x226   :  { %18944 = vmatmul.mubr.f32.gmra.mrb[28].mxu1 %v22786_v28  ;;  %19817 = vmatpush1.bf16.msra.mxu0 %v23065_v61  ;;  %v23098_v28 = vpack.c.bf16 %v22980_v15, %v22978_v48 }
 0x227   :  { %19792 = vmatpush3.bf16.msra.mxu1 %v19791_v5  ;;  %19819 = vmatprep.subr.bf16.mxu0 %v23075_v29 }
 0x228   :  { %18958 = vmatprep.subr.mxu1 %v24876_v13  ;;  %18960 = vmatprep.mubr.msk.f32.mxu1 %vm21589_vm0, %v24876_v13 }
 0x229   :  { %4149 = vmatmul.mubr.f32.vlgmr.msra.gmra.mrb[18].mxu0 %v24876_v13 }
 0x22a   :  { %19821 = vmatpush1.bf16.msra.mxu0 %v23084_v30  ;;  %4235 = vmatprep.mubr.f32.mxu0 %v24876_v13 }
 0x22b   :  { %18959 = vmatpush3.msra.mxu1 %v3482_v7  ;;  %19823 = vmatprep.subr.bf16.mxu0 %v23089_v44 }
 0x22c   :  { %18961 = vmatmul.mubr.f32.vlgmr.msra.gmra.mrb[24].mxu1 %v22705_v12  ;;  %19793 = vmatprep.subr.bf16.mxu1 %v24878_v3 }
 0x22d   :  { %19795 = vmatpush3.bf16.msra.mxu1 %v22747_v2  ;;  %18963 = vmatprep.mubr.msk.f32.mxu1 %vm21589_vm0, %v24876_v13  ;;  %v23124_v2 = vpack.c.bf16 %v4057_v32, %v4045_v39 }
 0x22e   :  { %19825 = vmatpush1.bf16.msra.mxu0 %v23098_v28  ;;  %19796 = vmatprep.subr.bf16.mxu1 %v24878_v3 }
 0x22f   :  { %19827 = vmatprep.subr.bf16.mxu0 %v22970_v38 }
 0x230   :  { %18964 = vmatmul.mubr.f32.gmra.mrb[26].mxu1 %v22725_v62 }
 0x231   :  { %19798 = vmatpush3.bf16.msra.mxu1 %v22780_v51  ;;  %4238 = vmatmul.mubr.f32.vlgmr.msra.gmra.mrb[18].mxu0 %v24876_v13  ;;  %v23137_v51 = vpack.c.bf16 %v4063_v52, %v4051_v43  ;;  %v17470_v43 = vld [vmem:[%s24860_s6] ss:$0 sm:$0xff]  ;;  %s21593_s6 = smov 32  }
 0x232   :  { %18966 = vmatprep.mubr.msk.f32.mxu1 %vm21589_vm0, %v24876_v13  ;;  %19829 = vmatpush1.bf16.msra.mxu0 %v22985_v0 }
 0x233   :  { %19799 = vmatprep.subr.bf16.mxu1 %v24878_v3  ;;  %19831 = vmatprep.subr.bf16.mxu0 %v23012_v42 }
 0x234   :  { %18967 = vmatmul.mubr.f32.gmra.mrb[28].mxu1 %v22749_v46  ;;  %4316 = vmatprep.mubr.f32.mxu0 %v24876_v13 }
 0x235   :  { %19801 = vmatpush3.bf16.msra.mxu1 %v22810_v55  ;;  %18983 = vmatprep.mubr.msk.f32.mxu1 %vm21589_vm0, %v24876_v13 }
 0x236   :  { %19833 = vmatpush1.bf16.msra.mxu0 %v23018_v37  ;;  %18981 = vmatprep.subr.mxu1 %v24876_v13 }
 0x237   :  { %19835 = vmatprep.subr.bf16.mxu0 %v23124_v2 }
 0x239   :  { %18982 = vmatpush3.msra.mxu1 %v22830_v11  ;;  %4320 = vmatmul.mubr.f32.vlgmr.msra.gmra.mrb[18].mxu0 %v24876_v13 }
 0x23a   :  { %18984 = vmatmul.mubr.f32.vlgmr.msra.gmra.mrb[24].mxu1 %v22705_v12  ;;  %19837 = vmatpush1.bf16.msra.mxu0 %v23137_v51 }
 0x23b   :  { %18986 = vmatprep.mubr.msk.f32.mxu1 %vm21589_vm0, %v24876_v13  ;;  %19839 = vmatprep.subr.bf16.mxu0 %v23144_v18 }
 0x23c   :  { %4414 = vmatprep.mubr.f32.mxu0 %v24876_v13  ;;  %19851 = vmatprep.subr.bf16.mxu1 %v22970_v38 }
 0x23d   :  { %19853 = vmatpush1.bf16.msra.mxu1 %v22985_v0 }
 0x23e   :  { %18987 = vmatmul.mubr.f32.gmra.mrb[26].mxu1 %v22725_v62  ;;  %19841 = vmatpush1.bf16.msra.mxu0 %v23154_v4 }
 0x23f   :  { %18989 = vmatprep.mubr.msk.f32.mxu1 %vm21589_vm0, %v24876_v13  ;;  %19843 = vmatprep.subr.bf16.mxu0 %v22970_v38 }
 0x240   :  { %19855 = vmatprep.subr.bf16.mxu1 %v23012_v42 }
 0x241   :  { %4416 = vmatmul.mubr.f32.vlgmr.msra.gmra.mrb[18].mxu0 %v24876_v13  ;;  %19857 = vmatpush1.bf16.msra.mxu1 %v23018_v37 }
 0x242   :  { %18990 = vmatmul.mubr.f32.gmra.mrb[28].mxu1 %v22749_v46  ;;  %19845 = vmatpush1.bf16.msra.mxu0 %v22985_v0  ;;  %v17469_v46 = vld [vmem:[%s24858_s4] ss:$0 sm:$0xff]  ;;  %s21592_s4 = smov 64  }
 0x243   :  { %19847 = vmatprep.subr.bf16.mxu0 %v23012_v42  ;;  %4494 = vmatprep.mubr.f32.mxu0 %v24876_v13 }
 0x244   :  { %4610 = vmatprep.mubr.f32.mxu1 %v24876_v13  ;;  %19859 = vmatprep.subr.bf16.mxu1 %v23045_v56 }
 0x246   :  { %19849 = vmatpush1.bf16.msra.mxu0 %v23018_v37 }
 0x247   :  { %19899 = vmatprep.subr.bf16.mxu0 %v22970_v38 }
 0x249   :  { %4496 = vmatmul.mubr.f32.vlgmr.msra.gmra.mrb[18].mxu0 %v24876_v13 }
 0x24a   :  { %19901 = vmatpush1.bf16.msra.mxu0 %v22985_v0  ;;  %5188 = vmatprep.mubr.f32.mxu0 %v24876_v13 }
 0x24b   :  { %19903 = vmatprep.subr.bf16.mxu0 %v23012_v42 }
 0x24e   :  { %19905 = vmatpush1.bf16.msra.mxu0 %v23018_v37 }
 0x24f   :  { %19907 = vmatprep.subr.bf16.mxu0 %v23045_v56 }
 0x2b7   :  { %v2786_v12 = vpop.f32.mrb[18].mxu1 }
 0x2b8   :  { %v18732_v62 = vpop.f32.mrb[19].mxu1  ;;  %v2787_v57 = vadd.f32 %v17469_v46, %v2786_v12 }
 0x2bb   :  { %v2796_v63 = vpop.f32.mrb[20].mxu1 }
 0x2bc   :  { %v2797_v31 = vadd.f32 %v17469_v46, %v2796_v63  ;;  %v18735_v55 = vpop.f32.mrb[21].mxu1 }
 0x2bf   :  { %v2806_v41 = vpop.f32.mrb[22].mxu1 }
 0x2c0   :  { %v2807_v60 = vadd.f32 %v17469_v46, %v2806_v41  ;;  %v18738_v11 = vpop.f32.mrb[23].mxu1 }
 0x2e8   :  { %v3302_v7 = vpop.f32.mrb[12].mxu0 }
 0x2e9   :  { %v20982_v8 = vadd.f32 %v3302_v7, %v2787_v57  ;;  %v18847_v33 = vpop.f32.mrb[13].mxu0 }
 0x2eb   :  { %v5105_v24 = vrot.slane %v20982_v8, 4  ;;  %v5683_v1 = vrot.slane %v20982_v8, 6 }
 0x2ec   :  { %v3308_v54 = vpop.f32.mrb[14].mxu0 }
 0x2ed   :  { %v20984_v6 = vadd.f32 %v3308_v54, %v2797_v31  ;;  %v18850_v49 = vpop.f32.mrb[15].mxu0  ;;  %v23214_v31 = vshrl.u32 %v2677_v20, 7 }
 0x2ef   :  { %v7411_v45 = vrot.slane %v20984_v6, 4  ;;  %v7989_v50 = vrot.slane %v20984_v6, 6  ;;  %v6834_v25 = vrot.slane %v20984_v6, 2  ;;  %24895 = vst [vmem:[#allocation5_spill] sm:$0xff] %v23214_v31  ;;  %vm2679_vm5 = vcmp.lt.s32.totalorder %v23214_v31, 2 }
 0x2f0   :  { %v3314_v53 = vpop.f32.mrb[16].mxu0 }
 0x2f1   :  { %v20986_v39 = vadd.f32 %v3314_v53, %v2807_v60  ;;  %v18853_v32 = vpop.f32.mrb[17].mxu0  ;;  %v4527_v60 = vrot.slane %v20982_v8, 2 }
 0x2f3   :  { %v9140_v21 = vrot.slane %v20986_v39, 2 }
 0x30d   :  { %v3929_v52 = vpop.f32.mrb[24].mxu1 }
 0x30e   :  { %v20987_v48 = vadd.f32 %v17470_v43, %v3929_v52  ;;  %v18985_v15 = vpop.f32.mrb[25].mxu1 }
 0x310   :  { %v7414_v22 = vrot.slane %v20987_v48, 4  ;;  %v7991_v27 = vrot.slane %v20987_v48, 2  ;;  %v23191_v19 = vsel %vm3953_vm4, %v20986_v39, %v20987_v48  ;;  %v9142_v36 = vrot.slane %v20987_v48, 6 }
 0x311   :  { %v3935_v26 = vpop.f32.mrb[26].mxu1 }
 0x312   :  { %v20988_v59 = vadd.f32 %v17470_v43, %v3935_v26  ;;  %v18988_v23 = vpop.f32.mrb[27].mxu1  ;;  %v23194_v58 = vsel %vm3953_vm4, %v7411_v45, %v7414_v22  ;;  %v23197_v16 = vsel %vm3953_vm4, %v7989_v50, %v7991_v27  ;;  %v23200_v40 = vsel %vm3953_vm4, %v9140_v21, %v9142_v36 }
 0x314   :  { %v5108_v10 = vrot.slane %v20988_v59, 4  ;;  %v5685_v35 = vrot.slane %v20988_v59, 2  ;;  %v23203_v34 = vsel %vm3953_vm4, %v20984_v6, %v20988_v59  ;;  %v6836_v47 = vrot.slane %v20988_v59, 6 }
 0x315   :  { %v3941_v17 = vpop.f32.mrb[28].mxu1 }
 0x316   :  { %v20989_v5 = vadd.f32 %v17470_v43, %v3941_v17  ;;  %v18991_v12 = vpop.f32.mrb[29].mxu1  ;;  %v23206_v62 = vsel %vm3953_vm4, %v5105_v24, %v5108_v10  ;;  %v23209_v46 = vsel %vm3953_vm4, %v5683_v1, %v5685_v35  ;;  %v23212_v63 = vsel %vm3953_vm4, %v6834_v25, %v6836_v47 }
 0x318   :  { %v4530_v55 = vrot.slane %v20989_v5, 6  ;;  %v3954_v41 = vsel %vm3953_vm4, %v20982_v8, %v20989_v5 }
 0x31a   :  { %v23218_v11 = vsel %vm3953_vm4, %v4527_v60, %v4530_v55 }
 0x31c   :  { %v4497_v57 = vpop.f32.mrb[18].mxu0 }
 0x31d   :  { %v4499_v7 = vpop.f32.mrb[19].mxu0 }
 0x31e   :  { %v4502_v33 = vsel %vm2679_vm5, %v4497_v57, %v4499_v7 }
 0x31f   :  { %v4503_v54 = vadd.f32 %v4502_v33, %v3954_v41 }
 0x321   :  { %21444 = vtanh.f32 %v4503_v54  ;;  %v4504_v49 = vmul.f32 0.5, %v4503_v54 }
 0x323   :  { %21446 = vtanh.f32 %v4504_v49 }
 0x32b   :  { %v21445_v6 = vpop.eup %21444 }
 0x32c   :  { %4511 = vrot.lane.b32.xlu1 %v21445_v6, %s21592_s4 }
 0x32d   :  { %v21447_v53 = vpop.eup %21446 }
 0x32e   :  { %v4506_v8 = vadd.f32 1.0, %v21447_v53 }
 0x330   :  { %v4507_v39 = vmul.f32 0.5, %v4506_v8 }
 0x332   :  { %v4509_v52 = vmul.f32 0.0, %v4507_v39 }
 0x39e   :  { %v4512_v32 = vpop.permute.xlu1 %4511 }
 0x39f   :  { %v4514_v43 = vmul.f32 %v4512_v32, %v4507_v39 }
 0x3a1   :  { %4516 = vrot.lane.b32.xlu0 %v4514_v43, %s21593_s6 }
 0x413   :  { %v4517_v48 = vpop.permute.xlu0 %4516 }
 0x414   :  { %v23225_v15 = vadd.f32 %v4517_v48, %v4509_v52 }
 0x416   :  { %21448 = vtanh.f32 %v23225_v15 }
 0x420   :  { %v21449_v21 = vpop.eup %21448 }
 0x421   :  { %4522 = vrot.lane.b32.xlu1 %v21449_v21, %s21592_s4 }
 0x493   :  { %v4523_v45 = vpop.permute.xlu1 %4522 }
 0x494   :  { %v23229_v50 = vmul.f32 %v4523_v45, %v4507_v39 }
 0x496   :  { %4534 = vrot.lane.b32.xlu0 %v23229_v50, %s21593_s6 }
 0x508   :  { %v23233_v22 = vpop.permute.xlu0 %4534 }
 0x509   :  { %v4536_v27 = vsel %vm3955_vm6, %v23233_v22, 0 }
 0x50a   :  { %v4611_v36 = vand.u32 4294901760, %v4536_v27 }
 0x50c   :  { %v4612_v26 = vsub.f32 %v4536_v27, %v4611_v36 }
 0x50e   :  { %v4613_v59 = vand.u32 4294901760, %v4612_v26 }
 0x510   :  { %v4614_v23 = vsub.f32 %v4612_v26, %v4613_v59 }
 0x512   :  { %v4615_v20 = vand.u32 4294901760, %v4614_v23 }
 0x514   :  { %4616 = vmatmul.mubr.f32.vlgmr.msra.gmra.mrb[30].mxu1 %v4615_v20 }
 0x515   :  { %19861 = vmatpush1.bf16.msra.mxu1 %v23049_v14  ;;  %4726 = vmatprep.mubr.f32.mxu1 %v24876_v13 }
 0x516   :  { %19863 = vmatprep.subr.bf16.mxu1 %v23059_v9 }
 0x519   :  { %19865 = vmatpush1.bf16.msra.mxu1 %v23065_v61 }
 0x51a   :  { %19867 = vmatprep.subr.bf16.mxu1 %v23075_v29 }
 0x51c   :  { %4728 = vmatmul.mubr.f32.vlgmr.msra.gmra.mrb[30].mxu1 %v4611_v36 }
 0x51d   :  { %19869 = vmatpush1.bf16.msra.mxu1 %v23084_v30  ;;  %4814 = vmatprep.mubr.f32.mxu1 %v24876_v13 }
 0x51e   :  { %19871 = vmatprep.subr.bf16.mxu1 %v23089_v44 }
 0x521   :  { %19873 = vmatpush1.bf16.msra.mxu1 %v23098_v28 }
 0x522   :  { %19875 = vmatprep.subr.bf16.mxu1 %v22970_v38 }
 0x524   :  { %4817 = vmatmul.mubr.f32.vlgmr.msra.gmra.mrb[30].mxu1 %v4612_v26 }
 0x525   :  { %19877 = vmatpush1.bf16.msra.mxu1 %v22985_v0  ;;  %4895 = vmatprep.mubr.f32.mxu1 %v24876_v13 }
 0x526   :  { %19879 = vmatprep.subr.bf16.mxu1 %v23012_v42 }
 0x529   :  { %19881 = vmatpush1.bf16.msra.mxu1 %v23018_v37 }
 0x52a   :  { %19883 = vmatprep.subr.bf16.mxu1 %v23124_v2 }
 0x52c   :  { %4899 = vmatmul.mubr.f32.vlgmr.msra.gmra.mrb[30].mxu1 %v4613_v59 }
 0x52d   :  { %19885 = vmatpush1.bf16.msra.mxu1 %v23137_v51  ;;  %4993 = vmatprep.mubr.f32.mxu1 %v24876_v13 }
 0x52e   :  { %19887 = vmatprep.subr.bf16.mxu1 %v23144_v18 }
 0x531   :  { %19889 = vmatpush1.bf16.msra.mxu1 %v23154_v4 }
 0x532   :  { %19891 = vmatprep.subr.bf16.mxu1 %v22970_v38 }
 0x534   :  { %4995 = vmatmul.mubr.f32.vlgmr.msra.gmra.mrb[30].mxu1 %v4611_v36 }
 0x535   :  { %19893 = vmatpush1.bf16.msra.mxu1 %v22985_v0  ;;  %5073 = vmatprep.mubr.f32.mxu1 %v24876_v13 }
 0x536   :  { %19895 = vmatprep.subr.bf16.mxu1 %v23012_v42 }
 0x539   :  { %19897 = vmatpush1.bf16.msra.mxu1 %v23018_v37 }
 0x53a   :  { %19947 = vmatprep.subr.bf16.mxu1 %v22970_v38 }
 0x53c   :  { %5075 = vmatmul.mubr.f32.vlgmr.msra.gmra.mrb[30].mxu1 %v4611_v36 }
 0x53d   :  { %19949 = vmatpush1.bf16.msra.mxu1 %v22985_v0  ;;  %5765 = vmatprep.mubr.f32.mxu1 %v24876_v13 }
 0x53e   :  { %19951 = vmatprep.subr.bf16.mxu1 %v23012_v42 }
 0x541   :  { %19953 = vmatpush1.bf16.msra.mxu1 %v23018_v37 }
 0x542   :  { %19955 = vmatprep.subr.bf16.mxu1 %v23045_v56 }
 0x60f   :  { %v5076_v24 = vpop.f32.mrb[30].mxu1 }
 0x610   :  { %v5078_v1 = vpop.f32.mrb[31].mxu1 }
 0x611   :  { %v5081_v25 = vsel %vm2679_vm5, %v5076_v24, %v5078_v1 }
 0x612   :  { %v5082_v10 = vadd.f32 %v5081_v25, %v23218_v11 }
 0x614   :  { %21450 = vtanh.f32 %v5082_v10  ;;  %v5083_v47 = vmul.f32 0.5, %v5082_v10 }
 0x616   :  { %21452 = vtanh.f32 %v5083_v47 }
 0x61e   :  { %v21451_v35 = vpop.eup %21450 }
 0x61f   :  { %5090 = vrot.lane.b32.xlu1 %v21451_v35, %s21592_s4 }
 0x620   :  { %v21453_v17 = vpop.eup %21452 }
 0x621   :  { %v5085_v5 = vadd.f32 1.0, %v21453_v17 }
 0x623   :  { %v5086_v12 = vmul.f32 0.5, %v5085_v5 }
 0x625   :  { %v5088_v60 = vmul.f32 %v5086_v12, %v23225_v15 }
 0x691   :  { %v5091_v55 = vpop.permute.xlu1 %5090 }
 0x692   :  { %v5093_v41 = vmul.f32 %v5091_v55, %v5086_v12 }
 0x694   :  { %5095 = vrot.lane.b32.xlu0 %v5093_v41, %s21593_s6 }
 0x706   :  { %v5096_v57 = vpop.permute.xlu0 %5095 }
 0x707   :  { %v23273_v7 = vadd.f32 %v5096_v57, %v5088_v60 }
 0x709   :  { %21454 = vtanh.f32 %v23273_v7 }
 0x713   :  { %v21455_v11 = vpop.eup %21454 }
 0x714   :  { %5101 = vrot.lane.b32.xlu1 %v21455_v11, %s21592_s4 }
 0x786   :  { %v5102_v33 = vpop.permute.xlu1 %5101 }
 0x787   :  { %v23277_v54 = vmul.f32 %v5102_v33, %v5086_v12 }
 0x789   :  { %5112 = vrot.lane.b32.xlu0 %v23277_v54, %s21593_s6 }
 0x7fb   :  { %v23281_v6 = vpop.permute.xlu0 %5112 }
 0x7fc   :  { %v5114_v49 = vsel %vm3955_vm6, %v23281_v6, 0 }
 0x7fd   :  { %v5189_v53 = vand.u32 4294901760, %v5114_v49 }
 0x7ff   :  { %v5190_v8 = vsub.f32 %v5114_v49, %v5189_v53 }
 0x801   :  { %v5191_v39 = vand.u32 4294901760, %v5190_v8 }
 0x803   :  { %v5192_v32 = vsub.f32 %v5190_v8, %v5191_v39 }
 0x805   :  { %v5193_v43 = vand.u32 4294901760, %v5192_v32 }
 0x807   :  { %5194 = vmatmul.mubr.f32.vlgmr.msra.gmra.mrb[20].mxu0 %v5193_v43 }
 0x808   :  { %19909 = vmatpush1.bf16.msra.mxu0 %v23049_v14  ;;  %5304 = vmatprep.mubr.f32.mxu0 %v24876_v13 }
 0x809   :  { %19911 = vmatprep.subr.bf16.mxu0 %v23059_v9 }
 0x80c   :  { %19913 = vmatpush1.bf16.msra.mxu0 %v23065_v61 }
 0x80d   :  { %19915 = vmatprep.subr.bf16.mxu0 %v23075_v29 }
 0x80f   :  { %5306 = vmatmul.mubr.f32.vlgmr.msra.gmra.mrb[20].mxu0 %v5189_v53 }
 0x810   :  { %19917 = vmatpush1.bf16.msra.mxu0 %v23084_v30  ;;  %5392 = vmatprep.mubr.f32.mxu0 %v24876_v13 }
 0x811   :  { %19919 = vmatprep.subr.bf16.mxu0 %v23089_v44 }
 0x814   :  { %19921 = vmatpush1.bf16.msra.mxu0 %v23098_v28 }
 0x815   :  { %19923 = vmatprep.subr.bf16.mxu0 %v22970_v38 }
 0x817   :  { %5395 = vmatmul.mubr.f32.vlgmr.msra.gmra.mrb[20].mxu0 %v5190_v8 }
 0x818   :  { %19925 = vmatpush1.bf16.msra.mxu0 %v22985_v0  ;;  %5473 = vmatprep.mubr.f32.mxu0 %v24876_v13 }
 0x819   :  { %19927 = vmatprep.subr.bf16.mxu0 %v23012_v42 }
 0x81c   :  { %19929 = vmatpush1.bf16.msra.mxu0 %v23018_v37 }
 0x81d   :  { %19931 = vmatprep.subr.bf16.mxu0 %v23124_v2 }
 0x81f   :  { %5477 = vmatmul.mubr.f32.vlgmr.msra.gmra.mrb[20].mxu0 %v5191_v39 }
 0x820   :  { %19933 = vmatpush1.bf16.msra.mxu0 %v23137_v51  ;;  %5571 = vmatprep.mubr.f32.mxu0 %v24876_v13 }
 0x821   :  { %19935 = vmatprep.subr.bf16.mxu0 %v23144_v18 }
 0x824   :  { %19937 = vmatpush1.bf16.msra.mxu0 %v23154_v4 }
 0x825   :  { %19939 = vmatprep.subr.bf16.mxu0 %v22970_v38 }
 0x827   :  { %5573 = vmatmul.mubr.f32.vlgmr.msra.gmra.mrb[20].mxu0 %v5189_v53 }
 0x828   :  { %19941 = vmatpush1.bf16.msra.mxu0 %v22985_v0  ;;  %5651 = vmatprep.mubr.f32.mxu0 %v24876_v13 }
 0x829   :  { %19943 = vmatprep.subr.bf16.mxu0 %v23012_v42 }
 0x82c   :  { %19945 = vmatpush1.bf16.msra.mxu0 %v23018_v37 }
 0x82d   :  { %19995 = vmatprep.subr.bf16.mxu0 %v22970_v38 }
 0x82f   :  { %5653 = vmatmul.mubr.f32.vlgmr.msra.gmra.mrb[20].mxu0 %v5189_v53 }
 0x830   :  { %19997 = vmatpush1.bf16.msra.mxu0 %v22985_v0  ;;  %6338 = vmatprep.mubr.f32.mxu0 %v24876_v13 }
 0x831   :  { %19999 = vmatprep.subr.bf16.mxu0 %v23012_v42 }
 0x834   :  { %20001 = vmatpush1.bf16.msra.mxu0 %v23018_v37 }
 0x835   :  { %20003 = vmatprep.subr.bf16.mxu0 %v23045_v56 }
 0x902   :  { %v5654_v52 = vpop.f32.mrb[20].mxu0 }
 0x903   :  { %v5656_v48 = vpop.f32.mrb[21].mxu0 }
 0x904   :  { %v5659_v15 = vsel %vm2679_vm5, %v5654_v52, %v5656_v48 }
 0x905   :  { %v5660_v21 = vadd.f32 %v5659_v15, %v23206_v62 }
 0x907   :  { %21456 = vtanh.f32 %v5660_v21  ;;  %v5661_v27 = vmul.f32 0.5, %v5660_v21 }
 0x909   :  { %21458 = vtanh.f32 %v5661_v27 }
 0x911   :  { %v21457_v45 = vpop.eup %21456 }
 0x912   :  { %5668 = vrot.lane.b32.xlu1 %v21457_v45, %s21592_s4 }
 0x913   :  { %v21459_v36 = vpop.eup %21458 }
 0x914   :  { %v5663_v26 = vadd.f32 1.0, %v21459_v36 }
 0x916   :  { %v5664_v59 = vmul.f32 0.5, %v5663_v26 }
 0x918   :  { %v5666_v24 = vmul.f32 %v5664_v59, %v23273_v7 }
 0x984   :  { %v5669_v23 = vpop.permute.xlu1 %5668 }
 0x985   :  { %v5671_v20 = vmul.f32 %v5669_v23, %v5664_v59 }
 0x987   :  { %5673 = vrot.lane.b32.xlu0 %v5671_v20, %s21593_s6 }
 0x9f9   :  { %v5674_v1 = vpop.permute.xlu0 %5673 }
 0x9fa   :  { %v23321_v25 = vadd.f32 %v5674_v1, %v5666_v24 }
 0x9fc   :  { %21460 = vtanh.f32 %v23321_v25 }
 0xa06   :  { %v21461_v62 = vpop.eup %21460 }
 0xa07   :  { %5679 = vrot.lane.b32.xlu1 %v21461_v62, %s21592_s4 }
 0xa79   :  { %v5680_v10 = vpop.permute.xlu1 %5679 }
 0xa7a   :  { %v23325_v35 = vmul.f32 %v5680_v10, %v5664_v59 }
 0xa7c   :  { %5689 = vrot.lane.b32.xlu0 %v23325_v35, %s21593_s6 }
 0xaee   :  { %v23329_v47 = vpop.permute.xlu0 %5689 }
 0xaef   :  { %v5691_v17 = vsel %vm3955_vm6, %v23329_v47, 0 }
 0xaf0   :  { %v5766_v5 = vand.u32 4294901760, %v5691_v17 }
 0xaf2   :  { %v5767_v12 = vsub.f32 %v5691_v17, %v5766_v5 }
 0xaf4   :  { %v5768_v55 = vand.u32 4294901760, %v5767_v12 }
 0xaf6   :  { %v5769_v41 = vsub.f32 %v5767_v12, %v5768_v55 }
 0xaf8   :  { %v5770_v60 = vand.u32 4294901760, %v5769_v41 }
 0xafa   :  { %5771 = vmatmul.mubr.f32.vlgmr.msra.gmra.mrb[32].mxu1 %v5770_v60 }
 0xafb   :  { %19957 = vmatpush1.bf16.msra.mxu1 %v23049_v14  ;;  %5881 = vmatprep.mubr.f32.mxu1 %v24876_v13 }
 0xafc   :  { %19959 = vmatprep.subr.bf16.mxu1 %v23059_v9 }
 0xaff   :  { %19961 = vmatpush1.bf16.msra.mxu1 %v23065_v61 }
 0xb00   :  { %19963 = vmatprep.subr.bf16.mxu1 %v23075_v29 }
 0xb02   :  { %5883 = vmatmul.mubr.f32.vlgmr.msra.gmra.mrb[32].mxu1 %v5766_v5 }
 0xb03   :  { %19965 = vmatpush1.bf16.msra.mxu1 %v23084_v30  ;;  %5969 = vmatprep.mubr.f32.mxu1 %v24876_v13 }
 0xb04   :  { %19967 = vmatprep.subr.bf16.mxu1 %v23089_v44 }
 0xb07   :  { %19969 = vmatpush1.bf16.msra.mxu1 %v23098_v28 }
 0xb08   :  { %19971 = vmatprep.subr.bf16.mxu1 %v22970_v38 }
 0xb0a   :  { %5972 = vmatmul.mubr.f32.vlgmr.msra.gmra.mrb[32].mxu1 %v5767_v12 }
 0xb0b   :  { %19973 = vmatpush1.bf16.msra.mxu1 %v22985_v0  ;;  %6050 = vmatprep.mubr.f32.mxu1 %v24876_v13 }
 0xb0c   :  { %19975 = vmatprep.subr.bf16.mxu1 %v23012_v42 }
 0xb0f   :  { %19977 = vmatpush1.bf16.msra.mxu1 %v23018_v37 }
 0xb10   :  { %19979 = vmatprep.subr.bf16.mxu1 %v23124_v2 }
 0xb12   :  { %6054 = vmatmul.mubr.f32.vlgmr.msra.gmra.mrb[32].mxu1 %v5768_v55 }
 0xb13   :  { %19981 = vmatpush1.bf16.msra.mxu1 %v23137_v51  ;;  %6148 = vmatprep.mubr.f32.mxu1 %v24876_v13 }
 0xb14   :  { %19983 = vmatprep.subr.bf16.mxu1 %v23144_v18 }
 0xb17   :  { %19985 = vmatpush1.bf16.msra.mxu1 %v23154_v4 }
 0xb18   :  { %19987 = vmatprep.subr.bf16.mxu1 %v22970_v38 }
 0xb1a   :  { %6150 = vmatmul.mubr.f32.vlgmr.msra.gmra.mrb[32].mxu1 %v5766_v5 }
 0xb1b   :  { %19989 = vmatpush1.bf16.msra.mxu1 %v22985_v0  ;;  %6228 = vmatprep.mubr.f32.mxu1 %v24876_v13 }
 0xb1c   :  { %19991 = vmatprep.subr.bf16.mxu1 %v23012_v42 }
 0xb1f   :  { %19993 = vmatpush1.bf16.msra.mxu1 %v23018_v37 }
 0xb20   :  { %20043 = vmatprep.subr.bf16.mxu1 %v22970_v38 }
 0xb22   :  { %6230 = vmatmul.mubr.f32.vlgmr.msra.gmra.mrb[32].mxu1 %v5766_v5 }
 0xb23   :  { %20045 = vmatpush1.bf16.msra.mxu1 %v22985_v0  ;;  %6916 = vmatprep.mubr.f32.mxu1 %v24876_v13 }
 0xb24   :  { %20047 = vmatprep.subr.bf16.mxu1 %v23012_v42 }
 0xb27   :  { %20049 = vmatpush1.bf16.msra.mxu1 %v23018_v37 }
 0xb28   :  { %20051 = vmatprep.subr.bf16.mxu1 %v23045_v56 }
 0xbf5   :  { %v6231_v57 = vpop.f32.mrb[32].mxu1 }
 0xbf6   :  { %v6233_v7 = vpop.f32.mrb[33].mxu1 }
 0xbf7   :  { %v6236_v11 = vsel %vm2679_vm5, %v6231_v57, %v6233_v7 }
 0xbf8   :  { %v6237_v33 = vadd.f32 %v6236_v11, %v23209_v46 }
 0xbfa   :  { %21462 = vtanh.f32 %v6237_v33  ;;  %v6238_v53 = vmul.f32 0.5, %v6237_v33 }
 0xbfc   :  { %21464 = vtanh.f32 %v6238_v53 }
 0xc04   :  { %v21463_v49 = vpop.eup %21462 }
 0xc05   :  { %6245 = vrot.lane.b32.xlu1 %v21463_v49, %s21592_s4 }
 0xc06   :  { %v21465_v8 = vpop.eup %21464 }
 0xc07   :  { %v6240_v39 = vadd.f32 1.0, %v21465_v8 }
 0xc09   :  { %v6241_v32 = vmul.f32 0.5, %v6240_v39 }
 0xc0b   :  { %v6243_v48 = vmul.f32 %v6241_v32, %v23321_v25 }
 0xc77   :  { %v6246_v43 = vpop.permute.xlu1 %6245 }
 0xc78   :  { %v6248_v52 = vmul.f32 %v6246_v43, %v6241_v32 }
 0xc7a   :  { %6250 = vrot.lane.b32.xlu0 %v6248_v52, %s21593_s6 }
 0xcec   :  { %v6251_v15 = vpop.permute.xlu0 %6250 }
 0xced   :  { %v23369_v21 = vadd.f32 %v6251_v15, %v6243_v48 }
 0xcef   :  { %21466 = vtanh.f32 %v23369_v21 }
 0xcf9   :  { %v21467_v46 = vpop.eup %21466 }
 0xcfa   :  { %6256 = vrot.lane.b32.xlu1 %v21467_v46, %s21592_s4 }
 0xd6c   :  { %v6257_v45 = vpop.permute.xlu1 %6256 }
 0xd6d   :  { %v23373_v27 = vmul.f32 %v6257_v45, %v6241_v32 }
 0xd6f   :  { %6262 = vrot.lane.b32.xlu0 %v23373_v27, %s21593_s6 }
 0xde1   :  { %v23377_v36 = vpop.permute.xlu0 %6262 }
 0xde2   :  { %v6264_v26 = vsel %vm3955_vm6, %v23377_v36, 0 }
 0xde3   :  { %v6339_v59 = vand.u32 4294901760, %v6264_v26 }
 0xde5   :  { %v6340_v23 = vsub.f32 %v6264_v26, %v6339_v59 }
 0xde7   :  { %v6341_v20 = vand.u32 4294901760, %v6340_v23 }
 0xde9   :  { %v6342_v24 = vsub.f32 %v6340_v23, %v6341_v20 }
 0xdeb   :  { %v6343_v1 = vand.u32 4294901760, %v6342_v24 }
 0xded   :  { %6344 = vmatmul.mubr.f32.vlgmr.msra.gmra.mrb[22].mxu0 %v6343_v1 }
 0xdee   :  { %20005 = vmatpush1.bf16.msra.mxu0 %v23049_v14  ;;  %6454 = vmatprep.mubr.f32.mxu0 %v24876_v13 }
 0xdef   :  { %20007 = vmatprep.subr.bf16.mxu0 %v23059_v9 }
 0xdf2   :  { %20009 = vmatpush1.bf16.msra.mxu0 %v23065_v61 }
 0xdf3   :  { %20011 = vmatprep.subr.bf16.mxu0 %v23075_v29 }
 0xdf5   :  { %6456 = vmatmul.mubr.f32.vlgmr.msra.gmra.mrb[22].mxu0 %v6339_v59 }
 0xdf6   :  { %20013 = vmatpush1.bf16.msra.mxu0 %v23084_v30  ;;  %6542 = vmatprep.mubr.f32.mxu0 %v24876_v13 }
 0xdf7   :  { %20015 = vmatprep.subr.bf16.mxu0 %v23089_v44 }
 0xdfa   :  { %20017 = vmatpush1.bf16.msra.mxu0 %v23098_v28 }
 0xdfb   :  { %20019 = vmatprep.subr.bf16.mxu0 %v22970_v38 }
 0xdfd   :  { %6545 = vmatmul.mubr.f32.vlgmr.msra.gmra.mrb[22].mxu0 %v6340_v23 }
 0xdfe   :  { %20021 = vmatpush1.bf16.msra.mxu0 %v22985_v0  ;;  %6623 = vmatprep.mubr.f32.mxu0 %v24876_v13 }
 0xdff   :  { %20023 = vmatprep.subr.bf16.mxu0 %v23012_v42 }
 0xe02   :  { %20025 = vmatpush1.bf16.msra.mxu0 %v23018_v37 }
 0xe03   :  { %20027 = vmatprep.subr.bf16.mxu0 %v23124_v2 }
 0xe05   :  { %6627 = vmatmul.mubr.f32.vlgmr.msra.gmra.mrb[22].mxu0 %v6341_v20 }
 0xe06   :  { %20029 = vmatpush1.bf16.msra.mxu0 %v23137_v51  ;;  %6721 = vmatprep.mubr.f32.mxu0 %v24876_v13 }
 0xe07   :  { %20031 = vmatprep.subr.bf16.mxu0 %v23144_v18 }
 0xe0a   :  { %20033 = vmatpush1.bf16.msra.mxu0 %v23154_v4 }
 0xe0b   :  { %20035 = vmatprep.subr.bf16.mxu0 %v22970_v38 }
 0xe0d   :  { %6723 = vmatmul.mubr.f32.vlgmr.msra.gmra.mrb[22].mxu0 %v6339_v59 }
 0xe0e   :  { %20037 = vmatpush1.bf16.msra.mxu0 %v22985_v0  ;;  %6801 = vmatprep.mubr.f32.mxu0 %v24876_v13 }
 0xe0f   :  { %20039 = vmatprep.subr.bf16.mxu0 %v23012_v42 }
 0xe12   :  { %20041 = vmatpush1.bf16.msra.mxu0 %v23018_v37 }
 0xe13   :  { %20091 = vmatprep.subr.bf16.mxu0 %v22970_v38 }
 0xe15   :  { %6803 = vmatmul.mubr.f32.vlgmr.msra.gmra.mrb[22].mxu0 %v6339_v59 }
 0xe16   :  { %20093 = vmatpush1.bf16.msra.mxu0 %v22985_v0  ;;  %7494 = vmatprep.mubr.f32.mxu0 %v24876_v13 }
 0xe17   :  { %20095 = vmatprep.subr.bf16.mxu0 %v23012_v42 }
 0xe1a   :  { %20097 = vmatpush1.bf16.msra.mxu0 %v23018_v37 }
 0xe1b   :  { %20099 = vmatprep.subr.bf16.mxu0 %v23045_v56 }
 0xee8   :  { %v6804_v25 = vpop.f32.mrb[22].mxu0 }
 0xee9   :  { %v6806_v62 = vpop.f32.mrb[23].mxu0 }
 0xeea   :  { %v6809_v10 = vsel %vm2679_vm5, %v6804_v25, %v6806_v62 }
 0xeeb   :  { %v6810_v17 = vadd.f32 %v6809_v10, %v23203_v34 }
 0xeed   :  { %21468 = vtanh.f32 %v6810_v17  ;;  %v6811_v12 = vmul.f32 0.5, %v6810_v17 }
 0xeef   :  { %21470 = vtanh.f32 %v6811_v12 }
 0xef7   :  { %v21469_v5 = vpop.eup %21468 }
 0xef8   :  { %6818 = vrot.lane.b32.xlu1 %v21469_v5, %s21592_s4 }
 0xef9   :  { %v21471_v55 = vpop.eup %21470 }
 0xefa   :  { %v6813_v41 = vadd.f32 1.0, %v21471_v55 }
 0xefc   :  { %v6814_v60 = vmul.f32 0.5, %v6813_v41 }
 0xefe   :  { %v6816_v11 = vmul.f32 %v6814_v60, %v23369_v21 }
 0xf6a   :  { %v6819_v57 = vpop.permute.xlu1 %6818 }
 0xf6b   :  { %v6821_v7 = vmul.f32 %v6819_v57, %v6814_v60 }
 0xf6d   :  { %6823 = vrot.lane.b32.xlu0 %v6821_v7, %s21593_s6 }
 0xfdf   :  { %v6824_v33 = vpop.permute.xlu0 %6823 }
 0xfe0   :  { %v23417_v49 = vadd.f32 %v6824_v33, %v6816_v11 }
 0xfe2   :  { %21472 = vtanh.f32 %v23417_v49 }
 0xfec   :  { %v21473_v34 = vpop.eup %21472 }
 0xfed   :  { %6829 = vrot.lane.b32.xlu1 %v21473_v34, %s21592_s4 }
0x105f   :  { %v6830_v53 = vpop.permute.xlu1 %6829 }
0x1060   :  { %v23421_v8 = vmul.f32 %v6830_v53, %v6814_v60 }
0x1062   :  { %6840 = vrot.lane.b32.xlu0 %v23421_v8, %s21593_s6 }
0x10d4   :  { %v23425_v39 = vpop.permute.xlu0 %6840 }
0x10d5   :  { %v6842_v32 = vsel %vm3955_vm6, %v23425_v39, 0 }
0x10d6   :  { %v6917_v43 = vand.u32 4294901760, %v6842_v32 }
0x10d8   :  { %v6918_v52 = vsub.f32 %v6842_v32, %v6917_v43 }
0x10da   :  { %v6919_v48 = vand.u32 4294901760, %v6918_v52 }
0x10dc   :  { %v6920_v15 = vsub.f32 %v6918_v52, %v6919_v48 }
0x10de   :  { %v6921_v21 = vand.u32 4294901760, %v6920_v15 }
0x10e0   :  { %6922 = vmatmul.mubr.f32.vlgmr.msra.gmra.mrb[34].mxu1 %v6921_v21 }
0x10e1   :  { %20053 = vmatpush1.bf16.msra.mxu1 %v23049_v14  ;;  %7032 = vmatprep.mubr.f32.mxu1 %v24876_v13 }
0x10e2   :  { %20055 = vmatprep.subr.bf16.mxu1 %v23059_v9 }
0x10e5   :  { %20057 = vmatpush1.bf16.msra.mxu1 %v23065_v61 }
0x10e6   :  { %20059 = vmatprep.subr.bf16.mxu1 %v23075_v29 }
0x10e8   :  { %7034 = vmatmul.mubr.f32.vlgmr.msra.gmra.mrb[34].mxu1 %v6917_v43 }
0x10e9   :  { %20061 = vmatpush1.bf16.msra.mxu1 %v23084_v30  ;;  %7120 = vmatprep.mubr.f32.mxu1 %v24876_v13 }
0x10ea   :  { %20063 = vmatprep.subr.bf16.mxu1 %v23089_v44 }
0x10ed   :  { %20065 = vmatpush1.bf16.msra.mxu1 %v23098_v28 }
0x10ee   :  { %20067 = vmatprep.subr.bf16.mxu1 %v22970_v38 }
0x10f0   :  { %7123 = vmatmul.mubr.f32.vlgmr.msra.gmra.mrb[34].mxu1 %v6918_v52 }
0x10f1   :  { %20069 = vmatpush1.bf16.msra.mxu1 %v22985_v0  ;;  %7201 = vmatprep.mubr.f32.mxu1 %v24876_v13 }
0x10f2   :  { %20071 = vmatprep.subr.bf16.mxu1 %v23012_v42 }
0x10f5   :  { %20073 = vmatpush1.bf16.msra.mxu1 %v23018_v37 }
0x10f6   :  { %20075 = vmatprep.subr.bf16.mxu1 %v23124_v2 }
0x10f8   :  { %7205 = vmatmul.mubr.f32.vlgmr.msra.gmra.mrb[34].mxu1 %v6919_v48 }
0x10f9   :  { %20077 = vmatpush1.bf16.msra.mxu1 %v23137_v51  ;;  %7299 = vmatprep.mubr.f32.mxu1 %v24876_v13 }
0x10fa   :  { %20079 = vmatprep.subr.bf16.mxu1 %v23144_v18 }
0x10fd   :  { %20081 = vmatpush1.bf16.msra.mxu1 %v23154_v4 }
0x10fe   :  { %20083 = vmatprep.subr.bf16.mxu1 %v22970_v38 }
0x1100   :  { %7301 = vmatmul.mubr.f32.vlgmr.msra.gmra.mrb[34].mxu1 %v6917_v43 }
0x1101   :  { %20085 = vmatpush1.bf16.msra.mxu1 %v22985_v0  ;;  %7379 = vmatprep.mubr.f32.mxu1 %v24876_v13 }
0x1102   :  { %20087 = vmatprep.subr.bf16.mxu1 %v23012_v42 }
0x1105   :  { %20089 = vmatpush1.bf16.msra.mxu1 %v23018_v37 }
0x1106   :  { %20139 = vmatprep.subr.bf16.mxu1 %v22970_v38 }
0x1108   :  { %7381 = vmatmul.mubr.f32.vlgmr.msra.gmra.mrb[34].mxu1 %v6917_v43 }
0x1109   :  { %20141 = vmatpush1.bf16.msra.mxu1 %v22985_v0  ;;  %8071 = vmatprep.mubr.f32.mxu1 %v24876_v13 }
0x110a   :  { %20143 = vmatprep.subr.bf16.mxu1 %v23012_v42 }
0x110d   :  { %20145 = vmatpush1.bf16.msra.mxu1 %v23018_v37 }
0x110e   :  { %20147 = vmatprep.subr.bf16.mxu1 %v23045_v56 }
0x11db   :  { %v7382_v46 = vpop.f32.mrb[34].mxu1 }
0x11dc   :  { %v7384_v45 = vpop.f32.mrb[35].mxu1 }
0x11dd   :  { %v7387_v26 = vsel %vm2679_vm5, %v7382_v46, %v7384_v45 }
0x11de   :  { %v7388_v59 = vadd.f32 %v7387_v26, %v23212_v63 }
0x11e0   :  { %21474 = vtanh.f32 %v7388_v59  ;;  %v7389_v20 = vmul.f32 0.5, %v7388_v59 }
0x11e2   :  { %21476 = vtanh.f32 %v7389_v20 }
0x11ea   :  { %v21475_v23 = vpop.eup %21474 }
0x11eb   :  { %7396 = vrot.lane.b32.xlu1 %v21475_v23, %s21592_s4 }
0x11ec   :  { %v21477_v24 = vpop.eup %21476 }
0x11ed   :  { %v7391_v1 = vadd.f32 1.0, %v21477_v24 }
0x11ef   :  { %v7392_v25 = vmul.f32 0.5, %v7391_v1 }
0x11f1   :  { %v7394_v17 = vmul.f32 %v7392_v25, %v23417_v49 }
0x125d   :  { %v7397_v62 = vpop.permute.xlu1 %7396 }
0x125e   :  { %v7399_v10 = vmul.f32 %v7397_v62, %v7392_v25 }
0x1260   :  { %7401 = vrot.lane.b32.xlu0 %v7399_v10, %s21593_s6 }
0x12d2   :  { %v7402_v5 = vpop.permute.xlu0 %7401 }
0x12d3   :  { %v23465_v12 = vadd.f32 %v7402_v5, %v7394_v17 }
0x12d5   :  { %21478 = vtanh.f32 %v23465_v12 }
0x12df   :  { %v21479_v63 = vpop.eup %21478 }
0x12e0   :  { %7407 = vrot.lane.b32.xlu1 %v21479_v63, %s21592_s4 }
0x1352   :  { %v7408_v55 = vpop.permute.xlu1 %7407 }
0x1353   :  { %v23469_v41 = vmul.f32 %v7408_v55, %v7392_v25 }
0x1355   :  { %7418 = vrot.lane.b32.xlu0 %v23469_v41, %s21593_s6 }
0x13c7   :  { %v23473_v60 = vpop.permute.xlu0 %7418 }
0x13c8   :  { %v7420_v57 = vsel %vm3955_vm6, %v23473_v60, 0 }
0x13c9   :  { %v7495_v7 = vand.u32 4294901760, %v7420_v57 }
0x13cb   :  { %v7496_v11 = vsub.f32 %v7420_v57, %v7495_v7 }
0x13cd   :  { %v7497_v33 = vand.u32 4294901760, %v7496_v11 }
0x13cf   :  { %v7498_v49 = vsub.f32 %v7496_v11, %v7497_v33 }
0x13d1   :  { %v7499_v34 = vand.u32 4294901760, %v7498_v49 }
0x13d3   :  { %7500 = vmatmul.mubr.f32.vlgmr.msra.gmra.mrb[24].mxu0 %v7499_v34 }
0x13d4   :  { %20101 = vmatpush1.bf16.msra.mxu0 %v23049_v14  ;;  %7610 = vmatprep.mubr.f32.mxu0 %v24876_v13 }
0x13d5   :  { %20103 = vmatprep.subr.bf16.mxu0 %v23059_v9 }
0x13d8   :  { %20105 = vmatpush1.bf16.msra.mxu0 %v23065_v61 }
0x13d9   :  { %20107 = vmatprep.subr.bf16.mxu0 %v23075_v29 }
0x13db   :  { %7612 = vmatmul.mubr.f32.vlgmr.msra.gmra.mrb[24].mxu0 %v7495_v7 }
0x13dc   :  { %20109 = vmatpush1.bf16.msra.mxu0 %v23084_v30  ;;  %7698 = vmatprep.mubr.f32.mxu0 %v24876_v13 }
0x13dd   :  { %20111 = vmatprep.subr.bf16.mxu0 %v23089_v44 }
0x13e0   :  { %20113 = vmatpush1.bf16.msra.mxu0 %v23098_v28 }
0x13e1   :  { %20115 = vmatprep.subr.bf16.mxu0 %v22970_v38 }
0x13e3   :  { %7701 = vmatmul.mubr.f32.vlgmr.msra.gmra.mrb[24].mxu0 %v7496_v11 }
0x13e4   :  { %20117 = vmatpush1.bf16.msra.mxu0 %v22985_v0  ;;  %7779 = vmatprep.mubr.f32.mxu0 %v24876_v13 }
0x13e5   :  { %20119 = vmatprep.subr.bf16.mxu0 %v23012_v42 }
0x13e8   :  { %20121 = vmatpush1.bf16.msra.mxu0 %v23018_v37 }
0x13e9   :  { %20123 = vmatprep.subr.bf16.mxu0 %v23124_v2 }
0x13eb   :  { %7783 = vmatmul.mubr.f32.vlgmr.msra.gmra.mrb[24].mxu0 %v7497_v33 }
0x13ec   :  { %20125 = vmatpush1.bf16.msra.mxu0 %v23137_v51  ;;  %7877 = vmatprep.mubr.f32.mxu0 %v24876_v13 }
0x13ed   :  { %20127 = vmatprep.subr.bf16.mxu0 %v23144_v18 }
0x13f0   :  { %20129 = vmatpush1.bf16.msra.mxu0 %v23154_v4 }
0x13f1   :  { %20131 = vmatprep.subr.bf16.mxu0 %v22970_v38 }
0x13f3   :  { %7879 = vmatmul.mubr.f32.vlgmr.msra.gmra.mrb[24].mxu0 %v7495_v7 }
0x13f4   :  { %20133 = vmatpush1.bf16.msra.mxu0 %v22985_v0  ;;  %7957 = vmatprep.mubr.f32.mxu0 %v24876_v13 }
0x13f5   :  { %20135 = vmatprep.subr.bf16.mxu0 %v23012_v42 }
0x13f8   :  { %20137 = vmatpush1.bf16.msra.mxu0 %v23018_v37 }
0x13f9   :  { %20187 = vmatprep.subr.bf16.mxu0 %v22970_v38 }
0x13fb   :  { %7959 = vmatmul.mubr.f32.vlgmr.msra.gmra.mrb[24].mxu0 %v7495_v7 }
0x13fc   :  { %20189 = vmatpush1.bf16.msra.mxu0 %v22985_v0  ;;  %8644 = vmatprep.mubr.f32.mxu0 %v24876_v13 }
0x13fd   :  { %20191 = vmatprep.subr.bf16.mxu0 %v23012_v42 }
0x1400   :  { %20193 = vmatpush1.bf16.msra.mxu0 %v23018_v37 }
0x1401   :  { %20195 = vmatprep.subr.bf16.mxu0 %v23045_v56 }
0x14ce   :  { %v7960_v53 = vpop.f32.mrb[24].mxu0 }
0x14cf   :  { %v7962_v32 = vpop.f32.mrb[25].mxu0 }
0x14d0   :  { %v7965_v43 = vsel %vm2679_vm5, %v7960_v53, %v7962_v32 }
0x14d1   :  { %v7966_v52 = vadd.f32 %v7965_v43, %v23194_v58 }
0x14d3   :  { %21480 = vtanh.f32 %v7966_v52  ;;  %v7967_v15 = vmul.f32 0.5, %v7966_v52 }
0x14d5   :  { %21482 = vtanh.f32 %v7967_v15 }
0x14dd   :  { %v21481_v48 = vpop.eup %21480 }
0x14de   :  { %7974 = vrot.lane.b32.xlu1 %v21481_v48, %s21592_s4 }
0x14df   :  { %v21483_v21 = vpop.eup %21482 }
0x14e0   :  { %v7969_v46 = vadd.f32 1.0, %v21483_v21 }
0x14e2   :  { %v7970_v45 = vmul.f32 0.5, %v7969_v46 }
0x14e4   :  { %v7972_v23 = vmul.f32 %v7970_v45, %v23465_v12 }
0x1550   :  { %v7975_v26 = vpop.permute.xlu1 %7974 }
0x1551   :  { %v7977_v59 = vmul.f32 %v7975_v26, %v7970_v45 }
0x1553   :  { %7979 = vrot.lane.b32.xlu0 %v7977_v59, %s21593_s6 }
0x15c5   :  { %v7980_v20 = vpop.permute.xlu0 %7979 }
0x15c6   :  { %v23513_v24 = vadd.f32 %v7980_v20, %v7972_v23 }
0x15c8   :  { %21484 = vtanh.f32 %v23513_v24 }
0x15d2   :  { %v21485_v58 = vpop.eup %21484 }
0x15d3   :  { %7985 = vrot.lane.b32.xlu1 %v21485_v58, %s21592_s4 }
0x1645   :  { %v7986_v1 = vpop.permute.xlu1 %7985 }
0x1646   :  { %v23517_v25 = vmul.f32 %v7986_v1, %v7970_v45 }
0x1648   :  { %7995 = vrot.lane.b32.xlu0 %v23517_v25, %s21593_s6 }
0x16ba   :  { %v23521_v62 = vpop.permute.xlu0 %7995 }
0x16bb   :  { %v7997_v10 = vsel %vm3955_vm6, %v23521_v62, 0 }
0x16bc   :  { %v8072_v17 = vand.u32 4294901760, %v7997_v10 }
0x16be   :  { %v8073_v5 = vsub.f32 %v7997_v10, %v8072_v17 }
0x16c0   :  { %v8074_v12 = vand.u32 4294901760, %v8073_v5 }
0x16c2   :  { %v8075_v63 = vsub.f32 %v8073_v5, %v8074_v12 }
0x16c4   :  { %v8076_v55 = vand.u32 4294901760, %v8075_v63 }
0x16c6   :  { %8077 = vmatmul.mubr.f32.vlgmr.msra.gmra.mrb[36].mxu1 %v8076_v55 }
0x16c7   :  { %20149 = vmatpush1.bf16.msra.mxu1 %v23049_v14  ;;  %8187 = vmatprep.mubr.f32.mxu1 %v24876_v13 }
0x16c8   :  { %20151 = vmatprep.subr.bf16.mxu1 %v23059_v9 }
0x16cb   :  { %20153 = vmatpush1.bf16.msra.mxu1 %v23065_v61 }
0x16cc   :  { %20155 = vmatprep.subr.bf16.mxu1 %v23075_v29 }
0x16ce   :  { %8189 = vmatmul.mubr.f32.vlgmr.msra.gmra.mrb[36].mxu1 %v8072_v17 }
0x16cf   :  { %20157 = vmatpush1.bf16.msra.mxu1 %v23084_v30  ;;  %8275 = vmatprep.mubr.f32.mxu1 %v24876_v13 }
0x16d0   :  { %20159 = vmatprep.subr.bf16.mxu1 %v23089_v44 }
0x16d3   :  { %20161 = vmatpush1.bf16.msra.mxu1 %v23098_v28 }
0x16d4   :  { %20163 = vmatprep.subr.bf16.mxu1 %v22970_v38 }
0x16d6   :  { %8278 = vmatmul.mubr.f32.vlgmr.msra.gmra.mrb[36].mxu1 %v8073_v5 }
0x16d7   :  { %20165 = vmatpush1.bf16.msra.mxu1 %v22985_v0  ;;  %8356 = vmatprep.mubr.f32.mxu1 %v24876_v13 }
0x16d8   :  { %20167 = vmatprep.subr.bf16.mxu1 %v23012_v42 }
0x16db   :  { %20169 = vmatpush1.bf16.msra.mxu1 %v23018_v37 }
0x16dc   :  { %20171 = vmatprep.subr.bf16.mxu1 %v23124_v2 }
0x16de   :  { %8360 = vmatmul.mubr.f32.vlgmr.msra.gmra.mrb[36].mxu1 %v8074_v12 }
0x16df   :  { %20173 = vmatpush1.bf16.msra.mxu1 %v23137_v51  ;;  %8454 = vmatprep.mubr.f32.mxu1 %v24876_v13 }
0x16e0   :  { %20175 = vmatprep.subr.bf16.mxu1 %v23144_v18 }
0x16e3   :  { %20177 = vmatpush1.bf16.msra.mxu1 %v23154_v4 }
0x16e4   :  { %20179 = vmatprep.subr.bf16.mxu1 %v22970_v38 }
0x16e6   :  { %8456 = vmatmul.mubr.f32.vlgmr.msra.gmra.mrb[36].mxu1 %v8072_v17 }
0x16e7   :  { %20181 = vmatpush1.bf16.msra.mxu1 %v22985_v0  ;;  %8534 = vmatprep.mubr.f32.mxu1 %v24876_v13 }
0x16e8   :  { %20183 = vmatprep.subr.bf16.mxu1 %v23012_v42 }
0x16eb   :  { %20185 = vmatpush1.bf16.msra.mxu1 %v23018_v37 }
0x16ec   :  { %20235 = vmatprep.subr.bf16.mxu1 %v22970_v38 }
0x16ee   :  { %8536 = vmatmul.mubr.f32.vlgmr.msra.gmra.mrb[36].mxu1 %v8072_v17 }
0x16ef   :  { %20237 = vmatpush1.bf16.msra.mxu1 %v22985_v0  ;;  %9222 = vmatprep.mubr.f32.mxu1 %v24876_v13 }
0x16f0   :  { %20239 = vmatprep.subr.bf16.mxu1 %v23012_v42 }
0x16f3   :  { %20241 = vmatpush1.bf16.msra.mxu1 %v23018_v37 }
0x16f4   :  { %20243 = vmatprep.subr.bf16.mxu1 %v23045_v56 }
0x17c1   :  { %v8537_v57 = vpop.f32.mrb[36].mxu1 }
0x17c2   :  { %v8539_v7 = vpop.f32.mrb[37].mxu1 }
0x17c3   :  { %v8542_v11 = vsel %vm2679_vm5, %v8537_v57, %v8539_v7 }
0x17c4   :  { %v8543_v33 = vadd.f32 %v8542_v11, %v23197_v16 }
0x17c6   :  { %21486 = vtanh.f32 %v8543_v33  ;;  %v8544_v34 = vmul.f32 0.5, %v8543_v33 }
0x17c8   :  { %21488 = vtanh.f32 %v8544_v34 }
0x17d0   :  { %v21487_v49 = vpop.eup %21486 }
0x17d1   :  { %8551 = vrot.lane.b32.xlu1 %v21487_v49, %s21592_s4 }
0x17d2   :  { %v21489_v53 = vpop.eup %21488 }
0x17d3   :  { %v8546_v32 = vadd.f32 1.0, %v21489_v53 }
0x17d5   :  { %v8547_v43 = vmul.f32 0.5, %v8546_v32 }
0x17d7   :  { %v8549_v56 = vmul.f32 %v8547_v43, %v23513_v24 }
0x1843   :  { %v8552_v52 = vpop.permute.xlu1 %8551 }
0x1844   :  { %v8554_v48 = vmul.f32 %v8552_v52, %v8547_v43 }
0x1846   :  { %8556 = vrot.lane.b32.xlu0 %v8554_v48, %s21593_s6 }
0x18b8   :  { %v8557_v15 = vpop.permute.xlu0 %8556 }
0x18b9   :  { %v8559_v21 = vadd.f32 %v8557_v15, %v8549_v56 }
0x18bb   :  { %21490 = vtanh.f32 %v8559_v21 }
0x18c5   :  { %v21491_v46 = vpop.eup %21490 }
0x18c6   :  { %8562 = vrot.lane.b32.xlu1 %v21491_v46, %s21592_s4 }
0x1938   :  { %v8563_v16 = vpop.permute.xlu1 %8562 }
0x1939   :  { %v23562_v45 = vmul.f32 %v8563_v16, %v8547_v43 }
0x193b   :  { %8568 = vrot.lane.b32.xlu0 %v23562_v45, %s21593_s6 }
0x19ad   :  { %v23566_v26 = vpop.permute.xlu0 %8568 }
0x19ae   :  { %v8570_v59 = vsel %vm3955_vm6, %v23566_v26, 0 }
0x19af   :  { %v8645_v23 = vand.u32 4294901760, %v8570_v59 }
0x19b1   :  { %v8646_v20 = vsub.f32 %v8570_v59, %v8645_v23 }
0x19b3   :  { %v8647_v24 = vand.u32 4294901760, %v8646_v20 }
0x19b5   :  { %v8648_v58 = vsub.f32 %v8646_v20, %v8647_v24 }
0x19b7   :  { %v8649_v1 = vand.u32 4294901760, %v8648_v58 }
0x19b9   :  { %8650 = vmatmul.mubr.f32.vlgmr.msra.gmra.mrb[26].mxu0 %v8649_v1 }
0x19ba   :  { %20197 = vmatpush1.bf16.msra.mxu0 %v23049_v14  ;;  %8760 = vmatprep.mubr.f32.mxu0 %v24876_v13 }
0x19bb   :  { %20199 = vmatprep.subr.bf16.mxu0 %v23059_v9 }
0x19be   :  { %20201 = vmatpush1.bf16.msra.mxu0 %v23065_v61 }
0x19bf   :  { %20203 = vmatprep.subr.bf16.mxu0 %v23075_v29 }
0x19c1   :  { %8762 = vmatmul.mubr.f32.vlgmr.msra.gmra.mrb[26].mxu0 %v8645_v23 }
0x19c2   :  { %20205 = vmatpush1.bf16.msra.mxu0 %v23084_v30  ;;  %8848 = vmatprep.mubr.f32.mxu0 %v24876_v13 }
0x19c3   :  { %20207 = vmatprep.subr.bf16.mxu0 %v23089_v44 }
0x19c6   :  { %20209 = vmatpush1.bf16.msra.mxu0 %v23098_v28 }
0x19c7   :  { %20211 = vmatprep.subr.bf16.mxu0 %v22970_v38 }
0x19c9   :  { %8851 = vmatmul.mubr.f32.vlgmr.msra.gmra.mrb[26].mxu0 %v8646_v20 }
0x19ca   :  { %20213 = vmatpush1.bf16.msra.mxu0 %v22985_v0  ;;  %8929 = vmatprep.mubr.f32.mxu0 %v24876_v13 }
0x19cb   :  { %20215 = vmatprep.subr.bf16.mxu0 %v23012_v42 }
0x19ce   :  { %20217 = vmatpush1.bf16.msra.mxu0 %v23018_v37 }
0x19cf   :  { %20219 = vmatprep.subr.bf16.mxu0 %v23124_v2 }
0x19d1   :  { %8933 = vmatmul.mubr.f32.vlgmr.msra.gmra.mrb[26].mxu0 %v8647_v24  ;;  %v10457_v24 = vld [vmem:[%s24864_s10] sm:$0xff] }
0x19d2   :  { %20221 = vmatpush1.bf16.msra.mxu0 %v23137_v51  ;;  %9027 = vmatprep.mubr.f32.mxu0 %v24876_v13 }
0x19d3   :  { %20223 = vmatprep.subr.bf16.mxu0 %v23144_v18 }
0x19d6   :  { %20225 = vmatpush1.bf16.msra.mxu0 %v23154_v4 }
0x19d7   :  { %20227 = vmatprep.subr.bf16.mxu0 %v22970_v38 }
0x19d9   :  { %9029 = vmatmul.mubr.f32.vlgmr.msra.gmra.mrb[26].mxu0 %v8645_v23 }
0x19da   :  { %20229 = vmatpush1.bf16.msra.mxu0 %v22985_v0  ;;  %9107 = vmatprep.mubr.f32.mxu0 %v24876_v13 }
0x19db   :  { %20231 = vmatprep.subr.bf16.mxu0 %v23012_v42 }
0x19de   :  { %20233 = vmatpush1.bf16.msra.mxu0 %v23018_v37 }
0x19df   :  { %20282 = vmatprep.subr.bf16.mxu0 %v24878_v3 }
0x19e1   :  { %9109 = vmatmul.mubr.f32.vlgmr.msra.gmra.mrb[26].mxu0 %v8645_v23 }
0x19e2   :  { %19008 = vmatprep.mubr.msk.f32.mxu0 %vm21589_vm0, %v24876_v13 }
0x1ab4   :  { %v9110_v10 = vpop.f32.mrb[26].mxu0 }
0x1ab5   :  { %v9112_v17 = vpop.f32.mrb[27].mxu0 }
0x1ab6   :  { %v9115_v5 = vsel %vm2679_vm5, %v9110_v10, %v9112_v17  ;;  %v10458_v10 = vld [vmem:[%s24864_s10 + $0x8] sm:$0xff]  ;;  %v10473_v17 = vand.u32 4294901760, %v10457_v24 }
0x1ab7   :  { %v9116_v12 = vadd.f32 %v9115_v5, %v23191_v19  ;;  %v10476_v5 = vand.u32 4294901760, %v10458_v10 }
0x1ab9   :  { %21492 = vtanh.f32 %v9116_v12  ;;  %v9117_v55 = vmul.f32 0.5, %v9116_v12 }
0x1abb   :  { %21494 = vtanh.f32 %v9117_v55 }
0x1ac3   :  { %v21493_v63 = vpop.eup %21492 }
0x1ac4   :  { %9124 = vrot.lane.b32.xlu1 %v21493_v63, %s21592_s4 }
0x1ac5   :  { %v21495_v57 = vpop.eup %21494 }
0x1ac6   :  { %v9119_v7 = vadd.f32 1.0, %v21495_v57  ;;  %v23680_v57 = vsub.f32 %v10457_v24, %v10473_v17  ;;  %v10464_v24 = vld [vmem:[%s24864_s10 + $0x38] sm:$0xff] }
0x1ac8   :  { %v9120_v11 = vmul.f32 0.5, %v9119_v7  ;;  %v23682_v7 = vpack.c.bf16 %v10476_v5, %v10473_v17 }
0x1aca   :  { %v9122_v34 = vmul.f32 %v9120_v11, %v8559_v21 }
0x1b36   :  { %v9125_v33 = vpop.permute.xlu1 %9124 }
0x1b37   :  { %v9127_v49 = vmul.f32 %v9125_v33, %v9120_v11  ;;  %v9811_v33 = vld [vmem:[%s24862_s8 + $0x10] sm:$0xff] }
0x1b39   :  { %9129 = vrot.lane.b32.xlu0 %v9127_v49, %s21593_s6  ;;  %v9812_v49 = vld [vmem:[%s24862_s8 + $0x18] sm:$0xff] }
0x1bab   :  { %v9130_v53 = vpop.permute.xlu0 %9129 }
0x1bac   :  { %v23602_v32 = vadd.f32 %v9130_v53, %v9122_v34  ;;  %v10459_v34 = vld [vmem:[%s24864_s10 + $0x10] sm:$0xff]  ;;  %v9841_v53 = vand.u32 4294901760, %v9811_v33 }
0x1bae   :  { %21496 = vtanh.f32 %v23602_v32 }
0x1bb8   :  { %v21497_v19 = vpop.eup %21496 }
0x1bb9   :  { %9135 = vrot.lane.b32.xlu1 %v21497_v19, %s21592_s4  ;;  %v10460_v19 = vld [vmem:[%s24864_s10 + $0x18] sm:$0xff] }
0x1c2b   :  { %v9136_v43 = vpop.permute.xlu1 %9135 }
0x1c2c   :  { %v23606_v52 = vmul.f32 %v9136_v43, %v9120_v11  ;;  %v23684_v11 = vsub.f32 %v10458_v10, %v10476_v5  ;;  %v10479_v43 = vand.u32 4294901760, %v10459_v34  ;;  %v10494_v10 = vand.u32 4294901760, %v10464_v24 }
0x1c2e   :  { %9146 = vrot.lane.b32.xlu0 %v23606_v52, %s21593_s6 }
0x1ca0   :  { %v23610_v48 = vpop.permute.xlu0 %9146 }
0x1ca1   :  { %v9148_v56 = vsel %vm3955_vm6, %v23610_v48, 0 }
0x1ca2   :  { %v9223_v15 = vand.u32 4294901760, %v9148_v56 }
0x1ca4   :  { %v9224_v21 = vsub.f32 %v9148_v56, %v9223_v15 }
0x1ca6   :  { %v9225_v46 = vand.u32 4294901760, %v9224_v21 }
0x1ca8   :  { %v9226_v16 = vsub.f32 %v9224_v21, %v9225_v46 }
0x1caa   :  { %v9227_v59 = vand.u32 4294901760, %v9226_v16  ;;  %v10461_v16 = vld [vmem:[%s24864_s10 + $0x20] sm:$0xff] }
0x1cac   :  { %9228 = vmatmul.mubr.f32.vlgmr.msra.gmra.mrb[38].mxu1 %v9227_v59 }
0x1cad   :  { %20245 = vmatpush1.bf16.msra.mxu1 %v23049_v14  ;;  %9338 = vmatprep.mubr.f32.mxu1 %v24876_v13 }
0x1cae   :  { %20247 = vmatprep.subr.bf16.mxu1 %v23059_v9 }
0x1cb1   :  { %20249 = vmatpush1.bf16.msra.mxu1 %v23065_v61 }
0x1cb2   :  { %20251 = vmatprep.subr.bf16.mxu1 %v23075_v29 }
0x1cb4   :  { %9340 = vmatmul.mubr.f32.vlgmr.msra.gmra.mrb[38].mxu1 %v9223_v15 }
0x1cb5   :  { %20253 = vmatpush1.bf16.msra.mxu1 %v23084_v30  ;;  %9426 = vmatprep.mubr.f32.mxu1 %v24876_v13 }
0x1cb6   :  { %20255 = vmatprep.subr.bf16.mxu1 %v23089_v44 }
0x1cb9   :  { %20257 = vmatpush1.bf16.msra.mxu1 %v23098_v28 }
0x1cba   :  { %20259 = vmatprep.subr.bf16.mxu1 %v22970_v38 }
0x1cbc   :  { %9429 = vmatmul.mubr.f32.vlgmr.msra.gmra.mrb[38].mxu1 %v9224_v21  ;;  %v9813_v21 = vld [vmem:[%s24862_s8 + $0x20] sm:$0xff] }
0x1cbd   :  { %20261 = vmatpush1.bf16.msra.mxu1 %v22985_v0  ;;  %9507 = vmatprep.mubr.f32.mxu1 %v24876_v13  ;;  %v9847_v59 = vand.u32 4294901760, %v9813_v21 }
0x1cbe   :  { %20263 = vmatprep.subr.bf16.mxu1 %v23012_v42 }
0x1cc1   :  { %20265 = vmatpush1.bf16.msra.mxu1 %v23018_v37 }
0x1cc2   :  { %20267 = vmatprep.subr.bf16.mxu1 %v23124_v2  ;;  %v9737_v2 = vrot.slane %v23517_v25, 2 }
0x1cc4   :  { %9511 = vmatmul.mubr.f32.vlgmr.msra.gmra.mrb[38].mxu1 %v9225_v46  ;;  %v9814_v46 = vld [vmem:[%s24862_s8 + $0x28] sm:$0xff] }
0x1cc5   :  { %20269 = vmatpush1.bf16.msra.mxu1 %v23137_v51  ;;  %9605 = vmatprep.mubr.f32.mxu1 %v24876_v13  ;;  %v9731_v51 = vrot.slane %v23562_v45, 2  ;;  %v9725_v45 = vrot.slane %v23606_v52, 2  ;;  %v10482_v52 = vand.u32 4294901760, %v10460_v19 }
0x1cc6   :  { %20271 = vmatprep.subr.bf16.mxu1 %v23144_v18  ;;  %v9761_v18 = vrot.slane %v23325_v35, 2  ;;  %v9809_v35 = vld [vmem:[%s24862_s8] sm:$0xff] }
0x1cc7   :  { %v9835_v58 = vand.u32 4294901760, %v9809_v35 }
0x1cc9   :  { %20273 = vmatpush1.bf16.msra.mxu1 %v23154_v4  ;;  %v9755_v4 = vrot.slane %v23373_v27, 2  ;;  %v9810_v27 = vld [vmem:[%s24862_s8 + $0x8] sm:$0xff]  ;;  %v23676_v63 = vsub.f32 %v9809_v35, %v9835_v58 }
0x1cca   :  { %20275 = vmatprep.subr.bf16.mxu1 %v22970_v38  ;;  %v9838_v1 = vand.u32 4294901760, %v9810_v27 }
0x1ccb   :  { %v24886_v17 = vand.u32 4294901760, %v23676_v63 }
0x1ccc   :  { %9607 = vmatmul.mubr.f32.vlgmr.msra.gmra.mrb[38].mxu1 %v9223_v15  ;;  %v23674_v12 = vpack.c.bf16 %v9838_v1, %v9835_v58  ;;  %v23678_v55 = vsub.f32 %v9810_v27, %v9838_v1 }
0x1ccd   :  { %20277 = vmatpush1.bf16.msra.mxu1 %v22985_v0  ;;  %9685 = vmatprep.mubr.f32.mxu1 %v24876_v13 }
0x1cce   :  { %20279 = vmatprep.subr.bf16.mxu1 %v23012_v42  ;;  %20284 = vmatpush3.bf16.msra.mxu0 %v23674_v12 }
0x1ccf   :  { %20285 = vmatprep.subr.bf16.mxu0 %v24878_v3 }
0x1cd1   :  { %20281 = vmatpush1.bf16.msra.mxu1 %v23018_v37 }
0x1cd2   :  { %20354 = vmatprep.subr.bf16.mxu1 %v24878_v3 }
0x1cd4   :  { %9687 = vmatmul.mubr.f32.vlgmr.msra.gmra.mrb[38].mxu1 %v9223_v15  ;;  %v23704_v15 = vpack.c.bf16 %v10482_v52, %v10479_v43 }
0x1cd5   :  { %19158 = vmatprep.mubr.msk.f32.mxu1 %vm21589_vm0, %v24876_v13  ;;  %20356 = vmatpush3.bf16.msra.mxu1 %v23682_v7 }
0x1cd6   :  { %20357 = vmatprep.subr.bf16.mxu1 %v24878_v3 }
0x1cd9   :  { %20359 = vmatpush3.bf16.msra.mxu1 %v23704_v15 }
0x1cda   :  { %20360 = vmatprep.subr.bf16.mxu1 %v24878_v3 }
0x1da7   :  { %v9688_v14 = vpop.f32.mrb[38].mxu1 }
0x1da8   :  { %v9690_v9 = vpop.f32.mrb[39].mxu1 }
0x1da9   :  { %v9693_v38 = vsel %vm2679_vm5, %v9688_v14, %v9690_v9  ;;  %v9850_v14 = vand.u32 4294901760, %v9814_v46  ;;  %v10462_v9 = vld [vmem:[%s24864_s10 + $0x28] sm:$0xff] }
0x1daa   :  { %v9694_v61 = vadd.f32 %v9693_v38, %v23200_v40  ;;  %v10485_v38 = vand.u32 4294901760, %v10461_v16 }
0x1dac   :  { %21498 = vtanh.f32 %v9694_v61  ;;  %v9695_v42 = vmul.f32 0.5, %v9694_v61  ;;  %v9775_v61 = vrot.slane %v23229_v50, 2 }
0x1dae   :  { %21500 = vtanh.f32 %v9695_v42  ;;  %v23722_v42 = vsub.f32 %v9811_v33, %v9841_v53  ;;  %v24885_v33 = vand.u32 4294901760, %v23678_v55 }
0x1db6   :  { %v21499_v0 = vpop.eup %21498 }
0x1db7   :  { %9702 = vrot.lane.b32.xlu1 %v21499_v0, %s21592_s4  ;;  %v10488_v0 = vand.u32 4294901760, %v10462_v9 }
0x1db8   :  { %v21501_v37 = vpop.eup %21500 }
0x1db9   :  { %v9697_v29 = vadd.f32 1.0, %v21501_v37 }
0x1dbb   :  { %v23645_v30 = vmul.f32 0.5, %v9697_v29  ;;  %v23726_v29 = vsub.f32 %v10459_v34, %v10479_v43  ;;  %v9767_v34 = vrot.slane %v23277_v54, 2  ;;  %v9948_v43 = vsub.f32 %v23678_v55, %v24885_v33 }
0x1dbd   :  { %v9700_v40 = vmul.f32 %v23645_v30, %v23602_v32  ;;  %v9844_v32 = vand.u32 4294901760, %v9812_v49 }
0x1dbf   :  { %v23702_v56 = vpack.c.bf16 %v9844_v32, %v9841_v53  ;;  %v23724_v37 = vsub.f32 %v9812_v49, %v9844_v32  ;;  %v24884_v49 = vand.u32 4294901760, %v23680_v57 }
0x1dc1   :  { %20287 = vmatpush3.bf16.msra.mxu0 %v23702_v56 }
0x1dc2   :  { %20288 = vmatprep.subr.bf16.mxu0 %v24878_v3 }
0x1e29   :  { %v9703_v44 = vpop.permute.xlu1 %9702 }
0x1e2a   :  { %v9705_v28 = vmul.f32 %v9703_v44, %v23645_v30  ;;  %v23728_v44 = vsub.f32 %v10460_v19, %v10482_v52  ;;  %v9941_v19 = vsub.f32 %v23676_v63, %v24886_v17  ;;  %v10579_v52 = vsub.f32 %v23680_v57, %v24884_v49 }
0x1e2c   :  { %9707 = vrot.lane.b32.xlu0 %v9705_v28, %s21593_s6  ;;  %v23731_v28 = vpack.c.bf16 %v9850_v14, %v9847_v59 }
0x1e2e   :  { %20290 = vmatpush3.bf16.msra.mxu0 %v23731_v28 }
0x1e2f   :  { %20291 = vmatprep.subr.bf16.mxu0 %v24878_v3 }
0x1e30   :  { %9738 = vrot.lane.b32.xlu0 %v9737_v2, %s21592_s4  ;;  %v23733_v2 = vsub.f32 %v9813_v21, %v9847_v59  ;;  %v24882_v21 = vand.u32 4294901760, %v23722_v42  ;;  %v24881_v59 = vand.u32 4294901760, %v23724_v37 }
0x1e34   :  { %9732 = vrot.lane.b32.xlu0 %v9731_v51, %s21592_s4  ;;  %v23735_v51 = vsub.f32 %v9814_v46, %v9850_v14  ;;  %v9749_v46 = vrot.slane %v23421_v8, 2  ;;  %v24880_v14 = vand.u32 4294901760, %v23726_v29  ;;  %v23798_v8 = vsub.f32 %v10464_v24, %v10494_v10 }
0x1e35   :  { %v9968_v24 = vand.u32 4294901760, %v23733_v2 }
0x1e38   :  { %9762 = vrot.lane.b32.xlu0 %v9761_v18, %s21592_s4  ;;  %v23737_v18 = vpack.c.bf16 %v10488_v0, %v10485_v38 }
0x1e3a   :  { %20362 = vmatpush3.bf16.msra.mxu1 %v23737_v18 }
0x1e3b   :  { %20363 = vmatprep.subr.bf16.mxu1 %v24878_v3 }
0x1e3c   :  { %9756 = vrot.lane.b32.xlu0 %v9755_v4, %s21592_s4  ;;  %v9815_v4 = vld [vmem:[%s24862_s8 + $0x30] sm:$0xff] }
0x1e3d   :  { %v9853_v35 = vand.u32 4294901760, %v9815_v4 }
0x1e9e   :  { %v9708_v23 = vpop.permute.xlu0 %9707 }
0x1e9f   :  { %v9710_v20 = vadd.f32 %v9708_v23, %v9700_v40  ;;  %v9816_v40 = vld [vmem:[%s24862_s8 + $0x38] sm:$0xff]  ;;  %v10463_v23 = vld [vmem:[%s24864_s10 + $0x30] sm:$0xff] }
0x1ea0   :  { %v9856_v27 = vand.u32 4294901760, %v9816_v40  ;;  %v10491_v1 = vand.u32 4294901760, %v10463_v23 }
0x1ea1   :  { %21502 = vtanh.f32 %v9710_v20 }
0x1ea2   :  { %v23761_v5 = vpack.c.bf16 %v9856_v27, %v9853_v35  ;;  %v23768_v32 = vpack.c.bf16 %v10494_v10, %v10491_v1 }
0x1ea4   :  { %20293 = vmatpush3.bf16.msra.mxu0 %v23761_v5  ;;  %20365 = vmatpush3.bf16.msra.mxu1 %v23768_v32 }
0x1ea5   :  { %20294 = vmatprep.subr.bf16.mxu0 %v24878_v3  ;;  %20366 = vmatprep.subr.bf16.mxu1 %v24878_v3 }
0x1eab   :  { %v21503_v25 = vpop.eup %21502 }
0x1eac   :  { %9713 = vrot.lane.b32.xlu1 %v21503_v25, %s21592_s4  ;;  %v23748_v25 = vsub.f32 %v10461_v16, %v10485_v38  ;;  %v9942_v16 = vand.u32 4294901760, %v9941_v19  ;;  %v23789_v38 = vsub.f32 %v9815_v4, %v9853_v35  ;;  %v9962_v4 = vsub.f32 %v23724_v37, %v24881_v59 }
0x1eae   :  { %v10606_v3 = vand.u32 4294901760, %v23748_v25 }
0x1eb0   :  { %9726 = vrot.lane.b32.xlu1 %v9725_v45, %s21592_s4  ;;  %v23750_v45 = vsub.f32 %v10462_v9, %v10488_v0  ;;  %v9743_v9 = vrot.slane %v23469_v41, 2  ;;  %v23791_v0 = vsub.f32 %v9816_v40, %v9856_v27  ;;  %v9955_v41 = vsub.f32 %v23722_v42, %v24882_v21 }
0x1eb1   :  { %v10593_v40 = vsub.f32 %v23726_v29, %v24880_v14 }
0x1eb2   :  { %v9956_v10 = vand.u32 4294901760, %v9955_v41 }
0x1f1e   :  { %v9714_v20 = vpop.permute.xlu1 %9713 }
0x1f1f   :  { %v9716_v58 = vmul.f32 %v9714_v20, %v23645_v30  ;;  %v24883_v30 = vand.u32 4294901760, %v23684_v11  ;;  %v23794_v20 = vsub.f32 %v10463_v23, %v10491_v1  ;;  %v10599_v23 = vand.u32 4294901760, %v23728_v44 }
0x1f20   :  { %v9975_v1 = vand.u32 4294901760, %v23735_v51 }
0x1f21   :  { %v9719_v53 = vrot.slane %v9716_v58, 2  ;;  %9772 = vrot.lane.b32.xlu0 %v9716_v58, %s21593_s6  ;;  %v10586_v54 = vsub.f32 %v23684_v11, %v24883_v30  ;;  %v9949_v58 = vand.u32 4294901760, %v9948_v43  ;;  %v10594_v43 = vand.u32 4294901760, %v10593_v40 }
0x1f22   :  { %v9976_v13 = vsub.f32 %v23735_v51, %v9975_v1  ;;  %v10607_v40 = vsub.f32 %v23748_v25, %v10606_v3 }
0x1f23   :  { %9720 = vrot.lane.b32.xlu1 %v9719_v53, %s21592_s4  ;;  %v10580_v53 = vand.u32 4294901760, %v10579_v52  ;;  %v10587_v19 = vand.u32 4294901760, %v10586_v54  ;;  %v23812_v35 = vpack.c.bf16 %v9949_v58, %v9942_v16  ;;  %v10600_v52 = vsub.f32 %v23728_v44, %v10599_v23 }
0x1f24   :  { %v9969_v54 = vsub.f32 %v23733_v2, %v9968_v24  ;;  %v10608_v30 = vand.u32 4294901760, %v10607_v40 }
0x1f25   :  { %9768 = vrot.lane.b32.xlu0 %v9767_v34, %s21592_s4  ;;  %v23814_v27 = vpack.c.bf16 %v10587_v19, %v10580_v53  ;;  %v9963_v34 = vand.u32 4294901760, %v9962_v4  ;;  %v10601_v58 = vand.u32 4294901760, %v10600_v52  ;;  %v9982_v53 = vand.u32 4294901760, %v23789_v38 }
0x1f26   :  { %v9989_v19 = vand.u32 4294901760, %v23791_v0  ;;  %v9970_v41 = vand.u32 4294901760, %v9969_v54  ;;  %v9977_v4 = vand.u32 4294901760, %v9976_v13 }
0x1f27   :  { %9750 = vrot.lane.b32.xlu1 %v9749_v46, %s21592_s4  ;;  %v10613_v46 = vand.u32 4294901760, %v23750_v45  ;;  %v23823_v16 = vpack.c.bf16 %v9963_v34, %v9956_v10  ;;  %v23830_v59 = vpack.c.bf16 %v10601_v58, %v10594_v43  ;;  %v9983_v21 = vsub.f32 %v23789_v38, %v9982_v53 }
0x1f28   :  { %v9990_v10 = vsub.f32 %v23791_v0, %v9989_v19  ;;  %v10620_v34 = vand.u32 4294901760, %v23794_v20  ;;  %v23835_v52 = vpack.c.bf16 %v9977_v4, %v9970_v41 }
0x1f29   :  { %v10614_v14 = vsub.f32 %v23750_v45, %v10613_v46  ;;  %v9984_v54 = vand.u32 4294901760, %v9983_v21 }
0x1f2a   :  { %v9991_v13 = vand.u32 4294901760, %v9990_v10  ;;  %v10621_v33 = vsub.f32 %v23794_v20, %v10620_v34  ;;  %v24903_v10 = vand.u32 4294901760, %v23726_v29 }
0x1f2b   :  { %9744 = vrot.lane.b32.xlu1 %v9743_v9, %s21592_s4  ;;  %v10615_v49 = vand.u32 4294901760, %v10614_v14  ;;  %v10627_v9 = vand.u32 4294901760, %v23798_v8  ;;  %v23887_v14 = vpack.c.bf16 %v9975_v1, %v9968_v24 }
0x1f2c   :  { %v23845_v17 = vpack.c.bf16 %v9991_v13, %v9984_v54  ;;  %v10622_v41 = vand.u32 4294901760, %v10621_v33  ;;  %v24896_v54 = vand.u32 4294901760, %v23676_v63  ;;  %v24897_v13 = vand.u32 4294901760, %v23678_v55 }
0x1f2d   :  { %v23842_v43 = vpack.c.bf16 %v10615_v49, %v10608_v30  ;;  %v10628_v58 = vsub.f32 %v23798_v8, %v10627_v9  ;;  %v24901_v33 = vand.u32 4294901760, %v23722_v42  ;;  %v23885_v50 = vpack.c.bf16 %v10599_v23, %v24903_v10 }
0x1f2e   :  { %v23893_v21 = vpack.c.bf16 %v10627_v9, %v10620_v34 }
0x1f2f   :  { %9776 = vrot.lane.b32.xlu1 %v9775_v61, %s21592_s4  ;;  %v10629_v4 = vand.u32 4294901760, %v10628_v58  ;;  %v23869_v58 = vpack.c.bf16 %v24897_v13, %v24896_v54  ;;  %v24902_v61 = vand.u32 4294901760, %v23724_v37  ;;  %v23889_v54 = vpack.c.bf16 %v10613_v46, %v10606_v3 }
0x1f30   :  { %v23891_v13 = vpack.c.bf16 %v9989_v19, %v9982_v53 }
0x1f31   :  { %v23847_v40 = vpack.c.bf16 %v10629_v4, %v10622_v41  ;;  %v24898_v41 = vand.u32 4294901760, %v23680_v57  ;;  %v24899_v4 = vand.u32 4294901760, %v23684_v11  ;;  %v23881_v30 = vpack.c.bf16 %v24902_v61, %v24901_v33  ;;  %v9727_v61 = vpop.permute.xlu1 %9726 }
0x1f32   :  { %v9729_v24 = vsel %vm3955_vm6, %v23281_v6, %v9727_v61 }
0x1f33   :  { %v23875_v49 = vpack.c.bf16 %v24899_v4, %v24898_v41  ;;  %v9739_v41 = vpop.permute.xlu0 %9738  ;;  %v9781_v46 = vrot.slane %v9729_v24, 6 }
0x1f34   :  { %v9741_v31 = vsel %vm3955_vm6, %v23377_v36, %v9739_v41 }
0x1f35   :  { %24900 = vst [vmem:[#allocation6_spill] sm:$0xff] %v23875_v49  ;;  %v9785_v23 = vrot.slane %v9741_v31, 6 }
0x1f37   :  { %v9733_v4 = vpop.permute.xlu0 %9732 }
0x1f38   :  { %v9735_v33 = vsel %vm3955_vm6, %v23329_v47, %v9733_v4 }
0x1f39   :  { %v9787_v3 = vsel %vm3953_vm4, %v9735_v33, %v9785_v23 }
0x1f3a   :  { %v9801_v19 = vrot.slane %v9787_v3, 4 }
0x1f3b   :  { %v9763_v49 = vpop.permute.xlu0 %9762 }
0x1f3c   :  { %v9765_v34 = vsel %vm3955_vm6, %v23566_v26, %v9763_v49 }
0x1f3d   :  { %v9793_v9 = vrot.slane %v9765_v34, 6 }
0x1f3f   :  { %v9757_v1 = vpop.permute.xlu0 %9756 }
0x1f40   :  { %v9759_v31 = vsel %vm3955_vm6, %v23521_v62, %v9757_v1 }
0x1f41   :  { %v9795_v49 = vsel %vm3953_vm4, %v9759_v31, %v9793_v9 }
0x1f42   :  { %v9806_v62 = vrot.slane %v9795_v49, 4 }
0x1f93   :  { %v9773_v61 = vpop.permute.xlu0 %9772 }
0x1f95   :  { %v9721_v53 = vpop.permute.xlu1 %9720 }
0x1f96   :  { %v9723_v36 = vsel %vm3955_vm6, %v23233_v22, %v9721_v53 }
0x1f97   :  { %v9783_v47 = vsel %vm3953_vm4, %v9723_v36, %v9781_v46  ;;  %v9769_v53 = vpop.permute.xlu0 %9768 }
0x1f98   :  { %v9804_v6 = vsel %vm9803_vm7, %v9783_v47, %v9801_v19 }
0x1f99   :  { %v9826_v10 = vsel %vm9824_vm8, %v9804_v6, 0  ;;  %v9751_v41 = vpop.permute.xlu1 %9750  ;;  %v9771_v6 = vsel %vm3955_vm6, %v23610_v48, %v9769_v53 }
0x1f9a   :  { %v23911_v4 = vand.u32 4294901760, %v9826_v10  ;;  %v9753_v26 = vsel %vm3955_vm6, %v23473_v60, %v9751_v41 }
0x1f9b   :  { %v9789_v33 = vrot.slane %v9753_v26, 6  ;;  %v24904_v26 = vmov 0.0|0.0  }
0x1f9c   :  { %v23917_v22 = vsub.f32 %v9826_v10, %v23911_v4 }
0x1f9d   :  { %v9745_v23 = vpop.permute.xlu1 %9744 }
0x1f9e   :  { %v9747_v24 = vsel %vm3955_vm6, %v23425_v39, %v9745_v23  ;;  %v23922_v3 = vand.u32 4294901760, %v23917_v22 }
0x1f9f   :  { %v9791_v1 = vsel %vm3953_vm4, %v9747_v24, %v9789_v33 }
0x1fa0   :  { %v9808_v46 = vsel %vm9803_vm7, %v9791_v1, %v9806_v62  ;;  %v9910_v60 = vsub.f32 %v23917_v22, %v23922_v3 }
0x1fa1   :  { %v9829_v19 = vsel %vm9824_vm8, %v9808_v46, 0  ;;  %v9777_v34 = vpop.permute.xlu1 %9776 }
0x1fa2   :  { %v23929_v36 = vand.u32 4294901760, %v9829_v19  ;;  %v9779_v47 = vsel %vm3955_vm6, %v9773_v61, %v9777_v34  ;;  %v9911_v31 = vand.u32 4294901760, %v9910_v60  ;;  %v24905_v61 = vmov 0.0  }
0x1fa3   :  { %v9797_v39 = vrot.slane %v9779_v47, 6 }
0x1fa4   :  { %v23935_v9 = vsub.f32 %v9829_v19, %v23929_v36  ;;  %19009 = vmatmul.mubr.f32.vlgmr.msra.gmra.mrb[28].mxu0 %v9911_v31  ;;  %19159 = vmatmul.mubr.f32.vlgmr.msra.gmra.mrb[40].mxu1 %v9911_v31 }
0x1fa5   :  { %v9799_v10 = vsel %vm3953_vm4, %v9771_v6, %v9797_v39  ;;  %20296 = vmatpush3.bf16.msra.mxu0 %v23812_v35  ;;  %20368 = vmatpush3.bf16.msra.mxu1 %v23814_v27 }
0x1fa6   :  { %v9832_v41 = vsel %vm9824_vm8, %v9799_v10, 0  ;;  %20297 = vmatprep.subr.bf16.mxu0 %v24904_v26  ;;  %20369 = vmatprep.subr.bf16.mxu1 %v24904_v26  ;;  %v23944_v49 = vand.u32 4294901760, %v23935_v9 }
0x1fa7   :  { %v23946_v48 = vand.u32 4294901760, %v9832_v41  ;;  %19011 = vmatprep.mubr.msk.f32.mxu0 %vm21589_vm0, %v24905_v61  ;;  %19161 = vmatprep.mubr.msk.f32.mxu1 %vm21589_vm0, %v24905_v61 }
0x1fa8   :  { %v9920_v35 = vsub.f32 %v23935_v9, %v23944_v49 }
0x1fa9   :  { %v23955_v27 = vsub.f32 %v9832_v41, %v23946_v48  ;;  %20299 = vmatpush3.bf16.msra.mxu0 %v23823_v16  ;;  %20371 = vmatpush3.bf16.msra.mxu1 %v23830_v59  ;;  %v24906_v16 = vpack.c.bf16 %v23678_v55, %v23676_v63  ;;  %v24908_v63 = vpack.c.bf16 %v23724_v37, %v23722_v42 }
0x1faa   :  { %v9921_v33 = vand.u32 4294901760, %v9920_v35  ;;  %20300 = vmatprep.subr.bf16.mxu0 %v24904_v26  ;;  %20372 = vmatprep.subr.bf16.mxu1 %v24904_v26  ;;  %v24909_v55 = vpack.c.bf16 %v23728_v44, %v23726_v29  ;;  %v24912_v42 = vpack.c.bf16 %v23791_v0, %v23789_v38  ;;  %v24913_v37 = vpack.c.bf16 %v23798_v8, %v23794_v20  ;;  %v24914_v29 = vld [vmem:[#allocation6_spill] sm:$0xff] }
0x1fab   :  { %v23962_v23 = vand.u32 4294901760, %v23955_v27  ;;  %v11096_v44 = vld [vmem:[%s24866_s12 + $0x8] sm:$0xff]  ;;  %v11097_v38 = vld [vmem:[%s24866_s12 + $0x10] sm:$0xff] }
0x1fac   :  { %19012 = vmatmul.mubr.f32.gmra.mrb[30].mxu0 %v9921_v33  ;;  %19162 = vmatmul.mubr.f32.gmra.mrb[42].mxu1 %v9921_v33 }
0x1fad   :  { %20302 = vmatpush3.bf16.msra.mxu0 %v23835_v52  ;;  %20374 = vmatpush3.bf16.msra.mxu1 %v23842_v43  ;;  %v9930_v62 = vsub.f32 %v23955_v27, %v23962_v23  ;;  %v11110_v52 = vand.u32 4294901760, %v11097_v38 }
0x1fae   :  { %19014 = vmatprep.mubr.msk.f32.mxu0 %vm21589_vm0, %v24905_v61  ;;  %20303 = vmatprep.subr.bf16.mxu0 %v24904_v26 }
0x1faf   :  { %19164 = vmatprep.mubr.msk.f32.mxu1 %vm21589_vm0, %v24905_v61  ;;  %20375 = vmatprep.subr.bf16.mxu1 %v24904_v26  ;;  %v9931_v59 = vand.u32 4294901760, %v9930_v62 }
0x1fb1   :  { %19015 = vmatmul.mubr.f32.gmra.mrb[32].mxu0 %v9931_v59  ;;  %19165 = vmatmul.mubr.f32.gmra.mrb[44].mxu1 %v9931_v59 }
0x1fb2   :  { %20305 = vmatpush3.bf16.msra.mxu0 %v23845_v17  ;;  %20377 = vmatpush3.bf16.msra.mxu1 %v23847_v40  ;;  %v24907_v17 = vpack.c.bf16 %v23684_v11, %v23680_v57  ;;  %v24910_v57 = vpack.c.bf16 %v23735_v51, %v23733_v2  ;;  %v24911_v11 = vpack.c.bf16 %v23750_v45, %v23748_v25  ;;  %v11098_v2 = vld [vmem:[%s24866_s12 + $0x18] sm:$0xff]  ;;  %v11104_v51 = vand.u32 4294901760, %v11096_v44  ;;  %v11095_v45 = vld [vmem:[%s24866_s12] sm:$0xff] }
0x1fb3   :  { %19033 = vmatprep.mubr.msk.f32.mxu0 %vm21589_vm0, %v24905_v61  ;;  %20306 = vmatprep.subr.bf16.mxu0 %v24904_v26  ;;  %v11108_v25 = vand.u32 4294901760, %v11098_v2  ;;  %v11106_v8 = vand.u32 4294901760, %v11095_v45 }
0x1fb4   :  { %19183 = vmatprep.mubr.msk.f32.mxu1 %vm21589_vm0, %v24905_v61  ;;  %20378 = vmatprep.subr.bf16.mxu1 %v24904_v26  ;;  %v24128_v0 = vsub.f32 %v11096_v44, %v11104_v51 }
0x1fb5   :  { %19034 = vmatmul.mubr.f32.vlgmr.msra.gmra.mrb[28].mxu0 %v23911_v4  ;;  %19184 = vmatmul.mubr.f32.vlgmr.msra.gmra.mrb[40].mxu1 %v23911_v4  ;;  %v24130_v20 = vsub.f32 %v11098_v2, %v11108_v25 }
0x1fb6   :  { %20308 = vmatpush3.bf16.msra.mxu0 %v24906_v16  ;;  %20380 = vmatpush3.bf16.msra.mxu1 %v24907_v17 }
0x1fb7   :  { %19036 = vmatprep.mubr.msk.f32.mxu0 %vm21589_vm0, %v24905_v61  ;;  %20309 = vmatprep.subr.bf16.mxu0 %v24904_v26 }
0x1fb8   :  { %19186 = vmatprep.mubr.msk.f32.mxu1 %vm21589_vm0, %v24905_v61  ;;  %20381 = vmatprep.subr.bf16.mxu1 %v24904_v26 }
0x1fb9   :  { %19037 = vmatmul.mubr.f32.gmra.mrb[30].mxu0 %v23929_v36  ;;  %19187 = vmatmul.mubr.f32.gmra.mrb[42].mxu1 %v23929_v36 }
0x1fba   :  { %20311 = vmatpush3.bf16.msra.mxu0 %v24908_v63  ;;  %20383 = vmatpush3.bf16.msra.mxu1 %v24909_v55 }
0x1fbb   :  { %19039 = vmatprep.mubr.msk.f32.mxu0 %vm21589_vm0, %v24905_v61  ;;  %20312 = vmatprep.subr.bf16.mxu0 %v24904_v26 }
0x1fbc   :  { %19189 = vmatprep.mubr.msk.f32.mxu1 %vm21589_vm0, %v24905_v61  ;;  %20384 = vmatprep.subr.bf16.mxu1 %v24904_v26 }
0x1fbd   :  { %19040 = vmatmul.mubr.f32.gmra.mrb[32].mxu0 %v23946_v48  ;;  %19190 = vmatmul.mubr.f32.gmra.mrb[44].mxu1 %v23946_v48 }
0x1fbe   :  { %20314 = vmatpush3.bf16.msra.mxu0 %v24910_v57  ;;  %20386 = vmatpush3.bf16.msra.mxu1 %v24911_v11 }
0x1fbf   :  { %20315 = vmatprep.subr.bf16.mxu0 %v24904_v26  ;;  %20387 = vmatprep.subr.bf16.mxu1 %v24904_v26 }
0x1fc0   :  { %19058 = vmatprep.mubr.msk.f32.mxu0 %vm21589_vm0, %v24905_v61  ;;  %19208 = vmatprep.mubr.msk.f32.mxu1 %vm21589_vm0, %v24905_v61 }
0x1fc2   :  { %20317 = vmatpush3.bf16.msra.mxu0 %v24912_v42  ;;  %20389 = vmatpush3.bf16.msra.mxu1 %v24913_v37 }
0x1fc3   :  { %20318 = vmatprep.subr.bf16.mxu0 %v24904_v26  ;;  %20390 = vmatprep.subr.bf16.mxu1 %v24904_v26 }
0x1fc5   :  { %19059 = vmatmul.mubr.f32.vlgmr.msra.gmra.mrb[28].mxu0 %v23917_v22  ;;  %19209 = vmatmul.mubr.f32.vlgmr.msra.gmra.mrb[40].mxu1 %v23917_v22 }
0x1fc6   :  { %20320 = vmatpush3.bf16.msra.mxu0 %v23674_v12  ;;  %20392 = vmatpush3.bf16.msra.mxu1 %v23682_v7 }
0x1fc7   :  { %19061 = vmatprep.mubr.msk.f32.mxu0 %vm21589_vm0, %v24905_v61  ;;  %19211 = vmatprep.mubr.msk.f32.mxu1 %vm21589_vm0, %v24905_v61 }
0x1fc8   :  { %20321 = vmatprep.subr.bf16.mxu0 %v24904_v26  ;;  %20393 = vmatprep.subr.bf16.mxu1 %v24904_v26 }
0x1fc9   :  { %19062 = vmatmul.mubr.f32.gmra.mrb[30].mxu0 %v23935_v9  ;;  %19212 = vmatmul.mubr.f32.gmra.mrb[42].mxu1 %v23935_v9 }
0x1fca   :  { %20323 = vmatpush3.bf16.msra.mxu0 %v23702_v56  ;;  %20395 = vmatpush3.bf16.msra.mxu1 %v23704_v15 }
0x1fcb   :  { %19064 = vmatprep.mubr.msk.f32.mxu0 %vm21589_vm0, %v24905_v61  ;;  %19214 = vmatprep.mubr.msk.f32.mxu1 %vm21589_vm0, %v24905_v61 }
0x1fcc   :  { %20324 = vmatprep.subr.bf16.mxu0 %v24904_v26  ;;  %20396 = vmatprep.subr.bf16.mxu1 %v24904_v26 }
0x1fcd   :  { %19065 = vmatmul.mubr.f32.gmra.mrb[32].mxu0 %v23955_v27  ;;  %19215 = vmatmul.mubr.f32.gmra.mrb[44].mxu1 %v23955_v27 }
0x1fce   :  { %20326 = vmatpush3.bf16.msra.mxu0 %v23731_v28  ;;  %20398 = vmatpush3.bf16.msra.mxu1 %v23737_v18 }
0x1fcf   :  { %20327 = vmatprep.subr.bf16.mxu0 %v24904_v26  ;;  %20399 = vmatprep.subr.bf16.mxu1 %v24904_v26 }
0x1fd0   :  { %19083 = vmatprep.mubr.msk.f32.mxu0 %vm21589_vm0, %v24905_v61  ;;  %19233 = vmatprep.mubr.msk.f32.mxu1 %vm21589_vm0, %v24905_v61 }
0x1fd2   :  { %20329 = vmatpush3.bf16.msra.mxu0 %v23761_v5  ;;  %20401 = vmatpush3.bf16.msra.mxu1 %v23768_v32 }
0x1fd3   :  { %20330 = vmatprep.subr.bf16.mxu0 %v24904_v26  ;;  %20402 = vmatprep.subr.bf16.mxu1 %v24904_v26 }
0x1fd5   :  { %19084 = vmatmul.mubr.f32.vlgmr.msra.gmra.mrb[28].mxu0 %v23922_v3  ;;  %19234 = vmatmul.mubr.f32.vlgmr.msra.gmra.mrb[40].mxu1 %v23922_v3  ;;  %v24176_v3 = vpack.c.bf16 %v11110_v52, %v11106_v8 }
0x1fd6   :  { %20332 = vmatpush3.bf16.msra.mxu0 %v23869_v58  ;;  %20404 = vmatpush3.bf16.msra.mxu1 %v24914_v29  ;;  %v24154_v58 = vsub.f32 %v11095_v45, %v11106_v8 }
0x1fd7   :  { %19086 = vmatprep.mubr.msk.f32.mxu0 %vm21589_vm0, %v24905_v61  ;;  %19236 = vmatprep.mubr.msk.f32.mxu1 %vm21589_vm0, %v24905_v61 }
0x1fd8   :  { %20333 = vmatprep.subr.bf16.mxu0 %v24904_v26  ;;  %20405 = vmatprep.subr.bf16.mxu1 %v24904_v26  ;;  %v11196_v1 = vand.u32 4294901760, %v24154_v58 }
0x1fd9   :  { %19087 = vmatmul.mubr.f32.gmra.mrb[30].mxu0 %v23944_v49  ;;  %19237 = vmatmul.mubr.f32.gmra.mrb[42].mxu1 %v23944_v49 }
0x1fda   :  { %20335 = vmatpush3.bf16.msra.mxu0 %v23881_v30  ;;  %20407 = vmatpush3.bf16.msra.mxu1 %v23885_v50  ;;  %v11197_v31 = vsub.f32 %v24154_v58, %v11196_v1 }
0x1fdb   :  { %19089 = vmatprep.mubr.msk.f32.mxu0 %vm21589_vm0, %v24905_v61  ;;  %19239 = vmatprep.mubr.msk.f32.mxu1 %vm21589_vm0, %v24905_v61 }
0x1fdc   :  { %20336 = vmatprep.subr.bf16.mxu0 %v24904_v26  ;;  %20408 = vmatprep.subr.bf16.mxu1 %v24904_v26  ;;  %v11198_v35 = vand.u32 4294901760, %v11197_v31 }
0x1fdd   :  { %19090 = vmatmul.mubr.f32.gmra.mrb[32].mxu0 %v23962_v23  ;;  %19240 = vmatmul.mubr.f32.gmra.mrb[44].mxu1 %v23962_v23 }
0x1fde   :  { %20338 = vmatpush3.bf16.msra.mxu0 %v23887_v14  ;;  %20410 = vmatpush3.bf16.msra.mxu1 %v23889_v54  ;;  %v11202_v14 = vand.u32 4294901760, %v24130_v20  ;;  %v24156_v54 = vsub.f32 %v11097_v38, %v11110_v52 }
0x1fdf   :  { %20339 = vmatprep.subr.bf16.mxu0 %v24904_v26  ;;  %20411 = vmatprep.subr.bf16.mxu1 %v24904_v26 }
0x1fe0   :  { %19108 = vmatprep.mubr.msk.f32.mxu0 %vm21589_vm0, %v24905_v61  ;;  %19258 = vmatprep.mubr.msk.f32.mxu1 %vm21589_vm0, %v24905_v61  ;;  %v11208_v46 = vand.u32 4294901760, %v24156_v54  ;;  %v24253_v57 = vpack.c.bf16 %v24156_v54, %v24154_v58 }
0x1fe2   :  { %20341 = vmatpush3.bf16.msra.mxu0 %v23891_v13  ;;  %20413 = vmatpush3.bf16.msra.mxu1 %v23893_v21  ;;  %v11099_v21 = vld [vmem:[%s24866_s12 + $0x20] sm:$0xff]  ;;  %v24160_v13 = vpack.c.bf16 %v11108_v25, %v11104_v51  ;;  %v11209_v39 = vsub.f32 %v24156_v54, %v11208_v46  ;;  %v24285_v29 = vpack.c.bf16 %v11208_v46, %v11196_v1 }
0x1fe3   :  { %20342 = vmatprep.subr.bf16.mxu0 %v24904_v26  ;;  %20414 = vmatprep.subr.bf16.mxu1 %v24904_v26  ;;  %v11114_v50 = vand.u32 4294901760, %v11099_v21  ;;  %v17472_v51 = vld [vmem:[%s24865_s11] ss:$0 sm:$0xff] }
0x1fe4   :  { %v11210_v27 = vand.u32 4294901760, %v11209_v39  ;;  %v17471_v25 = vld [vmem:[%s24863_s9] ss:$0 sm:$0xff] }
0x1fe5   :  { %19109 = vmatmul.mubr.f32.vlgmr.msra.gmra.mrb[28].mxu0 %v23911_v4  ;;  %19259 = vmatmul.mubr.f32.vlgmr.msra.gmra.mrb[40].mxu1 %v23911_v4  ;;  %v24182_v60 = vsub.f32 %v11099_v21, %v11114_v50 }
0x1fe6   :  { %20344 = vmatpush3.bf16.msra.mxu0 %v23674_v12  ;;  %20416 = vmatpush3.bf16.msra.mxu1 %v23682_v7  ;;  %v11100_v12 = vld [vmem:[%s24866_s12 + $0x28] sm:$0xff]  ;;  %v11102_v7 = vld [vmem:[%s24866_s12 + $0x38] sm:$0xff] }
0x1fe7   :  { %19111 = vmatprep.mubr.msk.f32.mxu0 %vm21589_vm0, %v24905_v61  ;;  %19261 = vmatprep.mubr.msk.f32.mxu1 %vm21589_vm0, %v24905_v61  ;;  %v11112_v43 = vand.u32 4294901760, %v11100_v12  ;;  %v11116_v40 = vand.u32 4294901760, %v11102_v7  ;;  %v11220_v6 = vand.u32 4294901760, %v24182_v60 }
0x1fe8   :  { %20345 = vmatprep.subr.bf16.mxu0 %v24904_v26  ;;  %20417 = vmatprep.subr.bf16.mxu1 %v24904_v26 }
0x1fe9   :  { %19112 = vmatmul.mubr.f32.gmra.mrb[30].mxu0 %v23929_v36  ;;  %19262 = vmatmul.mubr.f32.gmra.mrb[42].mxu1 %v23929_v36  ;;  %v24162_v22 = vsub.f32 %v11100_v12, %v11112_v43  ;;  %v24164_v24 = vsub.f32 %v11102_v7, %v11116_v40  ;;  %v24187_v19 = vpack.c.bf16 %v11116_v40, %v11112_v43 }
0x1fea   :  { %20347 = vmatpush3.bf16.msra.mxu0 %v23702_v56  ;;  %20419 = vmatpush3.bf16.msra.mxu1 %v23704_v15  ;;  %v11101_v56 = vld [vmem:[%s24866_s12 + $0x30] sm:$0xff]  ;;  %v11190_v15 = vand.u32 4294901760, %v24128_v0  ;;  %v11221_v33 = vsub.f32 %v24182_v60, %v11220_v6 }
0x1feb   :  { %19114 = vmatprep.mubr.msk.f32.mxu0 %vm21589_vm0, %v24905_v61  ;;  %19264 = vmatprep.mubr.msk.f32.mxu1 %vm21589_vm0, %v24905_v61  ;;  %v11118_v30 = vand.u32 4294901760, %v11101_v56  ;;  %v11214_v34 = vand.u32 4294901760, %v24162_v22  ;;  %v11226_v47 = vand.u32 4294901760, %v24164_v24  ;;  %v24258_v11 = vpack.c.bf16 %v24164_v24, %v24162_v22 }
0x1fec   :  { %20348 = vmatprep.subr.bf16.mxu0 %v24904_v26  ;;  %20420 = vmatprep.subr.bf16.mxu1 %v24904_v26  ;;  %v11222_v16 = vand.u32 4294901760, %v11221_v33  ;;  %v24278_v37 = vpack.c.bf16 %v11202_v14, %v11190_v15 }
0x1fed   :  { %19115 = vmatmul.mubr.f32.gmra.mrb[32].mxu0 %v23946_v48  ;;  %19265 = vmatmul.mubr.f32.gmra.mrb[44].mxu1 %v23946_v48  ;;  %v24184_v53 = vsub.f32 %v11101_v56, %v11118_v30  ;;  %v11215_v10 = vsub.f32 %v24162_v22, %v11214_v34  ;;  %v11227_v41 = vsub.f32 %v24164_v24, %v11226_v47 }
0x1fee   :  { %20350 = vmatpush3.bf16.msra.mxu0 %v23731_v28  ;;  %20422 = vmatpush3.bf16.msra.mxu1 %v23737_v18  ;;  %v11191_v28 = vsub.f32 %v24128_v0, %v11190_v15  ;;  %v11203_v18 = vsub.f32 %v24130_v20, %v11202_v14  ;;  %v24292_v44 = vpack.c.bf16 %v11226_v47, %v11214_v34 }
0x1fef   :  { %20351 = vmatprep.subr.bf16.mxu0 %v24904_v26  ;;  %20423 = vmatprep.subr.bf16.mxu1 %v24904_v26  ;;  %v11232_v9 = vand.u32 4294901760, %v24184_v53  ;;  %v11216_v62 = vand.u32 4294901760, %v11215_v10  ;;  %v11228_v59 = vand.u32 4294901760, %v11227_v41  ;;  %v24264_v42 = vpack.c.bf16 %v24184_v53, %v24182_v60 }
0x1ff0   :  { %19133 = vmatprep.mubr.msk.f32.mxu0 %vm21589_vm0, %v24905_v61  ;;  %19283 = vmatprep.mubr.msk.f32.mxu1 %vm21589_vm0, %v24905_v61 }
0x1ff1   :  { %v11233_v23 = vsub.f32 %v24184_v53, %v11232_v9  ;;  %v24237_v63 = vpack.c.bf16 %v11228_v59, %v11216_v62  ;;  %v24296_v2 = vpack.c.bf16 %v11232_v9, %v11220_v6 }
0x1ff2   :  { %20353 = vmatpush3.bf16.msra.mxu0 %v23761_v5  ;;  %20425 = vmatpush3.bf16.msra.mxu1 %v23768_v32  ;;  %v11192_v5 = vand.u32 4294901760, %v11191_v28  ;;  %v11204_v32 = vand.u32 4294901760, %v11203_v18 }
0x1ff3   :  { %20427 = vmatprep.subr.bf16.mxu0 %v24160_v13  ;;  %20475 = vmatprep.subr.bf16.mxu1 %v24160_v13  ;;  %v11234_v17 = vand.u32 4294901760, %v11233_v23 }
0x1ff4   :  { %v24216_v49 = vpack.c.bf16 %v11204_v32, %v11192_v5 }
0x1ff5   :  { %19134 = vmatmul.mubr.f32.vlgmr.msra.gmra.mrb[28].mxu0 %v23911_v4  ;;  %19284 = vmatmul.mubr.f32.vlgmr.msra.gmra.mrb[40].mxu1 %v23911_v4  ;;  %v24208_v4 = vpack.c.bf16 %v11118_v30, %v11114_v50  ;;  %v24242_v55 = vpack.c.bf16 %v11234_v17, %v11222_v16 }
0x1ff6   :  { %20429 = vmatpush1.bf16.msra.mxu0 %v24176_v3  ;;  %19136 = vmatprep.mubr.msk.f32.mxu0 %vm21589_vm0, %v24905_v61 }
0x1ff7   :  { %19286 = vmatprep.mubr.msk.f32.mxu1 %vm21589_vm0, %v24905_v61  ;;  %20431 = vmatprep.subr.bf16.mxu0 %v24187_v19 }
0x1ff8   :  { %20477 = vmatpush1.bf16.msra.mxu1 %v24176_v3 }
0x1ff9   :  { %19137 = vmatmul.mubr.f32.gmra.mrb[30].mxu0 %v23929_v36  ;;  %19287 = vmatmul.mubr.f32.gmra.mrb[42].mxu1 %v23929_v36  ;;  %v24234_v36 = vpack.c.bf16 %v11210_v27, %v11198_v35 }
0x1ffa   :  { %19139 = vmatprep.mubr.msk.f32.mxu0 %vm21589_vm0, %v24905_v61  ;;  %19289 = vmatprep.mubr.msk.f32.mxu1 %vm21589_vm0, %v24905_v61 }
0x1ffb   :  { %20433 = vmatpush1.bf16.msra.mxu0 %v24208_v4  ;;  %20479 = vmatprep.subr.bf16.mxu1 %v24187_v19 }
0x1ffc   :  { %20435 = vmatprep.subr.bf16.mxu0 %v24216_v49  ;;  %20481 = vmatpush1.bf16.msra.mxu1 %v24208_v4 }
0x1ffd   :  { %19140 = vmatmul.mubr.f32.gmra.mrb[32].mxu0 %v23946_v48  ;;  %19290 = vmatmul.mubr.f32.gmra.mrb[44].mxu1 %v23946_v48  ;;  %v24248_v48 = vpack.c.bf16 %v24130_v20, %v24128_v0 }
0x1ffe   :  { %11176 = vmatprep.mubr.f32.mxu0 %v24905_v61  ;;  %11755 = vmatprep.mubr.f32.mxu1 %v24905_v61 }
0x1fff   :  { %20483 = vmatprep.subr.bf16.mxu1 %v24216_v49 }
0x2001   :  { %11182 = vmatmul.mubr.f32.vlgmr.msra.gmra.mrb[34].mxu0 %v24905_v61 }
0x2002   :  { %20437 = vmatpush1.bf16.msra.mxu0 %v24234_v36  ;;  %11292 = vmatprep.mubr.f32.mxu0 %v24905_v61 }
0x2003   :  { %20439 = vmatprep.subr.bf16.mxu0 %v24237_v63 }
0x2006   :  { %20441 = vmatpush1.bf16.msra.mxu0 %v24242_v55 }
0x2007   :  { %20443 = vmatprep.subr.bf16.mxu0 %v24248_v48 }
0x2009   :  { %11294 = vmatmul.mubr.f32.vlgmr.msra.gmra.mrb[34].mxu0 %v24905_v61 }
0x200a   :  { %20445 = vmatpush1.bf16.msra.mxu0 %v24253_v57  ;;  %11380 = vmatprep.mubr.f32.mxu0 %v24905_v61 }
0x200b   :  { %20447 = vmatprep.subr.bf16.mxu0 %v24258_v11 }
0x200e   :  { %20449 = vmatpush1.bf16.msra.mxu0 %v24264_v42 }
0x200f   :  { %20451 = vmatprep.subr.bf16.mxu0 %v24160_v13 }
0x2011   :  { %11383 = vmatmul.mubr.f32.vlgmr.msra.gmra.mrb[34].mxu0 %v24905_v61 }
0x2012   :  { %20453 = vmatpush1.bf16.msra.mxu0 %v24176_v3  ;;  %11461 = vmatprep.mubr.f32.mxu0 %v24905_v61 }
0x2013   :  { %20455 = vmatprep.subr.bf16.mxu0 %v24187_v19 }
0x2016   :  { %20457 = vmatpush1.bf16.msra.mxu0 %v24208_v4 }
0x2017   :  { %20459 = vmatprep.subr.bf16.mxu0 %v24278_v37 }
0x2019   :  { %11465 = vmatmul.mubr.f32.vlgmr.msra.gmra.mrb[34].mxu0 %v24905_v61 }
0x201a   :  { %20461 = vmatpush1.bf16.msra.mxu0 %v24285_v29  ;;  %11559 = vmatprep.mubr.f32.mxu0 %v24905_v61 }
0x201b   :  { %20463 = vmatprep.subr.bf16.mxu0 %v24292_v44 }
0x201e   :  { %20465 = vmatpush1.bf16.msra.mxu0 %v24296_v2 }
0x201f   :  { %20467 = vmatprep.subr.bf16.mxu0 %v24160_v13 }
0x2021   :  { %11561 = vmatmul.mubr.f32.vlgmr.msra.gmra.mrb[34].mxu0 %v24905_v61 }
0x2022   :  { %20469 = vmatpush1.bf16.msra.mxu0 %v24176_v3  ;;  %11639 = vmatprep.mubr.f32.mxu0 %v24905_v61 }
0x2023   :  { %20471 = vmatprep.subr.bf16.mxu0 %v24187_v19 }
0x2026   :  { %20473 = vmatpush1.bf16.msra.mxu0 %v24208_v4 }
0x2027   :  { %20523 = vmatprep.subr.bf16.mxu0 %v24160_v13 }
0x2029   :  { %11641 = vmatmul.mubr.f32.vlgmr.msra.gmra.mrb[34].mxu0 %v24905_v61 }
0x202a   :  { %20525 = vmatpush1.bf16.msra.mxu0 %v24176_v3  ;;  %12333 = vmatprep.mubr.f32.mxu0 %v24905_v61 }
0x202b   :  { %20527 = vmatprep.subr.bf16.mxu0 %v24187_v19 }
0x202e   :  { %20529 = vmatpush1.bf16.msra.mxu0 %v24208_v4 }
0x202f   :  { %20531 = vmatprep.subr.bf16.mxu0 %v24216_v49 }
0x20c8   :  { %v10441_v45 = vpop.f32.mrb[28].mxu0  ;;  %v11079_v38 = vpop.f32.mrb[40].mxu1 }
0x20c9   :  { %v20993_v12 = vadd.f32 %v17472_v51, %v11079_v38  ;;  %v19135_v7 = vpop.f32.mrb[29].mxu0  ;;  %v19285_v0 = vpop.f32.mrb[41].mxu1  ;;  %v20990_v20 = vadd.f32 %v17471_v25, %v10441_v45 }
0x20cb   :  { %v11672_v15 = vrot.slane %v20990_v20, 2  ;;  %v12250_v14 = vrot.slane %v20990_v20, 4  ;;  %v12828_v50 = vrot.slane %v20990_v20, 6  ;;  %v14559_v30 = vrot.slane %v20993_v12, 4 }
0x20cc   :  { %v10447_v8 = vpop.f32.mrb[30].mxu0  ;;  %v11085_v52 = vpop.f32.mrb[42].mxu1  ;;  %v15136_v53 = vrot.slane %v20993_v12, 2  ;;  %v16287_v41 = vrot.slane %v20993_v12, 6 }
0x20cd   :  { %v20991_v43 = vadd.f32 %v17471_v25, %v10447_v8  ;;  %v20994_v40 = vadd.f32 %v17472_v51, %v11085_v52  ;;  %v19138_v21 = vpop.f32.mrb[31].mxu0  ;;  %v19288_v56 = vpop.f32.mrb[43].mxu1 }
0x20cf   :  { %v12253_v58 = vrot.slane %v20994_v40, 4  ;;  %v12830_v54 = vrot.slane %v20994_v40, 2  ;;  %v24321_v22 = vsel %vm3953_vm4, %v20991_v43, %v20994_v40  ;;  %v13979_v24 = vrot.slane %v20991_v43, 2 }
0x20d0   :  { %v10453_v28 = vpop.f32.mrb[32].mxu0  ;;  %v11091_v18 = vpop.f32.mrb[44].mxu1  ;;  %v13981_v1 = vrot.slane %v20994_v40, 6  ;;  %v14556_v46 = vrot.slane %v20991_v43, 4  ;;  %v15134_v60 = vrot.slane %v20991_v43, 6 }
0x20d1   :  { %v20992_v34 = vadd.f32 %v17471_v25, %v10453_v28  ;;  %v20995_v47 = vadd.f32 %v17472_v51, %v11091_v18  ;;  %v19141_v5 = vpop.f32.mrb[33].mxu0  ;;  %v19291_v32 = vpop.f32.mrb[45].mxu1  ;;  %v24324_v31 = vsel %vm3953_vm4, %v12250_v14, %v12253_v58  ;;  %v24327_v39 = vsel %vm3953_vm4, %v12828_v50, %v12830_v54 }
0x20d2   :  { %v24330_v6 = vsel %vm3953_vm4, %v13979_v24, %v13981_v1  ;;  %v24333_v9 = vsel %vm3953_vm4, %v14556_v46, %v14559_v30  ;;  %v24336_v10 = vsel %vm3953_vm4, %v15134_v60, %v15136_v53 }
0x20d3   :  { %v16285_v35 = vrot.slane %v20992_v34, 2  ;;  %v11675_v27 = vrot.slane %v20995_v47, 6  ;;  %v11103_v33 = vsel %vm3953_vm4, %v20990_v20, %v20995_v47  ;;  %v24340_v23 = vsel %vm3953_vm4, %v20992_v34, %v20993_v12 }
0x20d5   :  { %v24343_v62 = vsel %vm3953_vm4, %v11672_v15, %v11675_v27  ;;  %v24346_v59 = vsel %vm3953_vm4, %v16285_v35, %v16287_v41 }
0x20fc   :  { %v11642_v16 = vpop.f32.mrb[34].mxu0 }
0x20fd   :  { %v11644_v17 = vpop.f32.mrb[35].mxu0 }
0x20fe   :  { %v11647_v25 = vsel %vm2679_vm5, %v11642_v16, %v11644_v17 }
0x20ff   :  { %v11648_v45 = vadd.f32 %v11647_v25, %v11103_v33 }
0x2101   :  { %21504 = vtanh.f32 %v11648_v45  ;;  %v11649_v7 = vmul.f32 0.5, %v11648_v45 }
0x2103   :  { %21506 = vtanh.f32 %v11649_v7 }
0x210b   :  { %v21505_v38 = vpop.eup %21504 }
0x210c   :  { %11656 = vrot.lane.b32.xlu1 %v21505_v38, %s21592_s4 }
0x210d   :  { %v21507_v12 = vpop.eup %21506 }
0x210e   :  { %v11651_v0 = vadd.f32 1.0, %v21507_v12 }
0x2110   :  { %v11652_v20 = vmul.f32 0.5, %v11651_v0 }
0x2112   :  { %v11654_v43 = vmul.f32 0.0, %v11652_v20 }
0x217e   :  { %v11657_v8 = vpop.permute.xlu1 %11656 }
0x217f   :  { %v11659_v52 = vmul.f32 %v11657_v8, %v11652_v20 }
0x2181   :  { %11661 = vrot.lane.b32.xlu0 %v11659_v52, %s21593_s6 }
0x21f3   :  { %v11662_v40 = vpop.permute.xlu0 %11661 }
0x21f4   :  { %v24352_v21 = vadd.f32 %v11662_v40, %v11654_v43 }
0x21f6   :  { %21508 = vtanh.f32 %v24352_v21 }
0x2200   :  { %v21509_v56 = vpop.eup %21508 }
0x2201   :  { %11667 = vrot.lane.b32.xlu1 %v21509_v56, %s21592_s4 }
0x2273   :  { %v11668_v15 = vpop.permute.xlu1 %11667 }
0x2274   :  { %v24356_v14 = vmul.f32 %v11668_v15, %v11652_v20 }
0x2276   :  { %11679 = vrot.lane.b32.xlu0 %v24356_v14, %s21593_s6 }
0x22e8   :  { %v11680_v50 = vpop.permute.xlu0 %11679 }
0x22e9   :  { %v11681_v30 = vsel %vm3955_vm6, %v11680_v50, 0 }
0x22ea   :  { %v11756_v58 = vand.u32 4294901760, %v11681_v30 }
0x22ec   :  { %v11757_v54 = vsub.f32 %v11681_v30, %v11756_v58 }
0x22ee   :  { %v11758_v24 = vand.u32 4294901760, %v11757_v54 }
0x22f0   :  { %v11759_v28 = vsub.f32 %v11757_v54, %v11758_v24 }
0x22f2   :  { %v11760_v18 = vand.u32 4294901760, %v11759_v28 }
0x22f4   :  { %11761 = vmatmul.mubr.f32.vlgmr.msra.gmra.mrb[46].mxu1 %v11760_v18 }
0x22f5   :  { %20485 = vmatpush1.bf16.msra.mxu1 %v24234_v36  ;;  %11871 = vmatprep.mubr.f32.mxu1 %v24905_v61 }
0x22f6   :  { %20487 = vmatprep.subr.bf16.mxu1 %v24237_v63 }
0x22f9   :  { %20489 = vmatpush1.bf16.msra.mxu1 %v24242_v55 }
0x22fa   :  { %20491 = vmatprep.subr.bf16.mxu1 %v24248_v48 }
0x22fc   :  { %11873 = vmatmul.mubr.f32.vlgmr.msra.gmra.mrb[46].mxu1 %v11756_v58 }
0x22fd   :  { %20493 = vmatpush1.bf16.msra.mxu1 %v24253_v57  ;;  %11959 = vmatprep.mubr.f32.mxu1 %v24905_v61 }
0x22fe   :  { %20495 = vmatprep.subr.bf16.mxu1 %v24258_v11 }
0x2301   :  { %20497 = vmatpush1.bf16.msra.mxu1 %v24264_v42 }
0x2302   :  { %20499 = vmatprep.subr.bf16.mxu1 %v24160_v13 }
0x2304   :  { %11962 = vmatmul.mubr.f32.vlgmr.msra.gmra.mrb[46].mxu1 %v11757_v54 }
0x2305   :  { %20501 = vmatpush1.bf16.msra.mxu1 %v24176_v3  ;;  %12040 = vmatprep.mubr.f32.mxu1 %v24905_v61 }
0x2306   :  { %20503 = vmatprep.subr.bf16.mxu1 %v24187_v19 }
0x2309   :  { %20505 = vmatpush1.bf16.msra.mxu1 %v24208_v4 }
0x230a   :  { %20507 = vmatprep.subr.bf16.mxu1 %v24278_v37 }
0x230c   :  { %12044 = vmatmul.mubr.f32.vlgmr.msra.gmra.mrb[46].mxu1 %v11758_v24 }
0x230d   :  { %20509 = vmatpush1.bf16.msra.mxu1 %v24285_v29  ;;  %12138 = vmatprep.mubr.f32.mxu1 %v24905_v61 }
0x230e   :  { %20511 = vmatprep.subr.bf16.mxu1 %v24292_v44 }
0x2311   :  { %20513 = vmatpush1.bf16.msra.mxu1 %v24296_v2 }
0x2312   :  { %20515 = vmatprep.subr.bf16.mxu1 %v24160_v13 }
0x2314   :  { %12140 = vmatmul.mubr.f32.vlgmr.msra.gmra.mrb[46].mxu1 %v11756_v58 }
0x2315   :  { %20517 = vmatpush1.bf16.msra.mxu1 %v24176_v3  ;;  %12218 = vmatprep.mubr.f32.mxu1 %v24905_v61 }
0x2316   :  { %20519 = vmatprep.subr.bf16.mxu1 %v24187_v19 }
0x2319   :  { %20521 = vmatpush1.bf16.msra.mxu1 %v24208_v4 }
0x231a   :  { %20571 = vmatprep.subr.bf16.mxu1 %v24160_v13 }
0x231c   :  { %12220 = vmatmul.mubr.f32.vlgmr.msra.gmra.mrb[46].mxu1 %v11756_v58 }
0x231d   :  { %20573 = vmatpush1.bf16.msra.mxu1 %v24176_v3  ;;  %12910 = vmatprep.mubr.f32.mxu1 %v24905_v61 }
0x231e   :  { %20575 = vmatprep.subr.bf16.mxu1 %v24187_v19 }
0x2321   :  { %20577 = vmatpush1.bf16.msra.mxu1 %v24208_v4 }
0x2322   :  { %20579 = vmatprep.subr.bf16.mxu1 %v24216_v49 }
0x23ef   :  { %v12221_v1 = vpop.f32.mrb[46].mxu1 }
0x23f0   :  { %v12223_v46 = vpop.f32.mrb[47].mxu1 }
0x23f1   :  { %v12226_v60 = vsel %vm2679_vm5, %v12221_v1, %v12223_v46 }
0x23f2   :  { %v12227_v53 = vadd.f32 %v12226_v60, %v24343_v62 }
0x23f4   :  { %21510 = vtanh.f32 %v12227_v53  ;;  %v12228_v47 = vmul.f32 0.5, %v12227_v53 }
0x23f6   :  { %21512 = vtanh.f32 %v12228_v47 }
0x23fe   :  { %v21511_v34 = vpop.eup %21510 }
0x23ff   :  { %12235 = vrot.lane.b32.xlu1 %v21511_v34, %s21592_s4 }
0x2400   :  { %v21513_v5 = vpop.eup %21512 }
0x2401   :  { %v12230_v32 = vadd.f32 1.0, %v21513_v5 }
0x2403   :  { %v12231_v41 = vmul.f32 0.5, %v12230_v32 }
0x2405   :  { %v12233_v33 = vmul.f32 %v12231_v41, %v24352_v21 }
0x2471   :  { %v12236_v35 = vpop.permute.xlu1 %12235 }
0x2472   :  { %v12238_v27 = vmul.f32 %v12236_v35, %v12231_v41 }
0x2474   :  { %12240 = vrot.lane.b32.xlu0 %v12238_v27, %s21593_s6 }
0x24e6   :  { %v12241_v16 = vpop.permute.xlu0 %12240 }
0x24e7   :  { %v24397_v17 = vadd.f32 %v12241_v16, %v12233_v33 }
0x24e9   :  { %21514 = vtanh.f32 %v24397_v17 }
0x24f3   :  { %v21515_v62 = vpop.eup %21514 }
0x24f4   :  { %12246 = vrot.lane.b32.xlu1 %v21515_v62, %s21592_s4 }
0x2566   :  { %v12247_v25 = vpop.permute.xlu1 %12246 }
0x2567   :  { %v12249_v45 = vmul.f32 %v12247_v25, %v12231_v41 }
0x2569   :  { %12257 = vrot.lane.b32.xlu0 %v12249_v45, %s21593_s6 }
0x25db   :  { %v12258_v38 = vpop.permute.xlu0 %12257 }
0x25dc   :  { %v12259_v7 = vsel %vm3955_vm6, %v12258_v38, 0 }
0x25dd   :  { %v12334_v12 = vand.u32 4294901760, %v12259_v7 }
0x25df   :  { %v12335_v0 = vsub.f32 %v12259_v7, %v12334_v12 }
0x25e1   :  { %v12336_v20 = vand.u32 4294901760, %v12335_v0 }
0x25e3   :  { %v12337_v8 = vsub.f32 %v12335_v0, %v12336_v20 }
0x25e5   :  { %v12338_v52 = vand.u32 4294901760, %v12337_v8 }
0x25e7   :  { %12339 = vmatmul.mubr.f32.vlgmr.msra.gmra.mrb[36].mxu0 %v12338_v52 }
0x25e8   :  { %20533 = vmatpush1.bf16.msra.mxu0 %v24234_v36  ;;  %12449 = vmatprep.mubr.f32.mxu0 %v24905_v61 }
0x25e9   :  { %20535 = vmatprep.subr.bf16.mxu0 %v24237_v63 }
0x25ec   :  { %20537 = vmatpush1.bf16.msra.mxu0 %v24242_v55 }
0x25ed   :  { %20539 = vmatprep.subr.bf16.mxu0 %v24248_v48 }
0x25ef   :  { %12451 = vmatmul.mubr.f32.vlgmr.msra.gmra.mrb[36].mxu0 %v12334_v12 }
0x25f0   :  { %20541 = vmatpush1.bf16.msra.mxu0 %v24253_v57  ;;  %12537 = vmatprep.mubr.f32.mxu0 %v24905_v61 }
0x25f1   :  { %20543 = vmatprep.subr.bf16.mxu0 %v24258_v11 }
0x25f4   :  { %20545 = vmatpush1.bf16.msra.mxu0 %v24264_v42 }
0x25f5   :  { %20547 = vmatprep.subr.bf16.mxu0 %v24160_v13 }
0x25f7   :  { %12540 = vmatmul.mubr.f32.vlgmr.msra.gmra.mrb[36].mxu0 %v12335_v0 }
0x25f8   :  { %20549 = vmatpush1.bf16.msra.mxu0 %v24176_v3  ;;  %12618 = vmatprep.mubr.f32.mxu0 %v24905_v61 }
0x25f9   :  { %20551 = vmatprep.subr.bf16.mxu0 %v24187_v19 }
0x25fc   :  { %20553 = vmatpush1.bf16.msra.mxu0 %v24208_v4 }
0x25fd   :  { %20555 = vmatprep.subr.bf16.mxu0 %v24278_v37 }
0x25ff   :  { %12622 = vmatmul.mubr.f32.vlgmr.msra.gmra.mrb[36].mxu0 %v12336_v20 }
0x2600   :  { %20557 = vmatpush1.bf16.msra.mxu0 %v24285_v29  ;;  %12716 = vmatprep.mubr.f32.mxu0 %v24905_v61 }
0x2601   :  { %20559 = vmatprep.subr.bf16.mxu0 %v24292_v44 }
0x2604   :  { %20561 = vmatpush1.bf16.msra.mxu0 %v24296_v2 }
0x2605   :  { %20563 = vmatprep.subr.bf16.mxu0 %v24160_v13 }
0x2607   :  { %12718 = vmatmul.mubr.f32.vlgmr.msra.gmra.mrb[36].mxu0 %v12334_v12 }
0x2608   :  { %20565 = vmatpush1.bf16.msra.mxu0 %v24176_v3  ;;  %12796 = vmatprep.mubr.f32.mxu0 %v24905_v61 }
0x2609   :  { %20567 = vmatprep.subr.bf16.mxu0 %v24187_v19 }
0x260c   :  { %20569 = vmatpush1.bf16.msra.mxu0 %v24208_v4 }
0x260d   :  { %20619 = vmatprep.subr.bf16.mxu0 %v24160_v13 }
0x260f   :  { %12798 = vmatmul.mubr.f32.vlgmr.msra.gmra.mrb[36].mxu0 %v12334_v12 }
0x2610   :  { %20621 = vmatpush1.bf16.msra.mxu0 %v24176_v3  ;;  %13483 = vmatprep.mubr.f32.mxu0 %v24905_v61 }
0x2611   :  { %20623 = vmatprep.subr.bf16.mxu0 %v24187_v19 }
0x2614   :  { %20625 = vmatpush1.bf16.msra.mxu0 %v24208_v4 }
0x2615   :  { %20627 = vmatprep.subr.bf16.mxu0 %v24216_v49 }
0x26e2   :  { %v12799_v43 = vpop.f32.mrb[36].mxu0 }
0x26e3   :  { %v12801_v40 = vpop.f32.mrb[37].mxu0 }
0x26e4   :  { %v12804_v21 = vsel %vm2679_vm5, %v12799_v43, %v12801_v40 }
0x26e5   :  { %v12805_v56 = vadd.f32 %v12804_v21, %v24324_v31 }
0x26e7   :  { %21516 = vtanh.f32 %v12805_v56  ;;  %v12806_v50 = vmul.f32 0.5, %v12805_v56 }
0x26e9   :  { %21518 = vtanh.f32 %v12806_v50 }
0x26f1   :  { %v21517_v15 = vpop.eup %21516 }
0x26f2   :  { %12813 = vrot.lane.b32.xlu1 %v21517_v15, %s21592_s4 }
0x26f3   :  { %v21519_v30 = vpop.eup %21518 }
0x26f4   :  { %v12808_v58 = vadd.f32 1.0, %v21519_v30 }
0x26f6   :  { %v12809_v54 = vmul.f32 0.5, %v12808_v58 }
0x26f8   :  { %v12811_v18 = vmul.f32 %v12809_v54, %v24397_v17 }
0x2764   :  { %v12814_v24 = vpop.permute.xlu1 %12813 }
0x2765   :  { %v12816_v28 = vmul.f32 %v12814_v24, %v12809_v54 }
0x2767   :  { %12818 = vrot.lane.b32.xlu0 %v12816_v28, %s21593_s6 }
0x27d9   :  { %v12819_v1 = vpop.permute.xlu0 %12818 }
0x27da   :  { %v24439_v46 = vadd.f32 %v12819_v1, %v12811_v18 }
0x27dc   :  { %21520 = vtanh.f32 %v24439_v46 }
0x27e6   :  { %v21521_v31 = vpop.eup %21520 }
0x27e7   :  { %12824 = vrot.lane.b32.xlu1 %v21521_v31, %s21592_s4 }
0x2859   :  { %v12825_v60 = vpop.permute.xlu1 %12824 }
0x285a   :  { %v12827_v53 = vmul.f32 %v12825_v60, %v12809_v54 }
0x285c   :  { %12834 = vrot.lane.b32.xlu0 %v12827_v53, %s21593_s6 }
0x28ce   :  { %v12835_v34 = vpop.permute.xlu0 %12834 }
0x28cf   :  { %v12836_v47 = vsel %vm3955_vm6, %v12835_v34, 0 }
0x28d0   :  { %v12911_v5 = vand.u32 4294901760, %v12836_v47 }
0x28d2   :  { %v12912_v32 = vsub.f32 %v12836_v47, %v12911_v5 }
0x28d4   :  { %v12913_v41 = vand.u32 4294901760, %v12912_v32 }
0x28d6   :  { %v12914_v35 = vsub.f32 %v12912_v32, %v12913_v41 }
0x28d8   :  { %v12915_v27 = vand.u32 4294901760, %v12914_v35 }
0x28da   :  { %12916 = vmatmul.mubr.f32.vlgmr.msra.gmra.mrb[48].mxu1 %v12915_v27 }
0x28db   :  { %20581 = vmatpush1.bf16.msra.mxu1 %v24234_v36  ;;  %13026 = vmatprep.mubr.f32.mxu1 %v24905_v61 }
0x28dc   :  { %20583 = vmatprep.subr.bf16.mxu1 %v24237_v63 }
0x28df   :  { %20585 = vmatpush1.bf16.msra.mxu1 %v24242_v55 }
0x28e0   :  { %20587 = vmatprep.subr.bf16.mxu1 %v24248_v48 }
0x28e2   :  { %13028 = vmatmul.mubr.f32.vlgmr.msra.gmra.mrb[48].mxu1 %v12911_v5 }
0x28e3   :  { %20589 = vmatpush1.bf16.msra.mxu1 %v24253_v57  ;;  %13114 = vmatprep.mubr.f32.mxu1 %v24905_v61 }
0x28e4   :  { %20591 = vmatprep.subr.bf16.mxu1 %v24258_v11 }
0x28e7   :  { %20593 = vmatpush1.bf16.msra.mxu1 %v24264_v42 }
0x28e8   :  { %20595 = vmatprep.subr.bf16.mxu1 %v24160_v13 }
0x28ea   :  { %13117 = vmatmul.mubr.f32.vlgmr.msra.gmra.mrb[48].mxu1 %v12912_v32 }
0x28eb   :  { %20597 = vmatpush1.bf16.msra.mxu1 %v24176_v3  ;;  %13195 = vmatprep.mubr.f32.mxu1 %v24905_v61 }
0x28ec   :  { %20599 = vmatprep.subr.bf16.mxu1 %v24187_v19 }
0x28ef   :  { %20601 = vmatpush1.bf16.msra.mxu1 %v24208_v4 }
0x28f0   :  { %20603 = vmatprep.subr.bf16.mxu1 %v24278_v37 }
0x28f2   :  { %13199 = vmatmul.mubr.f32.vlgmr.msra.gmra.mrb[48].mxu1 %v12913_v41 }
0x28f3   :  { %20605 = vmatpush1.bf16.msra.mxu1 %v24285_v29  ;;  %13293 = vmatprep.mubr.f32.mxu1 %v24905_v61 }
0x28f4   :  { %20607 = vmatprep.subr.bf16.mxu1 %v24292_v44 }
0x28f7   :  { %20609 = vmatpush1.bf16.msra.mxu1 %v24296_v2 }
0x28f8   :  { %20611 = vmatprep.subr.bf16.mxu1 %v24160_v13 }
0x28fa   :  { %13295 = vmatmul.mubr.f32.vlgmr.msra.gmra.mrb[48].mxu1 %v12911_v5 }
0x28fb   :  { %20613 = vmatpush1.bf16.msra.mxu1 %v24176_v3  ;;  %13373 = vmatprep.mubr.f32.mxu1 %v24905_v61 }
0x28fc   :  { %20615 = vmatprep.subr.bf16.mxu1 %v24187_v19 }
0x28ff   :  { %20617 = vmatpush1.bf16.msra.mxu1 %v24208_v4 }
0x2900   :  { %20667 = vmatprep.subr.bf16.mxu1 %v24160_v13 }
0x2902   :  { %13375 = vmatmul.mubr.f32.vlgmr.msra.gmra.mrb[48].mxu1 %v12911_v5 }
0x2903   :  { %20669 = vmatpush1.bf16.msra.mxu1 %v24176_v3  ;;  %14061 = vmatprep.mubr.f32.mxu1 %v24905_v61 }
0x2904   :  { %20671 = vmatprep.subr.bf16.mxu1 %v24187_v19 }
0x2907   :  { %20673 = vmatpush1.bf16.msra.mxu1 %v24208_v4 }
0x2908   :  { %20675 = vmatprep.subr.bf16.mxu1 %v24216_v49 }
0x29d5   :  { %v13376_v33 = vpop.f32.mrb[48].mxu1 }
0x29d6   :  { %v13378_v16 = vpop.f32.mrb[49].mxu1 }
0x29d7   :  { %v13381_v17 = vsel %vm2679_vm5, %v13376_v33, %v13378_v16 }
0x29d8   :  { %v13382_v62 = vadd.f32 %v13381_v17, %v24327_v39 }
0x29da   :  { %21522 = vtanh.f32 %v13382_v62  ;;  %v13383_v45 = vmul.f32 0.5, %v13382_v62 }
0x29dc   :  { %21524 = vtanh.f32 %v13383_v45 }
0x29e4   :  { %v21523_v25 = vpop.eup %21522 }
0x29e5   :  { %13390 = vrot.lane.b32.xlu1 %v21523_v25, %s21592_s4 }
0x29e6   :  { %v21525_v38 = vpop.eup %21524 }
0x29e7   :  { %v13385_v7 = vadd.f32 1.0, %v21525_v38 }
0x29e9   :  { %v13386_v12 = vmul.f32 0.5, %v13385_v7 }
0x29eb   :  { %v13388_v8 = vmul.f32 %v13386_v12, %v24439_v46 }
0x2a57   :  { %v13391_v0 = vpop.permute.xlu1 %13390 }
0x2a58   :  { %v13393_v20 = vmul.f32 %v13391_v0, %v13386_v12 }
0x2a5a   :  { %13395 = vrot.lane.b32.xlu0 %v13393_v20, %s21593_s6 }
0x2acc   :  { %v13396_v52 = vpop.permute.xlu0 %13395 }
0x2acd   :  { %v24481_v43 = vadd.f32 %v13396_v52, %v13388_v8 }
0x2acf   :  { %21526 = vtanh.f32 %v24481_v43 }
0x2ad9   :  { %v21527_v39 = vpop.eup %21526 }
0x2ada   :  { %13401 = vrot.lane.b32.xlu1 %v21527_v39, %s21592_s4 }
0x2b4c   :  { %v13402_v40 = vpop.permute.xlu1 %13401 }
0x2b4d   :  { %v13404_v21 = vmul.f32 %v13402_v40, %v13386_v12 }
0x2b4f   :  { %13407 = vrot.lane.b32.xlu0 %v13404_v21, %s21593_s6 }
0x2bc1   :  { %v13408_v56 = vpop.permute.xlu0 %13407 }
0x2bc2   :  { %v13409_v15 = vsel %vm3955_vm6, %v13408_v56, 0 }
0x2bc3   :  { %v13484_v50 = vand.u32 4294901760, %v13409_v15 }
0x2bc5   :  { %v13485_v30 = vsub.f32 %v13409_v15, %v13484_v50 }
0x2bc7   :  { %v13486_v58 = vand.u32 4294901760, %v13485_v30 }
0x2bc9   :  { %v13487_v54 = vsub.f32 %v13485_v30, %v13486_v58 }
0x2bcb   :  { %v13488_v24 = vand.u32 4294901760, %v13487_v54 }
0x2bcd   :  { %13489 = vmatmul.mubr.f32.vlgmr.msra.gmra.mrb[38].mxu0 %v13488_v24 }
0x2bce   :  { %20629 = vmatpush1.bf16.msra.mxu0 %v24234_v36  ;;  %13599 = vmatprep.mubr.f32.mxu0 %v24905_v61 }
0x2bcf   :  { %20631 = vmatprep.subr.bf16.mxu0 %v24237_v63 }
0x2bd2   :  { %20633 = vmatpush1.bf16.msra.mxu0 %v24242_v55 }
0x2bd3   :  { %20635 = vmatprep.subr.bf16.mxu0 %v24248_v48 }
0x2bd5   :  { %13601 = vmatmul.mubr.f32.vlgmr.msra.gmra.mrb[38].mxu0 %v13484_v50 }
0x2bd6   :  { %20637 = vmatpush1.bf16.msra.mxu0 %v24253_v57  ;;  %13687 = vmatprep.mubr.f32.mxu0 %v24905_v61 }
0x2bd7   :  { %20639 = vmatprep.subr.bf16.mxu0 %v24258_v11 }
0x2bda   :  { %20641 = vmatpush1.bf16.msra.mxu0 %v24264_v42 }
0x2bdb   :  { %20643 = vmatprep.subr.bf16.mxu0 %v24160_v13 }
0x2bdd   :  { %13690 = vmatmul.mubr.f32.vlgmr.msra.gmra.mrb[38].mxu0 %v13485_v30 }
0x2bde   :  { %20645 = vmatpush1.bf16.msra.mxu0 %v24176_v3  ;;  %13768 = vmatprep.mubr.f32.mxu0 %v24905_v61 }
0x2bdf   :  { %20647 = vmatprep.subr.bf16.mxu0 %v24187_v19 }
0x2be2   :  { %20649 = vmatpush1.bf16.msra.mxu0 %v24208_v4 }
0x2be3   :  { %20651 = vmatprep.subr.bf16.mxu0 %v24278_v37 }
0x2be5   :  { %13772 = vmatmul.mubr.f32.vlgmr.msra.gmra.mrb[38].mxu0 %v13486_v58 }
0x2be6   :  { %20653 = vmatpush1.bf16.msra.mxu0 %v24285_v29  ;;  %13866 = vmatprep.mubr.f32.mxu0 %v24905_v61 }
0x2be7   :  { %20655 = vmatprep.subr.bf16.mxu0 %v24292_v44 }
0x2bea   :  { %20657 = vmatpush1.bf16.msra.mxu0 %v24296_v2 }
0x2beb   :  { %20659 = vmatprep.subr.bf16.mxu0 %v24160_v13 }
0x2bed   :  { %13868 = vmatmul.mubr.f32.vlgmr.msra.gmra.mrb[38].mxu0 %v13484_v50 }
0x2bee   :  { %20661 = vmatpush1.bf16.msra.mxu0 %v24176_v3  ;;  %13946 = vmatprep.mubr.f32.mxu0 %v24905_v61 }
0x2bef   :  { %20663 = vmatprep.subr.bf16.mxu0 %v24187_v19 }
0x2bf2   :  { %20665 = vmatpush1.bf16.msra.mxu0 %v24208_v4 }
0x2bf3   :  { %20715 = vmatprep.subr.bf16.mxu0 %v24160_v13 }
0x2bf5   :  { %13948 = vmatmul.mubr.f32.vlgmr.msra.gmra.mrb[38].mxu0 %v13484_v50 }
0x2bf6   :  { %20717 = vmatpush1.bf16.msra.mxu0 %v24176_v3  ;;  %14639 = vmatprep.mubr.f32.mxu0 %v24905_v61 }
0x2bf7   :  { %20719 = vmatprep.subr.bf16.mxu0 %v24187_v19 }
0x2bfa   :  { %20721 = vmatpush1.bf16.msra.mxu0 %v24208_v4 }
0x2bfb   :  { %20723 = vmatprep.subr.bf16.mxu0 %v24216_v49 }
0x2cc8   :  { %v13949_v28 = vpop.f32.mrb[38].mxu0 }
0x2cc9   :  { %v13951_v18 = vpop.f32.mrb[39].mxu0 }
0x2cca   :  { %v13954_v1 = vsel %vm2679_vm5, %v13949_v28, %v13951_v18 }
0x2ccb   :  { %v13955_v46 = vadd.f32 %v13954_v1, %v24321_v22 }
0x2ccd   :  { %21528 = vtanh.f32 %v13955_v46  ;;  %v13956_v60 = vmul.f32 0.5, %v13955_v46 }
0x2ccf   :  { %21530 = vtanh.f32 %v13956_v60 }
0x2cd7   :  { %v21529_v31 = vpop.eup %21528 }
0x2cd8   :  { %13963 = vrot.lane.b32.xlu1 %v21529_v31, %s21592_s4 }
0x2cd9   :  { %v21531_v53 = vpop.eup %21530 }
0x2cda   :  { %v13958_v34 = vadd.f32 1.0, %v21531_v53 }
0x2cdc   :  { %v13959_v47 = vmul.f32 0.5, %v13958_v34 }
0x2cde   :  { %v13961_v41 = vmul.f32 %v13959_v47, %v24481_v43 }
0x2d4a   :  { %v13964_v5 = vpop.permute.xlu1 %13963 }
0x2d4b   :  { %v13966_v32 = vmul.f32 %v13964_v5, %v13959_v47 }
0x2d4d   :  { %13968 = vrot.lane.b32.xlu0 %v13966_v32, %s21593_s6 }
0x2dbf   :  { %v13969_v35 = vpop.permute.xlu0 %13968 }
0x2dc0   :  { %v24523_v27 = vadd.f32 %v13969_v35, %v13961_v41 }
0x2dc2   :  { %21532 = vtanh.f32 %v24523_v27 }
0x2dcc   :  { %v21533_v22 = vpop.eup %21532 }
0x2dcd   :  { %13974 = vrot.lane.b32.xlu1 %v21533_v22, %s21592_s4 }
0x2e3f   :  { %v13975_v33 = vpop.permute.xlu1 %13974 }
0x2e40   :  { %v13977_v16 = vmul.f32 %v13975_v33, %v13959_v47 }
0x2e42   :  { %13985 = vrot.lane.b32.xlu0 %v13977_v16, %s21593_s6 }
0x2eb4   :  { %v13986_v17 = vpop.permute.xlu0 %13985 }
0x2eb5   :  { %v13987_v62 = vsel %vm3955_vm6, %v13986_v17, 0 }
0x2eb6   :  { %v14062_v25 = vand.u32 4294901760, %v13987_v62 }
0x2eb8   :  { %v14063_v45 = vsub.f32 %v13987_v62, %v14062_v25 }
0x2eba   :  { %v14064_v38 = vand.u32 4294901760, %v14063_v45 }
0x2ebc   :  { %v14065_v7 = vsub.f32 %v14063_v45, %v14064_v38 }
0x2ebe   :  { %v14066_v12 = vand.u32 4294901760, %v14065_v7 }
0x2ec0   :  { %14067 = vmatmul.mubr.f32.vlgmr.msra.gmra.mrb[50].mxu1 %v14066_v12 }
0x2ec1   :  { %20677 = vmatpush1.bf16.msra.mxu1 %v24234_v36  ;;  %14177 = vmatprep.mubr.f32.mxu1 %v24905_v61 }
0x2ec2   :  { %20679 = vmatprep.subr.bf16.mxu1 %v24237_v63 }
0x2ec5   :  { %20681 = vmatpush1.bf16.msra.mxu1 %v24242_v55 }
0x2ec6   :  { %20683 = vmatprep.subr.bf16.mxu1 %v24248_v48 }
0x2ec8   :  { %14179 = vmatmul.mubr.f32.vlgmr.msra.gmra.mrb[50].mxu1 %v14062_v25 }
0x2ec9   :  { %20685 = vmatpush1.bf16.msra.mxu1 %v24253_v57  ;;  %14265 = vmatprep.mubr.f32.mxu1 %v24905_v61 }
0x2eca   :  { %20687 = vmatprep.subr.bf16.mxu1 %v24258_v11 }
0x2ecd   :  { %20689 = vmatpush1.bf16.msra.mxu1 %v24264_v42 }
0x2ece   :  { %20691 = vmatprep.subr.bf16.mxu1 %v24160_v13 }
0x2ed0   :  { %14268 = vmatmul.mubr.f32.vlgmr.msra.gmra.mrb[50].mxu1 %v14063_v45 }
0x2ed1   :  { %20693 = vmatpush1.bf16.msra.mxu1 %v24176_v3  ;;  %14346 = vmatprep.mubr.f32.mxu1 %v24905_v61 }
0x2ed2   :  { %20695 = vmatprep.subr.bf16.mxu1 %v24187_v19 }
0x2ed5   :  { %20697 = vmatpush1.bf16.msra.mxu1 %v24208_v4 }
0x2ed6   :  { %20699 = vmatprep.subr.bf16.mxu1 %v24278_v37 }
0x2ed8   :  { %14350 = vmatmul.mubr.f32.vlgmr.msra.gmra.mrb[50].mxu1 %v14064_v38 }
0x2ed9   :  { %20701 = vmatpush1.bf16.msra.mxu1 %v24285_v29  ;;  %14444 = vmatprep.mubr.f32.mxu1 %v24905_v61 }
0x2eda   :  { %20703 = vmatprep.subr.bf16.mxu1 %v24292_v44 }
0x2edd   :  { %20705 = vmatpush1.bf16.msra.mxu1 %v24296_v2 }
0x2ede   :  { %20707 = vmatprep.subr.bf16.mxu1 %v24160_v13 }
0x2ee0   :  { %14446 = vmatmul.mubr.f32.vlgmr.msra.gmra.mrb[50].mxu1 %v14062_v25 }
0x2ee1   :  { %20709 = vmatpush1.bf16.msra.mxu1 %v24176_v3  ;;  %14524 = vmatprep.mubr.f32.mxu1 %v24905_v61 }
0x2ee2   :  { %20711 = vmatprep.subr.bf16.mxu1 %v24187_v19 }
0x2ee5   :  { %20713 = vmatpush1.bf16.msra.mxu1 %v24208_v4 }
0x2ee6   :  { %20763 = vmatprep.subr.bf16.mxu1 %v24160_v13 }
0x2ee8   :  { %14526 = vmatmul.mubr.f32.vlgmr.msra.gmra.mrb[50].mxu1 %v14062_v25 }
0x2ee9   :  { %20765 = vmatpush1.bf16.msra.mxu1 %v24176_v3  ;;  %15216 = vmatprep.mubr.f32.mxu1 %v24905_v61 }
0x2eea   :  { %20767 = vmatprep.subr.bf16.mxu1 %v24187_v19 }
0x2eed   :  { %20769 = vmatpush1.bf16.msra.mxu1 %v24208_v4 }
0x2eee   :  { %20771 = vmatprep.subr.bf16.mxu1 %v24216_v49 }
0x2fbb   :  { %v14527_v0 = vpop.f32.mrb[50].mxu1 }
0x2fbc   :  { %v14529_v20 = vpop.f32.mrb[51].mxu1 }
0x2fbd   :  { %v14532_v8 = vsel %vm2679_vm5, %v14527_v0, %v14529_v20 }
0x2fbe   :  { %v14533_v52 = vadd.f32 %v14532_v8, %v24330_v6 }
0x2fc0   :  { %21534 = vtanh.f32 %v14533_v52  ;;  %v14534_v39 = vmul.f32 0.5, %v14533_v52 }
0x2fc2   :  { %21536 = vtanh.f32 %v14534_v39 }
0x2fca   :  { %v21535_v43 = vpop.eup %21534 }
0x2fcb   :  { %14541 = vrot.lane.b32.xlu1 %v21535_v43, %s21592_s4 }
0x2fcc   :  { %v21537_v40 = vpop.eup %21536 }
0x2fcd   :  { %v14536_v21 = vadd.f32 1.0, %v21537_v40 }
0x2fcf   :  { %v14537_v56 = vmul.f32 0.5, %v14536_v21 }
0x2fd1   :  { %v14539_v30 = vmul.f32 %v14537_v56, %v24523_v27 }
0x303d   :  { %v14542_v15 = vpop.permute.xlu1 %14541 }
0x303e   :  { %v14544_v50 = vmul.f32 %v14542_v15, %v14537_v56 }
0x3040   :  { %14546 = vrot.lane.b32.xlu0 %v14544_v50, %s21593_s6 }
0x30b2   :  { %v14547_v58 = vpop.permute.xlu0 %14546 }
0x30b3   :  { %v24565_v54 = vadd.f32 %v14547_v58, %v14539_v30 }
0x30b5   :  { %21538 = vtanh.f32 %v24565_v54 }
0x30bf   :  { %v21539_v6 = vpop.eup %21538 }
0x30c0   :  { %14552 = vrot.lane.b32.xlu1 %v21539_v6, %s21592_s4 }
0x3132   :  { %v14553_v24 = vpop.permute.xlu1 %14552 }
0x3133   :  { %v14555_v28 = vmul.f32 %v14553_v24, %v14537_v56 }
0x3135   :  { %14563 = vrot.lane.b32.xlu0 %v14555_v28, %s21593_s6 }
0x31a7   :  { %v14564_v18 = vpop.permute.xlu0 %14563 }
0x31a8   :  { %v14565_v1 = vsel %vm3955_vm6, %v14564_v18, 0 }
0x31a9   :  { %v14640_v46 = vand.u32 4294901760, %v14565_v1 }
0x31ab   :  { %v14641_v31 = vsub.f32 %v14565_v1, %v14640_v46 }
0x31ad   :  { %v14642_v60 = vand.u32 4294901760, %v14641_v31 }
0x31af   :  { %v14643_v53 = vsub.f32 %v14641_v31, %v14642_v60 }
0x31b1   :  { %v14644_v34 = vand.u32 4294901760, %v14643_v53 }
0x31b3   :  { %14645 = vmatmul.mubr.f32.vlgmr.msra.gmra.mrb[40].mxu0 %v14644_v34 }
0x31b4   :  { %20725 = vmatpush1.bf16.msra.mxu0 %v24234_v36  ;;  %14755 = vmatprep.mubr.f32.mxu0 %v24905_v61 }
0x31b5   :  { %20727 = vmatprep.subr.bf16.mxu0 %v24237_v63 }
0x31b8   :  { %20729 = vmatpush1.bf16.msra.mxu0 %v24242_v55 }
0x31b9   :  { %20731 = vmatprep.subr.bf16.mxu0 %v24248_v48 }
0x31bb   :  { %14757 = vmatmul.mubr.f32.vlgmr.msra.gmra.mrb[40].mxu0 %v14640_v46 }
0x31bc   :  { %20733 = vmatpush1.bf16.msra.mxu0 %v24253_v57  ;;  %14843 = vmatprep.mubr.f32.mxu0 %v24905_v61 }
0x31bd   :  { %20735 = vmatprep.subr.bf16.mxu0 %v24258_v11 }
0x31c0   :  { %20737 = vmatpush1.bf16.msra.mxu0 %v24264_v42 }
0x31c1   :  { %20739 = vmatprep.subr.bf16.mxu0 %v24160_v13 }
0x31c3   :  { %14846 = vmatmul.mubr.f32.vlgmr.msra.gmra.mrb[40].mxu0 %v14641_v31 }
0x31c4   :  { %20741 = vmatpush1.bf16.msra.mxu0 %v24176_v3  ;;  %14924 = vmatprep.mubr.f32.mxu0 %v24905_v61 }
0x31c5   :  { %20743 = vmatprep.subr.bf16.mxu0 %v24187_v19 }
0x31c8   :  { %20745 = vmatpush1.bf16.msra.mxu0 %v24208_v4 }
0x31c9   :  { %20747 = vmatprep.subr.bf16.mxu0 %v24278_v37 }
0x31cb   :  { %14928 = vmatmul.mubr.f32.vlgmr.msra.gmra.mrb[40].mxu0 %v14642_v60 }
0x31cc   :  { %20749 = vmatpush1.bf16.msra.mxu0 %v24285_v29  ;;  %15022 = vmatprep.mubr.f32.mxu0 %v24905_v61 }
0x31cd   :  { %20751 = vmatprep.subr.bf16.mxu0 %v24292_v44 }
0x31d0   :  { %20753 = vmatpush1.bf16.msra.mxu0 %v24296_v2 }
0x31d1   :  { %20755 = vmatprep.subr.bf16.mxu0 %v24160_v13 }
0x31d3   :  { %15024 = vmatmul.mubr.f32.vlgmr.msra.gmra.mrb[40].mxu0 %v14640_v46 }
0x31d4   :  { %20757 = vmatpush1.bf16.msra.mxu0 %v24176_v3  ;;  %15102 = vmatprep.mubr.f32.mxu0 %v24905_v61 }
0x31d5   :  { %20759 = vmatprep.subr.bf16.mxu0 %v24187_v19 }
0x31d8   :  { %20761 = vmatpush1.bf16.msra.mxu0 %v24208_v4 }
0x31d9   :  { %20811 = vmatprep.subr.bf16.mxu0 %v24160_v13 }
0x31db   :  { %15104 = vmatmul.mubr.f32.vlgmr.msra.gmra.mrb[40].mxu0 %v14640_v46 }
0x31dc   :  { %20813 = vmatpush1.bf16.msra.mxu0 %v24176_v3  ;;  %15789 = vmatprep.mubr.f32.mxu0 %v24905_v61 }
0x31dd   :  { %20815 = vmatprep.subr.bf16.mxu0 %v24187_v19 }
0x31e0   :  { %20817 = vmatpush1.bf16.msra.mxu0 %v24208_v4 }
0x31e1   :  { %20819 = vmatprep.subr.bf16.mxu0 %v24216_v49 }
0x32ae   :  { %v15105_v47 = vpop.f32.mrb[40].mxu0 }
0x32af   :  { %v15107_v5 = vpop.f32.mrb[41].mxu0 }
0x32b0   :  { %v15110_v32 = vsel %vm2679_vm5, %v15105_v47, %v15107_v5 }
0x32b1   :  { %v15111_v41 = vadd.f32 %v15110_v32, %v24333_v9 }
0x32b3   :  { %21540 = vtanh.f32 %v15111_v41  ;;  %v15112_v27 = vmul.f32 0.5, %v15111_v41 }
0x32b5   :  { %21542 = vtanh.f32 %v15112_v27 }
0x32bd   :  { %v21541_v35 = vpop.eup %21540 }
0x32be   :  { %15119 = vrot.lane.b32.xlu1 %v21541_v35, %s21592_s4 }
0x32bf   :  { %v21543_v22 = vpop.eup %21542 }
0x32c0   :  { %v15114_v33 = vadd.f32 1.0, %v21543_v22 }
0x32c2   :  { %v15115_v16 = vmul.f32 0.5, %v15114_v33 }
0x32c4   :  { %v15117_v25 = vmul.f32 %v15115_v16, %v24565_v54 }
0x3330   :  { %v15120_v17 = vpop.permute.xlu1 %15119 }
0x3331   :  { %v15122_v62 = vmul.f32 %v15120_v17, %v15115_v16 }
0x3333   :  { %15124 = vrot.lane.b32.xlu0 %v15122_v62, %s21593_s6 }
0x33a5   :  { %v15125_v45 = vpop.permute.xlu0 %15124 }
0x33a6   :  { %v24607_v38 = vadd.f32 %v15125_v45, %v15117_v25 }
0x33a8   :  { %21544 = vtanh.f32 %v24607_v38 }
0x33b2   :  { %v21545_v9 = vpop.eup %21544 }
0x33b3   :  { %15130 = vrot.lane.b32.xlu1 %v21545_v9, %s21592_s4 }
0x3425   :  { %v15131_v7 = vpop.permute.xlu1 %15130 }
0x3426   :  { %v15133_v12 = vmul.f32 %v15131_v7, %v15115_v16 }
0x3428   :  { %15140 = vrot.lane.b32.xlu0 %v15133_v12, %s21593_s6 }
0x349a   :  { %v15141_v0 = vpop.permute.xlu0 %15140 }
0x349b   :  { %v15142_v20 = vsel %vm3955_vm6, %v15141_v0, 0 }
0x349c   :  { %v15217_v8 = vand.u32 4294901760, %v15142_v20 }
0x349e   :  { %v15218_v52 = vsub.f32 %v15142_v20, %v15217_v8 }
0x34a0   :  { %v15219_v43 = vand.u32 4294901760, %v15218_v52 }
0x34a2   :  { %v15220_v39 = vsub.f32 %v15218_v52, %v15219_v43 }
0x34a4   :  { %v15221_v40 = vand.u32 4294901760, %v15220_v39 }
0x34a6   :  { %15222 = vmatmul.mubr.f32.vlgmr.msra.gmra.mrb[52].mxu1 %v15221_v40 }
0x34a7   :  { %20773 = vmatpush1.bf16.msra.mxu1 %v24234_v36  ;;  %15332 = vmatprep.mubr.f32.mxu1 %v24905_v61 }
0x34a8   :  { %20775 = vmatprep.subr.bf16.mxu1 %v24237_v63 }
0x34ab   :  { %20777 = vmatpush1.bf16.msra.mxu1 %v24242_v55 }
0x34ac   :  { %20779 = vmatprep.subr.bf16.mxu1 %v24248_v48 }
0x34ae   :  { %15334 = vmatmul.mubr.f32.vlgmr.msra.gmra.mrb[52].mxu1 %v15217_v8 }
0x34af   :  { %20781 = vmatpush1.bf16.msra.mxu1 %v24253_v57  ;;  %15420 = vmatprep.mubr.f32.mxu1 %v24905_v61 }
0x34b0   :  { %20783 = vmatprep.subr.bf16.mxu1 %v24258_v11 }
0x34b3   :  { %20785 = vmatpush1.bf16.msra.mxu1 %v24264_v42 }
0x34b4   :  { %20787 = vmatprep.subr.bf16.mxu1 %v24160_v13 }
0x34b6   :  { %15423 = vmatmul.mubr.f32.vlgmr.msra.gmra.mrb[52].mxu1 %v15218_v52 }
0x34b7   :  { %20789 = vmatpush1.bf16.msra.mxu1 %v24176_v3  ;;  %15501 = vmatprep.mubr.f32.mxu1 %v24905_v61 }
0x34b8   :  { %20791 = vmatprep.subr.bf16.mxu1 %v24187_v19 }
0x34bb   :  { %20793 = vmatpush1.bf16.msra.mxu1 %v24208_v4 }
0x34bc   :  { %20795 = vmatprep.subr.bf16.mxu1 %v24278_v37 }
0x34be   :  { %15505 = vmatmul.mubr.f32.vlgmr.msra.gmra.mrb[52].mxu1 %v15219_v43 }
0x34bf   :  { %20797 = vmatpush1.bf16.msra.mxu1 %v24285_v29  ;;  %15599 = vmatprep.mubr.f32.mxu1 %v24905_v61 }
0x34c0   :  { %20799 = vmatprep.subr.bf16.mxu1 %v24292_v44 }
0x34c3   :  { %20801 = vmatpush1.bf16.msra.mxu1 %v24296_v2 }
0x34c4   :  { %20803 = vmatprep.subr.bf16.mxu1 %v24160_v13 }
0x34c6   :  { %15601 = vmatmul.mubr.f32.vlgmr.msra.gmra.mrb[52].mxu1 %v15217_v8 }
0x34c7   :  { %20805 = vmatpush1.bf16.msra.mxu1 %v24176_v3  ;;  %15679 = vmatprep.mubr.f32.mxu1 %v24905_v61 }
0x34c8   :  { %20807 = vmatprep.subr.bf16.mxu1 %v24187_v19 }
0x34cb   :  { %20809 = vmatpush1.bf16.msra.mxu1 %v24208_v4 }
0x34cc   :  { %20859 = vmatprep.subr.bf16.mxu1 %v24160_v13 }
0x34ce   :  { %15681 = vmatmul.mubr.f32.vlgmr.msra.gmra.mrb[52].mxu1 %v15217_v8 }
0x34cf   :  { %20861 = vmatpush1.bf16.msra.mxu1 %v24176_v3  ;;  %16367 = vmatprep.mubr.f32.mxu1 %v24905_v61 }
0x34d0   :  { %20863 = vmatprep.subr.bf16.mxu1 %v24187_v19 }
0x34d3   :  { %20865 = vmatpush1.bf16.msra.mxu1 %v24208_v4 }
0x34d4   :  { %20867 = vmatprep.subr.bf16.mxu1 %v24216_v49 }
0x35a1   :  { %v15682_v21 = vpop.f32.mrb[52].mxu1 }
0x35a2   :  { %v15684_v56 = vpop.f32.mrb[53].mxu1 }
0x35a3   :  { %v15687_v15 = vsel %vm2679_vm5, %v15682_v21, %v15684_v56 }
0x35a4   :  { %v15688_v50 = vadd.f32 %v15687_v15, %v24336_v10 }
0x35a6   :  { %21546 = vtanh.f32 %v15688_v50  ;;  %v15689_v58 = vmul.f32 0.5, %v15688_v50 }
0x35a8   :  { %21548 = vtanh.f32 %v15689_v58 }
0x35b0   :  { %v21547_v30 = vpop.eup %21546 }
0x35b1   :  { %15696 = vrot.lane.b32.xlu1 %v21547_v30, %s21592_s4 }
0x35b2   :  { %v21549_v54 = vpop.eup %21548 }
0x35b3   :  { %v15691_v6 = vadd.f32 1.0, %v21549_v54 }
0x35b5   :  { %v15692_v24 = vmul.f32 0.5, %v15691_v6 }
0x35b7   :  { %v15694_v49 = vmul.f32 %v15692_v24, %v24607_v38 }
0x3623   :  { %v15697_v28 = vpop.permute.xlu1 %15696 }
0x3624   :  { %v15699_v18 = vmul.f32 %v15697_v28, %v15692_v24  ;;  %v16866_v28 = vrot.slane %v24356_v14, 2  ;;  %v16876_v14 = vld [vmem:[%s24867_s13 + $0x28] sm:$0xff] }
0x3626   :  { %15701 = vrot.lane.b32.xlu0 %v15699_v18, %s21593_s6  ;;  %v16873_v18 = vld [vmem:[%s24867_s13 + $0x10] sm:$0xff] }
0x3698   :  { %v15702_v1 = vpop.permute.xlu0 %15701 }
0x3699   :  { %v15704_v46 = vadd.f32 %v15702_v1, %v15694_v49  ;;  %v16874_v49 = vld [vmem:[%s24867_s13 + $0x18] sm:$0xff]  ;;  %v16896_v1 = vand.u32 4294901760, %v16873_v18 }
0x369b   :  { %21550 = vtanh.f32 %v15704_v46 }
0x36a5   :  { %v21551_v31 = vpop.eup %21550 }
0x36a6   :  { %15707 = vrot.lane.b32.xlu1 %v21551_v31, %s21592_s4 }
0x3718   :  { %v15708_v10 = vpop.permute.xlu1 %15707 }
0x3719   :  { %v15710_v60 = vmul.f32 %v15708_v10, %v15692_v24  ;;  %v16875_v10 = vld [vmem:[%s24867_s13 + $0x20] sm:$0xff] }
0x371b   :  { %15713 = vrot.lane.b32.xlu0 %v15710_v60, %s21593_s6  ;;  %v16902_v60 = vand.u32 4294901760, %v16875_v10 }
0x378d   :  { %v15714_v53 = vpop.permute.xlu0 %15713 }
0x378e   :  { %v15715_v34 = vsel %vm3955_vm6, %v15714_v53, 0  ;;  %v16905_v53 = vand.u32 4294901760, %v16876_v14 }
0x378f   :  { %v15790_v47 = vand.u32 4294901760, %v15715_v34 }
0x3791   :  { %v15791_v5 = vsub.f32 %v15715_v34, %v15790_v47  ;;  %v24749_v34 = vpack.c.bf16 %v16905_v53, %v16902_v60 }
0x3793   :  { %v15792_v32 = vand.u32 4294901760, %v15791_v5 }
0x3795   :  { %v15793_v41 = vsub.f32 %v15791_v5, %v15792_v32 }
0x3797   :  { %v15794_v35 = vand.u32 4294901760, %v15793_v41 }
0x3799   :  { %15795 = vmatmul.mubr.f32.vlgmr.msra.gmra.mrb[42].mxu0 %v15794_v35 }
0x379a   :  { %20821 = vmatpush1.bf16.msra.mxu0 %v24234_v36  ;;  %15905 = vmatprep.mubr.f32.mxu0 %v24905_v61 }
0x379b   :  { %20823 = vmatprep.subr.bf16.mxu0 %v24237_v63 }
0x379e   :  { %20825 = vmatpush1.bf16.msra.mxu0 %v24242_v55 }
0x379f   :  { %20827 = vmatprep.subr.bf16.mxu0 %v24248_v48 }
0x37a1   :  { %15907 = vmatmul.mubr.f32.vlgmr.msra.gmra.mrb[42].mxu0 %v15790_v47 }
0x37a2   :  { %20829 = vmatpush1.bf16.msra.mxu0 %v24253_v57  ;;  %15993 = vmatprep.mubr.f32.mxu0 %v24905_v61 }
0x37a3   :  { %20831 = vmatprep.subr.bf16.mxu0 %v24258_v11 }
0x37a6   :  { %20833 = vmatpush1.bf16.msra.mxu0 %v24264_v42 }
0x37a7   :  { %20835 = vmatprep.subr.bf16.mxu0 %v24160_v13 }
0x37a9   :  { %15996 = vmatmul.mubr.f32.vlgmr.msra.gmra.mrb[42].mxu0 %v15791_v5  ;;  %v16878_v5 = vld [vmem:[%s24867_s13 + $0x38] sm:$0xff] }
0x37aa   :  { %20837 = vmatpush1.bf16.msra.mxu0 %v24176_v3  ;;  %16074 = vmatprep.mubr.f32.mxu0 %v24905_v61  ;;  %v16911_v41 = vand.u32 4294901760, %v16878_v5 }
0x37ab   :  { %20839 = vmatprep.subr.bf16.mxu0 %v24187_v19 }
0x37ae   :  { %20841 = vmatpush1.bf16.msra.mxu0 %v24208_v4 }
0x37af   :  { %20843 = vmatprep.subr.bf16.mxu0 %v24278_v37 }
0x37b1   :  { %16078 = vmatmul.mubr.f32.vlgmr.msra.gmra.mrb[42].mxu0 %v15792_v32 }
0x37b2   :  { %20845 = vmatpush1.bf16.msra.mxu0 %v24285_v29  ;;  %16172 = vmatprep.mubr.f32.mxu0 %v24905_v61 }
0x37b3   :  { %20847 = vmatprep.subr.bf16.mxu0 %v24292_v44 }
0x37b6   :  { %20849 = vmatpush1.bf16.msra.mxu0 %v24296_v2 }
0x37b7   :  { %20851 = vmatprep.subr.bf16.mxu0 %v24160_v13 }
0x37b9   :  { %16174 = vmatmul.mubr.f32.vlgmr.msra.gmra.mrb[42].mxu0 %v15790_v47 }
0x37ba   :  { %20853 = vmatpush1.bf16.msra.mxu0 %v24176_v3  ;;  %16252 = vmatprep.mubr.f32.mxu0 %v24905_v61 }
0x37bb   :  { %20855 = vmatprep.subr.bf16.mxu0 %v24187_v19 }
0x37be   :  { %20857 = vmatpush1.bf16.msra.mxu0 %v24208_v4 }
0x37bf   :  { %20906 = vmatprep.subr.bf16.mxu0 %v24904_v26 }
0x37c1   :  { %16254 = vmatmul.mubr.f32.vlgmr.msra.gmra.mrb[42].mxu0 %v15790_v47  ;;  %v16877_v47 = vld [vmem:[%s24867_s13 + $0x30] sm:$0xff] }
0x37c2   :  { %19308 = vmatprep.mubr.msk.f32.mxu0 %vm21589_vm0, %v24905_v61  ;;  %v16908_v32 = vand.u32 4294901760, %v16877_v47 }
0x3894   :  { %v16255_v27 = vpop.f32.mrb[42].mxu0 }
0x3895   :  { %v16257_v22 = vpop.f32.mrb[43].mxu0 }
0x3896   :  { %v16260_v33 = vsel %vm2679_vm5, %v16255_v27, %v16257_v22  ;;  %v24760_v22 = vsub.f32 %v16873_v18, %v16896_v1 }
0x3897   :  { %v16261_v16 = vadd.f32 %v16260_v33, %v24340_v23 }
0x3899   :  { %21552 = vtanh.f32 %v16261_v16  ;;  %v16262_v62 = vmul.f32 0.5, %v16261_v16  ;;  %v24764_v16 = vsub.f32 %v16875_v10, %v16902_v60 }
0x389b   :  { %21554 = vtanh.f32 %v16262_v62  ;;  %v24769_v62 = vpack.c.bf16 %v16911_v41, %v16908_v32 }
0x38a3   :  { %v21553_v17 = vpop.eup %21552 }
0x38a4   :  { %16269 = vrot.lane.b32.xlu1 %v21553_v17, %s21592_s4  ;;  %v24766_v17 = vsub.f32 %v16876_v14, %v16905_v53 }
0x38a5   :  { %v21555_v25 = vpop.eup %21554 }
0x38a6   :  { %v16264_v45 = vadd.f32 1.0, %v21555_v25  ;;  %v24771_v25 = vsub.f32 %v16877_v47, %v16908_v32 }
0x38a8   :  { %v16265_v38 = vmul.f32 0.5, %v16264_v45  ;;  %v24773_v45 = vsub.f32 %v16878_v5, %v16911_v41 }
0x38aa   :  { %v16267_v12 = vmul.f32 %v16265_v38, %v15704_v46  ;;  %v16899_v46 = vand.u32 4294901760, %v16874_v49 }
0x38ac   :  { %v24739_v31 = vpack.c.bf16 %v16899_v46, %v16896_v1  ;;  %v24762_v33 = vsub.f32 %v16874_v49, %v16899_v46 }
0x3916   :  { %v16270_v9 = vpop.permute.xlu1 %16269 }
0x3917   :  { %v16272_v7 = vmul.f32 %v16270_v9, %v16265_v38 }
0x3919   :  { %16274 = vrot.lane.b32.xlu0 %v16272_v7, %s21593_s6 }
0x398b   :  { %v16275_v0 = vpop.permute.xlu0 %16274 }
0x398c   :  { %v16277_v20 = vadd.f32 %v16275_v0, %v16267_v12  ;;  %v16989_v12 = vand.u32 4294901760, %v24760_v22  ;;  %v16996_v0 = vand.u32 4294901760, %v24762_v33 }
0x398e   :  { %21556 = vtanh.f32 %v16277_v20 }
0x3998   :  { %v21557_v8 = vpop.eup %21556 }
0x3999   :  { %16280 = vrot.lane.b32.xlu1 %v21557_v8, %s21592_s4 }
0x3a0b   :  { %v16281_v23 = vpop.permute.xlu1 %16280 }
0x3a0c   :  { %v16283_v52 = vmul.f32 %v16281_v23, %v16265_v38 }
0x3a0e   :  { %16291 = vrot.lane.b32.xlu0 %v16283_v52, %s21593_s6  ;;  %v16990_v52 = vsub.f32 %v24760_v22, %v16989_v12 }
0x3a80   :  { %v16292_v43 = vpop.permute.xlu0 %16291 }
0x3a81   :  { %v16293_v39 = vsel %vm3955_vm6, %v16292_v43, 0  ;;  %v16997_v43 = vsub.f32 %v24762_v33, %v16996_v0 }
0x3a82   :  { %v16368_v40 = vand.u32 4294901760, %v16293_v39 }
0x3a84   :  { %v16369_v21 = vsub.f32 %v16293_v39, %v16368_v40 }
0x3a86   :  { %v16370_v56 = vand.u32 4294901760, %v16369_v21 }
0x3a88   :  { %v16371_v15 = vsub.f32 %v16369_v21, %v16370_v56 }
0x3a8a   :  { %v16372_v50 = vand.u32 4294901760, %v16371_v15  ;;  %v17010_v15 = vand.u32 4294901760, %v24766_v17 }
0x3a8c   :  { %16373 = vmatmul.mubr.f32.vlgmr.msra.gmra.mrb[54].mxu1 %v16372_v50 }
0x3a8d   :  { %20869 = vmatpush1.bf16.msra.mxu1 %v24234_v36  ;;  %16483 = vmatprep.mubr.f32.mxu1 %v24905_v61 }
0x3a8e   :  { %20871 = vmatprep.subr.bf16.mxu1 %v24237_v63 }
0x3a91   :  { %20873 = vmatpush1.bf16.msra.mxu1 %v24242_v55 }
0x3a92   :  { %20875 = vmatprep.subr.bf16.mxu1 %v24248_v48 }
0x3a94   :  { %16485 = vmatmul.mubr.f32.vlgmr.msra.gmra.mrb[54].mxu1 %v16368_v40 }
0x3a95   :  { %20877 = vmatpush1.bf16.msra.mxu1 %v24253_v57  ;;  %16571 = vmatprep.mubr.f32.mxu1 %v24905_v61 }
0x3a96   :  { %20879 = vmatprep.subr.bf16.mxu1 %v24258_v11 }
0x3a99   :  { %20881 = vmatpush1.bf16.msra.mxu1 %v24264_v42 }
0x3a9a   :  { %20883 = vmatprep.subr.bf16.mxu1 %v24160_v13 }
0x3a9c   :  { %16574 = vmatmul.mubr.f32.vlgmr.msra.gmra.mrb[54].mxu1 %v16369_v21  ;;  %v16998_v21 = vand.u32 4294901760, %v16997_v43 }
0x3a9d   :  { %20885 = vmatpush1.bf16.msra.mxu1 %v24176_v3  ;;  %16652 = vmatprep.mubr.f32.mxu1 %v24905_v61 }
0x3a9e   :  { %20887 = vmatprep.subr.bf16.mxu1 %v24187_v19 }
0x3aa1   :  { %20889 = vmatpush1.bf16.msra.mxu1 %v24208_v4 }
0x3aa2   :  { %20891 = vmatprep.subr.bf16.mxu1 %v24278_v37 }
0x3aa4   :  { %16656 = vmatmul.mubr.f32.vlgmr.msra.gmra.mrb[54].mxu1 %v16370_v56  ;;  %v17003_v56 = vand.u32 4294901760, %v24764_v16 }
0x3aa5   :  { %20893 = vmatpush1.bf16.msra.mxu1 %v24285_v29  ;;  %16750 = vmatprep.mubr.f32.mxu1 %v24905_v61 }
0x3aa6   :  { %20895 = vmatprep.subr.bf16.mxu1 %v24292_v44 }
0x3aa9   :  { %20897 = vmatpush1.bf16.msra.mxu1 %v24296_v2  ;;  %v16871_v2 = vld [vmem:[%s24867_s13] sm:$0xff] }
0x3aaa   :  { %20899 = vmatprep.subr.bf16.mxu1 %v24160_v13  ;;  %v16890_v51 = vand.u32 4294901760, %v16871_v2 }
0x3aac   :  { %16752 = vmatmul.mubr.f32.vlgmr.msra.gmra.mrb[54].mxu1 %v16368_v40  ;;  %v24724_v54 = vsub.f32 %v16871_v2, %v16890_v51  ;;  %v20937_v2 = vpack.c.bf16 %v24766_v17, %v24764_v16 }
0x3aad   :  { %20901 = vmatpush1.bf16.msra.mxu1 %v24176_v3  ;;  %16830 = vmatprep.mubr.f32.mxu1 %v24905_v61 }
0x3aae   :  { %20903 = vmatprep.subr.bf16.mxu1 %v24187_v19  ;;  %v16975_v35 = vand.u32 4294901760, %v24724_v54 }
0x3ab0   :  { %v16976_v38 = vsub.f32 %v24724_v54, %v16975_v35 }
0x3ab1   :  { %20905 = vmatpush1.bf16.msra.mxu1 %v24208_v4 }
0x3ab2   :  { %v16977_v7 = vand.u32 4294901760, %v16976_v38 }
0x3ab4   :  { %16832 = vmatmul.mubr.f32.vlgmr.msra.gmra.mrb[54].mxu1 %v16368_v40  ;;  %v16991_v40 = vand.u32 4294901760, %v16990_v52 }
0x3ab6   :  { %v20922_v50 = vpack.c.bf16 %v16998_v21, %v16991_v40 }
0x3b87   :  { %v16833_v36 = vpop.f32.mrb[54].mxu1 }
0x3b88   :  { %v16835_v63 = vpop.f32.mrb[55].mxu1 }
0x3b89   :  { %v16838_v55 = vsel %vm2679_vm5, %v16833_v36, %v16835_v63  ;;  %v17004_v36 = vsub.f32 %v24764_v16, %v17003_v56  ;;  %v17011_v63 = vsub.f32 %v24766_v17, %v17010_v15 }
0x3b8a   :  { %v16839_v48 = vadd.f32 %v16838_v55, %v24346_v59  ;;  %v16872_v59 = vld [vmem:[%s24867_s13 + $0x8] sm:$0xff] }
0x3b8b   :  { %v16893_v30 = vand.u32 4294901760, %v16872_v59  ;;  %v17005_v55 = vand.u32 4294901760, %v17004_v36 }
0x3b8c   :  { %21558 = vtanh.f32 %v16839_v48  ;;  %v16840_v13 = vmul.f32 0.5, %v16839_v48  ;;  %v17012_v48 = vand.u32 4294901760, %v17011_v63 }
0x3b8d   :  { %v24722_v58 = vpack.c.bf16 %v16893_v30, %v16890_v51  ;;  %v24726_v6 = vsub.f32 %v16872_v59, %v16893_v30  ;;  %v20940_v59 = vpack.c.bf16 %v24773_v45, %v24771_v25  ;;  %v20958_v30 = vpack.c.bf16 %v16996_v0, %v16989_v12 }
0x3b8e   :  { %21560 = vtanh.f32 %v16840_v13  ;;  %v17024_v13 = vand.u32 4294901760, %v24773_v45 }
0x3b8f   :  { %20908 = vmatpush3.bf16.msra.mxu0 %v24722_v58  ;;  %v16982_v27 = vand.u32 4294901760, %v24726_v6 }
0x3b90   :  { %20909 = vmatprep.subr.bf16.mxu0 %v24904_v26 }
0x3b91   :  { %v16983_v9 = vsub.f32 %v24726_v6, %v16982_v27  ;;  %v20955_v51 = vpack.c.bf16 %v16982_v27, %v16975_v35 }
0x3b93   :  { %20911 = vmatpush3.bf16.msra.mxu0 %v24739_v31  ;;  %v16984_v8 = vand.u32 4294901760, %v16983_v9 }
0x3b94   :  { %20912 = vmatprep.subr.bf16.mxu0 %v24904_v26 }
0x3b95   :  { %v20919_v39 = vpack.c.bf16 %v16984_v8, %v16977_v7 }
0x3b96   :  { %v21559_v57 = vpop.eup %21558 }
0x3b97   :  { %16847 = vrot.lane.b32.xlu1 %v21559_v57, %s21592_s4  ;;  %20914 = vmatpush3.bf16.msra.mxu0 %v24749_v34  ;;  %v17017_v57 = vand.u32 4294901760, %v24771_v25 }
0x3b98   :  { %v21561_v3 = vpop.eup %21560  ;;  %20915 = vmatprep.subr.bf16.mxu0 %v24904_v26 }
0x3b99   :  { %v16842_v11 = vadd.f32 1.0, %v21561_v3  ;;  %v20925_v3 = vpack.c.bf16 %v17012_v48, %v17005_v55 }
0x3b9b   :  { %v16843_v42 = vmul.f32 0.5, %v16842_v11  ;;  %20917 = vmatpush3.bf16.msra.mxu0 %v24769_v62  ;;  %v17018_v11 = vsub.f32 %v24771_v25, %v17017_v57 }
0x3b9c   :  { %20918 = vmatprep.subr.bf16.mxu0 %v24904_v26 }
0x3b9d   :  { %v16845_v4 = vmul.f32 %v16843_v42, %v16277_v20 }
0x3c09   :  { %v16848_v19 = vpop.permute.xlu1 %16847 }
0x3c0a   :  { %v16850_v37 = vmul.f32 %v16848_v19, %v16843_v42  ;;  %v17019_v19 = vand.u32 4294901760, %v17018_v11 }
0x3c0c   :  { %16852 = vrot.lane.b32.xlu0 %v16850_v37, %s21593_s6 }
0x3c7e   :  { %v16853_v29 = vpop.permute.xlu0 %16852 }
0x3c7f   :  { %v16855_v44 = vadd.f32 %v16853_v29, %v16845_v4  ;;  %v20931_v29 = vpack.c.bf16 %v24726_v6, %v24724_v54 }
0x3c81   :  { %21562 = vtanh.f32 %v16855_v44  ;;  %v20934_v44 = vpack.c.bf16 %v24762_v33, %v24760_v22 }
0x3c8b   :  { %v21563_v24 = vpop.eup %21562 }
0x3c8c   :  { %16858 = vrot.lane.b32.xlu1 %v21563_v24, %s21592_s4  ;;  %v20961_v24 = vpack.c.bf16 %v17010_v15, %v17003_v56 }
0x3c90   :  { %16867 = vrot.lane.b32.xlu1 %v16866_v28, %s21592_s4  ;;  %v20964_v28 = vpack.c.bf16 %v17024_v13, %v17017_v57 }
0x3cfe   :  { %v16859_v20 = vpop.permute.xlu1 %16858 }
0x3cff   :  { %v16861_v23 = vmul.f32 %v16859_v20, %v16843_v42  ;;  %v17025_v42 = vsub.f32 %v24773_v45, %v17024_v13 }
0x3d01   :  { %16863 = vrot.lane.b32.xlu0 %v16861_v23, %s21593_s6  ;;  %v17026_v37 = vand.u32 4294901760, %v17025_v42 }
0x3d02   :  { %v16868_v18 = vpop.permute.xlu1 %16867 }
0x3d03   :  { %v20928_v4 = vpack.c.bf16 %v17026_v37, %v17019_v19 }
0x3d73   :  { %v16864_v49 = vpop.permute.xlu0 %16863 }
0x3d74   :  { %v16870_v1 = vsel %vm3955_vm6, %v16864_v49, %v16868_v18 }
0x3d75   :  { %v16887_v46 = vsel %vm9824_vm8, %v16870_v1, 0 }
0x3d76   :  { %v16962_v54 = vand.u32 4294901760, %v16887_v46 }
0x3d78   :  { %v16963_v6 = vsub.f32 %v16887_v46, %v16962_v54 }
0x3d7a   :  { %v16964_v10 = vand.u32 4294901760, %v16963_v6 }
0x3d7c   :  { %v16965_v14 = vsub.f32 %v16963_v6, %v16964_v10 }
0x3d7e   :  { %v16966_v60 = vand.u32 4294901760, %v16965_v14 }
0x3d80   :  { %19309 = vmatmul.mubr.f32.vlgmr.msra.gmra.mrb[44].mxu0 %v16966_v60 }
0x3d81   :  { %20920 = vmatpush3.bf16.msra.mxu0 %v20919_v39  ;;  %19327 = vmatprep.mubr.msk.f32.mxu0 %vm21589_vm0, %v24905_v61 }
0x3d82   :  { %20921 = vmatprep.subr.bf16.mxu0 %v24904_v26 }
0x3d85   :  { %20923 = vmatpush3.bf16.msra.mxu0 %v20922_v50 }
0x3d86   :  { %20924 = vmatprep.subr.bf16.mxu0 %v24904_v26 }
0x3d89   :  { %20926 = vmatpush3.bf16.msra.mxu0 %v20925_v3 }
0x3d8a   :  { %20927 = vmatprep.subr.bf16.mxu0 %v24904_v26 }
0x3d8d   :  { %20929 = vmatpush3.bf16.msra.mxu0 %v20928_v4 }
0x3d8e   :  { %20930 = vmatprep.subr.bf16.mxu0 %v24904_v26 }
0x3d90   :  { %19328 = vmatmul.mubr.f32.vlgmr.msra.gmra.mrb[44].mxu0 %v16962_v54 }
0x3d91   :  { %20932 = vmatpush3.bf16.msra.mxu0 %v20931_v29  ;;  %19346 = vmatprep.mubr.msk.f32.mxu0 %vm21589_vm0, %v24905_v61 }
0x3d92   :  { %20933 = vmatprep.subr.bf16.mxu0 %v24904_v26 }
0x3d95   :  { %20935 = vmatpush3.bf16.msra.mxu0 %v20934_v44 }
0x3d96   :  { %20936 = vmatprep.subr.bf16.mxu0 %v24904_v26 }
0x3d99   :  { %20938 = vmatpush3.bf16.msra.mxu0 %v20937_v2 }
0x3d9a   :  { %20939 = vmatprep.subr.bf16.mxu0 %v24904_v26 }
0x3d9d   :  { %20941 = vmatpush3.bf16.msra.mxu0 %v20940_v59 }
0x3d9e   :  { %20942 = vmatprep.subr.bf16.mxu0 %v24904_v26 }
0x3da0   :  { %19347 = vmatmul.mubr.f32.vlgmr.msra.gmra.mrb[44].mxu0 %v16963_v6 }
0x3da1   :  { %20944 = vmatpush3.bf16.msra.mxu0 %v24722_v58  ;;  %19365 = vmatprep.mubr.msk.f32.mxu0 %vm21589_vm0, %v24905_v61 }
0x3da2   :  { %20945 = vmatprep.subr.bf16.mxu0 %v24904_v26 }
0x3da5   :  { %20947 = vmatpush3.bf16.msra.mxu0 %v24739_v31 }
0x3da6   :  { %20948 = vmatprep.subr.bf16.mxu0 %v24904_v26 }
0x3da9   :  { %20950 = vmatpush3.bf16.msra.mxu0 %v24749_v34 }
0x3daa   :  { %20951 = vmatprep.subr.bf16.mxu0 %v24904_v26 }
0x3dad   :  { %20953 = vmatpush3.bf16.msra.mxu0 %v24769_v62 }
0x3dae   :  { %20954 = vmatprep.subr.bf16.mxu0 %v24904_v26 }
0x3db0   :  { %19366 = vmatmul.mubr.f32.vlgmr.msra.gmra.mrb[44].mxu0 %v16964_v10 }
0x3db1   :  { %20956 = vmatpush3.bf16.msra.mxu0 %v20955_v51  ;;  %19384 = vmatprep.mubr.msk.f32.mxu0 %vm21589_vm0, %v24905_v61 }
0x3db2   :  { %20957 = vmatprep.subr.bf16.mxu0 %v24904_v26 }
0x3db5   :  { %20959 = vmatpush3.bf16.msra.mxu0 %v20958_v30 }
0x3db6   :  { %20960 = vmatprep.subr.bf16.mxu0 %v24904_v26 }
0x3db9   :  { %20962 = vmatpush3.bf16.msra.mxu0 %v20961_v24 }
0x3dba   :  { %20963 = vmatprep.subr.bf16.mxu0 %v24904_v26 }
0x3dbd   :  { %20965 = vmatpush3.bf16.msra.mxu0 %v20964_v28 }
0x3dbe   :  { %20966 = vmatprep.subr.bf16.mxu0 %v24904_v26 }
0x3dc0   :  { %19385 = vmatmul.mubr.f32.vlgmr.msra.gmra.mrb[44].mxu0 %v16962_v54 }
0x3dc1   :  { %20968 = vmatpush3.bf16.msra.mxu0 %v24722_v58  ;;  %19403 = vmatprep.mubr.msk.f32.mxu0 %vm21589_vm0, %v24905_v61  ;;  %v17473_v58 = vld [vmem:[%s24868_s14] ss:$0 sm:$0xff] }
0x3dc2   :  { %20969 = vmatprep.subr.bf16.mxu0 %v24904_v26 }
0x3dc5   :  { %20971 = vmatpush3.bf16.msra.mxu0 %v24739_v31 }
0x3dc6   :  { %20972 = vmatprep.subr.bf16.mxu0 %v24904_v26 }
0x3dc9   :  { %20974 = vmatpush3.bf16.msra.mxu0 %v24749_v34 }
0x3dca   :  { %20975 = vmatprep.subr.bf16.mxu0 %v24904_v26 }
0x3dcd   :  { %20977 = vmatpush3.bf16.msra.mxu0 %v24769_v62 }
0x3dd0   :  { %19404 = vmatmul.mubr.f32.vlgmr.msra.gmra.mrb[44].mxu0 %v16962_v54 }
0x3ea3   :  { %v17422_v61 = vpop.f32.mrb[44].mxu0 }
0x3ea4   :  { %v20996_v53 = vadd.f32 %v17473_v58, %v17422_v61  ;;  %v19405_v47 = vpop.f32.mrb[45].mxu0 }
0x3ea6   :  { %17427 = vst.msk [vmem:[#allocation2] sm:$0x3] %vm17426_vm9, %v20996_v53 }
0x3ea7   :  { %21575 = shalt.err (!%p21572_p4)
}
0x3ea8   :  { %s21576_s29 = scalar_lea.hbm %s24869_s15, 32 }
0x3ea9   :  { %p21577_p5 = scmp.ne.s32.totalorder %s24869_s15, %s21576_s29  ;;  %p21580_p6 = scmp.lt.u32.totalorder %s21576_s29, %s24869_s15 }
0x3eab   :  { %p21582_p7 = pnand %p21580_p6, %p21577_p5 }
0x3ead   :  { %21585 = shalt.err (!%p21582_p7)
}
0x3eae   :  { %17437 = dma.vmem_to_hbm [thread:$0]  %s17435_s1, 32, %s24869_s15, [#allocation3]  }
0x3eaf   :  { %21586 = dma.done.wait [#allocation3], 32  }
0x3eb0   :  { %21587 = vsyncadd [#allocation3], 4294967264 }
0x3eb1   :  { %17441 = vsyncpa [#allocation3], 1 }

</bundles_post_ra>
